<compile_context>
chip_gen: v5e
topology: v5e:2x2
jax: 0.10.0
libtpu: 0.0.40
codegen_flags: <defaults>
</compile_context>

<pallas_src>
import jax
import jax.numpy as jnp
from jax.experimental import pallas as pl
from jax.experimental.pallas import tpu as pltpu

INPUT_SIZE = 1 * 28 * 28          # 784
H1, H2, H3 = 512, 256, 128
H4 = 64                           # true output width
H4_PAD = 128                      # lane-dense output width (extra cols are zero)
TB_MAX = 2048                     # max batch-tile rows per grid step


def _cdiv(a, b):
    return (a + b - 1) // b


def _round_up(x, m):
    return _cdiv(x, m) * m


def encoder_kernel(x_ref, w1_ref, w2_ref, w3_ref, b3_ref, w4_ref, b4_ref, o_ref):
    # x arrives as f32 straight from HBM; cast to bf16 in-kernel (cheap VPU
    # work, hidden under the next tile's DMA).
    x = x_ref[...].astype(jnp.bfloat16)                                  # (TB, 784)
    # Layer 1: 784 -> 512, no bias, ReLU  (bf16 MXU, f32 accumulate)
    h = jnp.dot(x, w1_ref[...], preferred_element_type=jnp.float32)
    h = jnp.maximum(h, 0.0)
    # Layer 2: 512 -> 256, no bias, ReLU
    h = jnp.dot(h.astype(jnp.bfloat16), w2_ref[...],
                preferred_element_type=jnp.float32)
    h = jnp.maximum(h, 0.0)
    # Layer 3: 256 -> 128, bias, ReLU
    h = jnp.dot(h.astype(jnp.bfloat16), w3_ref[...],
                preferred_element_type=jnp.float32) + b3_ref[...]
    h = jnp.maximum(h, 0.0)
    # Layer 4: 128 -> 128 (64 real + 64 zero-padded), bias, ReLU
    h = jnp.dot(h.astype(jnp.bfloat16), w4_ref[...],
                preferred_element_type=jnp.float32) + b4_ref[...]
    h = jnp.maximum(h, 0.0)
    o_ref[...] = h.astype(o_ref.dtype)


def _select_tb(B):
    # Multiple of 256 (bf16 sublane packing / MXU rows), >= 2 grid steps when
    # the batch allows it (so v7x's second TensorCore gets work), capped at
    # TB_MAX to stay well inside VMEM.
    return min(TB_MAX, _round_up(max(_cdiv(B, 2), 1), 256))


def encoder_forward(x_nchw, params):
    """x_nchw: (B, 1, 28, 28) float32 -> (B, 64) float32."""
    B = x_nchw.shape[0]
    w1, w2, w3, b3, w4, b4 = params

    # Free row-major reshape; stays f32 — no extra pass over x.
    x = x_nchw.reshape(B, INPUT_SIZE)

    TB = _select_tb(B)
    grid = (_cdiv(B, TB),)          # partial last block handled by Pallas masking

    flops = 2 * B * (INPUT_SIZE * H1 + H1 * H2 + H2 * H3 + H3 * H4_PAD)
    bytes_accessed = (
        B * INPUT_SIZE * 4                                             # x (f32)
        + (INPUT_SIZE * H1 + H1 * H2 + H2 * H3 + H3 * H4_PAD) * 2      # weights (bf16)
        + (H3 + H4_PAD) * 4                                            # biases (f32)
        + B * H4_PAD * 4                                               # output (f32)
    )

    out = pl.pallas_call(
        encoder_kernel,
        out_shape=jax.ShapeDtypeStruct((B, H4_PAD), jnp.float32),
        grid=grid,
        in_specs=[
            pl.BlockSpec((TB, INPUT_SIZE), lambda i: (i, 0)),   # x tiled over batch
            pl.BlockSpec(w1.shape, lambda i: (0, 0)),           # weights/biases resident
            pl.BlockSpec(w2.shape, lambda i: (0, 0)),
            pl.BlockSpec(w3.shape, lambda i: (0, 0)),
            pl.BlockSpec(b3.shape, lambda i: (0, 0)),
            pl.BlockSpec(w4.shape, lambda i: (0, 0)),
            pl.BlockSpec(b4.shape, lambda i: (0, 0)),
        ],
        out_specs=pl.BlockSpec((TB, H4_PAD), lambda i: (i, 0)),
        compiler_params=pltpu.CompilerParams(
            dimension_semantics=("parallel",),
            vmem_limit_bytes=32 << 20,
        ),
        cost_estimate=pl.CostEstimate(
            flops=flops, transcendentals=0, bytes_accessed=bytes_accessed),
    )(x, w1, w2, w3, b3, w4, b4)

    # Drop the zero-padded output columns.
    return out[:, :H4]


def init_params(key):
    """Deterministic init mimicking torch.nn.Linear default
    (U(-1/sqrt(fan_in), 1/sqrt(fan_in))). Weights stored (in, out) in bf16;
    w4/b4 zero-padded from 64 -> 128 output columns. Biases stay f32."""
    def linear(k, fan_in, fan_out, bias):
        kw, kb = jax.random.split(k)
        bound = 1.0 / jnp.sqrt(fan_in)
        w = jax.random.uniform(kw, (fan_in, fan_out), jnp.float32, -bound, bound)
        b = (jax.random.uniform(kb, (1, fan_out), jnp.float32, -bound, bound)
             if bias else None)
        return w, b

    k1, k2, k3, k4 = jax.random.split(key, 4)
    w1, _ = linear(k1, INPUT_SIZE, H1, bias=False)   # enc_1
    w2, _ = linear(k2, H1, H2, bias=False)           # new_enc3
    w3, b3 = linear(k3, H2, H3, bias=True)           # new_enc4
    w4, b4 = linear(k4, H3, H4, bias=True)           # enc_2

    # Lane-dense layer-4 output: zero-pad N 64 -> 128 (exactly zero, sliced off).
    w4 = jnp.pad(w4, ((0, 0), (0, H4_PAD - H4)))
    b4 = jnp.pad(b4, ((0, 0), (0, H4_PAD - H4)))

    w1 = w1.astype(jnp.bfloat16)
    w2 = w2.astype(jnp.bfloat16)
    w3 = w3.astype(jnp.bfloat16)
    w4 = w4.astype(jnp.bfloat16)
    return w1, w2, w3, b3, w4, b4


def encoder_reference(x_nchw, params):
    """Pure-JAX reference with matching precision (bf16 matmul operands,
    f32 accumulation) for correctness checking."""
    w1, w2, w3, b3, w4, b4 = params
    B = x_nchw.shape[0]
    x = x_nchw.reshape(B, INPUT_SIZE).astype(jnp.bfloat16)
    h = jnp.maximum(jnp.dot(x, w1, preferred_element_type=jnp.float32), 0.0)
    h = jnp.maximum(jnp.dot(h.astype(jnp.bfloat16), w2,
                            preferred_element_type=jnp.float32), 0.0)
    h = jnp.maximum(jnp.dot(h.astype(jnp.bfloat16), w3,
                            preferred_element_type=jnp.float32) + b3, 0.0)
    h = jnp.maximum(jnp.dot(h.astype(jnp.bfloat16), w4,
                            preferred_element_type=jnp.float32) + b4, 0.0)
    return h[:, :H4]


if __name__ == "__main__":
    key = jax.random.PRNGKey(0)
    kx, kp, kx2 = jax.random.split(key, 3)

    params = init_params(kp)

    # Primary small test (matches the module's expected input layout, NCHW).
    B = 2
    x = jax.random.normal(kx, (B, 1, 28, 28), jnp.float32)
    out = jax.block_until_ready(encoder_forward(x, params))
    ref = encoder_reference(x, params)
    assert out.shape == (B, 64), out.shape
    assert jnp.allclose(out, ref, atol=2e-3, rtol=2e-3), "mismatch vs reference (B=2)"

    # Secondary test exercising a multi-step grid with a partial last block.
    B2 = 300
    x2 = jax.random.normal(kx2, (B2, 1, 28, 28), jnp.float32)
    out2 = jax.block_until_ready(encoder_forward(x2, params))
    ref2 = encoder_reference(x2, params)
    assert out2.shape == (B2, 64), out2.shape
    assert jnp.allclose(out2, ref2, atol=2e-3, rtol=2e-3), "mismatch vs reference (B=300)"

    print("KERNEL_OK")
</pallas_src>

<mosaic_0001>
module attributes {stable_mosaic.version = 11 : i64} {
  func.func @encoder_kernel(%arg0: i32, %arg1: memref<256x784xf32, #tpu.memory_space<vmem>>, %arg2: memref<784x512xbf16, #tpu.memory_space<vmem>>, %arg3: memref<512x256xbf16, #tpu.memory_space<vmem>>, %arg4: memref<256x128xbf16, #tpu.memory_space<vmem>>, %arg5: memref<1x128xf32, #tpu.memory_space<vmem>>, %arg6: memref<128x128xbf16, #tpu.memory_space<vmem>>, %arg7: memref<1x128xf32, #tpu.memory_space<vmem>>, %arg8: memref<256x128xf32, #tpu.memory_space<vmem>>) attributes {dimension_semantics = [#tpu.dimension_semantics<parallel>], iteration_bounds = array<i64: 1>, scalar_prefetch = 0 : i64, scratch_operands = 0 : i64, tpu.core_type = #tpu.core_type<tc>, window_params = [{transform_indices = @transform_0, window_bounds = array<i64: 256, 784>}, {pipeline_mode = #tpu.pipeline_mode<synchronous>, transform_indices = @transform_1, window_bounds = array<i64: 784, 512>}, {pipeline_mode = #tpu.pipeline_mode<synchronous>, transform_indices = @transform_2, window_bounds = array<i64: 512, 256>}, {pipeline_mode = #tpu.pipeline_mode<synchronous>, transform_indices = @transform_3, window_bounds = array<i64: 256, 128>}, {pipeline_mode = #tpu.pipeline_mode<synchronous>, transform_indices = @transform_4, window_bounds = array<i64: 1, 128>}, {pipeline_mode = #tpu.pipeline_mode<synchronous>, transform_indices = @transform_5, window_bounds = array<i64: 128, 128>}, {pipeline_mode = #tpu.pipeline_mode<synchronous>, transform_indices = @transform_6, window_bounds = array<i64: 1, 128>}, {transform_indices = @transform_7, window_bounds = array<i64: 256, 128>}]} {
    %c0 = arith.constant 0 : index
    %c0_0 = arith.constant 0 : index
    %0 = vector.load %arg1[%c0, %c0_0] : memref<256x784xf32, #tpu.memory_space<vmem>>, vector<256x784xf32>
    %1 = arith.truncf %0 : vector<256x784xf32> to vector<256x784xbf16>
    %c0_1 = arith.constant 0 : index
    %c0_2 = arith.constant 0 : index
    %2 = vector.load %arg2[%c0_1, %c0_2] : memref<784x512xbf16, #tpu.memory_space<vmem>>, vector<784x512xbf16>
    %cst = arith.constant dense<0.000000e+00> : vector<256x512xf32>
    %3 = tpu.matmul %1, %2, %cst {dimension_numbers = #tpu.dot_dimension_numbers<[1], [0], [0], [1], [0, 0, 1, 1], [], []>} : vector<256x784xbf16>, vector<784x512xbf16>, vector<256x512xf32> -> vector<256x512xf32>
    %cst_3 = arith.constant 0.000000e+00 : f32
    %4 = vector.broadcast %cst_3 : f32 to vector<256x512xf32>
    %5 = arith.maximumf %3, %4 : vector<256x512xf32>
    %6 = arith.truncf %5 : vector<256x512xf32> to vector<256x512xbf16>
    %c0_4 = arith.constant 0 : index
    %c0_5 = arith.constant 0 : index
    %7 = vector.load %arg3[%c0_4, %c0_5] : memref<512x256xbf16, #tpu.memory_space<vmem>>, vector<512x256xbf16>
    %cst_6 = arith.constant dense<0.000000e+00> : vector<256x256xf32>
    %8 = tpu.matmul %6, %7, %cst_6 {dimension_numbers = #tpu.dot_dimension_numbers<[1], [0], [0], [1], [0, 0, 1, 1], [], []>} : vector<256x512xbf16>, vector<512x256xbf16>, vector<256x256xf32> -> vector<256x256xf32>
    %cst_7 = arith.constant 0.000000e+00 : f32
    %9 = vector.broadcast %cst_7 : f32 to vector<256x256xf32>
    %10 = arith.maximumf %8, %9 : vector<256x256xf32>
    %11 = arith.truncf %10 : vector<256x256xf32> to vector<256x256xbf16>
    %c0_8 = arith.constant 0 : index
    %c0_9 = arith.constant 0 : index
    %12 = vector.load %arg4[%c0_8, %c0_9] : memref<256x128xbf16, #tpu.memory_space<vmem>>, vector<256x128xbf16>
    %cst_10 = arith.constant dense<0.000000e+00> : vector<256x128xf32>
    %13 = tpu.matmul %11, %12, %cst_10 {dimension_numbers = #tpu.dot_dimension_numbers<[1], [0], [0], [1], [0, 0, 1, 1], [], []>} : vector<256x256xbf16>, vector<256x128xbf16>, vector<256x128xf32> -> vector<256x128xf32>
    %c0_11 = arith.constant 0 : index
    %c0_12 = arith.constant 0 : index
    %14 = vector.load %arg5[%c0_11, %c0_12] : memref<1x128xf32, #tpu.memory_space<vmem>>, vector<1x128xf32>
    %15 = vector.broadcast %14 : vector<1x128xf32> to vector<256x128xf32>
    %16 = arith.addf %13, %15 : vector<256x128xf32>
    %cst_13 = arith.constant 0.000000e+00 : f32
    %17 = vector.broadcast %cst_13 : f32 to vector<256x128xf32>
    %18 = arith.maximumf %16, %17 : vector<256x128xf32>
    %19 = arith.truncf %18 : vector<256x128xf32> to vector<256x128xbf16>
    %c0_14 = arith.constant 0 : index
    %c0_15 = arith.constant 0 : index
    %20 = vector.load %arg6[%c0_14, %c0_15] : memref<128x128xbf16, #tpu.memory_space<vmem>>, vector<128x128xbf16>
    %cst_16 = arith.constant dense<0.000000e+00> : vector<256x128xf32>
    %21 = tpu.matmul %19, %20, %cst_16 {dimension_numbers = #tpu.dot_dimension_numbers<[1], [0], [0], [1], [0, 0, 1, 1], [], []>} : vector<256x128xbf16>, vector<128x128xbf16>, vector<256x128xf32> -> vector<256x128xf32>
    %c0_17 = arith.constant 0 : index
    %c0_18 = arith.constant 0 : index
    %22 = vector.load %arg7[%c0_17, %c0_18] : memref<1x128xf32, #tpu.memory_space<vmem>>, vector<1x128xf32>
    %23 = vector.broadcast %22 : vector<1x128xf32> to vector<256x128xf32>
    %24 = arith.addf %21, %23 : vector<256x128xf32>
    %cst_19 = arith.constant 0.000000e+00 : f32
    %25 = vector.broadcast %cst_19 : f32 to vector<256x128xf32>
    %26 = arith.maximumf %24, %25 : vector<256x128xf32>
    %c0_20 = arith.constant 0 : index
    %c0_21 = arith.constant 0 : index
    %27 = vector.load %arg8[%c0_20, %c0_21] : memref<256x128xf32, #tpu.memory_space<vmem>>, vector<256x128xf32>
    tpu.vector_store %arg8[%c0_20, %c0_21], %26 {strides = array<i32>} : memref<256x128xf32, #tpu.memory_space<vmem>>, vector<256x128xf32>,
    return
  }
  func.func @transform_0(%arg0: i32) -> (i32, i32) {
    %c0_i32 = arith.constant 0 : i32
    %c0_i32_0 = arith.constant 0 : i32
    return %arg0, %c0_i32 : i32, i32
  }
  func.func @transform_1(%arg0: i32) -> (i32, i32) {
    %c0_i32 = arith.constant 0 : i32
    %c0_i32_0 = arith.constant 0 : i32
    %c0_i32_1 = arith.constant 0 : i32
    return %c0_i32, %c0_i32_0 : i32, i32
  }
  func.func @transform_2(%arg0: i32) -> (i32, i32) {
    %c0_i32 = arith.constant 0 : i32
    %c0_i32_0 = arith.constant 0 : i32
    %c0_i32_1 = arith.constant 0 : i32
    return %c0_i32, %c0_i32_0 : i32, i32
  }
  func.func @transform_3(%arg0: i32) -> (i32, i32) {
    %c0_i32 = arith.constant 0 : i32
    %c0_i32_0 = arith.constant 0 : i32
    %c0_i32_1 = arith.constant 0 : i32
    return %c0_i32, %c0_i32_0 : i32, i32
  }
  func.func @transform_4(%arg0: i32) -> (i32, i32) {
    %c0_i32 = arith.constant 0 : i32
    %c0_i32_0 = arith.constant 0 : i32
    %c0_i32_1 = arith.constant 0 : i32
    return %c0_i32, %c0_i32_0 : i32, i32
  }
  func.func @transform_5(%arg0: i32) -> (i32, i32) {
    %c0_i32 = arith.constant 0 : i32
    %c0_i32_0 = arith.constant 0 : i32
    %c0_i32_1 = arith.constant 0 : i32
    return %c0_i32, %c0_i32_0 : i32, i32
  }
  func.func @transform_6(%arg0: i32) -> (i32, i32) {
    %c0_i32 = arith.constant 0 : i32
    %c0_i32_0 = arith.constant 0 : i32
    %c0_i32_1 = arith.constant 0 : i32
    return %c0_i32, %c0_i32_0 : i32, i32
  }
  func.func @transform_7(%arg0: i32) -> (i32, i32) {
    %c0_i32 = arith.constant 0 : i32
    %c0_i32_0 = arith.constant 0 : i32
    return %arg0, %c0_i32 : i32, i32
  }
}

</mosaic_0001>

<bundles_post_ra>
// kernel: tpu_custom_call.1
= control target key start
LH: loop header
LB: loop body
LE: loop exit
PB: predicated region body
PF: predicated region fallthrough
CT: control target
= control target key end

     0   :  { %12 = vsyncpa [#allocation3], 0  ;;  %s12561_s0 = inlined_call_operand.hbm [shape: f32[2,784], index: 0, kind: input, shape index: {}]   ;;  %s12562_s1 = inlined_call_operand.hbm [shape: bf16[784,512], index: 1, kind: input, shape index: {}]   ;;  %s12563_s2 = inlined_call_operand.hbm [shape: bf16[512,256], index: 2, kind: input, shape index: {}]   ;;  %s12564_s3 = inlined_call_operand.hbm [shape: bf16[256,128], index: 3, kind: input, shape index: {}]   ;;  %s12565_s4 = inlined_call_operand.vmem [shape: f32[1,128], index: 4, kind: input, shape index: {}]   ;;  %s12566_s5 = inlined_call_operand.hbm [shape: bf16[128,128], index: 5, kind: input, shape index: {}]   ;;  %s12567_s6 = inlined_call_operand.vmem [shape: f32[1,128], index: 6, kind: input, shape index: {}]   ;;  %s12568_s7 = inlined_call_operand.hbm [shape: f32[2,128], index: 7, kind: output, shape index: {}]  }
   0x1   :  { %13 = vsyncpa [#allocation6], 0 }
   0x2   :  { %14 = vsyncpa [#allocation9], 0 }
   0x3   :  { %15 = vsyncpa [#allocation4], 0  ;;  %s33_s26 = sshll.u32 %s12562_s1, 4  ;;  %s34_s26 = int_to_ptr.hbm [resolvable:$true] %s33_s26 }
   0x4   :  { %19 = vsyncadd [#allocation3], 28448  ;;  %s8820_s27 = smov [#allocation5]   ;;  %s59_s8 = sshll.u32 %s12564_s3, 4  ;;  %s60_s8 = int_to_ptr.hbm [resolvable:$true] %s59_s8 }
   0x5   :  { %s35_s28 = sshll.u32 %s8820_s27, 4  ;;  %s8821_s9 = smov 256   ;;  %s36_s28 = int_to_ptr.vmem [resolvable:$true] %s35_s28 }
   0x6   :  { %s8822_s10 = smov 16   ;;  %s8823_s11 = smov [#allocation8]  }
   0x7   :  { %41 = dma.hbm_to_vmem [thread:$0]  %s34_s26, 25088, %s36_s28, [#allocation6], %s8821_s9, %s8821_s9, %s8822_s10  }
   0x8   :  { %s61_s12 = sshll.u32 %s8823_s11, 4  ;;  %s8824_s13 = smov 64   ;;  %s62_s12 = int_to_ptr.vmem [resolvable:$true] %s61_s12 }
   0x9   :  { %s8825_s14 = smov 4   ;;  %s20_s16 = sshll.u32 %s12561_s0, 4  ;;  %s21_s16 = int_to_ptr.hbm [resolvable:$true] %s20_s16 }
   0xa   :  { %67 = dma.hbm_to_vmem [thread:$0]  %s60_s8, 2048, %s62_s12, [#allocation9], %s8824_s13, %s8824_s13, %s8825_s14  }
   0xb   :  { %s8826_s17 = smov [#allocation2]   ;;  %s46_s20 = sshll.u32 %s12563_s2, 4  ;;  %s47_s20 = int_to_ptr.hbm [resolvable:$true] %s46_s20 }
   0xc   :  { %s22_s18 = sshll.u32 %s8826_s17, 4  ;;  %s8827_s21 = smov 224   ;;  %s23_s18 = int_to_ptr.vmem [resolvable:$true] %s22_s18 }
   0xd   :  { %s8828_s22 = smov 14   ;;  %s8829_s23 = smov [#allocation7]  }
   0xe   :  { %28 = dma.hbm_to_vmem [thread:$0]  %s21_s16, 224, %s23_s18, [#allocation3], %s8827_s21, %s8827_s21, %s8828_s22  }
   0xf   :  { %s48_s24 = sshll.u32 %s8829_s23, 4  ;;  %s8830_s25 = smov 128   ;;  %s49_s24 = int_to_ptr.vmem [resolvable:$true] %s48_s24 }
  0x10   :  { %s8831_s26 = smov 8   ;;  %s74_s28 = sshll.u32 %s12566_s5, 4  ;;  %s75_s28 = int_to_ptr.hbm [resolvable:$true] %s74_s28 }
  0x11   :  { %54 = dma.hbm_to_vmem [thread:$0]  %s47_s20, 8192, %s49_s24, [#allocation6], %s8830_s25, %s8830_s25, %s8831_s26  }
  0x12   :  { %s8832_s29 = smov [#allocation10]  }
  0x13   :  { %s76_s30 = sshll.u32 %s8832_s29, 4  ;;  %s77_s30 = int_to_ptr.vmem [resolvable:$true] %s76_s30 }
  0x14   :  { %82 = dma.hbm_to_vmem [thread:$0]  %s75_s28, 1024, %s77_s30, [#allocation9], %s8824_s13, %s8824_s13, %s8825_s14  }
  0x15   :  { %8812 = dma.done.wait [#allocation3], 28672  }
  0x16   :  { %8813 = vsyncadd [#allocation3], 4294938624 }
  0x17   :  { %8814 = dma.done.wait [#allocation6], 33280  }
  0x18   :  { %8815 = vsyncadd [#allocation6], 4294934016 }
  0x19   :  { %8816 = dma.done.wait [#allocation9], 3072  }
  0x1a   :  { %8817 = vsyncadd [#allocation9], 4294964224  ;;  %v7256_v0 = vld [vmem:[#allocation5 + $0xe0] sm:$0xf]  ;;  %v8372_v1 = vld [vmem:[#allocation5 + $0xec] sm:$0xf0] }
  0x1b   :  { %v7384_v2 = vld [vmem:[#allocation5 + $0x1e0] sm:$0xf]  ;;  %v7257_v3 = vor.u32 %v8372_v1, %v7256_v0  ;;  %v8404_v4 = vld [vmem:[#allocation5 + $0x1ec] sm:$0xf0]  ;;  %vm2617_vm0 = vcmask 130048  }
  0x1c   :  { %v7512_v5 = vld [vmem:[#allocation5 + $0x2e0] sm:$0xf]  ;;  %v8436_v6 = vld [vmem:[#allocation5 + $0x2ec] sm:$0xf0]  ;;  %v8891_v7 = vor.u32 %v8404_v4, %v7384_v2 }
  0x1d   :  { %v8893_v8 = vor.u32 %v8436_v6, %v7512_v5  ;;  %v7240_v9 = vld [vmem:[#allocation5 + $0xc0] sm:$0xf]  ;;  %v8368_v10 = vld [vmem:[#allocation5 + $0xcc] sm:$0xf0]  ;;  %2666 = vmatpush.bf16.msra.mxu0 %v7257_v3  ;;  %8626 = vmatpush.bf16.msra.mxu3 %v7257_v3 }
  0x1e   :  { %v7368_v11 = vld [vmem:[#allocation5 + $0x1c0] sm:$0xf]  ;;  %v7241_v12 = vor.u32 %v8368_v10, %v7240_v9  ;;  %v8400_v13 = vld [vmem:[#allocation5 + $0x1cc] sm:$0xf0]  ;;  %2755 = vmatpush.bf16.msra.mxu1 %v8891_v7 }
  0x1f   :  { %v7496_v14 = vld [vmem:[#allocation5 + $0x2c0] sm:$0xf]  ;;  %v8432_v15 = vld [vmem:[#allocation5 + $0x2cc] sm:$0xf0]  ;;  %2844 = vmatpush.bf16.msra.mxu2 %v8893_v8  ;;  %v8897_v16 = vor.u32 %v8400_v13, %v7368_v11  ;;  %v114_v11 = vld [vmem:[#allocation2 + $0x38] sm:$0xff] }
  0x20   :  { %v8899_v17 = vor.u32 %v8432_v15, %v7496_v14  ;;  %v7224_v18 = vld [vmem:[#allocation5 + $0xa0] sm:$0xf]  ;;  %v8364_v19 = vld [vmem:[#allocation5 + $0xac] sm:$0xf0]  ;;  %v118_v13 = vld [vmem:[#allocation2 + $0x54] sm:$0xff] }
  0x21   :  { %v7352_v20 = vld [vmem:[#allocation5 + $0x1a0] sm:$0xf]  ;;  %v8396_v21 = vld [vmem:[#allocation5 + $0x1ac] sm:$0xf0]  ;;  %2667 = vmatpush.bf16.msra.mxu0 %v7241_v12  ;;  %v7225_v24 = vor.u32 %v8364_v19, %v7224_v18  ;;  %8627 = vmatpush.bf16.msra.mxu3 %v7241_v12  ;;  %v116_v12 = vld [vmem:[#allocation2 + $0x46] sm:$0xff] }
  0x22   :  { %v7480_v22 = vld [vmem:[#allocation5 + $0x2a0] sm:$0xf]  ;;  %v8428_v23 = vld [vmem:[#allocation5 + $0x2ac] sm:$0xf0]  ;;  %2756 = vmatpush.bf16.msra.mxu1 %v8897_v16  ;;  %v8903_v25 = vor.u32 %v8396_v21, %v7352_v20 }
  0x23   :  { %2845 = vmatpush.bf16.msra.mxu2 %v8899_v17  ;;  %v8905_v26 = vor.u32 %v8428_v23, %v7480_v22  ;;  %v7208_v27 = vld [vmem:[#allocation5 + $0x80] sm:$0xf]  ;;  %v8360_v28 = vld [vmem:[#allocation5 + $0x8c] sm:$0xf0] }
  0x24   :  { %v7336_v29 = vld [vmem:[#allocation5 + $0x180] sm:$0xf]  ;;  %v8392_v30 = vld [vmem:[#allocation5 + $0x18c] sm:$0xf0]  ;;  %v7209_v33 = vor.u32 %v8360_v28, %v7208_v27 }
  0x25   :  { %v7464_v31 = vld [vmem:[#allocation5 + $0x280] sm:$0xf]  ;;  %v8424_v32 = vld [vmem:[#allocation5 + $0x28c] sm:$0xf0]  ;;  %2668 = vmatpush.bf16.msra.mxu0 %v7225_v24  ;;  %8628 = vmatpush.bf16.msra.mxu3 %v7225_v24  ;;  %v8909_v34 = vor.u32 %v8392_v30, %v7336_v29 }
  0x26   :  { %2757 = vmatpush.bf16.msra.mxu1 %v8903_v25  ;;  %v8911_v35 = vor.u32 %v8424_v32, %v7464_v31  ;;  %v7192_v36 = vld [vmem:[#allocation5 + $0x60] sm:$0xf]  ;;  %v8356_v37 = vld [vmem:[#allocation5 + $0x6c] sm:$0xf0] }
  0x27   :  { %2846 = vmatpush.bf16.msra.mxu2 %v8905_v26  ;;  %v7320_v38 = vld [vmem:[#allocation5 + $0x160] sm:$0xf]  ;;  %v8388_v39 = vld [vmem:[#allocation5 + $0x16c] sm:$0xf0]  ;;  %v7193_v44 = vor.u32 %v8356_v37, %v7192_v36 }
  0x28   :  { %v7448_v40 = vld [vmem:[#allocation5 + $0x260] sm:$0xf]  ;;  %v8420_v41 = vld [vmem:[#allocation5 + $0x26c] sm:$0xf0]  ;;  %v8915_v48 = vor.u32 %v8388_v39, %v7320_v38  ;;  %v134_v39 = vld [vmem:[#allocation2 + $0xc4] sm:$0xff] }
  0x29   :  { %v7176_v42 = vld [vmem:[#allocation5 + $0x40] sm:$0xf]  ;;  %v8352_v43 = vld [vmem:[#allocation5 + $0x4c] sm:$0xf0]  ;;  %2669 = vmatpush.bf16.msra.mxu0 %v7209_v33  ;;  %8629 = vmatpush.bf16.msra.mxu3 %v7209_v33  ;;  %v8917_v49 = vor.u32 %v8420_v41, %v7448_v40 }
  0x2a   :  { %v7304_v45 = vld [vmem:[#allocation5 + $0x140] sm:$0xf]  ;;  %v8384_v46 = vld [vmem:[#allocation5 + $0x14c] sm:$0xf0]  ;;  %2758 = vmatpush.bf16.msra.mxu1 %v8909_v34  ;;  %v7177_v56 = vor.u32 %v8352_v43, %v7176_v42 }
  0x2b   :  { %v7432_v47 = vld [vmem:[#allocation5 + $0x240] sm:$0xf]  ;;  %2847 = vmatpush.bf16.msra.mxu2 %v8911_v35  ;;  %v108_v51 = vld [vmem:[#allocation2 + $0xe] sm:$0xff]  ;;  %v8921_v59 = vor.u32 %v8384_v46, %v7304_v45 }
  0x2c   :  { %v106_v50 = vld [vmem:[#allocation2] sm:$0xff]  ;;  %v8416_v53 = vld [vmem:[#allocation5 + $0x24c] sm:$0xf0]  ;;  %620 = vst [vmem:[#allocation1 + $0x1] ss:$4 sm:$0xff] %v108_v51 }
  0x2d   :  { %v110_v52 = vld [vmem:[#allocation2 + $0x1c] sm:$0xff]  ;;  %v112_v54 = vld [vmem:[#allocation2 + $0x2a] sm:$0xff]  ;;  %618 = vst [vmem:[#allocation1] ss:$4 sm:$0xff] %v106_v50  ;;  %2670 = vmatpush.bf16.msra.mxu0 %v7193_v44  ;;  %8630 = vmatpush.bf16.msra.mxu3 %v7193_v44  ;;  %v8923_v60 = vor.u32 %v8416_v53, %v7432_v47  ;;  %v136_v43 = vld [vmem:[#allocation2 + $0xd2] sm:$0xff] }
  0x2e   :  { %v7160_v55 = vld [vmem:[#allocation5 + $0x20] sm:$0xf]  ;;  %v8348_v57 = vld [vmem:[#allocation5 + $0x2c] sm:$0xf0]  ;;  %622 = vst [vmem:[#allocation1 + $0x2] ss:$4 sm:$0xff] %v110_v52  ;;  %2759 = vmatpush.bf16.msra.mxu1 %v8915_v48 }
  0x2f   :  { %v7288_v58 = vld [vmem:[#allocation5 + $0x120] sm:$0xf]  ;;  %2848 = vmatpush.bf16.msra.mxu2 %v8917_v49  ;;  %v8380_v61 = vld [vmem:[#allocation5 + $0x12c] sm:$0xf0]  ;;  %624 = vst [vmem:[#allocation1 + $0x3] ss:$4 sm:$0xff] %v112_v54  ;;  %v7161_v0 = vor.u32 %v8348_v57, %v7160_v55 }
  0x30   :  { %v7416_v62 = vld [vmem:[#allocation5 + $0x220] sm:$0xf]  ;;  %v8412_v63 = vld [vmem:[#allocation5 + $0x22c] sm:$0xf0]  ;;  %v8927_v1 = vor.u32 %v8380_v61, %v7288_v58  ;;  %v146_v55 = vld [vmem:[#allocation2 + $0x118] sm:$0xff] }
  0x31   :  { %2671 = vmatpush.bf16.msra.mxu0 %v7177_v56  ;;  %8631 = vmatpush.bf16.msra.mxu3 %v7177_v56  ;;  %v8929_v2 = vor.u32 %v8412_v63, %v7416_v62  ;;  %v7144_v3 = vld [vmem:[#allocation5] sm:$0xf]  ;;  %v8344_v4 = vld [vmem:[#allocation5 + $0xc] sm:$0xf0]  ;;  %v148_v56 = vld [vmem:[#allocation2 + $0x126] sm:$0xff] }
  0x32   :  { %2760 = vmatpush.bf16.msra.mxu1 %v8921_v59  ;;  %v7272_v5 = vld [vmem:[#allocation5 + $0x100] sm:$0xf]  ;;  %v8376_v6 = vld [vmem:[#allocation5 + $0x10c] sm:$0xf0]  ;;  %v7145_v14 = vor.u32 %v8344_v4, %v7144_v3  ;;  %v150_v57 = vld [vmem:[#allocation2 + $0x134] sm:$0xff] }
  0x33   :  { %2849 = vmatpush.bf16.msra.mxu2 %v8923_v60  ;;  %v7400_v9 = vld [vmem:[#allocation5 + $0x200] sm:$0xf]  ;;  %v8408_v10 = vld [vmem:[#allocation5 + $0x20c] sm:$0xf0]  ;;  %v7273_v19 = vor.u32 %v8376_v6, %v7272_v5 }
  0x34   :  { %v8933_v20 = vor.u32 %v8408_v10, %v7400_v9  ;;  %v120_v23 = vld [vmem:[#allocation2 + $0x62] sm:$0xff]  ;;  %v122_v24 = vld [vmem:[#allocation2 + $0x70] sm:$0xff]  ;;  %v128_v38 = vld [vmem:[#allocation2 + $0x9a] sm:$0xff] }
  0x35   :  { %2672 = vmatpush.bf16.msra.mxu0 %v7161_v0  ;;  %8632 = vmatpush.bf16.msra.mxu3 %v7161_v0  ;;  %v124_v27 = vld [vmem:[#allocation2 + $0x7e] sm:$0xff]  ;;  %v126_v28 = vld [vmem:[#allocation2 + $0x8c] sm:$0xff] }
  0x36   :  { %v633_v15 = vld.sshfl [vmem:[#allocation1] sm:$0xff pattern:$0x73625140]  ;;  %v634_v18 = vld.sshfl [vmem:[#allocation1 + $0x8] sm:$0xff pattern:$0x73625140]  ;;  %2761 = vmatpush.bf16.msra.mxu1 %v8927_v1 }
  0x37   :  { %2850 = vmatpush.bf16.msra.mxu2 %v8929_v2  ;;  %v635_v21 = vld.sshfl [vmem:[#allocation1 + $0x10] sm:$0xff pattern:$0x73625140]  ;;  %v8935_v22 = vld.sshfl [vmem:[#allocation1 + $0x18] sm:$0xff pattern:$0x73625140] }
  0x38   :  { %640 = vst [vmem:[#allocation1] ss:$4 sm:$0xff] %v114_v11  ;;  %v140_v44 = vld [vmem:[#allocation2 + $0xee] sm:$0xff]  ;;  %v142_v45 = vld [vmem:[#allocation2 + $0xfc] sm:$0xff] }
  0x39   :  { %641 = vst [vmem:[#allocation1 + $0x1] ss:$4 sm:$0xff] %v116_v12  ;;  %2673 = vmatpush.bf16.msra.mxu0 %v7145_v14  ;;  %8633 = vmatpush.bf16.msra.mxu3 %v7145_v14  ;;  %v144_v54 = vld [vmem:[#allocation2 + $0x10a] sm:$0xff]  ;;  %v152_v63 = vld [vmem:[#allocation2 + $0x142] sm:$0xff] }
  0x3a   :  { %642 = vst [vmem:[#allocation1 + $0x2] ss:$4 sm:$0xff] %v118_v13  ;;  %2762 = vmatpush.bf16.msra.mxu1 %v7273_v19  ;;  %v154_v0 = vld [vmem:[#allocation2 + $0x150] sm:$0xff]  ;;  %v160_v13 = vld [vmem:[#allocation2 + $0x17a] sm:$0xff]  ;;  %v162_v14 = vld [vmem:[#allocation2 + $0x188] sm:$0xff] }
  0x3b   :  { %2851 = vmatpush.bf16.msra.mxu2 %v8933_v20  ;;  %643 = vst [vmem:[#allocation1 + $0x3] ss:$4 sm:$0xff] %v120_v23  ;;  %v158_v3 = vld [vmem:[#allocation2 + $0x16c] sm:$0xff] }
  0x3d   :  { %8634 = vmatpush.bf16.msrb.mxu3 %v8891_v7  ;;  %v130_v7 = vld [vmem:[#allocation2 + $0xa8] sm:$0xff] }
  0x41   :  { %8635 = vmatpush.bf16.msrb.mxu3 %v8897_v16  ;;  %v132_v16 = vld [vmem:[#allocation2 + $0xb6] sm:$0xff] }
  0x42   :  { %v648_v29 = vld.sshfl [vmem:[#allocation1] sm:$0xff pattern:$0x73625140]  ;;  %v8940_v30 = vld.sshfl [vmem:[#allocation1 + $0x18] sm:$0xff pattern:$0x73625140] }
  0x43   :  { %v8942_v31 = vpack.c.bf16 %v648_v29, %v633_v15  ;;  %v649_v32 = vld.sshfl [vmem:[#allocation1 + $0x8] sm:$0xff pattern:$0x73625140]  ;;  %v650_v33 = vld.sshfl [vmem:[#allocation1 + $0x10] sm:$0xff pattern:$0x73625140] }
  0x44   :  { %v8944_v36 = vpack.c.bf16 %v649_v32, %v634_v18  ;;  %v8946_v37 = vpack.c.bf16 %v650_v33, %v635_v21  ;;  %655 = vst [vmem:[#allocation1] ss:$4 sm:$0xff] %v122_v24  ;;  %v164_v15 = vld [vmem:[#allocation2 + $0x196] sm:$0xff]  ;;  %v166_v18 = vld [vmem:[#allocation2 + $0x1a4] sm:$0xff]  ;;  %v172_v29 = vld [vmem:[#allocation2 + $0x1ce] sm:$0xff] }
  0x45   :  { %12866 = vst [vmem:[#allocation16_spill] sm:$0xff] %v8942_v31  ;;  %8636 = vmatpush.bf16.msrb.mxu3 %v8903_v25  ;;  %2674 = vmatmul.bf16.vlgmr.msra.gmra.mxu0 %v8942_v31  ;;  %v174_v32 = vld [vmem:[#allocation2 + $0x1dc] sm:$0xff] }
  0x46   :  { %12867 = vst [vmem:[#allocation17_spill] sm:$0xff] %v8944_v36  ;;  %2763 = vmatmul.bf16.vlgmr.msra.gmra.mxu1 %v8944_v36  ;;  %2852 = vmatmul.bf16.vlgmr.msra.gmra.mxu2 %v8946_v37 }
  0x47   :  { %12868 = vst [vmem:[#allocation18_spill] sm:$0xff] %v8946_v37 }
  0x48   :  { %656 = vst [vmem:[#allocation1 + $0x1] ss:$4 sm:$0xff] %v124_v27  ;;  %v168_v27 = vld [vmem:[#allocation2 + $0x1b2] sm:$0xff] }
  0x49   :  { %657 = vst [vmem:[#allocation1 + $0x2] ss:$4 sm:$0xff] %v126_v28  ;;  %8637 = vmatpush.bf16.msrb.mxu3 %v8909_v34  ;;  %v138_v34 = vld [vmem:[#allocation2 + $0xe0] sm:$0xff] }
  0x4a   :  { %658 = vst [vmem:[#allocation1 + $0x3] ss:$4 sm:$0xff] %v128_v38  ;;  %v170_v28 = vld [vmem:[#allocation2 + $0x1c0] sm:$0xff] }
  0x4d   :  { %8638 = vmatpush.bf16.msrb.mxu3 %v8915_v48 }
  0x51   :  { %v663_v40 = vld.sshfl [vmem:[#allocation1] sm:$0xff pattern:$0x73625140]  ;;  %v664_v41 = vld.sshfl [vmem:[#allocation1 + $0x8] sm:$0xff pattern:$0x73625140]  ;;  %8639 = vmatpush.bf16.msrb.mxu3 %v8921_v59 }
  0x52   :  { %v665_v42 = vld.sshfl [vmem:[#allocation1 + $0x10] sm:$0xff pattern:$0x73625140]  ;;  %v8954_v25 = vld.sshfl [vmem:[#allocation1 + $0x18] sm:$0xff pattern:$0x73625140] }
  0x53   :  { %670 = vst [vmem:[#allocation1] ss:$4 sm:$0xff] %v130_v7 }
  0x54   :  { %671 = vst [vmem:[#allocation1 + $0x1] ss:$4 sm:$0xff] %v132_v16 }
  0x55   :  { %672 = vst [vmem:[#allocation1 + $0x2] ss:$4 sm:$0xff] %v134_v39  ;;  %8640 = vmatpush.bf16.msrb.mxu3 %v8927_v1  ;;  %v156_v1 = vld [vmem:[#allocation2 + $0x15e] sm:$0xff] }
  0x56   :  { %673 = vst [vmem:[#allocation1 + $0x3] ss:$4 sm:$0xff] %v136_v43  ;;  %v178_v43 = vld [vmem:[#allocation2 + $0x1f8] sm:$0xff] }
  0x59   :  { %8641 = vmatpush.bf16.msrb.mxu3 %v7273_v19 }
  0x5d   :  { %v678_v46 = vld.sshfl [vmem:[#allocation1] sm:$0xff pattern:$0x73625140]  ;;  %v8958_v47 = vld.sshfl [vmem:[#allocation1 + $0x18] sm:$0xff pattern:$0x73625140] }
  0x5e   :  { %v8960_v48 = vpack.c.bf16 %v678_v46, %v663_v40  ;;  %v679_v50 = vld.sshfl [vmem:[#allocation1 + $0x8] sm:$0xff pattern:$0x73625140]  ;;  %v680_v51 = vld.sshfl [vmem:[#allocation1 + $0x10] sm:$0xff pattern:$0x73625140] }
  0x5f   :  { %v8962_v52 = vpack.c.bf16 %v679_v50, %v664_v41  ;;  %v8964_v53 = vpack.c.bf16 %v680_v51, %v665_v42  ;;  %685 = vst [vmem:[#allocation1] ss:$4 sm:$0xff] %v138_v34  ;;  %v176_v42 = vld [vmem:[#allocation2 + $0x1ea] sm:$0xff] }
  0x60   :  { %12869 = vst [vmem:[#allocation19_spill] sm:$0xff] %v8960_v48  ;;  %2679 = vmatmul.bf16.gmra.mxu0 %v8960_v48  ;;  %v180_v34 = vld [vmem:[#allocation2 + $0x206] sm:$0xff] }
  0x61   :  { %12870 = vst [vmem:[#allocation20_spill] sm:$0xff] %v8962_v52  ;;  %2768 = vmatmul.bf16.gmra.mxu1 %v8962_v52  ;;  %2857 = vmatmul.bf16.gmra.mxu2 %v8964_v53 }
  0x62   :  { %12871 = vst [vmem:[#allocation21_spill] sm:$0xff] %v8964_v53 }
  0x63   :  { %686 = vst [vmem:[#allocation1 + $0x1] ss:$4 sm:$0xff] %v140_v44  ;;  %v182_v44 = vld [vmem:[#allocation2 + $0x214] sm:$0xff] }
  0x64   :  { %687 = vst [vmem:[#allocation1 + $0x2] ss:$4 sm:$0xff] %v142_v45 }
  0x65   :  { %688 = vst [vmem:[#allocation1 + $0x3] ss:$4 sm:$0xff] %v144_v54  ;;  %v184_v54 = vld [vmem:[#allocation2 + $0x222] sm:$0xff] }
  0x6c   :  { %v693_v58 = vld.sshfl [vmem:[#allocation1] sm:$0xff pattern:$0x73625140]  ;;  %v694_v59 = vld.sshfl [vmem:[#allocation1 + $0x8] sm:$0xff pattern:$0x73625140] }
  0x6d   :  { %v695_v61 = vld.sshfl [vmem:[#allocation1 + $0x10] sm:$0xff pattern:$0x73625140]  ;;  %v8969_v62 = vld.sshfl [vmem:[#allocation1 + $0x18] sm:$0xff pattern:$0x73625140] }
  0x6e   :  { %700 = vst [vmem:[#allocation1] ss:$4 sm:$0xff] %v146_v55  ;;  %v186_v55 = vld [vmem:[#allocation2 + $0x230] sm:$0xff] }
  0x6f   :  { %701 = vst [vmem:[#allocation1 + $0x1] ss:$4 sm:$0xff] %v148_v56  ;;  %v188_v56 = vld [vmem:[#allocation2 + $0x23e] sm:$0xff] }
  0x70   :  { %702 = vst [vmem:[#allocation1 + $0x2] ss:$4 sm:$0xff] %v150_v57  ;;  %v190_v57 = vld [vmem:[#allocation2 + $0x24c] sm:$0xff] }
  0x71   :  { %703 = vst [vmem:[#allocation1 + $0x3] ss:$4 sm:$0xff] %v152_v63 }
  0x78   :  { %v708_v4 = vld.sshfl [vmem:[#allocation1] sm:$0xff pattern:$0x73625140]  ;;  %v8971_v5 = vld.sshfl [vmem:[#allocation1 + $0x18] sm:$0xff pattern:$0x73625140] }
  0x79   :  { %v8973_v6 = vpack.c.bf16 %v708_v4, %v693_v58  ;;  %v709_v9 = vld.sshfl [vmem:[#allocation1 + $0x8] sm:$0xff pattern:$0x73625140]  ;;  %v710_v10 = vld.sshfl [vmem:[#allocation1 + $0x10] sm:$0xff pattern:$0x73625140] }
  0x7a   :  { %v8975_v11 = vpack.c.bf16 %v709_v9, %v694_v59  ;;  %v8977_v12 = vpack.c.bf16 %v710_v10, %v695_v61  ;;  %715 = vst [vmem:[#allocation1] ss:$4 sm:$0xff] %v154_v0  ;;  %v192_v4 = vld [vmem:[#allocation2 + $0x25a] sm:$0xff]  ;;  %v194_v9 = vld [vmem:[#allocation2 + $0x268] sm:$0xff] }
  0x7b   :  { %12872 = vst [vmem:[#allocation22_spill] sm:$0xff] %v8973_v6  ;;  %2684 = vmatmul.bf16.gmra.mxu0 %v8973_v6  ;;  %v196_v10 = vld [vmem:[#allocation2 + $0x276] sm:$0xff] }
  0x7c   :  { %12873 = vst [vmem:[#allocation23_spill] sm:$0xff] %v8975_v11  ;;  %2773 = vmatmul.bf16.gmra.mxu1 %v8975_v11  ;;  %2862 = vmatmul.bf16.gmra.mxu2 %v8977_v12 }
  0x7d   :  { %12874 = vst [vmem:[#allocation24_spill] sm:$0xff] %v8977_v12  ;;  %v8504_v12 = vld [vmem:[#allocation5 + $0x50c] sm:$0xf0] }
  0x7e   :  { %716 = vst [vmem:[#allocation1 + $0x1] ss:$4 sm:$0xff] %v156_v1 }
  0x7f   :  { %717 = vst [vmem:[#allocation1 + $0x2] ss:$4 sm:$0xff] %v158_v3 }
  0x80   :  { %718 = vst [vmem:[#allocation1 + $0x3] ss:$4 sm:$0xff] %v160_v13  ;;  %v198_v13 = vld [vmem:[#allocation2 + $0x284] sm:$0xff] }
  0x87   :  { %v723_v19 = vld.sshfl [vmem:[#allocation1] sm:$0xff pattern:$0x73625140]  ;;  %v724_v21 = vld.sshfl [vmem:[#allocation1 + $0x8] sm:$0xff pattern:$0x73625140] }
  0x88   :  { %v725_v23 = vld.sshfl [vmem:[#allocation1 + $0x10] sm:$0xff pattern:$0x73625140]  ;;  %v8982_v24 = vld.sshfl [vmem:[#allocation1 + $0x18] sm:$0xff pattern:$0x73625140] }
  0x89   :  { %730 = vst [vmem:[#allocation1] ss:$4 sm:$0xff] %v162_v14 }
  0x8a   :  { %731 = vst [vmem:[#allocation1 + $0x1] ss:$4 sm:$0xff] %v164_v15 }
  0x8b   :  { %732 = vst [vmem:[#allocation1 + $0x2] ss:$4 sm:$0xff] %v166_v18 }
  0x8c   :  { %733 = vst [vmem:[#allocation1 + $0x3] ss:$4 sm:$0xff] %v168_v27  ;;  %v204_v27 = vld [vmem:[#allocation2 + $0x2ae] sm:$0xff] }
  0x93   :  { %v738_v33 = vld.sshfl [vmem:[#allocation1] sm:$0xff pattern:$0x73625140]  ;;  %v8984_v38 = vld.sshfl [vmem:[#allocation1 + $0x18] sm:$0xff pattern:$0x73625140] }
  0x94   :  { %v8986_v7 = vpack.c.bf16 %v738_v33, %v723_v19  ;;  %v739_v16 = vld.sshfl [vmem:[#allocation1 + $0x8] sm:$0xff pattern:$0x73625140]  ;;  %v740_v39 = vld.sshfl [vmem:[#allocation1 + $0x10] sm:$0xff pattern:$0x73625140] }
  0x95   :  { %v8988_v40 = vpack.c.bf16 %v739_v16, %v724_v21  ;;  %v8990_v41 = vpack.c.bf16 %v740_v39, %v725_v23  ;;  %745 = vst [vmem:[#allocation1] ss:$4 sm:$0xff] %v170_v28  ;;  %v200_v21 = vld [vmem:[#allocation2 + $0x292] sm:$0xff]  ;;  %v202_v23 = vld [vmem:[#allocation2 + $0x2a0] sm:$0xff] }
  0x96   :  { %12875 = vst [vmem:[#allocation25_spill] sm:$0xff] %v8986_v7  ;;  %2689 = vmatmul.bf16.gmra.mxu0 %v8986_v7  ;;  %v206_v28 = vld [vmem:[#allocation2 + $0x2bc] sm:$0xff] }
  0x97   :  { %12876 = vst [vmem:[#allocation26_spill] sm:$0xff] %v8988_v40  ;;  %2778 = vmatmul.bf16.gmra.mxu1 %v8988_v40  ;;  %2867 = vmatmul.bf16.gmra.mxu2 %v8990_v41 }
  0x98   :  { %12877 = vst [vmem:[#allocation27_spill] sm:$0xff] %v8990_v41 }
  0x99   :  { %746 = vst [vmem:[#allocation1 + $0x1] ss:$4 sm:$0xff] %v172_v29 }
  0x9a   :  { %747 = vst [vmem:[#allocation1 + $0x2] ss:$4 sm:$0xff] %v174_v32 }
  0x9b   :  { %748 = vst [vmem:[#allocation1 + $0x3] ss:$4 sm:$0xff] %v176_v42 }
  0xa2   :  { %v753_v45 = vld.sshfl [vmem:[#allocation1] sm:$0xff pattern:$0x73625140]  ;;  %v754_v46 = vld.sshfl [vmem:[#allocation1 + $0x8] sm:$0xff pattern:$0x73625140] }
  0xa3   :  { %v755_v50 = vld.sshfl [vmem:[#allocation1 + $0x10] sm:$0xff pattern:$0x73625140]  ;;  %v8995_v51 = vld.sshfl [vmem:[#allocation1 + $0x18] sm:$0xff pattern:$0x73625140] }
  0xa4   :  { %760 = vst [vmem:[#allocation1] ss:$4 sm:$0xff] %v178_v43 }
  0xa5   :  { %761 = vst [vmem:[#allocation1 + $0x1] ss:$4 sm:$0xff] %v180_v34  ;;  %v208_v34 = vld [vmem:[#allocation2 + $0x2ca] sm:$0xff] }
  0xa6   :  { %762 = vst [vmem:[#allocation1 + $0x2] ss:$4 sm:$0xff] %v182_v44  ;;  %v210_v44 = vld [vmem:[#allocation2 + $0x2d8] sm:$0xff] }
  0xa7   :  { %763 = vst [vmem:[#allocation1 + $0x3] ss:$4 sm:$0xff] %v184_v54 }
  0xae   :  { %v768_v58 = vld.sshfl [vmem:[#allocation1] sm:$0xff pattern:$0x73625140]  ;;  %v8997_v59 = vld.sshfl [vmem:[#allocation1 + $0x18] sm:$0xff pattern:$0x73625140] }
  0xaf   :  { %v8999_v61 = vpack.c.bf16 %v768_v58, %v753_v45  ;;  %v769_v63 = vld.sshfl [vmem:[#allocation1 + $0x8] sm:$0xff pattern:$0x73625140]  ;;  %v770_v0 = vld.sshfl [vmem:[#allocation1 + $0x10] sm:$0xff pattern:$0x73625140] }
  0xb0   :  { %v9001_v1 = vpack.c.bf16 %v769_v63, %v754_v46  ;;  %v9003_v3 = vpack.c.bf16 %v770_v0, %v755_v50  ;;  %775 = vst [vmem:[#allocation1] ss:$4 sm:$0xff] %v186_v55  ;;  %v212_v45 = vld [vmem:[#allocation2 + $0x2e6] sm:$0xff]  ;;  %v214_v46 = vld [vmem:[#allocation2 + $0x2f4] sm:$0xff] }
  0xb1   :  { %12878 = vst [vmem:[#allocation28_spill] sm:$0xff] %v8999_v61  ;;  %2694 = vmatmul.bf16.gmra.mxu0 %v8999_v61  ;;  %v254_v61 = vld [vmem:[#allocation2 + $0x40c] sm:$0xff] }
  0xb2   :  { %12879 = vst [vmem:[#allocation29_spill] sm:$0xff] %v9001_v1  ;;  %2783 = vmatmul.bf16.gmra.mxu1 %v9001_v1  ;;  %2872 = vmatmul.bf16.gmra.mxu2 %v9003_v3  ;;  %v7880_v1 = vld [vmem:[#allocation5 + $0x5c0] sm:$0xf] }
  0xb3   :  { %12880 = vst [vmem:[#allocation30_spill] sm:$0xff] %v9003_v3  ;;  %v8496_v3 = vld [vmem:[#allocation5 + $0x4cc] sm:$0xf0] }
  0xb4   :  { %776 = vst [vmem:[#allocation1 + $0x1] ss:$4 sm:$0xff] %v188_v56 }
  0xb5   :  { %777 = vst [vmem:[#allocation1 + $0x2] ss:$4 sm:$0xff] %v190_v57  ;;  %v216_v57 = vld [vmem:[#allocation2 + $0x302] sm:$0xff] }
  0xb6   :  { %778 = vst [vmem:[#allocation1 + $0x3] ss:$4 sm:$0xff] %v192_v4  ;;  %v218_v4 = vld [vmem:[#allocation2 + $0x310] sm:$0xff] }
  0xbd   :  { %v783_v14 = vld.sshfl [vmem:[#allocation1] sm:$0xff pattern:$0x73625140]  ;;  %v784_v15 = vld.sshfl [vmem:[#allocation1 + $0x8] sm:$0xff pattern:$0x73625140] }
  0xbe   :  { %v785_v18 = vld.sshfl [vmem:[#allocation1 + $0x10] sm:$0xff pattern:$0x73625140]  ;;  %v9008_v19 = vld.sshfl [vmem:[#allocation1 + $0x18] sm:$0xff pattern:$0x73625140] }
  0xbf   :  { %790 = vst [vmem:[#allocation1] ss:$4 sm:$0xff] %v194_v9  ;;  %v220_v9 = vld [vmem:[#allocation2 + $0x31e] sm:$0xff] }
  0xc0   :  { %791 = vst [vmem:[#allocation1 + $0x1] ss:$4 sm:$0xff] %v196_v10  ;;  %v222_v10 = vld [vmem:[#allocation2 + $0x32c] sm:$0xff] }
  0xc1   :  { %792 = vst [vmem:[#allocation1 + $0x2] ss:$4 sm:$0xff] %v198_v13 }
  0xc2   :  { %793 = vst [vmem:[#allocation1 + $0x3] ss:$4 sm:$0xff] %v200_v21  ;;  %v2675_v58 = vpop.f32.mrf.mxu0 }
  0xc3   :  { %v2764_v63 = vpop.f32.mrf.mxu1 }
  0xc4   :  { %v2765_v0 = vadd.f32 %v2764_v63, %v2675_v58  ;;  %v234_v63 = vld [vmem:[#allocation2 + $0x380] sm:$0xff] }
  0xc9   :  { %v798_v29 = vld.sshfl [vmem:[#allocation1] sm:$0xff pattern:$0x73625140]  ;;  %v9010_v32 = vld.sshfl [vmem:[#allocation1 + $0x18] sm:$0xff pattern:$0x73625140] }
  0xca   :  { %v9012_v33 = vpack.c.bf16 %v798_v29, %v783_v14  ;;  %v799_v16 = vld.sshfl [vmem:[#allocation1 + $0x8] sm:$0xff pattern:$0x73625140]  ;;  %v800_v39 = vld.sshfl [vmem:[#allocation1 + $0x10] sm:$0xff pattern:$0x73625140] }
  0xcb   :  { %v9014_v42 = vpack.c.bf16 %v799_v16, %v784_v15  ;;  %v9016_v43 = vpack.c.bf16 %v800_v39, %v785_v18  ;;  %805 = vst [vmem:[#allocation1] ss:$4 sm:$0xff] %v202_v23  ;;  %v226_v29 = vld [vmem:[#allocation2 + $0x348] sm:$0xff]  ;;  %v228_v16 = vld [vmem:[#allocation2 + $0x356] sm:$0xff]  ;;  %v9040_v58 = vpop.f32.mrf.mxu1 }
  0xcc   :  { %12881 = vst [vmem:[#allocation31_spill] sm:$0xff] %v9012_v33  ;;  %2699 = vmatmul.bf16.gmra.mxu0 %v9012_v33  ;;  %v230_v39 = vld [vmem:[#allocation2 + $0x364] sm:$0xff] }
  0xcd   :  { %12882 = vst [vmem:[#allocation32_spill] sm:$0xff] %v9014_v42  ;;  %2788 = vmatmul.bf16.gmra.mxu1 %v9014_v42  ;;  %2877 = vmatmul.bf16.gmra.mxu2 %v9016_v43  ;;  %v252_v33 = vld [vmem:[#allocation2 + $0x3fe] sm:$0xff] }
  0xce   :  { %12883 = vst [vmem:[#allocation33_spill] sm:$0xff] %v9016_v43  ;;  %v7752_v43 = vld [vmem:[#allocation5 + $0x4c0] sm:$0xf] }
  0xcf   :  { %806 = vst [vmem:[#allocation1 + $0x1] ss:$4 sm:$0xff] %v204_v27 }
  0xd0   :  { %807 = vst [vmem:[#allocation1 + $0x2] ss:$4 sm:$0xff] %v206_v28  ;;  %v224_v28 = vld [vmem:[#allocation2 + $0x33a] sm:$0xff] }
  0xd1   :  { %808 = vst [vmem:[#allocation1 + $0x3] ss:$4 sm:$0xff] %v208_v34 }
  0xd8   :  { %v813_v50 = vld.sshfl [vmem:[#allocation1] sm:$0xff pattern:$0x73625140]  ;;  %v814_v54 = vld.sshfl [vmem:[#allocation1 + $0x8] sm:$0xff pattern:$0x73625140] }
  0xd9   :  { %v815_v55 = vld.sshfl [vmem:[#allocation1 + $0x10] sm:$0xff pattern:$0x73625140]  ;;  %v9021_v56 = vld.sshfl [vmem:[#allocation1 + $0x18] sm:$0xff pattern:$0x73625140] }
  0xda   :  { %820 = vst [vmem:[#allocation1] ss:$4 sm:$0xff] %v210_v44 }
  0xdb   :  { %821 = vst [vmem:[#allocation1 + $0x1] ss:$4 sm:$0xff] %v212_v45 }
  0xdc   :  { %822 = vst [vmem:[#allocation1 + $0x2] ss:$4 sm:$0xff] %v214_v46 }
  0xdd   :  { %823 = vst [vmem:[#allocation1 + $0x3] ss:$4 sm:$0xff] %v216_v57 }
  0xe4   :  { %v828_v13 = vld.sshfl [vmem:[#allocation1] sm:$0xff pattern:$0x73625140]  ;;  %v9023_v14 = vld.sshfl [vmem:[#allocation1 + $0x18] sm:$0xff pattern:$0x73625140] }
  0xe5   :  { %v9025_v15 = vpack.c.bf16 %v828_v13, %v813_v50  ;;  %v829_v18 = vld.sshfl [vmem:[#allocation1 + $0x8] sm:$0xff pattern:$0x73625140]  ;;  %v830_v21 = vld.sshfl [vmem:[#allocation1 + $0x10] sm:$0xff pattern:$0x73625140] }
  0xe6   :  { %v9027_v23 = vpack.c.bf16 %v829_v18, %v814_v54  ;;  %v9029_v27 = vpack.c.bf16 %v830_v21, %v815_v55  ;;  %835 = vst [vmem:[#allocation1] ss:$4 sm:$0xff] %v218_v4  ;;  %v232_v50 = vld [vmem:[#allocation2 + $0x372] sm:$0xff]  ;;  %v2853_v54 = vpop.f32.mrf.mxu2  ;;  %v9036_v55 = vpop.f32.mrf.mxu0 }
  0xe7   :  { %12884 = vst [vmem:[#allocation34_spill] sm:$0xff] %v9025_v15  ;;  %2704 = vmatmul.bf16.gmra.mxu0 %v9025_v15  ;;  %v9038_v57 = vadd.f32 %v2853_v54, %v2765_v0  ;;  %v236_v4 = vld [vmem:[#allocation2 + $0x38e] sm:$0xff] }
  0xe8   :  { %12885 = vst [vmem:[#allocation35_spill] sm:$0xff] %v9027_v23  ;;  %2793 = vmatmul.bf16.gmra.mxu1 %v9027_v23  ;;  %2882 = vmatmul.bf16.gmra.mxu2 %v9029_v27 }
  0xe9   :  { %12886 = vst [vmem:[#allocation36_spill] sm:$0xff] %v9029_v27 }
  0xea   :  { %836 = vst [vmem:[#allocation1 + $0x1] ss:$4 sm:$0xff] %v220_v9  ;;  %v238_v9 = vld [vmem:[#allocation2 + $0x39c] sm:$0xff] }
  0xeb   :  { %837 = vst [vmem:[#allocation1 + $0x2] ss:$4 sm:$0xff] %v222_v10 }
  0xec   :  { %838 = vst [vmem:[#allocation1 + $0x3] ss:$4 sm:$0xff] %v224_v28 }
  0xee   :  { %v2680_v0 = vpop.f32.mrf.mxu0  ;;  %v9053_v54 = vpop.f32.mrf.mxu2 }
  0xf3   :  { %v843_v34 = vld.sshfl [vmem:[#allocation1] sm:$0xff pattern:$0x73625140]  ;;  %v844_v44 = vld.sshfl [vmem:[#allocation1 + $0x8] sm:$0xff pattern:$0x73625140] }
  0xf4   :  { %v845_v45 = vld.sshfl [vmem:[#allocation1 + $0x10] sm:$0xff pattern:$0x73625140]  ;;  %v9034_v46 = vld.sshfl [vmem:[#allocation1 + $0x18] sm:$0xff pattern:$0x73625140] }
  0xf5   :  { %850 = vst [vmem:[#allocation1] ss:$4 sm:$0xff] %v226_v29 }
  0xf6   :  { %851 = vst [vmem:[#allocation1 + $0x1] ss:$4 sm:$0xff] %v228_v16 }
  0xf7   :  { %852 = vst [vmem:[#allocation1 + $0x2] ss:$4 sm:$0xff] %v230_v39  ;;  %v240_v39 = vld [vmem:[#allocation2 + $0x3aa] sm:$0xff] }
  0xf8   :  { %853 = vst [vmem:[#allocation1 + $0x3] ss:$4 sm:$0xff] %v232_v50 }
  0xff   :  { %v858_v10 = vld.sshfl [vmem:[#allocation1] sm:$0xff pattern:$0x73625140]  ;;  %v9042_v13 = vld.sshfl [vmem:[#allocation1 + $0x18] sm:$0xff pattern:$0x73625140] }
 0x100   :  { %v9044_v18 = vpack.c.bf16 %v858_v10, %v843_v34  ;;  %v859_v21 = vld.sshfl [vmem:[#allocation1 + $0x8] sm:$0xff pattern:$0x73625140]  ;;  %v860_v28 = vld.sshfl [vmem:[#allocation1 + $0x10] sm:$0xff pattern:$0x73625140]  ;;  %v2769_v34 = vpop.f32.mrf.mxu1 }
 0x101   :  { %v9046_v29 = vpack.c.bf16 %v859_v21, %v844_v44  ;;  %v9048_v16 = vpack.c.bf16 %v860_v28, %v845_v45  ;;  %865 = vst [vmem:[#allocation1] ss:$4 sm:$0xff] %v234_v63  ;;  %v2770_v50 = vadd.f32 %v2769_v34, %v2680_v0  ;;  %v242_v44 = vld [vmem:[#allocation2 + $0x3b8] sm:$0xff]  ;;  %v244_v10 = vld [vmem:[#allocation2 + $0x3c6] sm:$0xff]  ;;  %v250_v34 = vld [vmem:[#allocation2 + $0x3f0] sm:$0xff] }
 0x102   :  { %12887 = vst [vmem:[#allocation37_spill] sm:$0xff] %v9044_v18  ;;  %2709 = vmatmul.bf16.gmra.mxu0 %v9044_v18  ;;  %v246_v45 = vld [vmem:[#allocation2 + $0x3d4] sm:$0xff] }
 0x103   :  { %12888 = vst [vmem:[#allocation38_spill] sm:$0xff] %v9046_v29  ;;  %2798 = vmatmul.bf16.gmra.mxu1 %v9046_v29  ;;  %2887 = vmatmul.bf16.gmra.mxu2 %v9048_v16 }
 0x104   :  { %12889 = vst [vmem:[#allocation39_spill] sm:$0xff] %v9048_v16 }
 0x105   :  { %866 = vst [vmem:[#allocation1 + $0x1] ss:$4 sm:$0xff] %v236_v4  ;;  %v248_v4 = vld [vmem:[#allocation2 + $0x3e2] sm:$0xff] }
 0x106   :  { %867 = vst [vmem:[#allocation1 + $0x2] ss:$4 sm:$0xff] %v238_v9  ;;  %v2858_v9 = vpop.f32.mrf.mxu2 }
 0x107   :  { %868 = vst [vmem:[#allocation1 + $0x3] ss:$4 sm:$0xff] %v240_v39  ;;  %v9057_v39 = vpop.f32.mrf.mxu0  ;;  %v9059_v18 = vadd.f32 %v2858_v9, %v2770_v50 }
 0x108   :  { %12890 = vst [vmem:[#allocation40_spill] sm:$0xff] %v9057_v39  ;;  %v9061_v0 = vpop.f32.mrf.mxu1 }
 0x109   :  { %12891 = vst [vmem:[#allocation41_spill] sm:$0xff] %v9059_v18 }
 0x10a   :  { %12892 = vst [vmem:[#allocation42_spill] sm:$0xff] %v9061_v0  ;;  %v7864_v0 = vld [vmem:[#allocation5 + $0x5a0] sm:$0xf] }
 0x10e   :  { %v873_v21 = vld.sshfl [vmem:[#allocation1] sm:$0xff pattern:$0x73625140]  ;;  %v874_v28 = vld.sshfl [vmem:[#allocation1 + $0x8] sm:$0xff pattern:$0x73625140]  ;;  %v9074_v9 = vpop.f32.mrf.mxu2 }
 0x10f   :  { %v875_v63 = vld.sshfl [vmem:[#allocation1 + $0x10] sm:$0xff pattern:$0x73625140]  ;;  %v9055_v15 = vld.sshfl [vmem:[#allocation1 + $0x18] sm:$0xff pattern:$0x73625140]  ;;  %v2685_v50 = vpop.f32.mrf.mxu0 }
 0x110   :  { %880 = vst [vmem:[#allocation1] ss:$4 sm:$0xff] %v242_v44 }
 0x111   :  { %881 = vst [vmem:[#allocation1 + $0x1] ss:$4 sm:$0xff] %v244_v10 }
 0x112   :  { %882 = vst [vmem:[#allocation1 + $0x2] ss:$4 sm:$0xff] %v246_v45 }
 0x113   :  { %883 = vst [vmem:[#allocation1 + $0x3] ss:$4 sm:$0xff] %v248_v4  ;;  %v256_v4 = vld [vmem:[#allocation2 + $0x41a] sm:$0xff] }
 0x114   :  { %12896 = vst [vmem:[#allocation46_spill] sm:$0xff] %v9074_v9  ;;  %v272_v9 = vld [vmem:[#allocation2 + $0x48a] sm:$0xff] }
 0x11a   :  { %v888_v7 = vld.sshfl [vmem:[#allocation1] sm:$0xff pattern:$0x73625140]  ;;  %v9063_v6 = vld.sshfl [vmem:[#allocation1 + $0x18] sm:$0xff pattern:$0x73625140] }
 0x11b   :  { %v9065_v48 = vpack.c.bf16 %v888_v7, %v873_v21  ;;  %v889_v31 = vld.sshfl [vmem:[#allocation1 + $0x8] sm:$0xff pattern:$0x73625140]  ;;  %v890_v44 = vld.sshfl [vmem:[#allocation1 + $0x10] sm:$0xff pattern:$0x73625140]  ;;  %v2774_v7 = vpop.f32.mrf.mxu1 }
 0x11c   :  { %v9067_v10 = vpack.c.bf16 %v889_v31, %v874_v28  ;;  %v9069_v45 = vpack.c.bf16 %v890_v44, %v875_v63  ;;  %895 = vst [vmem:[#allocation1] ss:$4 sm:$0xff] %v250_v34  ;;  %v2775_v21 = vadd.f32 %v2774_v7, %v2685_v50  ;;  %v258_v31 = vld [vmem:[#allocation2 + $0x428] sm:$0xff]  ;;  %v260_v28 = vld [vmem:[#allocation2 + $0x436] sm:$0xff]  ;;  %v9078_v50 = vpop.f32.mrf.mxu0 }
 0x11d   :  { %12893 = vst [vmem:[#allocation43_spill] sm:$0xff] %v9065_v48  ;;  %2714 = vmatmul.bf16.gmra.mxu0 %v9065_v48  ;;  %v262_v63 = vld [vmem:[#allocation2 + $0x444] sm:$0xff]  ;;  %v7896_v48 = vld [vmem:[#allocation5 + $0x5e0] sm:$0xf] }
 0x11e   :  { %12894 = vst [vmem:[#allocation44_spill] sm:$0xff] %v9067_v10  ;;  %2803 = vmatmul.bf16.gmra.mxu1 %v9067_v10  ;;  %2892 = vmatmul.bf16.gmra.mxu2 %v9069_v45  ;;  %v8532_v10 = vld [vmem:[#allocation5 + $0x5ec] sm:$0xf0] }
 0x11f   :  { %12895 = vst [vmem:[#allocation45_spill] sm:$0xff] %v9069_v45  ;;  %v2863_v45 = vpop.f32.mrf.mxu2  ;;  %v7897_v42 = vor.u32 %v8532_v10, %v7896_v48 }
 0x120   :  { %896 = vst [vmem:[#allocation1 + $0x1] ss:$4 sm:$0xff] %v252_v33  ;;  %v264_v33 = vld [vmem:[#allocation2 + $0x452] sm:$0xff]  ;;  %v9080_v27 = vadd.f32 %v2863_v45, %v2775_v21 }
 0x121   :  { %897 = vst [vmem:[#allocation1 + $0x2] ss:$4 sm:$0xff] %v254_v61  ;;  %v7768_v61 = vld [vmem:[#allocation5 + $0x4e0] sm:$0xf]  ;;  %3111 = vmatpush.bf16.msrb.mxu1 %v7897_v42 }
 0x122   :  { %898 = vst [vmem:[#allocation1 + $0x3] ss:$4 sm:$0xff] %v256_v4  ;;  %v8500_v4 = vld [vmem:[#allocation5 + $0x4ec] sm:$0xf0] }
 0x123   :  { %12898 = vst [vmem:[#allocation48_spill] sm:$0xff] %v9078_v50  ;;  %v7769_v7 = vor.u32 %v8500_v4, %v7768_v61  ;;  %v9082_v23 = vpop.f32.mrf.mxu1  ;;  %v7736_v61 = vld [vmem:[#allocation5 + $0x4a0] sm:$0xf]  ;;  %v8492_v4 = vld [vmem:[#allocation5 + $0x4ac] sm:$0xf0]  ;;  %v7753_v50 = vor.u32 %v8496_v3, %v7752_v43 }
 0x124   :  { %12899 = vst [vmem:[#allocation49_spill] sm:$0xff] %v9080_v27  ;;  %v2690_v3 = vpop.f32.mrf.mxu0  ;;  %v7720_v43 = vld [vmem:[#allocation5 + $0x480] sm:$0xf] }
 0x125   :  { %12900 = vst [vmem:[#allocation50_spill] sm:$0xff] %v9082_v23  ;;  %3022 = vmatpush.bf16.msrb.mxu0 %v7769_v7  ;;  %v8524_v7 = vld [vmem:[#allocation5 + $0x5ac] sm:$0xf0] }
 0x129   :  { %v903_v44 = vld.sshfl [vmem:[#allocation1] sm:$0xff pattern:$0x73625140]  ;;  %v904_v16 = vld.sshfl [vmem:[#allocation1 + $0x8] sm:$0xff pattern:$0x73625140]  ;;  %3023 = vmatpush.bf16.msrb.mxu0 %v7753_v50 }
 0x12a   :  { %v905_v34 = vld.sshfl [vmem:[#allocation1 + $0x10] sm:$0xff pattern:$0x73625140]  ;;  %v9076_v29 = vld.sshfl [vmem:[#allocation1 + $0x18] sm:$0xff pattern:$0x73625140] }
 0x12b   :  { %12897 = vst [vmem:[#allocation47_spill] sm:$0xff] %v9076_v29  ;;  %v2779_v42 = vpop.f32.mrf.mxu1  ;;  %v7784_v29 = vld [vmem:[#allocation5 + $0x500] sm:$0xf] }
 0x12c   :  { %910 = vst [vmem:[#allocation1] ss:$4 sm:$0xff] %v258_v31  ;;  %v8528_v31 = vld [vmem:[#allocation5 + $0x5cc] sm:$0xf0] }
 0x12d   :  { %911 = vst [vmem:[#allocation1 + $0x1] ss:$4 sm:$0xff] %v260_v28  ;;  %v266_v28 = vld [vmem:[#allocation2 + $0x460] sm:$0xff]  ;;  %v7881_v48 = vor.u32 %v8528_v31, %v7880_v1  ;;  %v7865_v1 = vor.u32 %v8524_v7, %v7864_v0 }
 0x12e   :  { %912 = vst [vmem:[#allocation1 + $0x2] ss:$4 sm:$0xff] %v262_v63  ;;  %v268_v63 = vld [vmem:[#allocation2 + $0x46e] sm:$0xff]  ;;  %v280_v0 = vld [vmem:[#allocation2 + $0x4c2] sm:$0xff] }
 0x12f   :  { %913 = vst [vmem:[#allocation1 + $0x3] ss:$4 sm:$0xff] %v264_v33  ;;  %v270_v33 = vld [vmem:[#allocation2 + $0x47c] sm:$0xff]  ;;  %3112 = vmatpush.bf16.msrb.mxu1 %v7881_v48 }
 0x130   :  { %v284_v7 = vld [vmem:[#allocation2 + $0x4de] sm:$0xff] }
 0x133   :  { %3113 = vmatpush.bf16.msrb.mxu1 %v7865_v1 }
 0x136   :  { %v918_v41 = vld.sshfl [vmem:[#allocation1] sm:$0xff pattern:$0x73625140]  ;;  %v9084_v40 = vld.sshfl [vmem:[#allocation1 + $0x18] sm:$0xff pattern:$0x73625140] }
 0x137   :  { %12901 = vst [vmem:[#allocation51_spill] sm:$0xff] %v9084_v40  ;;  %v9086_v45 = vpack.c.bf16 %v918_v41, %v903_v44  ;;  %v919_v21 = vld.sshfl [vmem:[#allocation1 + $0x8] sm:$0xff pattern:$0x73625140]  ;;  %v7737_v41 = vor.u32 %v8492_v4, %v7736_v61  ;;  %v282_v4 = vld [vmem:[#allocation2 + $0x4d0] sm:$0xff] }
 0x138   :  { %v920_v23 = vld.sshfl [vmem:[#allocation1 + $0x10] sm:$0xff pattern:$0x73625140]  ;;  %v9088_v10 = vpack.c.bf16 %v919_v21, %v904_v16  ;;  %v8488_v16 = vld [vmem:[#allocation5 + $0x48c] sm:$0xf0] }
 0x139   :  { %12902 = vst [vmem:[#allocation52_spill] sm:$0xff] %v9086_v45  ;;  %v9090_v27 = vpack.c.bf16 %v920_v23, %v905_v34  ;;  %2719 = vmatmul.bf16.gmra.mxu0 %v9086_v45  ;;  %v9095_v23 = vadd.f32 %v2779_v42, %v2690_v3  ;;  %v7848_v44 = vld [vmem:[#allocation5 + $0x580] sm:$0xf]  ;;  %v8520_v34 = vld [vmem:[#allocation5 + $0x58c] sm:$0xf0]  ;;  %v7721_v31 = vor.u32 %v8488_v16, %v7720_v43  ;;  %v276_v21 = vld [vmem:[#allocation2 + $0x4a6] sm:$0xff]  ;;  %v9114_v45 = vpop.f32.mrf.mxu0 }
 0x13a   :  { %12903 = vst [vmem:[#allocation53_spill] sm:$0xff] %v9088_v10  ;;  %2808 = vmatmul.bf16.gmra.mxu1 %v9088_v10  ;;  %3024 = vmatpush.bf16.msrb.mxu0 %v7737_v41  ;;  %v286_v41 = vld [vmem:[#allocation2 + $0x4ec] sm:$0xff] }
 0x13b   :  { %12904 = vst [vmem:[#allocation54_spill] sm:$0xff] %v9090_v27  ;;  %2897 = vmatmul.bf16.gmra.mxu2 %v9090_v27  ;;  %v7816_v27 = vld [vmem:[#allocation5 + $0x540] sm:$0xf] }
 0x13c   :  { %925 = vst [vmem:[#allocation1] ss:$4 sm:$0xff] %v266_v28  ;;  %v7849_v28 = vor.u32 %v8520_v34, %v7848_v44 }
 0x13d   :  { %926 = vst [vmem:[#allocation1 + $0x1] ss:$4 sm:$0xff] %v268_v63  ;;  %v274_v63 = vld [vmem:[#allocation2 + $0x498] sm:$0xff] }
 0x13e   :  { %927 = vst [vmem:[#allocation1 + $0x2] ss:$4 sm:$0xff] %v270_v33  ;;  %v278_v33 = vld [vmem:[#allocation2 + $0x4b4] sm:$0xff]  ;;  %3025 = vmatpush.bf16.msrb.mxu0 %v7721_v31  ;;  %3114 = vmatpush.bf16.msrb.mxu1 %v7849_v28  ;;  %v9110_v28 = vpop.f32.mrf.mxu2 }
 0x13f   :  { %928 = vst [vmem:[#allocation1 + $0x3] ss:$4 sm:$0xff] %v272_v9  ;;  %v288_v31 = vld [vmem:[#allocation2 + $0x4fa] sm:$0xff] }
 0x140   :  { %12910 = vst [vmem:[#allocation60_spill] sm:$0xff] %v9110_v28  ;;  %v8508_v28 = vld [vmem:[#allocation5 + $0x52c] sm:$0xf0] }
 0x141   :  { %12912 = vst [vmem:[#allocation62_spill] sm:$0xff] %v9114_v45  ;;  %v302_v45 = vld [vmem:[#allocation2 + $0x55c] sm:$0xff] }
 0x146   :  { %v933_v9 = vld.sshfl [vmem:[#allocation1] sm:$0xff pattern:$0x73625140]  ;;  %v934_v50 = vld.sshfl [vmem:[#allocation1 + $0x8] sm:$0xff pattern:$0x73625140] }
 0x147   :  { %v935_v48 = vld.sshfl [vmem:[#allocation1 + $0x10] sm:$0xff pattern:$0x73625140]  ;;  %v9097_v61 = vld.sshfl [vmem:[#allocation1 + $0x18] sm:$0xff pattern:$0x73625140] }
 0x148   :  { %12905 = vst [vmem:[#allocation55_spill] sm:$0xff] %v9097_v61  ;;  %v8536_v61 = vld [vmem:[#allocation5 + $0x60c] sm:$0xf0] }
 0x149   :  { %940 = vst [vmem:[#allocation1] ss:$4 sm:$0xff] %v274_v63  ;;  %v290_v63 = vld [vmem:[#allocation2 + $0x508] sm:$0xff] }
 0x14a   :  { %941 = vst [vmem:[#allocation1 + $0x1] ss:$4 sm:$0xff] %v276_v21  ;;  %v292_v21 = vld [vmem:[#allocation2 + $0x516] sm:$0xff] }
 0x14b   :  { %942 = vst [vmem:[#allocation1 + $0x2] ss:$4 sm:$0xff] %v278_v33  ;;  %v294_v33 = vld [vmem:[#allocation2 + $0x524] sm:$0xff] }
 0x14c   :  { %943 = vst [vmem:[#allocation1 + $0x3] ss:$4 sm:$0xff] %v280_v0 }
 0x153   :  { %v948_v1 = vld.sshfl [vmem:[#allocation1] sm:$0xff pattern:$0x73625140]  ;;  %v9099_v3 = vld.sshfl [vmem:[#allocation1 + $0x18] sm:$0xff pattern:$0x73625140] }
 0x154   :  { %12906 = vst [vmem:[#allocation56_spill] sm:$0xff] %v9099_v3  ;;  %v9101_v42 = vpack.c.bf16 %v948_v1, %v933_v9  ;;  %v949_v43 = vld.sshfl [vmem:[#allocation1 + $0x8] sm:$0xff pattern:$0x73625140]  ;;  %v8484_v1 = vld [vmem:[#allocation5 + $0x46c] sm:$0xf0] }
 0x155   :  { %v950_v16 = vld.sshfl [vmem:[#allocation1 + $0x10] sm:$0xff pattern:$0x73625140]  ;;  %v9103_v44 = vpack.c.bf16 %v949_v43, %v934_v50  ;;  %v7912_v3 = vld [vmem:[#allocation5 + $0x600] sm:$0xf] }
 0x156   :  { %12907 = vst [vmem:[#allocation57_spill] sm:$0xff] %v9101_v42  ;;  %v9105_v34 = vpack.c.bf16 %v950_v16, %v935_v48  ;;  %2724 = vmatmul.bf16.gmra.mxu0 %v9101_v42  ;;  %v8516_v16 = vld [vmem:[#allocation5 + $0x56c] sm:$0xf0]  ;;  %v2868_v42 = vpop.f32.mrf.mxu2 }
 0x157   :  { %12908 = vst [vmem:[#allocation58_spill] sm:$0xff] %v9103_v44  ;;  %2813 = vmatmul.bf16.gmra.mxu1 %v9103_v44  ;;  %v8480_v44 = vld [vmem:[#allocation5 + $0x44c] sm:$0xf0]  ;;  %v9117_v10 = vadd.f32 %v2868_v42, %v9095_v23  ;;  %v7656_v42 = vld [vmem:[#allocation5 + $0x400] sm:$0xf] }
 0x158   :  { %12909 = vst [vmem:[#allocation59_spill] sm:$0xff] %v9105_v34  ;;  %2902 = vmatmul.bf16.gmra.mxu2 %v9105_v34  ;;  %v7688_v34 = vld [vmem:[#allocation5 + $0x440] sm:$0xf]  ;;  %v304_v23 = vld [vmem:[#allocation2 + $0x56a] sm:$0xff] }
 0x159   :  { %955 = vst [vmem:[#allocation1] ss:$4 sm:$0xff] %v282_v4  ;;  %v296_v4 = vld [vmem:[#allocation2 + $0x532] sm:$0xff] }
 0x15a   :  { %956 = vst [vmem:[#allocation1 + $0x1] ss:$4 sm:$0xff] %v284_v7  ;;  %v7704_v7 = vld [vmem:[#allocation5 + $0x460] sm:$0xf] }
 0x15b   :  { %957 = vst [vmem:[#allocation1 + $0x2] ss:$4 sm:$0xff] %v286_v41  ;;  %v7705_v43 = vor.u32 %v8484_v1, %v7704_v7  ;;  %v7832_v41 = vld [vmem:[#allocation5 + $0x560] sm:$0xf] }
 0x15c   :  { %958 = vst [vmem:[#allocation1 + $0x3] ss:$4 sm:$0xff] %v288_v31  ;;  %v7833_v31 = vor.u32 %v8516_v16, %v7832_v41  ;;  %v7672_v1 = vld [vmem:[#allocation5 + $0x420] sm:$0xf]  ;;  %v8476_v41 = vld [vmem:[#allocation5 + $0x42c] sm:$0xf0] }
 0x15d   :  { %3026 = vmatpush.bf16.msrb.mxu0 %v7705_v43  ;;  %12913 = vst [vmem:[#allocation63_spill] sm:$0xff] %v9117_v10  ;;  %v7800_v16 = vld [vmem:[#allocation5 + $0x520] sm:$0xf] }
 0x15e   :  { %3115 = vmatpush.bf16.msrb.mxu1 %v7833_v31  ;;  %v7801_v10 = vor.u32 %v8508_v28, %v7800_v16 }
 0x163   :  { %v963_v9 = vld.sshfl [vmem:[#allocation1] sm:$0xff pattern:$0x73625140]  ;;  %v964_v50 = vld.sshfl [vmem:[#allocation1 + $0x8] sm:$0xff pattern:$0x73625140] }
 0x164   :  { %v965_v48 = vld.sshfl [vmem:[#allocation1 + $0x10] sm:$0xff pattern:$0x73625140]  ;;  %v9112_v0 = vld.sshfl [vmem:[#allocation1 + $0x18] sm:$0xff pattern:$0x73625140] }
 0x165   :  { %12911 = vst [vmem:[#allocation61_spill] sm:$0xff] %v9112_v0  ;;  %v300_v0 = vld [vmem:[#allocation2 + $0x54e] sm:$0xff] }
 0x166   :  { %970 = vst [vmem:[#allocation1] ss:$4 sm:$0xff] %v290_v63  ;;  %v9119_v63 = vpop.f32.mrf.mxu1 }
 0x167   :  { %971 = vst [vmem:[#allocation1 + $0x1] ss:$4 sm:$0xff] %v292_v21  ;;  %v7689_v21 = vor.u32 %v8480_v44, %v7688_v34  ;;  %v7913_v44 = vor.u32 %v8536_v61, %v7912_v3  ;;  %v109_v3 = vld [vmem:[#allocation2 + $0x16] sm:$0x3f] }
 0x168   :  { %972 = vst [vmem:[#allocation1 + $0x2] ss:$4 sm:$0xff] %v294_v33  ;;  %v8512_v33 = vld [vmem:[#allocation5 + $0x54c] sm:$0xf0] }
 0x169   :  { %973 = vst [vmem:[#allocation1 + $0x3] ss:$4 sm:$0xff] %v296_v4  ;;  %v298_v4 = vld [vmem:[#allocation2 + $0x540] sm:$0xff]  ;;  %v7817_v7 = vor.u32 %v8512_v33, %v7816_v27  ;;  %3027 = vmatpush.bf16.msrb.mxu0 %v7689_v21  ;;  %v7673_v33 = vor.u32 %v8476_v41, %v7672_v1  ;;  %3207 = vmatpush.bf16.msrb.mxu2 %v7913_v44  ;;  %v107_v21 = vld [vmem:[#allocation2 + $0x8] sm:$0x3f]  ;;  %v310_v1 = vld [vmem:[#allocation2 + $0x594] sm:$0xff] }
 0x16a   :  { %12914 = vst [vmem:[#allocation64_spill] sm:$0xff] %v9119_v63  ;;  %v8472_v63 = vld [vmem:[#allocation5 + $0x40c] sm:$0xf0] }
 0x16b   :  { %3116 = vmatpush.bf16.msrb.mxu1 %v7817_v7  ;;  %626 = vst [vmem:[#allocation1 + $0x20] ss:$4 sm:$0xff] %v107_v21  ;;  %v308_v7 = vld [vmem:[#allocation2 + $0x586] sm:$0xff] }
 0x16c   :  { %628 = vst [vmem:[#allocation1 + $0x21] ss:$4 sm:$0xff] %v109_v3 }
 0x16d   :  { %3028 = vmatpush.bf16.msrb.mxu0 %v7673_v33  ;;  %v121_v33 = vld [vmem:[#allocation2 + $0x6a] sm:$0x3f] }
 0x16e   :  { %v2784_v61 = vpop.f32.mrf.mxu1 }
 0x16f   :  { %3117 = vmatpush.bf16.msrb.mxu1 %v7801_v10 }
 0x170   :  { %v978_v39 = vld.sshfl [vmem:[#allocation1] sm:$0xff pattern:$0x73625140]  ;;  %v9121_v43 = vld.sshfl [vmem:[#allocation1 + $0x18] sm:$0xff pattern:$0x73625140] }
 0x171   :  { %12915 = vst [vmem:[#allocation65_spill] sm:$0xff] %v9121_v43  ;;  %v9123_v34 = vpack.c.bf16 %v978_v39, %v963_v9  ;;  %v979_v31 = vld.sshfl [vmem:[#allocation1 + $0x8] sm:$0xff pattern:$0x73625140]  ;;  %v2695_v39 = vpop.f32.mrf.mxu0  ;;  %v7657_v9 = vor.u32 %v8472_v63, %v7656_v42  ;;  %v319_v43 = vld [vmem:[#allocation2 + $0x5d4] sm:$0x3f] }
 0x172   :  { %v980_v27 = vld.sshfl [vmem:[#allocation1 + $0x10] sm:$0xff pattern:$0x73625140]  ;;  %v9125_v18 = vpack.c.bf16 %v979_v31, %v964_v50  ;;  %v2785_v28 = vadd.f32 %v2784_v61, %v2695_v39  ;;  %v7785_v50 = vor.u32 %v8504_v12, %v7784_v29  ;;  %v115_v29 = vld [vmem:[#allocation2 + $0x40] sm:$0x3f] }
 0x173   :  { %12916 = vst [vmem:[#allocation66_spill] sm:$0xff] %v9123_v34  ;;  %v9127_v40 = vpack.c.bf16 %v980_v27, %v965_v48  ;;  %2729 = vmatmul.bf16.gmra.mxu0 %v9123_v34  ;;  %v111_v48 = vld [vmem:[#allocation2 + $0x24] sm:$0x3f]  ;;  %v119_v31 = vld [vmem:[#allocation2 + $0x5c] sm:$0x3f] }
 0x174   :  { %12917 = vst [vmem:[#allocation67_spill] sm:$0xff] %v9125_v18  ;;  %2818 = vmatmul.bf16.gmra.mxu1 %v9125_v18  ;;  %3029 = vmatpush.bf16.msrb.mxu0 %v7657_v9  ;;  %v312_v12 = vld [vmem:[#allocation2 + $0x5a2] sm:$0xff]  ;;  %v314_v9 = vld [vmem:[#allocation2 + $0x5b0] sm:$0xff] }
 0x175   :  { %12918 = vst [vmem:[#allocation68_spill] sm:$0xff] %v9127_v40  ;;  %2907 = vmatmul.bf16.gmra.mxu2 %v9127_v40  ;;  %3118 = vmatpush.bf16.msrb.mxu1 %v7785_v50  ;;  %v316_v50 = vld [vmem:[#allocation2 + $0x5be] sm:$0xff] }
 0x176   :  { %985 = vst [vmem:[#allocation1] ss:$4 sm:$0xff] %v298_v4  ;;  %v113_v4 = vld [vmem:[#allocation2 + $0x32] sm:$0x3f]  ;;  %v9144_v3 = vpop.f32.mrf.mxu1 }
 0x177   :  { %986 = vst [vmem:[#allocation1 + $0x1] ss:$4 sm:$0xff] %v300_v0  ;;  %v9132_v0 = vpop.f32.mrf.mxu2 }
 0x178   :  { %987 = vst [vmem:[#allocation1 + $0x2] ss:$4 sm:$0xff] %v302_v45  ;;  %v306_v45 = vld [vmem:[#allocation2 + $0x578] sm:$0xff] }
 0x179   :  { %988 = vst [vmem:[#allocation1 + $0x3] ss:$4 sm:$0xff] %v304_v23  ;;  %v117_v23 = vld [vmem:[#allocation2 + $0x4e] sm:$0x3f]  ;;  %v9140_v39 = vpop.f32.mrf.mxu0 }
 0x17a   :  { %630 = vst [vmem:[#allocation1 + $0x22] ss:$4 sm:$0xff] %v111_v48  ;;  %v318_v48 = vld [vmem:[#allocation2 + $0x5cc] sm:$0xff] }
 0x17b   :  { %632 = vst [vmem:[#allocation1 + $0x23] ss:$4 sm:$0xff] %v113_v4 }
 0x17c   :  { %12919 = vst [vmem:[#allocation69_spill] sm:$0xff] %v9132_v0 }
 0x17d   :  { %12921 = vst [vmem:[#allocation71_spill] sm:$0xff] %v9140_v39 }
 0x17e   :  { %12923 = vst [vmem:[#allocation73_spill] sm:$0xff] %v9144_v3  ;;  %v2789_v40 = vpop.f32.mrf.mxu1 }
 0x17f   :  { %v2873_v21 = vpop.f32.mrf.mxu2 }
 0x180   :  { %v993_v41 = vld.sshfl [vmem:[#allocation1] sm:$0xff pattern:$0x73625140]  ;;  %v9134_v16 = vld.sshfl [vmem:[#allocation1 + $0x8] sm:$0xff pattern:$0x73625140]  ;;  %v9142_v61 = vadd.f32 %v2873_v21, %v2785_v28 }
 0x181   :  { %v9136_v10 = vld.sshfl [vmem:[#allocation1 + $0x10] sm:$0xff pattern:$0x73625140]  ;;  %v9138_v63 = vld.sshfl [vmem:[#allocation1 + $0x18] sm:$0xff pattern:$0x73625140]  ;;  %v2700_v34 = vpop.f32.mrf.mxu0 }
 0x182   :  { %12920 = vst [vmem:[#allocation70_spill] sm:$0xff] %v9138_v63  ;;  %v637_v42 = vld.sshfl [vmem:[#allocation1 + $0x20] sm:$0xff pattern:$0x73625140] }
 0x183   :  { %1000 = vst [vmem:[#allocation1] ss:$4 sm:$0xff] %v306_v45  ;;  %v638_v44 = vld.sshfl [vmem:[#allocation1 + $0x28] sm:$0xff pattern:$0x73625140] }
 0x184   :  { %1001 = vst [vmem:[#allocation1 + $0x1] ss:$4 sm:$0xff] %v308_v7  ;;  %v639_v27 = vld.sshfl [vmem:[#allocation1 + $0x30] sm:$0xff pattern:$0x73625140]  ;;  %v320_v28 = vld [vmem:[#allocation2 + $0x5da] sm:$0xff] }
 0x185   :  { %1002 = vst [vmem:[#allocation1 + $0x2] ss:$4 sm:$0xff] %v310_v1 }
 0x186   :  { %1003 = vst [vmem:[#allocation1 + $0x3] ss:$4 sm:$0xff] %v312_v12 }
 0x187   :  { %644 = vst [vmem:[#allocation1 + $0x20] ss:$4 sm:$0xff] %v115_v29  ;;  %v123_v29 = vld [vmem:[#allocation2 + $0x78] sm:$0x3f] }
 0x188   :  { %645 = vst [vmem:[#allocation1 + $0x21] ss:$4 sm:$0xff] %v117_v23  ;;  %v125_v23 = vld [vmem:[#allocation2 + $0x86] sm:$0x3f] }
 0x189   :  { %646 = vst [vmem:[#allocation1 + $0x22] ss:$4 sm:$0xff] %v119_v31  ;;  %v127_v31 = vld [vmem:[#allocation2 + $0x94] sm:$0x3f] }
 0x18a   :  { %12922 = vst [vmem:[#allocation72_spill] sm:$0xff] %v9142_v61 }
 0x18b   :  { %647 = vst [vmem:[#allocation1 + $0x23] ss:$4 sm:$0xff] %v121_v33 }
 0x18d   :  { %v1008_v4 = vld.sshfl [vmem:[#allocation1] sm:$0xff pattern:$0x73625140]  ;;  %v9146_v45 = vld.sshfl [vmem:[#allocation1 + $0x8] sm:$0xff pattern:$0x73625140] }
 0x18e   :  { %v9148_v7 = vld.sshfl [vmem:[#allocation1 + $0x10] sm:$0xff pattern:$0x73625140]  ;;  %v9150_v1 = vld.sshfl [vmem:[#allocation1 + $0x18] sm:$0xff pattern:$0x73625140]  ;;  %v9152_v12 = vpack.c.bf16 %v1008_v4, %v993_v41 }
 0x18f   :  { %12924 = vst [vmem:[#allocation74_spill] sm:$0xff] %v9150_v1 }
 0x190   :  { %12925 = vst [vmem:[#allocation75_spill] sm:$0xff] %v9152_v12  ;;  %2734 = vmatmul.bf16.vlgmr.msra.gmra.mxu3 %v9152_v12 }
 0x191   :  { %1015 = vst [vmem:[#allocation1] ss:$4 sm:$0xff] %v314_v9  ;;  %8642 = vmatpush.bf16.msra.mxu3 %v8893_v8  ;;  %v2790_v9 = vadd.f32 %v2789_v40, %v2700_v34  ;;  %v9167_v8 = vpop.f32.mrf.mxu2  ;;  %v324_v40 = vld [vmem:[#allocation2 + $0x5f6] sm:$0xff]  ;;  %v326_v34 = vld [vmem:[#allocation2 + $0x604] sm:$0xff] }
 0x192   :  { %1016 = vst [vmem:[#allocation1 + $0x1] ss:$4 sm:$0xff] %v316_v50  ;;  %v652_v33 = vld.sshfl [vmem:[#allocation1 + $0x20] sm:$0xff pattern:$0x73625140] }
 0x193   :  { %1017 = vst [vmem:[#allocation1 + $0x2] ss:$4 sm:$0xff] %v318_v48  ;;  %v653_v21 = vld.sshfl [vmem:[#allocation1 + $0x28] sm:$0xff pattern:$0x73625140]  ;;  %v9156_v18 = vpack.c.bf16 %v652_v33, %v637_v42  ;;  %v322_v42 = vld [vmem:[#allocation2 + $0x5e8] sm:$0xff] }
 0x194   :  { %v9158_v3 = vpack.c.bf16 %v653_v21, %v638_v44  ;;  %v654_v41 = vld.sshfl [vmem:[#allocation1 + $0x30] sm:$0xff pattern:$0x73625140]  ;;  %1018 = vst [vmem:[#allocation1 + $0x3] ss:$4 sm:$0xff] %v320_v28 }
 0x195   :  { %12926 = vst [vmem:[#allocation76_spill] sm:$0xff] %v9156_v18  ;;  %v9160_v4 = vpack.c.bf16 %v654_v41, %v639_v27  ;;  %v129_v50 = vld [vmem:[#allocation2 + $0xa2] sm:$0x3f]  ;;  %3030 = vmatmul.bf16.vlgmr.msrb.gmra.mxu0 %v9156_v18  ;;  %8643 = vmatpush.bf16.msra.mxu3 %v8899_v17  ;;  %v135_v21 = vld [vmem:[#allocation2 + $0xcc] sm:$0x3f]  ;;  %v9177_v18 = vpop.f32.mrf.mxu0 }
 0x196   :  { %12927 = vst [vmem:[#allocation77_spill] sm:$0xff] %v9158_v3  ;;  %3119 = vmatmul.bf16.vlgmr.msrb.gmra.mxu1 %v9158_v3  ;;  %v133_v17 = vld [vmem:[#allocation2 + $0xbe] sm:$0x3f] }
 0x197   :  { %12928 = vst [vmem:[#allocation78_spill] sm:$0xff] %v9160_v4  ;;  %7926 = vmatmul.msk.bf16.vlgmr.msrb.gmra.mxu2 %vm2617_vm0, %v9160_v4 }
 0x198   :  { %659 = vst [vmem:[#allocation1 + $0x20] ss:$4 sm:$0xff] %v123_v29  ;;  %v328_v29 = vld [vmem:[#allocation2 + $0x612] sm:$0xff] }
 0x199   :  { %660 = vst [vmem:[#allocation1 + $0x21] ss:$4 sm:$0xff] %v125_v23  ;;  %8644 = vmatpush.bf16.msra.mxu3 %v8905_v26  ;;  %v131_v23 = vld [vmem:[#allocation2 + $0xb0] sm:$0x3f]  ;;  %v2878_v26 = vpop.f32.mrf.mxu2 }
 0x19a   :  { %661 = vst [vmem:[#allocation1 + $0x22] ss:$4 sm:$0xff] %v127_v31 }
 0x19b   :  { %662 = vst [vmem:[#allocation1 + $0x23] ss:$4 sm:$0xff] %v129_v50  ;;  %v1023_v44 = vld.sshfl [vmem:[#allocation1] sm:$0xff pattern:$0x73625140] }
 0x19c   :  { %12929 = vst [vmem:[#allocation79_spill] sm:$0xff] %v9167_v8  ;;  %v9169_v27 = vld.sshfl [vmem:[#allocation1 + $0x8] sm:$0xff pattern:$0x73625140]  ;;  %v137_v50 = vld [vmem:[#allocation2 + $0xda] sm:$0x3f] }
 0x19d   :  { %v9172_v48 = vld.sshfl [vmem:[#allocation1 + $0x10] sm:$0xff pattern:$0x73625140]  ;;  %v9174_v28 = vld.sshfl [vmem:[#allocation1 + $0x18] sm:$0xff pattern:$0x73625140]  ;;  %8645 = vmatpush.bf16.msra.mxu3 %v8911_v35 }
 0x19e   :  { %12930 = vst [vmem:[#allocation80_spill] sm:$0xff] %v9174_v28  ;;  %v332_v35 = vld [vmem:[#allocation2 + $0x62e] sm:$0xff] }
 0x19f   :  { %1030 = vst [vmem:[#allocation1] ss:$4 sm:$0xff] %v322_v42  ;;  %v9180_v42 = vadd.f32 %v2878_v26, %v2790_v9  ;;  %v139_v9 = vld [vmem:[#allocation2 + $0xe8] sm:$0x3f] }
 0x1a0   :  { %1031 = vst [vmem:[#allocation1 + $0x1] ss:$4 sm:$0xff] %v324_v40  ;;  %v9182_v40 = vpop.f32.mrf.mxu1 }
 0x1a1   :  { %1032 = vst [vmem:[#allocation1 + $0x2] ss:$4 sm:$0xff] %v326_v34  ;;  %8646 = vmatpush.bf16.msra.mxu3 %v8917_v49  ;;  %v330_v34 = vld [vmem:[#allocation2 + $0x620] sm:$0xff]  ;;  %v336_v49 = vld [vmem:[#allocation2 + $0x64a] sm:$0xff] }
 0x1a2   :  { %v667_v31 = vld.sshfl [vmem:[#allocation1 + $0x20] sm:$0xff pattern:$0x73625140]  ;;  %1033 = vst [vmem:[#allocation1 + $0x3] ss:$4 sm:$0xff] %v328_v29 }
 0x1a3   :  { %v668_v33 = vld.sshfl [vmem:[#allocation1 + $0x28] sm:$0xff pattern:$0x73625140]  ;;  %v669_v41 = vld.sshfl [vmem:[#allocation1 + $0x30] sm:$0xff pattern:$0x73625140] }
 0x1a4   :  { %674 = vst [vmem:[#allocation1 + $0x20] ss:$4 sm:$0xff] %v131_v23  ;;  %v334_v29 = vld [vmem:[#allocation2 + $0x63c] sm:$0xff] }
 0x1a5   :  { %675 = vst [vmem:[#allocation1 + $0x21] ss:$4 sm:$0xff] %v133_v17  ;;  %8647 = vmatpush.bf16.msra.mxu3 %v8923_v60  ;;  %v2705_v60 = vpop.f32.mrf.mxu0 }
 0x1a6   :  { %12931 = vst [vmem:[#allocation81_spill] sm:$0xff] %v9177_v18 }
 0x1a7   :  { %676 = vst [vmem:[#allocation1 + $0x22] ss:$4 sm:$0xff] %v135_v21  ;;  %v141_v21 = vld [vmem:[#allocation2 + $0xf6] sm:$0x3f] }
 0x1a8   :  { %12932 = vst [vmem:[#allocation82_spill] sm:$0xff] %v9180_v42  ;;  %v2794_v18 = vpop.f32.mrf.mxu1 }
 0x1a9   :  { %12933 = vst [vmem:[#allocation83_spill] sm:$0xff] %v9182_v40  ;;  %v1038_v12 = vld.sshfl [vmem:[#allocation1] sm:$0xff pattern:$0x73625140]  ;;  %8648 = vmatpush.bf16.msra.mxu3 %v8929_v2  ;;  %v9206_v2 = vpop.f32.mrf.mxu2 }
 0x1aa   :  { %677 = vst [vmem:[#allocation1 + $0x23] ss:$4 sm:$0xff] %v137_v50  ;;  %v9184_v4 = vld.sshfl [vmem:[#allocation1 + $0x8] sm:$0xff pattern:$0x73625140]  ;;  %v9191_v3 = vpack.c.bf16 %v1038_v12, %v1023_v44  ;;  %v2795_v44 = vadd.f32 %v2794_v18, %v2705_v60 }
 0x1ab   :  { %v9187_v23 = vld.sshfl [vmem:[#allocation1 + $0x10] sm:$0xff pattern:$0x73625140]  ;;  %v9189_v17 = vld.sshfl [vmem:[#allocation1 + $0x18] sm:$0xff pattern:$0x73625140] }
 0x1ac   :  { %12934 = vst [vmem:[#allocation84_spill] sm:$0xff] %v9189_v17  ;;  %2739 = vmatmul.bf16.gmra.mxu3 %v9191_v3  ;;  %v143_v50 = vld [vmem:[#allocation2 + $0x104] sm:$0x3f]  ;;  %v151_v60 = vld [vmem:[#allocation2 + $0x13c] sm:$0x3f] }
 0x1ad   :  { %12935 = vst [vmem:[#allocation85_spill] sm:$0xff] %v9191_v3  ;;  %8649 = vmatpush.bf16.msra.mxu3 %v8933_v20  ;;  %v340_v18 = vld [vmem:[#allocation2 + $0x666] sm:$0xff]  ;;  %v9214_v3 = vpop.f32.mrf.mxu0 }
 0x1ae   :  { %1045 = vst [vmem:[#allocation1] ss:$4 sm:$0xff] %v330_v34 }
 0x1af   :  { %1046 = vst [vmem:[#allocation1 + $0x1] ss:$4 sm:$0xff] %v332_v35  ;;  %v145_v35 = vld [vmem:[#allocation2 + $0x112] sm:$0x3f] }
 0x1b0   :  { %1047 = vst [vmem:[#allocation1 + $0x2] ss:$4 sm:$0xff] %v334_v29 }
 0x1b1   :  { %v682_v26 = vld.sshfl [vmem:[#allocation1 + $0x20] sm:$0xff pattern:$0x73625140]  ;;  %v683_v40 = vld.sshfl [vmem:[#allocation1 + $0x28] sm:$0xff pattern:$0x73625140] }
 0x1b2   :  { %v9195_v42 = vpack.c.bf16 %v682_v26, %v667_v31  ;;  %v9197_v17 = vpack.c.bf16 %v683_v40, %v668_v33  ;;  %v684_v12 = vld.sshfl [vmem:[#allocation1 + $0x30] sm:$0xff pattern:$0x73625140]  ;;  %1048 = vst [vmem:[#allocation1 + $0x3] ss:$4 sm:$0xff] %v336_v49  ;;  %v338_v31 = vld [vmem:[#allocation2 + $0x658] sm:$0xff] }
 0x1b3   :  { %v9199_v34 = vpack.c.bf16 %v684_v12, %v669_v41  ;;  %689 = vst [vmem:[#allocation1 + $0x20] ss:$4 sm:$0xff] %v139_v9  ;;  %v342_v33 = vld [vmem:[#allocation2 + $0x674] sm:$0xff]  ;;  %v344_v9 = vld [vmem:[#allocation2 + $0x682] sm:$0xff] }
 0x1b4   :  { %12936 = vst [vmem:[#allocation86_spill] sm:$0xff] %v9195_v42  ;;  %3035 = vmatmul.bf16.gmra.mxu0 %v9195_v42  ;;  %3124 = vmatmul.bf16.gmra.mxu1 %v9197_v17  ;;  %v2883_v42 = vpop.f32.mrf.mxu2 }
 0x1b5   :  { %12937 = vst [vmem:[#allocation87_spill] sm:$0xff] %v9197_v17  ;;  %7927 = vmatmul.msk.bf16.gmra.mxu2 %vm2617_vm0, %v9199_v34  ;;  %v9218_v17 = vpop.f32.mrf.mxu1 }
 0x1b6   :  { %12938 = vst [vmem:[#allocation88_spill] sm:$0xff] %v9199_v34  ;;  %v9216_v34 = vadd.f32 %v2883_v42, %v2795_v44  ;;  %v352_v42 = vld [vmem:[#allocation2 + $0x6ba] sm:$0xff] }
 0x1b7   :  { %690 = vst [vmem:[#allocation1 + $0x21] ss:$4 sm:$0xff] %v141_v21  ;;  %v147_v21 = vld [vmem:[#allocation2 + $0x120] sm:$0x3f]  ;;  %v155_v44 = vld [vmem:[#allocation2 + $0x158] sm:$0x3f] }
 0x1b8   :  { %691 = vst [vmem:[#allocation1 + $0x22] ss:$4 sm:$0xff] %v143_v50  ;;  %v149_v50 = vld [vmem:[#allocation2 + $0x12e] sm:$0x3f] }
 0x1b9   :  { %692 = vst [vmem:[#allocation1 + $0x23] ss:$4 sm:$0xff] %v145_v35  ;;  %v1053_v41 = vld.sshfl [vmem:[#allocation1] sm:$0xff pattern:$0x73625140] }
 0x1ba   :  { %12939 = vst [vmem:[#allocation89_spill] sm:$0xff] %v9206_v2  ;;  %v9208_v40 = vld.sshfl [vmem:[#allocation1 + $0x8] sm:$0xff pattern:$0x73625140]  ;;  %v153_v35 = vld [vmem:[#allocation2 + $0x14a] sm:$0x3f] }
 0x1bb   :  { %v9210_v29 = vld.sshfl [vmem:[#allocation1 + $0x10] sm:$0xff pattern:$0x73625140]  ;;  %v9212_v49 = vld.sshfl [vmem:[#allocation1 + $0x18] sm:$0xff pattern:$0x73625140] }
 0x1bc   :  { %12940 = vst [vmem:[#allocation90_spill] sm:$0xff] %v9212_v49 }
 0x1bd   :  { %1060 = vst [vmem:[#allocation1] ss:$4 sm:$0xff] %v338_v31  ;;  %v346_v31 = vld [vmem:[#allocation2 + $0x690] sm:$0xff]  ;;  %v2799_v8 = vpop.f32.mrf.mxu1 }
 0x1be   :  { %1061 = vst [vmem:[#allocation1 + $0x1] ss:$4 sm:$0xff] %v340_v18  ;;  %v348_v18 = vld [vmem:[#allocation2 + $0x69e] sm:$0xff] }
 0x1bf   :  { %1062 = vst [vmem:[#allocation1 + $0x2] ss:$4 sm:$0xff] %v342_v33  ;;  %v350_v33 = vld [vmem:[#allocation2 + $0x6ac] sm:$0xff] }
 0x1c0   :  { %v697_v20 = vld.sshfl [vmem:[#allocation1 + $0x20] sm:$0xff pattern:$0x73625140]  ;;  %1063 = vst [vmem:[#allocation1 + $0x3] ss:$4 sm:$0xff] %v344_v9 }
 0x1c1   :  { %v698_v26 = vld.sshfl [vmem:[#allocation1 + $0x28] sm:$0xff pattern:$0x73625140]  ;;  %v699_v12 = vld.sshfl [vmem:[#allocation1 + $0x30] sm:$0xff pattern:$0x73625140] }
 0x1c2   :  { %704 = vst [vmem:[#allocation1 + $0x20] ss:$4 sm:$0xff] %v147_v21 }
 0x1c3   :  { %705 = vst [vmem:[#allocation1 + $0x21] ss:$4 sm:$0xff] %v149_v50  ;;  %v9229_v50 = vpop.f32.mrf.mxu2 }
 0x1c4   :  { %12941 = vst [vmem:[#allocation91_spill] sm:$0xff] %v9214_v3 }
 0x1c5   :  { %706 = vst [vmem:[#allocation1 + $0x22] ss:$4 sm:$0xff] %v151_v60  ;;  %v2710_v60 = vpop.f32.mrf.mxu0 }
 0x1c6   :  { %12942 = vst [vmem:[#allocation92_spill] sm:$0xff] %v9216_v34 }
 0x1c7   :  { %12943 = vst [vmem:[#allocation93_spill] sm:$0xff] %v9218_v17  ;;  %v1068_v49 = vld.sshfl [vmem:[#allocation1] sm:$0xff pattern:$0x73625140] }
 0x1c8   :  { %707 = vst [vmem:[#allocation1 + $0x23] ss:$4 sm:$0xff] %v153_v35  ;;  %v9220_v9 = vld.sshfl [vmem:[#allocation1 + $0x8] sm:$0xff pattern:$0x73625140]  ;;  %v9226_v21 = vpack.c.bf16 %v1068_v49, %v1053_v41  ;;  %v2800_v49 = vadd.f32 %v2799_v8, %v2710_v60 }
 0x1c9   :  { %v9222_v2 = vld.sshfl [vmem:[#allocation1 + $0x10] sm:$0xff pattern:$0x73625140]  ;;  %v9224_v28 = vld.sshfl [vmem:[#allocation1 + $0x18] sm:$0xff pattern:$0x73625140] }
 0x1ca   :  { %12944 = vst [vmem:[#allocation94_spill] sm:$0xff] %v9224_v28  ;;  %2744 = vmatmul.bf16.gmra.mxu3 %v9226_v21  ;;  %v157_v35 = vld [vmem:[#allocation2 + $0x166] sm:$0x3f]  ;;  %v159_v17 = vld [vmem:[#allocation2 + $0x174] sm:$0x3f] }
 0x1cb   :  { %12945 = vst [vmem:[#allocation95_spill] sm:$0xff] %v9226_v21 }
 0x1cc   :  { %1075 = vst [vmem:[#allocation1] ss:$4 sm:$0xff] %v346_v31 }
 0x1cd   :  { %1076 = vst [vmem:[#allocation1 + $0x1] ss:$4 sm:$0xff] %v348_v18  ;;  %v161_v18 = vld [vmem:[#allocation2 + $0x182] sm:$0x3f] }
 0x1ce   :  { %1077 = vst [vmem:[#allocation1 + $0x2] ss:$4 sm:$0xff] %v350_v33  ;;  %v9241_v33 = vpop.f32.mrf.mxu0 }
 0x1cf   :  { %12946 = vst [vmem:[#allocation96_spill] sm:$0xff] %v9229_v50  ;;  %v712_v3 = vld.sshfl [vmem:[#allocation1 + $0x20] sm:$0xff pattern:$0x73625140] }
 0x1d0   :  { %v713_v34 = vld.sshfl [vmem:[#allocation1 + $0x28] sm:$0xff pattern:$0x73625140]  ;;  %v9231_v39 = vpack.c.bf16 %v712_v3, %v697_v20  ;;  %v714_v41 = vld.sshfl [vmem:[#allocation1 + $0x30] sm:$0xff pattern:$0x73625140] }
 0x1d1   :  { %v9233_v28 = vpack.c.bf16 %v713_v34, %v698_v26  ;;  %1078 = vst [vmem:[#allocation1 + $0x3] ss:$4 sm:$0xff] %v352_v42  ;;  %v9235_v31 = vpack.c.bf16 %v714_v41, %v699_v12  ;;  %v354_v3 = vld [vmem:[#allocation2 + $0x6c8] sm:$0xff]  ;;  %v356_v34 = vld [vmem:[#allocation2 + $0x6d6] sm:$0xff]  ;;  %v2888_v26 = vpop.f32.mrf.mxu2 }
 0x1d2   :  { %12947 = vst [vmem:[#allocation97_spill] sm:$0xff] %v9231_v39  ;;  %3040 = vmatmul.bf16.gmra.mxu0 %v9231_v39  ;;  %v358_v20 = vld [vmem:[#allocation2 + $0x6e4] sm:$0xff]  ;;  %v9245_v42 = vadd.f32 %v2888_v26, %v2800_v49  ;;  %v360_v41 = vld [vmem:[#allocation2 + $0x6f2] sm:$0xff] }
 0x1d3   :  { %12948 = vst [vmem:[#allocation98_spill] sm:$0xff] %v9233_v28  ;;  %3129 = vmatmul.bf16.gmra.mxu1 %v9233_v28  ;;  %7928 = vmatmul.msk.bf16.gmra.mxu2 %vm2617_vm0, %v9235_v31 }
 0x1d4   :  { %12949 = vst [vmem:[#allocation99_spill] sm:$0xff] %v9235_v31  ;;  %v167_v31 = vld [vmem:[#allocation2 + $0x1ac] sm:$0x3f] }
 0x1d5   :  { %719 = vst [vmem:[#allocation1 + $0x20] ss:$4 sm:$0xff] %v155_v44  ;;  %v9247_v44 = vpop.f32.mrf.mxu1 }
 0x1d6   :  { %720 = vst [vmem:[#allocation1 + $0x21] ss:$4 sm:$0xff] %v157_v35  ;;  %v2715_v26 = vpop.f32.mrf.mxu0 }
 0x1d7   :  { %721 = vst [vmem:[#allocation1 + $0x22] ss:$4 sm:$0xff] %v159_v17  ;;  %v163_v17 = vld [vmem:[#allocation2 + $0x190] sm:$0x3f] }
 0x1d8   :  { %722 = vst [vmem:[#allocation1 + $0x23] ss:$4 sm:$0xff] %v161_v18  ;;  %v1083_v8 = vld.sshfl [vmem:[#allocation1] sm:$0xff pattern:$0x73625140] }
 0x1d9   :  { %12950 = vst [vmem:[#allocation100_spill] sm:$0xff] %v9241_v33  ;;  %v9243_v12 = vld.sshfl [vmem:[#allocation1 + $0x8] sm:$0xff pattern:$0x73625140]  ;;  %v169_v33 = vld [vmem:[#allocation2 + $0x1ba] sm:$0x3f]  ;;  %v9253_v49 = vpop.f32.mrf.mxu2 }
 0x1da   :  { %12951 = vst [vmem:[#allocation101_spill] sm:$0xff] %v9245_v42  ;;  %v9249_v60 = vld.sshfl [vmem:[#allocation1 + $0x10] sm:$0xff pattern:$0x73625140]  ;;  %v165_v18 = vld [vmem:[#allocation2 + $0x19e] sm:$0x3f] }
 0x1db   :  { %12952 = vst [vmem:[#allocation102_spill] sm:$0xff] %v9247_v44  ;;  %v9251_v35 = vld.sshfl [vmem:[#allocation1 + $0x18] sm:$0xff pattern:$0x73625140] }
 0x1dc   :  { %12953 = vst [vmem:[#allocation103_spill] sm:$0xff] %v9251_v35 }
 0x1dd   :  { %1090 = vst [vmem:[#allocation1] ss:$4 sm:$0xff] %v354_v3  ;;  %v2804_v44 = vpop.f32.mrf.mxu1 }
 0x1de   :  { %1091 = vst [vmem:[#allocation1 + $0x1] ss:$4 sm:$0xff] %v356_v34  ;;  %v2805_v42 = vadd.f32 %v2804_v44, %v2715_v26  ;;  %v9262_v35 = vpop.f32.mrf.mxu0 }
 0x1df   :  { %1092 = vst [vmem:[#allocation1 + $0x2] ss:$4 sm:$0xff] %v358_v20  ;;  %v727_v39 = vld.sshfl [vmem:[#allocation1 + $0x20] sm:$0xff pattern:$0x73625140]  ;;  %v9259_v20 = vpack.c.bf16 %v9184_v4, %v9169_v27 }
 0x1e0   :  { %1093 = vst [vmem:[#allocation1 + $0x3] ss:$4 sm:$0xff] %v360_v41  ;;  %v728_v21 = vld.sshfl [vmem:[#allocation1 + $0x28] sm:$0xff pattern:$0x73625140] }
 0x1e1   :  { %v729_v28 = vld.sshfl [vmem:[#allocation1 + $0x30] sm:$0xff pattern:$0x73625140]  ;;  %12954 = vst [vmem:[#allocation104_spill] sm:$0xff] %v9253_v49  ;;  %v2893_v41 = vpop.f32.mrf.mxu2  ;;  %v173_v49 = vld [vmem:[#allocation2 + $0x1d6] sm:$0x3f] }
 0x1e2   :  { %734 = vst [vmem:[#allocation1 + $0x20] ss:$4 sm:$0xff] %v163_v17  ;;  %v171_v17 = vld [vmem:[#allocation2 + $0x1c8] sm:$0x3f]  ;;  %v9264_v50 = vadd.f32 %v2893_v41, %v2805_v42  ;;  %v9280_v41 = vpack.c.bf16 %v9146_v45, %v9134_v16 }
 0x1e3   :  { %735 = vst [vmem:[#allocation1 + $0x21] ss:$4 sm:$0xff] %v165_v18  ;;  %v175_v4 = vld [vmem:[#allocation2 + $0x1e4] sm:$0x3f] }
 0x1e4   :  { %736 = vst [vmem:[#allocation1 + $0x22] ss:$4 sm:$0xff] %v167_v31 }
 0x1e5   :  { %737 = vst [vmem:[#allocation1 + $0x23] ss:$4 sm:$0xff] %v169_v33  ;;  %v9266_v18 = vpop.f32.mrf.mxu1 }
 0x1e6   :  { %12956 = vst [vmem:[#allocation106_spill] sm:$0xff] %v9259_v20 }
 0x1e7   :  { %v1098_v3 = vld.sshfl [vmem:[#allocation1] sm:$0xff pattern:$0x73625140]  ;;  %12957 = vst [vmem:[#allocation107_spill] sm:$0xff] %v9262_v35  ;;  %v271_v35 = vld [vmem:[#allocation2 + $0x484] sm:$0x3f] }
 0x1e8   :  { %v9255_v34 = vpack.c.bf16 %v1098_v3, %v1083_v8  ;;  %12958 = vst [vmem:[#allocation108_spill] sm:$0xff] %v9264_v50  ;;  %v177_v3 = vld [vmem:[#allocation2 + $0x1f2] sm:$0x3f] }
 0x1e9   :  { %12959 = vst [vmem:[#allocation109_spill] sm:$0xff] %v9266_v18 }
 0x1ea   :  { %12955 = vst [vmem:[#allocation105_spill] sm:$0xff] %v9255_v34  ;;  %2749 = vmatmul.bf16.gmra.mxu3 %v9255_v34  ;;  %v185_v34 = vld [vmem:[#allocation2 + $0x22a] sm:$0x3f] }
 0x1eb   :  { %12963 = vst [vmem:[#allocation113_spill] sm:$0xff] %v9280_v41 }
 0x1ec   :  { %v742_v31 = vld.sshfl [vmem:[#allocation1 + $0x20] sm:$0xff pattern:$0x73625140]  ;;  %v743_v33 = vld.sshfl [vmem:[#allocation1 + $0x28] sm:$0xff pattern:$0x73625140] }
 0x1ed   :  { %v9268_v44 = vpack.c.bf16 %v742_v31, %v727_v39  ;;  %v9270_v8 = vpack.c.bf16 %v743_v33, %v728_v21  ;;  %v744_v26 = vld.sshfl [vmem:[#allocation1 + $0x30] sm:$0xff pattern:$0x73625140]  ;;  %v2720_v39 = vpop.f32.mrf.mxu0  ;;  %v2809_v42 = vpop.f32.mrf.mxu1 }
 0x1ee   :  { %v9272_v27 = vpack.c.bf16 %v744_v26, %v729_v28  ;;  %749 = vst [vmem:[#allocation1 + $0x20] ss:$4 sm:$0xff] %v171_v17  ;;  %v2810_v21 = vadd.f32 %v2809_v42, %v2720_v39  ;;  %v9282_v28 = vpop.f32.mrf.mxu2  ;;  %v179_v17 = vld [vmem:[#allocation2 + $0x200] sm:$0x3f]  ;;  %v181_v31 = vld [vmem:[#allocation2 + $0x20e] sm:$0x3f] }
 0x1ef   :  { %12960 = vst [vmem:[#allocation110_spill] sm:$0xff] %v9268_v44  ;;  %3045 = vmatmul.bf16.gmra.mxu0 %v9268_v44  ;;  %3134 = vmatmul.bf16.gmra.mxu1 %v9270_v8  ;;  %v183_v44 = vld [vmem:[#allocation2 + $0x21c] sm:$0x3f] }
 0x1f0   :  { %12961 = vst [vmem:[#allocation111_spill] sm:$0xff] %v9270_v8  ;;  %7929 = vmatmul.msk.bf16.gmra.mxu2 %vm2617_vm0, %v9272_v27  ;;  %v187_v42 = vld [vmem:[#allocation2 + $0x238] sm:$0x3f] }
 0x1f1   :  { %12962 = vst [vmem:[#allocation112_spill] sm:$0xff] %v9272_v27  ;;  %v189_v27 = vld [vmem:[#allocation2 + $0x246] sm:$0x3f] }
 0x1f2   :  { %750 = vst [vmem:[#allocation1 + $0x21] ss:$4 sm:$0xff] %v173_v49 }
 0x1f3   :  { %751 = vst [vmem:[#allocation1 + $0x22] ss:$4 sm:$0xff] %v175_v4  ;;  %v9287_v4 = vpack.c.bf16 %v9220_v9, %v9208_v40  ;;  %v193_v40 = vld [vmem:[#allocation2 + $0x262] sm:$0x3f] }
 0x1f4   :  { %752 = vst [vmem:[#allocation1 + $0x23] ss:$4 sm:$0xff] %v177_v3 }
 0x1f5   :  { %12964 = vst [vmem:[#allocation114_spill] sm:$0xff] %v9282_v28  ;;  %v9289_v45 = vpop.f32.mrf.mxu0  ;;  %v9293_v39 = vpop.f32.mrf.mxu1 }
 0x1f6   :  { %12965 = vst [vmem:[#allocation115_spill] sm:$0xff] %v9287_v4  ;;  %v2898_v16 = vpop.f32.mrf.mxu2 }
 0x1f7   :  { %12966 = vst [vmem:[#allocation116_spill] sm:$0xff] %v9289_v45  ;;  %v9291_v3 = vadd.f32 %v2898_v16, %v2810_v21 }
 0x1f8   :  { %12968 = vst [vmem:[#allocation118_spill] sm:$0xff] %v9293_v39 }
 0x1f9   :  { %12967 = vst [vmem:[#allocation117_spill] sm:$0xff] %v9291_v3  ;;  %v225_v3 = vld [vmem:[#allocation2 + $0x342] sm:$0x3f] }
 0x1fa   :  { %2823 = vmatmul.bf16.vlgmr.msrb.gmra.mxu3 %v9280_v41 }
 0x1fb   :  { %v757_v33 = vld.sshfl [vmem:[#allocation1 + $0x20] sm:$0xff pattern:$0x73625140]  ;;  %v758_v26 = vld.sshfl [vmem:[#allocation1 + $0x28] sm:$0xff pattern:$0x73625140] }
 0x1fc   :  { %v759_v49 = vld.sshfl [vmem:[#allocation1 + $0x30] sm:$0xff pattern:$0x73625140] }
 0x1fd   :  { %764 = vst [vmem:[#allocation1 + $0x20] ss:$4 sm:$0xff] %v179_v17  ;;  %v2725_v9 = vpop.f32.mrf.mxu0 }
 0x1fe   :  { %765 = vst [vmem:[#allocation1 + $0x21] ss:$4 sm:$0xff] %v181_v31 }
 0x1ff   :  { %766 = vst [vmem:[#allocation1 + $0x22] ss:$4 sm:$0xff] %v183_v44  ;;  %v191_v44 = vld [vmem:[#allocation2 + $0x254] sm:$0x3f] }
 0x200   :  { %767 = vst [vmem:[#allocation1 + $0x23] ss:$4 sm:$0xff] %v185_v34 }
 0x207   :  { %v772_v8 = vld.sshfl [vmem:[#allocation1 + $0x20] sm:$0xff pattern:$0x73625140]  ;;  %v773_v41 = vld.sshfl [vmem:[#allocation1 + $0x28] sm:$0xff pattern:$0x73625140] }
 0x208   :  { %v9295_v28 = vpack.c.bf16 %v772_v8, %v757_v33  ;;  %v9297_v17 = vpack.c.bf16 %v773_v41, %v758_v26  ;;  %v774_v34 = vld.sshfl [vmem:[#allocation1 + $0x30] sm:$0xff pattern:$0x73625140]  ;;  %v2814_v8 = vpop.f32.mrf.mxu1  ;;  %v9306_v41 = vpop.f32.mrf.mxu2  ;;  %v195_v33 = vld [vmem:[#allocation2 + $0x270] sm:$0x3f] }
 0x209   :  { %v9299_v31 = vpack.c.bf16 %v774_v34, %v759_v49  ;;  %779 = vst [vmem:[#allocation1 + $0x20] ss:$4 sm:$0xff] %v187_v42  ;;  %v2815_v21 = vadd.f32 %v2814_v8, %v2725_v9  ;;  %v197_v26 = vld [vmem:[#allocation2 + $0x27e] sm:$0x3f]  ;;  %v199_v42 = vld [vmem:[#allocation2 + $0x28c] sm:$0x3f] }
 0x20a   :  { %12969 = vst [vmem:[#allocation119_spill] sm:$0xff] %v9295_v28  ;;  %3050 = vmatmul.bf16.gmra.mxu0 %v9295_v28  ;;  %3139 = vmatmul.bf16.gmra.mxu1 %v9297_v17  ;;  %v201_v28 = vld [vmem:[#allocation2 + $0x29a] sm:$0x3f]  ;;  %v203_v9 = vld [vmem:[#allocation2 + $0x2a8] sm:$0x3f] }
 0x20b   :  { %12970 = vst [vmem:[#allocation120_spill] sm:$0xff] %v9297_v17  ;;  %7930 = vmatmul.msk.bf16.gmra.mxu2 %vm2617_vm0, %v9299_v31  ;;  %2828 = vmatmul.bf16.gmra.mxu3 %v9259_v20  ;;  %v205_v8 = vld [vmem:[#allocation2 + $0x2b6] sm:$0x3f] }
 0x20c   :  { %12971 = vst [vmem:[#allocation121_spill] sm:$0xff] %v9299_v31 }
 0x20d   :  { %780 = vst [vmem:[#allocation1 + $0x21] ss:$4 sm:$0xff] %v189_v27 }
 0x20e   :  { %781 = vst [vmem:[#allocation1 + $0x22] ss:$4 sm:$0xff] %v191_v44  ;;  %v9308_v44 = vpop.f32.mrf.mxu0 }
 0x20f   :  { %782 = vst [vmem:[#allocation1 + $0x23] ss:$4 sm:$0xff] %v193_v40 }
 0x210   :  { %12972 = vst [vmem:[#allocation122_spill] sm:$0xff] %v9306_v41  ;;  %v2903_v27 = vpop.f32.mrf.mxu2  ;;  %v9312_v31 = vpop.f32.mrf.mxu1 }
 0x211   :  { %12973 = vst [vmem:[#allocation123_spill] sm:$0xff] %v9308_v44  ;;  %v9310_v40 = vadd.f32 %v2903_v27, %v2815_v21  ;;  %v211_v27 = vld [vmem:[#allocation2 + $0x2e0] sm:$0x3f] }
 0x212   :  { %12975 = vst [vmem:[#allocation125_spill] sm:$0xff] %v9312_v31  ;;  %v221_v31 = vld [vmem:[#allocation2 + $0x326] sm:$0x3f] }
 0x213   :  { %12974 = vst [vmem:[#allocation124_spill] sm:$0xff] %v9310_v40 }
 0x216   :  { %v787_v49 = vld.sshfl [vmem:[#allocation1 + $0x20] sm:$0xff pattern:$0x73625140]  ;;  %v788_v16 = vld.sshfl [vmem:[#allocation1 + $0x28] sm:$0xff pattern:$0x73625140] }
 0x217   :  { %v789_v34 = vld.sshfl [vmem:[#allocation1 + $0x30] sm:$0xff pattern:$0x73625140] }
 0x218   :  { %794 = vst [vmem:[#allocation1 + $0x20] ss:$4 sm:$0xff] %v195_v33  ;;  %v2819_v21 = vpop.f32.mrf.mxu1 }
 0x219   :  { %795 = vst [vmem:[#allocation1 + $0x21] ss:$4 sm:$0xff] %v197_v26  ;;  %v207_v26 = vld [vmem:[#allocation2 + $0x2c4] sm:$0x3f] }
 0x21a   :  { %796 = vst [vmem:[#allocation1 + $0x22] ss:$4 sm:$0xff] %v199_v42  ;;  %v209_v42 = vld [vmem:[#allocation2 + $0x2d2] sm:$0x3f] }
 0x21b   :  { %797 = vst [vmem:[#allocation1 + $0x23] ss:$4 sm:$0xff] %v201_v28  ;;  %2833 = vmatmul.bf16.gmra.mxu3 %v9287_v4  ;;  %v217_v4 = vld [vmem:[#allocation2 + $0x30a] sm:$0x3f] }
 0x222   :  { %v802_v17 = vld.sshfl [vmem:[#allocation1 + $0x20] sm:$0xff pattern:$0x73625140]  ;;  %v803_v20 = vld.sshfl [vmem:[#allocation1 + $0x28] sm:$0xff pattern:$0x73625140] }
 0x223   :  { %v9315_v41 = vpack.c.bf16 %v802_v17, %v787_v49  ;;  %v9317_v39 = vpack.c.bf16 %v803_v20, %v788_v16  ;;  %v804_v33 = vld.sshfl [vmem:[#allocation1 + $0x30] sm:$0xff pattern:$0x73625140]  ;;  %v2730_v17 = vpop.f32.mrf.mxu0  ;;  %v1099_v49 = vld.sshfl [vmem:[#allocation1 + $0x8] sm:$0xff pattern:$0x73625140] }
 0x224   :  { %v9319_v28 = vpack.c.bf16 %v804_v33, %v789_v34  ;;  %809 = vst [vmem:[#allocation1 + $0x20] ss:$4 sm:$0xff] %v203_v9  ;;  %v2820_v20 = vadd.f32 %v2819_v21, %v2730_v17  ;;  %v9326_v16 = vpack.c.bf16 %v1099_v49, %v9243_v12  ;;  %v9328_v34 = vpop.f32.mrf.mxu2  ;;  %v213_v9 = vld [vmem:[#allocation2 + $0x2ee] sm:$0x3f]  ;;  %v7624_v49 = vld [vmem:[#allocation5 + $0x3c0] sm:$0xf] }
 0x225   :  { %12976 = vst [vmem:[#allocation126_spill] sm:$0xff] %v9315_v41  ;;  %3055 = vmatmul.bf16.gmra.mxu0 %v9315_v41  ;;  %3144 = vmatmul.bf16.gmra.mxu1 %v9317_v39 }
 0x226   :  { %12977 = vst [vmem:[#allocation127_spill] sm:$0xff] %v9317_v39  ;;  %7931 = vmatmul.msk.bf16.gmra.mxu2 %vm2617_vm0, %v9319_v28  ;;  %v215_v39 = vld [vmem:[#allocation2 + $0x2fc] sm:$0x3f] }
 0x227   :  { %12978 = vst [vmem:[#allocation128_spill] sm:$0xff] %v9319_v28  ;;  %v8464_v28 = vld [vmem:[#allocation5 + $0x3cc] sm:$0xf0] }
 0x228   :  { %810 = vst [vmem:[#allocation1 + $0x21] ss:$4 sm:$0xff] %v205_v8  ;;  %v7625_v45 = vor.u32 %v8464_v28, %v7624_v49 }
 0x229   :  { %811 = vst [vmem:[#allocation1 + $0x22] ss:$4 sm:$0xff] %v207_v26  ;;  %v7640_v26 = vld [vmem:[#allocation5 + $0x3e0] sm:$0xf] }
 0x22a   :  { %812 = vst [vmem:[#allocation1 + $0x23] ss:$4 sm:$0xff] %v209_v42  ;;  %v8468_v42 = vld [vmem:[#allocation5 + $0x3ec] sm:$0xf0] }
 0x22b   :  { %12979 = vst [vmem:[#allocation129_spill] sm:$0xff] %v9326_v16  ;;  %2838 = vmatmul.bf16.gmra.mxu3 %v9326_v16  ;;  %v7641_v12 = vor.u32 %v8468_v42, %v7640_v26  ;;  %v8456_v26 = vld [vmem:[#allocation5 + $0x38c] sm:$0xf0]  ;;  %v235_v42 = vld [vmem:[#allocation2 + $0x388] sm:$0x3f] }
 0x22c   :  { %12980 = vst [vmem:[#allocation130_spill] sm:$0xff] %v9328_v34  ;;  %v2908_v17 = vpop.f32.mrf.mxu2  ;;  %v219_v34 = vld [vmem:[#allocation2 + $0x318] sm:$0x3f] }
 0x22d   :  { %v9331_v21 = vadd.f32 %v2908_v17, %v2820_v20  ;;  %2933 = vmatpush.bf16.msrb.mxu3 %v7641_v12  ;;  %v9341_v20 = vpack.c.bf16 %v9148_v7, %v9136_v10  ;;  %v233_v7 = vld [vmem:[#allocation2 + $0x37a] sm:$0x3f] }
 0x22e   :  { %v237_v17 = vld [vmem:[#allocation2 + $0x396] sm:$0x3f] }
 0x22f   :  { %12981 = vst [vmem:[#allocation131_spill] sm:$0xff] %v9331_v21 }
 0x230   :  { %12985 = vst [vmem:[#allocation135_spill] sm:$0xff] %v9341_v20 }
 0x231   :  { %v817_v33 = vld.sshfl [vmem:[#allocation1 + $0x20] sm:$0xff pattern:$0x73625140]  ;;  %v818_v41 = vld.sshfl [vmem:[#allocation1 + $0x28] sm:$0xff pattern:$0x73625140]  ;;  %2934 = vmatpush.bf16.msrb.mxu3 %v7625_v45 }
 0x232   :  { %v819_v8 = vld.sshfl [vmem:[#allocation1 + $0x30] sm:$0xff pattern:$0x73625140]  ;;  %v8460_v45 = vld [vmem:[#allocation5 + $0x3ac] sm:$0xf0] }
 0x233   :  { %824 = vst [vmem:[#allocation1 + $0x20] ss:$4 sm:$0xff] %v211_v27 }
 0x234   :  { %825 = vst [vmem:[#allocation1 + $0x21] ss:$4 sm:$0xff] %v213_v9 }
 0x235   :  { %826 = vst [vmem:[#allocation1 + $0x22] ss:$4 sm:$0xff] %v215_v39 }
 0x236   :  { %827 = vst [vmem:[#allocation1 + $0x23] ss:$4 sm:$0xff] %v217_v4  ;;  %v223_v4 = vld [vmem:[#allocation2 + $0x334] sm:$0x3f] }
 0x23b   :  { %2912 = vmatmul.bf16.vlgmr.msra.gmra.mxu3 %v9341_v20 }
 0x23d   :  { %v832_v44 = vld.sshfl [vmem:[#allocation1 + $0x20] sm:$0xff pattern:$0x73625140]  ;;  %v833_v40 = vld.sshfl [vmem:[#allocation1 + $0x28] sm:$0xff pattern:$0x73625140] }
 0x23e   :  { %v9333_v27 = vpack.c.bf16 %v832_v44, %v817_v33  ;;  %v9335_v16 = vpack.c.bf16 %v833_v40, %v818_v41  ;;  %v834_v39 = vld.sshfl [vmem:[#allocation1 + $0x30] sm:$0xff pattern:$0x73625140]  ;;  %v227_v41 = vld [vmem:[#allocation2 + $0x350] sm:$0x3f] }
 0x23f   :  { %v9337_v9 = vpack.c.bf16 %v834_v39, %v819_v8  ;;  %839 = vst [vmem:[#allocation1 + $0x20] ss:$4 sm:$0xff] %v219_v34  ;;  %v229_v44 = vld [vmem:[#allocation2 + $0x35e] sm:$0x3f]  ;;  %v231_v34 = vld [vmem:[#allocation2 + $0x36c] sm:$0x3f] }
 0x240   :  { %12982 = vst [vmem:[#allocation132_spill] sm:$0xff] %v9333_v27  ;;  %3060 = vmatmul.bf16.gmra.mxu0 %v9333_v27  ;;  %3149 = vmatmul.bf16.gmra.mxu1 %v9335_v16  ;;  %v7608_v33 = vld [vmem:[#allocation5 + $0x3a0] sm:$0xf] }
 0x241   :  { %12983 = vst [vmem:[#allocation133_spill] sm:$0xff] %v9335_v16  ;;  %7932 = vmatmul.msk.bf16.gmra.mxu2 %vm2617_vm0, %v9337_v9  ;;  %v7592_v8 = vld [vmem:[#allocation5 + $0x380] sm:$0xf] }
 0x242   :  { %12984 = vst [vmem:[#allocation134_spill] sm:$0xff] %v9337_v9  ;;  %v7593_v39 = vor.u32 %v8456_v26, %v7592_v8  ;;  %v247_v8 = vld [vmem:[#allocation2 + $0x3dc] sm:$0x3f] }
 0x243   :  { %840 = vst [vmem:[#allocation1 + $0x21] ss:$4 sm:$0xff] %v221_v31  ;;  %v9350_v31 = vpack.c.bf16 %v9187_v23, %v9172_v48  ;;  %v239_v48 = vld [vmem:[#allocation2 + $0x3a4] sm:$0x3f]  ;;  %v7560_v27 = vld [vmem:[#allocation5 + $0x340] sm:$0xf] }
 0x244   :  { %841 = vst [vmem:[#allocation1 + $0x22] ss:$4 sm:$0xff] %v223_v4 }
 0x245   :  { %842 = vst [vmem:[#allocation1 + $0x23] ss:$4 sm:$0xff] %v225_v3  ;;  %v7609_v3 = vor.u32 %v8460_v45, %v7608_v33  ;;  %v245_v33 = vld [vmem:[#allocation2 + $0x3ce] sm:$0x3f] }
 0x246   :  { %12986 = vst [vmem:[#allocation136_spill] sm:$0xff] %v9350_v31 }
 0x247   :  { %2935 = vmatpush.bf16.msrb.mxu3 %v7609_v3 }
 0x24b   :  { %2917 = vmatmul.bf16.gmra.mxu3 %v9350_v31 }
 0x24c   :  { %v847_v40 = vld.sshfl [vmem:[#allocation1 + $0x20] sm:$0xff pattern:$0x73625140]  ;;  %v848_v28 = vld.sshfl [vmem:[#allocation1 + $0x28] sm:$0xff pattern:$0x73625140]  ;;  %2936 = vmatpush.bf16.msrb.mxu3 %v7593_v39  ;;  %v9377_v39 = vpack.c.bf16 %v9222_v2, %v9210_v29 }
 0x24d   :  { %v849_v10 = vld.sshfl [vmem:[#allocation1 + $0x30] sm:$0xff pattern:$0x73625140] }
 0x24e   :  { %854 = vst [vmem:[#allocation1 + $0x20] ss:$4 sm:$0xff] %v227_v41 }
 0x24f   :  { %855 = vst [vmem:[#allocation1 + $0x21] ss:$4 sm:$0xff] %v229_v44 }
 0x250   :  { %856 = vst [vmem:[#allocation1 + $0x22] ss:$4 sm:$0xff] %v231_v34  ;;  %v241_v34 = vld [vmem:[#allocation2 + $0x3b2] sm:$0x3f] }
 0x251   :  { %857 = vst [vmem:[#allocation1 + $0x23] ss:$4 sm:$0xff] %v233_v7  ;;  %v9363_v7 = vpop.f32.mrf.mxu3 }
 0x252   :  { %12994 = vst [vmem:[#allocation144_spill] sm:$0xff] %v9377_v39 }
 0x258   :  { %v862_v12 = vld.sshfl [vmem:[#allocation1 + $0x20] sm:$0xff pattern:$0x73625140]  ;;  %v863_v49 = vld.sshfl [vmem:[#allocation1 + $0x28] sm:$0xff pattern:$0x73625140] }
 0x259   :  { %v9353_v4 = vpack.c.bf16 %v862_v12, %v847_v40  ;;  %v9355_v41 = vpack.c.bf16 %v863_v49, %v848_v28  ;;  %v864_v44 = vld.sshfl [vmem:[#allocation1 + $0x30] sm:$0xff pattern:$0x73625140]  ;;  %v9365_v40 = vpop.f32.mrf.mxu0  ;;  %v9367_v28 = vpop.f32.mrf.mxu1 }
 0x25a   :  { %v9357_v23 = vpack.c.bf16 %v864_v44, %v849_v10  ;;  %869 = vst [vmem:[#allocation1 + $0x20] ss:$4 sm:$0xff] %v235_v42  ;;  %v243_v10 = vld [vmem:[#allocation2 + $0x3c0] sm:$0x3f]  ;;  %v9369_v42 = vpop.f32.mrf.mxu3  ;;  %v9371_v12 = vpop.f32.mrf.mxu2 }
 0x25b   :  { %12987 = vst [vmem:[#allocation137_spill] sm:$0xff] %v9353_v4  ;;  %3065 = vmatmul.bf16.gmra.mxu0 %v9353_v4  ;;  %3154 = vmatmul.bf16.gmra.mxu1 %v9355_v41 }
 0x25c   :  { %12988 = vst [vmem:[#allocation138_spill] sm:$0xff] %v9355_v41  ;;  %7933 = vmatmul.msk.bf16.gmra.mxu2 %vm2617_vm0, %v9357_v23  ;;  %2922 = vmatmul.bf16.gmra.mxu3 %v9377_v39  ;;  %v257_v39 = vld [vmem:[#allocation2 + $0x422] sm:$0x3f] }
 0x25d   :  { %12989 = vst [vmem:[#allocation139_spill] sm:$0xff] %v9357_v23 }
 0x25e   :  { %870 = vst [vmem:[#allocation1 + $0x21] ss:$4 sm:$0xff] %v237_v17  ;;  %v249_v17 = vld [vmem:[#allocation2 + $0x3ea] sm:$0x3f] }
 0x25f   :  { %871 = vst [vmem:[#allocation1 + $0x22] ss:$4 sm:$0xff] %v239_v48  ;;  %v7576_v48 = vld [vmem:[#allocation5 + $0x360] sm:$0xf] }
 0x260   :  { %872 = vst [vmem:[#allocation1 + $0x23] ss:$4 sm:$0xff] %v241_v34  ;;  %v8452_v34 = vld [vmem:[#allocation5 + $0x36c] sm:$0xf0] }
 0x261   :  { %12990 = vst [vmem:[#allocation140_spill] sm:$0xff] %v9365_v40  ;;  %v9373_v49 = vpop.f32.mrf.mxu0  ;;  %v9379_v44 = vpop.f32.mrf.mxu1  ;;  %v7577_v4 = vor.u32 %v8452_v34, %v7576_v48  ;;  %v269_v40 = vld [vmem:[#allocation2 + $0x476] sm:$0x3f] }
 0x262   :  { %12991 = vst [vmem:[#allocation141_spill] sm:$0xff] %v9367_v28  ;;  %v9382_v41 = vpop.f32.mrf.mxu3 }
 0x263   :  { %12992 = vst [vmem:[#allocation142_spill] sm:$0xff] %v9369_v42  ;;  %2937 = vmatpush.bf16.msrb.mxu3 %v7577_v4  ;;  %v255_v42 = vld [vmem:[#allocation2 + $0x414] sm:$0x3f]  ;;  %v9392_v4 = vpop.f32.mrf.mxu2 }
 0x264   :  { %12993 = vst [vmem:[#allocation143_spill] sm:$0xff] %v9371_v12  ;;  %v7528_v12 = vld [vmem:[#allocation5 + $0x300] sm:$0xf] }
 0x267   :  { %v877_v45 = vld.sshfl [vmem:[#allocation1 + $0x20] sm:$0xff pattern:$0x73625140]  ;;  %v878_v3 = vld.sshfl [vmem:[#allocation1 + $0x28] sm:$0xff pattern:$0x73625140] }
 0x268   :  { %v879_v26 = vld.sshfl [vmem:[#allocation1 + $0x30] sm:$0xff pattern:$0x73625140] }
 0x269   :  { %884 = vst [vmem:[#allocation1 + $0x20] ss:$4 sm:$0xff] %v243_v10  ;;  %v8448_v10 = vld [vmem:[#allocation5 + $0x34c] sm:$0xf0] }
 0x26a   :  { %885 = vst [vmem:[#allocation1 + $0x21] ss:$4 sm:$0xff] %v245_v33  ;;  %v251_v33 = vld [vmem:[#allocation2 + $0x3f8] sm:$0x3f]  ;;  %v7561_v9 = vor.u32 %v8448_v10, %v7560_v27  ;;  %v9396_v27 = vpop.f32.mrf.mxu0 }
 0x26b   :  { %886 = vst [vmem:[#allocation1 + $0x22] ss:$4 sm:$0xff] %v247_v8  ;;  %v253_v8 = vld [vmem:[#allocation2 + $0x406] sm:$0x3f]  ;;  %v9402_v10 = vpop.f32.mrf.mxu2 }
 0x26c   :  { %887 = vst [vmem:[#allocation1 + $0x23] ss:$4 sm:$0xff] %v249_v17  ;;  %2938 = vmatpush.bf16.msrb.mxu3 %v7561_v9 }
 0x273   :  { %v892_v23 = vld.sshfl [vmem:[#allocation1 + $0x20] sm:$0xff pattern:$0x73625140]  ;;  %v893_v17 = vld.sshfl [vmem:[#allocation1 + $0x28] sm:$0xff pattern:$0x73625140]  ;;  %v9414_v28 = vpop.f32.mrf.mxu2 }
 0x274   :  { %v9384_v16 = vpack.c.bf16 %v892_v23, %v877_v45  ;;  %v9386_v2 = vpack.c.bf16 %v893_v17, %v878_v3  ;;  %v894_v29 = vld.sshfl [vmem:[#allocation1 + $0x30] sm:$0xff pattern:$0x73625140]  ;;  %v9398_v23 = vpop.f32.mrf.mxu1  ;;  %v9400_v45 = vpop.f32.mrf.mxu3  ;;  %v259_v3 = vld [vmem:[#allocation2 + $0x430] sm:$0x3f]  ;;  %13002 = vst [vmem:[#allocation152_spill] sm:$0xff] %v9414_v28 }
 0x275   :  { %v9388_v31 = vpack.c.bf16 %v894_v29, %v879_v26  ;;  %899 = vst [vmem:[#allocation1 + $0x20] ss:$4 sm:$0xff] %v251_v33  ;;  %v261_v26 = vld [vmem:[#allocation2 + $0x43e] sm:$0x3f]  ;;  %v263_v33 = vld [vmem:[#allocation2 + $0x44c] sm:$0x3f]  ;;  %v9404_v29 = vpop.f32.mrf.mxu0 }
 0x276   :  { %12995 = vst [vmem:[#allocation145_spill] sm:$0xff] %v9384_v16  ;;  %3070 = vmatmul.bf16.gmra.mxu0 %v9384_v16  ;;  %3159 = vmatmul.bf16.gmra.mxu1 %v9386_v2  ;;  %v265_v17 = vld [vmem:[#allocation2 + $0x45a] sm:$0x3f]  ;;  %v8394_v28 = vld [vmem:[#allocation5 + $0x1a4] sm:$0xf] }
 0x277   :  { %12996 = vst [vmem:[#allocation146_spill] sm:$0xff] %v9386_v2  ;;  %7934 = vmatmul.msk.bf16.gmra.mxu2 %vm2617_vm0, %v9388_v31  ;;  %v8444_v2 = vld [vmem:[#allocation5 + $0x32c] sm:$0xf0] }
 0x278   :  { %12997 = vst [vmem:[#allocation147_spill] sm:$0xff] %v9388_v31  ;;  %v7544_v31 = vld [vmem:[#allocation5 + $0x320] sm:$0xf] }
 0x279   :  { %900 = vst [vmem:[#allocation1 + $0x21] ss:$4 sm:$0xff] %v253_v8 }
 0x27a   :  { %901 = vst [vmem:[#allocation1 + $0x22] ss:$4 sm:$0xff] %v255_v42  ;;  %v1100_v42 = vld.sshfl [vmem:[#allocation1 + $0x10] sm:$0xff pattern:$0x73625140] }
 0x27b   :  { %902 = vst [vmem:[#allocation1 + $0x23] ss:$4 sm:$0xff] %v257_v39  ;;  %v9409_v39 = vpack.c.bf16 %v1100_v42, %v9249_v60 }
 0x27c   :  { %12998 = vst [vmem:[#allocation148_spill] sm:$0xff] %v9400_v45  ;;  %v9406_v9 = vpop.f32.mrf.mxu1  ;;  %v9411_v16 = vpop.f32.mrf.mxu3  ;;  %v7545_v45 = vor.u32 %v8444_v2, %v7544_v31  ;;  %v273_v2 = vld [vmem:[#allocation2 + $0x492] sm:$0x3f] }
 0x27d   :  { %12999 = vst [vmem:[#allocation149_spill] sm:$0xff] %v9404_v29  ;;  %2927 = vmatmul.bf16.gmra.mxu3 %v9409_v39  ;;  %v9420_v18 = vpop.f32.mrf.mxu0  ;;  %v7338_v29 = vld [vmem:[#allocation5 + $0x190] sm:$0xf0] }
 0x27e   :  { %13000 = vst [vmem:[#allocation150_spill] sm:$0xff] %v9406_v9  ;;  %2939 = vmatpush.bf16.msrb.mxu3 %v7545_v45  ;;  %v9432_v45 = vpop.f32.mrf.mxu2 }
 0x27f   :  { %13001 = vst [vmem:[#allocation151_spill] sm:$0xff] %v9409_v39 }
 0x280   :  { %13005 = vst [vmem:[#allocation155_spill] sm:$0xff] %v9420_v18 }
 0x281   :  { %13009 = vst [vmem:[#allocation159_spill] sm:$0xff] %v9432_v45  ;;  %v8462_v45 = vld [vmem:[#allocation5 + $0x3c4] sm:$0xf] }
 0x282   :  { %v907_v48 = vld.sshfl [vmem:[#allocation1 + $0x20] sm:$0xff pattern:$0x73625140]  ;;  %v908_v34 = vld.sshfl [vmem:[#allocation1 + $0x28] sm:$0xff pattern:$0x73625140] }
 0x283   :  { %v909_v8 = vld.sshfl [vmem:[#allocation1 + $0x30] sm:$0xff pattern:$0x73625140] }
 0x284   :  { %914 = vst [vmem:[#allocation1 + $0x20] ss:$4 sm:$0xff] %v259_v3  ;;  %v8440_v3 = vld [vmem:[#allocation5 + $0x30c] sm:$0xf0]  ;;  %v9424_v31 = vpop.f32.mrf.mxu1 }
 0x285   :  { %915 = vst [vmem:[#allocation1 + $0x21] ss:$4 sm:$0xff] %v261_v26  ;;  %v267_v26 = vld [vmem:[#allocation2 + $0x468] sm:$0x3f]  ;;  %v7529_v21 = vor.u32 %v8440_v3, %v7528_v12  ;;  %v9430_v12 = vpop.f32.mrf.mxu3 }
 0x286   :  { %916 = vst [vmem:[#allocation1 + $0x22] ss:$4 sm:$0xff] %v263_v33 }
 0x287   :  { %917 = vst [vmem:[#allocation1 + $0x23] ss:$4 sm:$0xff] %v265_v17  ;;  %2940 = vmatpush.bf16.msrb.mxu3 %v7529_v21  ;;  %v9440_v21 = vpop.f32.mrf.mxu2 }
 0x288   :  { %13007 = vst [vmem:[#allocation157_spill] sm:$0xff] %v9424_v31  ;;  %v7610_v31 = vld [vmem:[#allocation5 + $0x3b0] sm:$0xf0] }
 0x289   :  { %13008 = vst [vmem:[#allocation158_spill] sm:$0xff] %v9430_v12 }
 0x28a   :  { %13012 = vst [vmem:[#allocation162_spill] sm:$0xff] %v9440_v21  ;;  %v289_v21 = vld [vmem:[#allocation2 + $0x502] sm:$0x3f] }
 0x28c   :  { %v9436_v3 = vpop.f32.mrf.mxu1 }
 0x28d   :  { %13011 = vst [vmem:[#allocation161_spill] sm:$0xff] %v9436_v3 }
 0x28e   :  { %v922_v33 = vld.sshfl [vmem:[#allocation1 + $0x20] sm:$0xff pattern:$0x73625140]  ;;  %v923_v17 = vld.sshfl [vmem:[#allocation1 + $0x28] sm:$0xff pattern:$0x73625140] }
 0x28f   :  { %v9416_v20 = vpack.c.bf16 %v922_v33, %v907_v48  ;;  %v9418_v60 = vpack.c.bf16 %v923_v17, %v908_v34  ;;  %v924_v42 = vld.sshfl [vmem:[#allocation1 + $0x30] sm:$0xff pattern:$0x73625140]  ;;  %v9434_v48 = vpop.f32.mrf.mxu0  ;;  %v275_v34 = vld [vmem:[#allocation2 + $0x4a0] sm:$0x3f] }
 0x290   :  { %v9422_v39 = vpack.c.bf16 %v924_v42, %v909_v8  ;;  %929 = vst [vmem:[#allocation1 + $0x20] ss:$4 sm:$0xff] %v267_v26  ;;  %v277_v8 = vld [vmem:[#allocation2 + $0x4ae] sm:$0x3f]  ;;  %v279_v17 = vld [vmem:[#allocation2 + $0x4bc] sm:$0x3f] }
 0x291   :  { %13003 = vst [vmem:[#allocation153_spill] sm:$0xff] %v9416_v20  ;;  %3075 = vmatmul.bf16.gmra.mxu0 %v9416_v20  ;;  %3164 = vmatmul.bf16.gmra.mxu1 %v9418_v60  ;;  %v281_v42 = vld [vmem:[#allocation2 + $0x4ca] sm:$0x3f]  ;;  %v8370_v20 = vld [vmem:[#allocation5 + $0xe4] sm:$0xf] }
 0x292   :  { %13004 = vst [vmem:[#allocation154_spill] sm:$0xff] %v9418_v60  ;;  %7935 = vmatmul.msk.bf16.gmra.mxu2 %vm2617_vm0, %v9422_v39 }
 0x293   :  { %13006 = vst [vmem:[#allocation156_spill] sm:$0xff] %v9422_v39  ;;  %v7258_v39 = vld [vmem:[#allocation5 + $0xf0] sm:$0xf0] }
 0x294   :  { %930 = vst [vmem:[#allocation1 + $0x21] ss:$4 sm:$0xff] %v269_v40  ;;  %v7261_v12 = vor.u32 %v8370_v20, %v7258_v39  ;;  %v9449_v50 = vpop.f32.mrf.mxu1  ;;  %v9463_v20 = vpop.f32.mrf.mxu2 }
 0x295   :  { %931 = vst [vmem:[#allocation1 + $0x22] ss:$4 sm:$0xff] %v271_v35  ;;  %v9438_v35 = vpop.f32.mrf.mxu3 }
 0x296   :  { %932 = vst [vmem:[#allocation1 + $0x23] ss:$4 sm:$0xff] %v273_v2  ;;  %v9444_v2 = vpack.c.bf16 %v8940_v30, %v8935_v22  ;;  %3289 = vmatpush.bf16.msra.mxu3 %v7261_v12  ;;  %v287_v30 = vld [vmem:[#allocation2 + $0x4f4] sm:$0x3f] }
 0x297   :  { %13010 = vst [vmem:[#allocation160_spill] sm:$0xff] %v9434_v48  ;;  %v9446_v60 = vpop.f32.mrf.mxu0  ;;  %v7498_v48 = vld [vmem:[#allocation5 + $0x2d0] sm:$0xf0] }
 0x298   :  { %13013 = vst [vmem:[#allocation163_spill] sm:$0xff] %v9444_v2  ;;  %2941 = vmatmul.bf16.vlgmr.msrb.gmra.mxu3 %v9444_v2 }
 0x299   :  { %13014 = vst [vmem:[#allocation164_spill] sm:$0xff] %v9446_v60  ;;  %v331_v60 = vld [vmem:[#allocation2 + $0x628] sm:$0x3f] }
 0x29a   :  { %13015 = vst [vmem:[#allocation165_spill] sm:$0xff] %v9449_v50 }
 0x29b   :  { %13019 = vst [vmem:[#allocation169_spill] sm:$0xff] %v9463_v20 }
 0x29c   :  { %v9467_v12 = vpop.f32.mrf.mxu1 }
 0x29d   :  { %v937_v26 = vld.sshfl [vmem:[#allocation1 + $0x20] sm:$0xff pattern:$0x73625140]  ;;  %v938_v33 = vld.sshfl [vmem:[#allocation1 + $0x28] sm:$0xff pattern:$0x73625140]  ;;  %v9457_v0 = vpop.f32.mrf.mxu3 }
 0x29e   :  { %v939_v40 = vld.sshfl [vmem:[#allocation1 + $0x30] sm:$0xff pattern:$0x73625140]  ;;  %13021 = vst [vmem:[#allocation171_spill] sm:$0xff] %v9467_v12 }
 0x29f   :  { %944 = vst [vmem:[#allocation1 + $0x20] ss:$4 sm:$0xff] %v275_v34  ;;  %v283_v34 = vld [vmem:[#allocation2 + $0x4d8] sm:$0x3f]  ;;  %v9465_v39 = vpop.f32.mrf.mxu0  ;;  %v299_v12 = vld [vmem:[#allocation2 + $0x548] sm:$0x3f] }
 0x2a0   :  { %945 = vst [vmem:[#allocation1 + $0x21] ss:$4 sm:$0xff] %v277_v8  ;;  %v285_v8 = vld [vmem:[#allocation2 + $0x4e6] sm:$0x3f] }
 0x2a1   :  { %946 = vst [vmem:[#allocation1 + $0x22] ss:$4 sm:$0xff] %v279_v17 }
 0x2a2   :  { %947 = vst [vmem:[#allocation1 + $0x23] ss:$4 sm:$0xff] %v281_v42 }
 0x2a3   :  { %13020 = vst [vmem:[#allocation170_spill] sm:$0xff] %v9465_v39  ;;  %v301_v39 = vld [vmem:[#allocation2 + $0x556] sm:$0x3f] }
 0x2a9   :  { %v952_v17 = vld.sshfl [vmem:[#allocation1 + $0x20] sm:$0xff pattern:$0x73625140]  ;;  %v953_v42 = vld.sshfl [vmem:[#allocation1 + $0x28] sm:$0xff pattern:$0x73625140] }
 0x2aa   :  { %v9451_v61 = vpack.c.bf16 %v952_v17, %v937_v26  ;;  %v9453_v1 = vpack.c.bf16 %v953_v42, %v938_v33  ;;  %v954_v22 = vld.sshfl [vmem:[#allocation1 + $0x30] sm:$0xff pattern:$0x73625140]  ;;  %v291_v26 = vld [vmem:[#allocation2 + $0x510] sm:$0x3f]  ;;  %v9469_v17 = vpop.f32.mrf.mxu3 }
 0x2ab   :  { %v9455_v63 = vpack.c.bf16 %v954_v22, %v939_v40  ;;  %959 = vst [vmem:[#allocation1 + $0x20] ss:$4 sm:$0xff] %v283_v34  ;;  %v293_v33 = vld [vmem:[#allocation2 + $0x51e] sm:$0x3f]  ;;  %v295_v42 = vld [vmem:[#allocation2 + $0x52c] sm:$0x3f] }
 0x2ac   :  { %13016 = vst [vmem:[#allocation166_spill] sm:$0xff] %v9451_v61  ;;  %3080 = vmatmul.bf16.gmra.mxu0 %v9451_v61  ;;  %3169 = vmatmul.bf16.gmra.mxu1 %v9453_v1  ;;  %v9471_v61 = vpop.f32.mrf.mxu2 }
 0x2ad   :  { %13017 = vst [vmem:[#allocation167_spill] sm:$0xff] %v9453_v1  ;;  %7936 = vmatmul.msk.bf16.gmra.mxu2 %vm2617_vm0, %v9455_v63 }
 0x2ae   :  { %13018 = vst [vmem:[#allocation168_spill] sm:$0xff] %v9455_v63  ;;  %v9479_v63 = vpack.c.bf16 %v8958_v47, %v8954_v25  ;;  %v305_v25 = vld [vmem:[#allocation2 + $0x572] sm:$0x3f] }
 0x2af   :  { %960 = vst [vmem:[#allocation1 + $0x21] ss:$4 sm:$0xff] %v285_v8  ;;  %v297_v8 = vld [vmem:[#allocation2 + $0x53a] sm:$0x3f] }
 0x2b0   :  { %961 = vst [vmem:[#allocation1 + $0x22] ss:$4 sm:$0xff] %v287_v30  ;;  %v9475_v30 = vpop.f32.mrf.mxu1  ;;  %2946 = vmatmul.bf16.gmra.mxu3 %v9479_v63 }
 0x2b1   :  { %962 = vst [vmem:[#allocation1 + $0x23] ss:$4 sm:$0xff] %v289_v21  ;;  %v9473_v21 = vpop.f32.mrf.mxu0 }
 0x2b2   :  { %13022 = vst [vmem:[#allocation172_spill] sm:$0xff] %v9471_v61  ;;  %v9482_v1 = vpop.f32.mrf.mxu3 }
 0x2b3   :  { %13023 = vst [vmem:[#allocation173_spill] sm:$0xff] %v9473_v21 }
 0x2b4   :  { %13024 = vst [vmem:[#allocation174_spill] sm:$0xff] %v9475_v30  ;;  %v9488_v61 = vpop.f32.mrf.mxu2  ;;  %v303_v30 = vld [vmem:[#allocation2 + $0x564] sm:$0x3f] }
 0x2b5   :  { %13025 = vst [vmem:[#allocation175_spill] sm:$0xff] %v9479_v63 }
 0x2b6   :  { %13026 = vst [vmem:[#allocation176_spill] sm:$0xff] %v9482_v1 }
 0x2b7   :  { %13029 = vst [vmem:[#allocation179_spill] sm:$0xff] %v9488_v61 }
 0x2b8   :  { %v967_v40 = vld.sshfl [vmem:[#allocation1 + $0x20] sm:$0xff pattern:$0x73625140]  ;;  %v968_v34 = vld.sshfl [vmem:[#allocation1 + $0x28] sm:$0xff pattern:$0x73625140] }
 0x2b9   :  { %v969_v22 = vld.sshfl [vmem:[#allocation1 + $0x30] sm:$0xff pattern:$0x73625140]  ;;  %v9494_v47 = vpop.f32.mrf.mxu0 }
 0x2ba   :  { %974 = vst [vmem:[#allocation1 + $0x20] ss:$4 sm:$0xff] %v291_v26 }
 0x2bb   :  { %975 = vst [vmem:[#allocation1 + $0x21] ss:$4 sm:$0xff] %v293_v33 }
 0x2bc   :  { %976 = vst [vmem:[#allocation1 + $0x22] ss:$4 sm:$0xff] %v295_v42 }
 0x2bd   :  { %977 = vst [vmem:[#allocation1 + $0x23] ss:$4 sm:$0xff] %v297_v8 }
 0x2be   :  { %13031 = vst [vmem:[#allocation181_spill] sm:$0xff] %v9494_v47 }
 0x2c1   :  { %v9504_v1 = vpop.f32.mrf.mxu0 }
 0x2c2   :  { %13034 = vst [vmem:[#allocation184_spill] sm:$0xff] %v9504_v1 }
 0x2c4   :  { %v982_v26 = vld.sshfl [vmem:[#allocation1 + $0x20] sm:$0xff pattern:$0x73625140]  ;;  %v983_v33 = vld.sshfl [vmem:[#allocation1 + $0x28] sm:$0xff pattern:$0x73625140] }
 0x2c5   :  { %v9484_v20 = vpack.c.bf16 %v982_v26, %v967_v40  ;;  %v9486_v42 = vpack.c.bf16 %v983_v33, %v968_v34  ;;  %v984_v8 = vld.sshfl [vmem:[#allocation1 + $0x30] sm:$0xff pattern:$0x73625140]  ;;  %v9498_v40 = vpop.f32.mrf.mxu1  ;;  %v9500_v34 = vpop.f32.mrf.mxu3 }
 0x2c6   :  { %v9490_v21 = vpack.c.bf16 %v984_v8, %v969_v22  ;;  %989 = vst [vmem:[#allocation1 + $0x20] ss:$4 sm:$0xff] %v299_v12  ;;  %v307_v22 = vld [vmem:[#allocation2 + $0x580] sm:$0x3f]  ;;  %v309_v26 = vld [vmem:[#allocation2 + $0x58e] sm:$0x3f]  ;;  %v9502_v33 = vpop.f32.mrf.mxu2 }
 0x2c7   :  { %13027 = vst [vmem:[#allocation177_spill] sm:$0xff] %v9484_v20  ;;  %3085 = vmatmul.bf16.gmra.mxu0 %v9484_v20  ;;  %3174 = vmatmul.bf16.gmra.mxu1 %v9486_v42  ;;  %v311_v20 = vld [vmem:[#allocation2 + $0x59c] sm:$0x3f] }
 0x2c8   :  { %13028 = vst [vmem:[#allocation178_spill] sm:$0xff] %v9486_v42  ;;  %7937 = vmatmul.msk.bf16.gmra.mxu2 %vm2617_vm0, %v9490_v21 }
 0x2c9   :  { %13030 = vst [vmem:[#allocation180_spill] sm:$0xff] %v9490_v21  ;;  %v8366_v21 = vld [vmem:[#allocation5 + $0xc4] sm:$0xf]  ;;  %v9517_v61 = vpop.f32.mrf.mxu0 }
 0x2ca   :  { %990 = vst [vmem:[#allocation1 + $0x21] ss:$4 sm:$0xff] %v301_v39  ;;  %v313_v39 = vld [vmem:[#allocation2 + $0x5aa] sm:$0x3f] }
 0x2cb   :  { %13032 = vst [vmem:[#allocation182_spill] sm:$0xff] %v9498_v40 }
 0x2cc   :  { %991 = vst [vmem:[#allocation1 + $0x22] ss:$4 sm:$0xff] %v303_v30 }
 0x2cd   :  { %992 = vst [vmem:[#allocation1 + $0x23] ss:$4 sm:$0xff] %v305_v25  ;;  %v9506_v47 = vpop.f32.mrf.mxu1  ;;  %v9508_v30 = vpop.f32.mrf.mxu3  ;;  %v9512_v25 = vpack.c.bf16 %v8971_v5, %v8969_v62 }
 0x2ce   :  { %13033 = vst [vmem:[#allocation183_spill] sm:$0xff] %v9502_v33  ;;  %v7242_v33 = vld [vmem:[#allocation5 + $0xd0] sm:$0xf0]  ;;  %v9514_v40 = vpop.f32.mrf.mxu2 }
 0x2cf   :  { %13035 = vst [vmem:[#allocation185_spill] sm:$0xff] %v9506_v47  ;;  %2951 = vmatmul.bf16.gmra.mxu3 %v9512_v25  ;;  %v7245_v1 = vor.u32 %v8366_v21, %v7242_v33  ;;  %v317_v47 = vld [vmem:[#allocation2 + $0x5c6] sm:$0x3f] }
 0x2d0   :  { %13036 = vst [vmem:[#allocation186_spill] sm:$0xff] %v9508_v30 }
 0x2d1   :  { %13037 = vst [vmem:[#allocation187_spill] sm:$0xff] %v9512_v25  ;;  %3290 = vmatpush.bf16.msra.mxu3 %v7245_v1  ;;  %v9535_v33 = vpop.f32.mrf.mxu0  ;;  %v8422_v25 = vld [vmem:[#allocation5 + $0x284] sm:$0xf] }
 0x2d2   :  { %13038 = vst [vmem:[#allocation188_spill] sm:$0xff] %v9514_v40  ;;  %v321_v40 = vld [vmem:[#allocation2 + $0x5e2] sm:$0x3f] }
 0x2d3   :  { %13039 = vst [vmem:[#allocation189_spill] sm:$0xff] %v9517_v61  ;;  %v8466_v61 = vld [vmem:[#allocation5 + $0x3e4] sm:$0xf] }
 0x2d4   :  { %v997_v12 = vld.sshfl [vmem:[#allocation1 + $0x20] sm:$0xff pattern:$0x73625140]  ;;  %v998_v8 = vld.sshfl [vmem:[#allocation1 + $0x28] sm:$0xff pattern:$0x73625140] }
 0x2d5   :  { %v999_v42 = vld.sshfl [vmem:[#allocation1 + $0x30] sm:$0xff pattern:$0x73625140]  ;;  %v9531_v1 = vpop.f32.mrf.mxu3  ;;  %13045 = vst [vmem:[#allocation195_spill] sm:$0xff] %v9535_v33 }
 0x2d6   :  { %1004 = vst [vmem:[#allocation1 + $0x20] ss:$4 sm:$0xff] %v307_v22  ;;  %v315_v22 = vld [vmem:[#allocation2 + $0x5b8] sm:$0x3f]  ;;  %v9533_v21 = vpop.f32.mrf.mxu2 }
 0x2d7   :  { %1005 = vst [vmem:[#allocation1 + $0x21] ss:$4 sm:$0xff] %v309_v26 }
 0x2d8   :  { %1006 = vst [vmem:[#allocation1 + $0x22] ss:$4 sm:$0xff] %v311_v20 }
 0x2d9   :  { %1007 = vst [vmem:[#allocation1 + $0x23] ss:$4 sm:$0xff] %v313_v39  ;;  %v9519_v39 = vpop.f32.mrf.mxu1 }
 0x2da   :  { %13040 = vst [vmem:[#allocation190_spill] sm:$0xff] %v9519_v39  ;;  %v7514_v39 = vld [vmem:[#allocation5 + $0x2f0] sm:$0xf0] }
 0x2db   :  { %13044 = vst [vmem:[#allocation194_spill] sm:$0xff] %v9533_v21  ;;  %v9543_v21 = vpop.f32.mrf.mxu0 }
 0x2dc   :  { %13049 = vst [vmem:[#allocation199_spill] sm:$0xff] %v9543_v21 }
 0x2e0   :  { %v1012_v20 = vld.sshfl [vmem:[#allocation1 + $0x20] sm:$0xff pattern:$0x73625140]  ;;  %v1013_v26 = vld.sshfl [vmem:[#allocation1 + $0x28] sm:$0xff pattern:$0x73625140] }
 0x2e1   :  { %v9521_v30 = vpack.c.bf16 %v1012_v20, %v997_v12  ;;  %v9523_v62 = vpack.c.bf16 %v1013_v26, %v998_v8  ;;  %v1014_v5 = vld.sshfl [vmem:[#allocation1 + $0x30] sm:$0xff pattern:$0x73625140]  ;;  %v323_v12 = vld [vmem:[#allocation2 + $0x5f0] sm:$0x3f] }
 0x2e2   :  { %v9525_v50 = vpack.c.bf16 %v1014_v5, %v999_v42  ;;  %1019 = vst [vmem:[#allocation1 + $0x20] ss:$4 sm:$0xff] %v315_v22  ;;  %v9537_v42 = vpop.f32.mrf.mxu1  ;;  %v325_v8 = vld [vmem:[#allocation2 + $0x5fe] sm:$0x3f]  ;;  %v327_v26 = vld [vmem:[#allocation2 + $0x60c] sm:$0x3f] }
 0x2e3   :  { %13041 = vst [vmem:[#allocation191_spill] sm:$0xff] %v9521_v30  ;;  %3090 = vmatmul.bf16.gmra.mxu0 %v9521_v30  ;;  %3179 = vmatmul.bf16.gmra.mxu1 %v9523_v62  ;;  %v9539_v30 = vpop.f32.mrf.mxu3 }
 0x2e4   :  { %13042 = vst [vmem:[#allocation192_spill] sm:$0xff] %v9523_v62  ;;  %7938 = vmatmul.msk.bf16.gmra.mxu2 %vm2617_vm0, %v9525_v50  ;;  %v8434_v62 = vld [vmem:[#allocation5 + $0x2e4] sm:$0xf] }
 0x2e5   :  { %13043 = vst [vmem:[#allocation193_spill] sm:$0xff] %v9525_v50  ;;  %v7386_v50 = vld [vmem:[#allocation5 + $0x1f0] sm:$0xf0] }
 0x2e6   :  { %1020 = vst [vmem:[#allocation1 + $0x21] ss:$4 sm:$0xff] %v317_v47  ;;  %v329_v47 = vld [vmem:[#allocation2 + $0x61a] sm:$0x3f] }
 0x2e7   :  { %1021 = vst [vmem:[#allocation1 + $0x22] ss:$4 sm:$0xff] %v319_v43  ;;  %v9541_v43 = vpop.f32.mrf.mxu2 }
 0x2e8   :  { %1022 = vst [vmem:[#allocation1 + $0x23] ss:$4 sm:$0xff] %v321_v40  ;;  %v8402_v40 = vld [vmem:[#allocation5 + $0x1e4] sm:$0xf] }
 0x2e9   :  { %13046 = vst [vmem:[#allocation196_spill] sm:$0xff] %v9537_v42  ;;  %v9547_v42 = vpack.c.bf16 %v8984_v38, %v8982_v24  ;;  %v7389_v33 = vor.u32 %v8402_v40, %v7386_v50  ;;  %v7626_v24 = vld [vmem:[#allocation5 + $0x3d0] sm:$0xf0] }
 0x2ea   :  { %13047 = vst [vmem:[#allocation197_spill] sm:$0xff] %v9539_v30  ;;  %v9549_v3 = vpop.f32.mrf.mxu1  ;;  %v7370_v30 = vld [vmem:[#allocation5 + $0x1d0] sm:$0xf0]  ;;  %v7629_v40 = vor.u32 %v8462_v45, %v7626_v24  ;;  %v8390_v45 = vld [vmem:[#allocation5 + $0x184] sm:$0xf] }
 0x2eb   :  { %13048 = vst [vmem:[#allocation198_spill] sm:$0xff] %v9541_v43  ;;  %v8430_v43 = vld [vmem:[#allocation5 + $0x2c4] sm:$0xf]  ;;  %2956 = vmatmul.bf16.gmra.mxu3 %v9547_v42  ;;  %3378 = vmatpush.bf16.msra.mxu0 %v7389_v33  ;;  %v333_v38 = vld [vmem:[#allocation2 + $0x636] sm:$0x3f]  ;;  %v9552_v33 = vpop.f32.mrf.mxu3 }
 0x2ec   :  { %13050 = vst [vmem:[#allocation200_spill] sm:$0xff] %v9547_v42  ;;  %v7501_v50 = vor.u32 %v8430_v43, %v7498_v48  ;;  %v337_v42 = vld [vmem:[#allocation2 + $0x652] sm:$0x3f] }
 0x2ed   :  { %13051 = vst [vmem:[#allocation201_spill] sm:$0xff] %v9549_v3  ;;  %v7354_v3 = vld [vmem:[#allocation5 + $0x1b0] sm:$0xf0] }
 0x2ee   :  { %v7357_v48 = vor.u32 %v8394_v28, %v7354_v3  ;;  %v7594_v28 = vld [vmem:[#allocation5 + $0x390] sm:$0xf0] }
 0x2ef   :  { %v1027_v22 = vld.sshfl [vmem:[#allocation1 + $0x20] sm:$0xff pattern:$0x73625140]  ;;  %v1028_v20 = vld.sshfl [vmem:[#allocation1 + $0x28] sm:$0xff pattern:$0x73625140] }
 0x2f0   :  { %v1029_v5 = vld.sshfl [vmem:[#allocation1 + $0x30] sm:$0xff pattern:$0x73625140] }
 0x2f1   :  { %1034 = vst [vmem:[#allocation1 + $0x20] ss:$4 sm:$0xff] %v323_v12  ;;  %v7642_v12 = vld [vmem:[#allocation5 + $0x3f0] sm:$0xf0] }
 0x2f2   :  { %1035 = vst [vmem:[#allocation1 + $0x21] ss:$4 sm:$0xff] %v325_v8  ;;  %v7517_v8 = vor.u32 %v8434_v62, %v7514_v39  ;;  %v8426_v39 = vld [vmem:[#allocation5 + $0x2a4] sm:$0xf]  ;;  %v7482_v62 = vld [vmem:[#allocation5 + $0x2b0] sm:$0xf0]  ;;  %v9568_v3 = vpop.f32.mrf.mxu1 }
 0x2f3   :  { %1036 = vst [vmem:[#allocation1 + $0x22] ss:$4 sm:$0xff] %v327_v26  ;;  %v7645_v26 = vor.u32 %v8466_v61, %v7642_v12  ;;  %v335_v61 = vld [vmem:[#allocation2 + $0x644] sm:$0x3f] }
 0x2f4   :  { %1037 = vst [vmem:[#allocation1 + $0x23] ss:$4 sm:$0xff] %v329_v47  ;;  %v8398_v47 = vld [vmem:[#allocation5 + $0x1c4] sm:$0xf]  ;;  %3467 = vmatpush.bf16.msra.mxu1 %v7517_v8 }
 0x2f5   :  { %v7373_v21 = vor.u32 %v8398_v47, %v7370_v30  ;;  %3556 = vmatpush.bf16.msra.mxu2 %v7645_v26  ;;  %v8458_v12 = vld [vmem:[#allocation5 + $0x3a4] sm:$0xf]  ;;  %v7485_v26 = vor.u32 %v8426_v39, %v7482_v62 }
 0x2f6   :  { %v7613_v24 = vor.u32 %v8458_v12, %v7610_v31  ;;  %v7341_v31 = vor.u32 %v8390_v45, %v7338_v29  ;;  %v345_v29 = vld [vmem:[#allocation2 + $0x68a] sm:$0x3f]  ;;  %v8418_v45 = vld [vmem:[#allocation5 + $0x264] sm:$0xf] }
 0x2f7   :  { %3379 = vmatpush.bf16.msra.mxu0 %v7373_v21  ;;  %v8454_v21 = vld [vmem:[#allocation5 + $0x384] sm:$0xf] }
 0x2f8   :  { %3468 = vmatpush.bf16.msra.mxu1 %v7501_v50  ;;  %v341_v50 = vld [vmem:[#allocation2 + $0x66e] sm:$0x3f] }
 0x2f9   :  { %3557 = vmatpush.bf16.msra.mxu2 %v7629_v40 }
 0x2fb   :  { %v1042_v9 = vld.sshfl [vmem:[#allocation1 + $0x20] sm:$0xff pattern:$0x73625140]  ;;  %v1043_v18 = vld.sshfl [vmem:[#allocation1 + $0x28] sm:$0xff pattern:$0x73625140]  ;;  %3380 = vmatpush.bf16.msra.mxu0 %v7357_v48 }
 0x2fc   :  { %v9554_v30 = vpack.c.bf16 %v1042_v9, %v1027_v22  ;;  %v9556_v47 = vpack.c.bf16 %v1043_v18, %v1028_v20  ;;  %v1044_v8 = vld.sshfl [vmem:[#allocation1 + $0x30] sm:$0xff pattern:$0x73625140]  ;;  %v9562_v18 = vpop.f32.mrf.mxu2  ;;  %v7466_v9 = vld [vmem:[#allocation5 + $0x290] sm:$0xf0]  ;;  %3469 = vmatpush.bf16.msra.mxu1 %v7485_v26  ;;  %v7597_v20 = vor.u32 %v8454_v21, %v7594_v28  ;;  %v2825_v26 = vadd.f32 %v9469_v17, %v9363_v7 }
 0x2fd   :  { %v9558_v43 = vpack.c.bf16 %v1044_v8, %v1029_v5  ;;  %1049 = vst [vmem:[#allocation1 + $0x20] ss:$4 sm:$0xff] %v331_v60  ;;  %v9566_v60 = vpop.f32.mrf.mxu0  ;;  %3558 = vmatpush.bf16.msra.mxu2 %v7613_v24  ;;  %v7469_v22 = vor.u32 %v8422_v25, %v7466_v9  ;;  %v9570_v5 = vpop.f32.mrf.mxu3  ;;  %v8386_v8 = vld [vmem:[#allocation5 + $0x164] sm:$0xf]  ;;  %v7322_v48 = vld [vmem:[#allocation5 + $0x170] sm:$0xf0]  ;;  %v9582_v24 = vpack.c.bf16 %v8997_v59, %v8995_v51 }
 0x2fe   :  { %13052 = vst [vmem:[#allocation202_spill] sm:$0xff] %v9554_v30  ;;  %3095 = vmatmul.bf16.gmra.mxu0 %v9554_v30  ;;  %3184 = vmatmul.bf16.gmra.mxu1 %v9556_v47  ;;  %v9576_v25 = vpop.f32.mrf.mxu1  ;;  %v7325_v9 = vor.u32 %v8386_v8, %v7322_v48  ;;  %v7450_v21 = vld [vmem:[#allocation5 + $0x270] sm:$0xf0]  ;;  %v8450_v28 = vld [vmem:[#allocation5 + $0x364] sm:$0xf] }
 0x2ff   :  { %13053 = vst [vmem:[#allocation203_spill] sm:$0xff] %v9556_v47  ;;  %7939 = vmatmul.msk.bf16.gmra.mxu2 %vm2617_vm0, %v9558_v43  ;;  %3381 = vmatpush.bf16.msra.mxu0 %v7341_v31  ;;  %v7578_v31 = vld [vmem:[#allocation5 + $0x370] sm:$0xf0]  ;;  %v347_v30 = vld [vmem:[#allocation2 + $0x698] sm:$0x3f] }
 0x300   :  { %13054 = vst [vmem:[#allocation204_spill] sm:$0xff] %v9558_v43  ;;  %3470 = vmatpush.bf16.msra.mxu1 %v7469_v22  ;;  %v8362_v22 = vld [vmem:[#allocation5 + $0xa4] sm:$0xf]  ;;  %2961 = vmatmul.bf16.gmra.mxu3 %v9582_v24  ;;  %v7306_v17 = vld [vmem:[#allocation5 + $0x150] sm:$0xf0] }
 0x301   :  { %1050 = vst [vmem:[#allocation1 + $0x21] ss:$4 sm:$0xff] %v333_v38  ;;  %3559 = vmatpush.bf16.msra.mxu2 %v7597_v20  ;;  %v339_v38 = vld [vmem:[#allocation2 + $0x660] sm:$0x3f]  ;;  %v7226_v20 = vld [vmem:[#allocation5 + $0xb0] sm:$0xf0] }
 0x302   :  { %1051 = vst [vmem:[#allocation1 + $0x22] ss:$4 sm:$0xff] %v335_v61  ;;  %v7229_v43 = vor.u32 %v8362_v22, %v7226_v20  ;;  %v8414_v51 = vld [vmem:[#allocation5 + $0x244] sm:$0xf]  ;;  %v7434_v59 = vld [vmem:[#allocation5 + $0x250] sm:$0xf0] }
 0x303   :  { %1052 = vst [vmem:[#allocation1 + $0x23] ss:$4 sm:$0xff] %v337_v42  ;;  %v343_v42 = vld [vmem:[#allocation2 + $0x67c] sm:$0x3f]  ;;  %3382 = vmatpush.bf16.msra.mxu0 %v7325_v9  ;;  %v349_v8 = vld [vmem:[#allocation2 + $0x6a6] sm:$0x3f]  ;;  %v7437_v47 = vor.u32 %v8414_v51, %v7434_v59 }
 0x304   :  { %v9572_v62 = vpop.f32.mrf.mxu2  ;;  %13057 = vst [vmem:[#allocation207_spill] sm:$0xff] %v9576_v25  ;;  %v8446_v25 = vld [vmem:[#allocation5 + $0x344] sm:$0xf]  ;;  %3291 = vmatpush.bf16.msra.mxu3 %v7229_v43  ;;  %v7290_v22 = vld [vmem:[#allocation5 + $0x130] sm:$0xf0] }
 0x305   :  { %13055 = vst [vmem:[#allocation205_spill] sm:$0xff] %v9572_v62  ;;  %v9574_v12 = vpop.f32.mrf.mxu0  ;;  %v8410_v9 = vld [vmem:[#allocation5 + $0x224] sm:$0xf] }
 0x306   :  { %13056 = vst [vmem:[#allocation206_spill] sm:$0xff] %v9574_v12  ;;  %v8442_v51 = vld [vmem:[#allocation5 + $0x324] sm:$0xf] }
 0x307   :  { %13058 = vst [vmem:[#allocation208_spill] sm:$0xff] %v9582_v24 }
 0x30a   :  { %v1057_v40 = vld.sshfl [vmem:[#allocation1 + $0x20] sm:$0xff pattern:$0x73625140]  ;;  %v1058_v39 = vld.sshfl [vmem:[#allocation1 + $0x28] sm:$0xff pattern:$0x73625140] }
 0x30b   :  { %v1059_v61 = vld.sshfl [vmem:[#allocation1 + $0x30] sm:$0xff pattern:$0x73625140] }
 0x30c   :  { %1064 = vst [vmem:[#allocation1 + $0x20] ss:$4 sm:$0xff] %v339_v38  ;;  %v7453_v38 = vor.u32 %v8418_v45, %v7450_v21  ;;  %v7562_v45 = vld [vmem:[#allocation5 + $0x350] sm:$0xf0]  ;;  %v8378_v21 = vld [vmem:[#allocation5 + $0x124] sm:$0xf] }
 0x30d   :  { %1065 = vst [vmem:[#allocation1 + $0x21] ss:$4 sm:$0xff] %v341_v50  ;;  %v7581_v50 = vor.u32 %v8450_v28, %v7578_v31  ;;  %v351_v28 = vld [vmem:[#allocation2 + $0x6b4] sm:$0x3f]  ;;  %v9587_v31 = vpop.f32.mrf.mxu2  ;;  %v7565_v12 = vor.u32 %v8446_v25, %v7562_v45  ;;  %v9597_v25 = vpop.f32.mrf.mxu1 }
 0x30e   :  { %1066 = vst [vmem:[#allocation1 + $0x22] ss:$4 sm:$0xff] %v343_v42  ;;  %v2913_v42 = vpop.f32.mrf.mxu3  ;;  %3471 = vmatpush.bf16.msra.mxu1 %v7453_v38  ;;  %v7546_v45 = vld [vmem:[#allocation5 + $0x330] sm:$0xf0] }
 0x30f   :  { %1067 = vst [vmem:[#allocation1 + $0x23] ss:$4 sm:$0xff] %v345_v29  ;;  %v8382_v29 = vld [vmem:[#allocation5 + $0x144] sm:$0xf]  ;;  %v9585_v7 = vadd.f32 %v2913_v42, %v2825_v26  ;;  %3560 = vmatpush.bf16.msra.mxu2 %v7581_v50  ;;  %v7418_v26 = vld [vmem:[#allocation5 + $0x230] sm:$0xf0] }
 0x310   :  { %v7309_v48 = vor.u32 %v8382_v29, %v7306_v17  ;;  %13060 = vst [vmem:[#allocation210_spill] sm:$0xff] %v9587_v31  ;;  %v9593_v29 = vpop.f32.mrf.mxu0  ;;  %v7293_v17 = vor.u32 %v8378_v21, %v7290_v22  ;;  %v7421_v59 = vor.u32 %v8410_v9, %v7418_v26  ;;  %v8374_v31 = vld [vmem:[#allocation5 + $0x104] sm:$0xf]  ;;  %v7530_v21 = vld [vmem:[#allocation5 + $0x310] sm:$0xf0] }
 0x311   :  { %13059 = vst [vmem:[#allocation209_spill] sm:$0xff] %v9585_v7  ;;  %v353_v7 = vld [vmem:[#allocation2 + $0x6c2] sm:$0x3f]  ;;  %v355_v26 = vld [vmem:[#allocation2 + $0x6d0] sm:$0x3f] }
 0x312   :  { %3383 = vmatpush.bf16.msra.mxu0 %v7309_v48  ;;  %3472 = vmatpush.bf16.msra.mxu1 %v7437_v47  ;;  %v8406_v48 = vld [vmem:[#allocation5 + $0x204] sm:$0xf] }
 0x313   :  { %3561 = vmatpush.bf16.msra.mxu2 %v7565_v12  ;;  %v8438_v47 = vld [vmem:[#allocation5 + $0x304] sm:$0xf] }
 0x314   :  { %v7533_v9 = vor.u32 %v8438_v47, %v7530_v21 }
 0x316   :  { %v1072_v20 = vld.sshfl [vmem:[#allocation1 + $0x20] sm:$0xff pattern:$0x73625140]  ;;  %v1073_v42 = vld.sshfl [vmem:[#allocation1 + $0x28] sm:$0xff pattern:$0x73625140]  ;;  %3384 = vmatpush.bf16.msra.mxu0 %v7293_v17  ;;  %3473 = vmatpush.bf16.msra.mxu1 %v7421_v59  ;;  %v9615_v17 = vpop.f32.mrf.mxu1 }
 0x317   :  { %v9589_v62 = vpack.c.bf16 %v1072_v20, %v1057_v40  ;;  %v9591_v38 = vpack.c.bf16 %v1073_v42, %v1058_v39  ;;  %v1074_v50 = vld.sshfl [vmem:[#allocation1 + $0x30] sm:$0xff pattern:$0x73625140]  ;;  %v7549_v40 = vor.u32 %v8442_v51, %v7546_v45  ;;  %v7274_v39 = vld [vmem:[#allocation5 + $0x110] sm:$0xf0] }
 0x318   :  { %v9595_v43 = vpack.c.bf16 %v1074_v50, %v1059_v61  ;;  %1079 = vst [vmem:[#allocation1 + $0x20] ss:$4 sm:$0xff] %v347_v30  ;;  %v9603_v30 = vpop.f32.mrf.mxu3  ;;  %v7402_v61 = vld [vmem:[#allocation5 + $0x210] sm:$0xf0]  ;;  %v7277_v12 = vor.u32 %v8374_v31, %v7274_v39  ;;  %v357_v20 = vld [vmem:[#allocation2 + $0x6de] sm:$0x3f]  ;;  %v9609_v42 = vpop.f32.mrf.mxu0 }
 0x319   :  { %13061 = vst [vmem:[#allocation211_spill] sm:$0xff] %v9589_v62  ;;  %3100 = vmatmul.bf16.gmra.mxu0 %v9589_v62  ;;  %3189 = vmatmul.bf16.gmra.mxu1 %v9591_v38  ;;  %v7405_v22 = vor.u32 %v8406_v48, %v7402_v61  ;;  %v359_v59 = vld [vmem:[#allocation2 + $0x6ec] sm:$0x3f] }
 0x31a   :  { %13062 = vst [vmem:[#allocation212_spill] sm:$0xff] %v9591_v38  ;;  %7940 = vmatmul.msk.bf16.gmra.mxu2 %vm2617_vm0, %v9595_v43  ;;  %3385 = vmatpush.bf16.msra.mxu0 %v7277_v12  ;;  %v13102_v38 = vld [vmem:[#allocation60_spill] sm:$0xff] }
 0x31b   :  { %13063 = vst [vmem:[#allocation213_spill] sm:$0xff] %v9595_v43  ;;  %3562 = vmatpush.bf16.msra.mxu2 %v7549_v40  ;;  %3474 = vmatpush.bf16.msra.mxu1 %v7405_v22 }
 0x31c   :  { %1080 = vst [vmem:[#allocation1 + $0x21] ss:$4 sm:$0xff] %v349_v8  ;;  %v9605_v8 = vpop.f32.mrf.mxu2 }
 0x31d   :  { %1081 = vst [vmem:[#allocation1 + $0x22] ss:$4 sm:$0xff] %v351_v28  ;;  %v2830_v28 = vadd.f32 %v9500_v34, %v9382_v41  ;;  %v361_v41 = vld [vmem:[#allocation2 + $0x6fa] sm:$0x3f] }
 0x31e   :  { %1082 = vst [vmem:[#allocation1 + $0x23] ss:$4 sm:$0xff] %v353_v7  ;;  %v9613_v7 = vpack.c.bf16 %v9010_v32, %v9008_v19  ;;  %v9626_v39 = vpop.f32.mrf.mxu1 }
 0x31f   :  { %3563 = vmatpush.bf16.msra.mxu2 %v7533_v9  ;;  %v2835_v9 = vadd.f32 %v9531_v1, %v9411_v16 }
 0x320   :  { %13064 = vst [vmem:[#allocation214_spill] sm:$0xff] %v9613_v7  ;;  %v2918_v51 = vpop.f32.mrf.mxu3  ;;  %2966 = vmatmul.bf16.gmra.mxu3 %v9613_v7  ;;  %v9624_v32 = vpop.f32.mrf.mxu0 }
 0x321   :  { %v9618_v40 = vadd.f32 %v2918_v51, %v2830_v28  ;;  %v9640_v28 = vpack.c.bf16 %v9023_v14, %v9021_v56 }
 0x323   :  { %13065 = vst [vmem:[#allocation215_spill] sm:$0xff] %v9618_v40 }
 0x324   :  { %v9620_v34 = vpop.f32.mrf.mxu2  ;;  %13070 = vst [vmem:[#allocation220_spill] sm:$0xff] %v9640_v28 }
 0x325   :  { %v1087_v31 = vld.sshfl [vmem:[#allocation1 + $0x20] sm:$0xff pattern:$0x73625140]  ;;  %v1088_v50 = vld.sshfl [vmem:[#allocation1 + $0x28] sm:$0xff pattern:$0x73625140] }
 0x326   :  { %v1089_v45 = vld.sshfl [vmem:[#allocation1 + $0x30] sm:$0xff pattern:$0x73625140] }
 0x327   :  { %1094 = vst [vmem:[#allocation1 + $0x20] ss:$4 sm:$0xff] %v355_v26  ;;  %v8358_v26 = vld [vmem:[#allocation5 + $0x84] sm:$0xf] }
 0x328   :  { %1095 = vst [vmem:[#allocation1 + $0x21] ss:$4 sm:$0xff] %v357_v20  ;;  %v9622_v19 = vpop.f32.mrf.mxu3  ;;  %v7210_v20 = vld [vmem:[#allocation5 + $0x90] sm:$0xf0]  ;;  %v9649_v1 = vpop.f32.mrf.mxu0 }
 0x329   :  { %1096 = vst [vmem:[#allocation1 + $0x22] ss:$4 sm:$0xff] %v359_v59  ;;  %v7213_v51 = vor.u32 %v8358_v26, %v7210_v20  ;;  %v9651_v59 = vpop.f32.mrf.mxu1 }
 0x32a   :  { %1097 = vst [vmem:[#allocation1 + $0x23] ss:$4 sm:$0xff] %v361_v41 }
 0x32b   :  { %13066 = vst [vmem:[#allocation216_spill] sm:$0xff] %v9622_v19  ;;  %3292 = vmatpush.bf16.msra.mxu3 %v7213_v51 }
 0x330   :  { %2971 = vmatmul.bf16.gmra.mxu3 %v9640_v28 }
 0x331   :  { %v1102_v48 = vld.sshfl [vmem:[#allocation1 + $0x20] sm:$0xff pattern:$0x73625140]  ;;  %v1103_v61 = vld.sshfl [vmem:[#allocation1 + $0x28] sm:$0xff pattern:$0x73625140]  ;;  %v9659_v41 = vpop.f32.mrf.mxu1 }
 0x332   :  { %v9628_v47 = vpack.c.bf16 %v1102_v48, %v1087_v31  ;;  %v9630_v12 = vpack.c.bf16 %v1103_v61, %v1088_v50  ;;  %v1104_v21 = vld.sshfl [vmem:[#allocation1 + $0x30] sm:$0xff pattern:$0x73625140]  ;;  %v2923_v31 = vpop.f32.mrf.mxu3  ;;  %v9644_v50 = vpop.f32.mrf.mxu2  ;;  %v2840_v48 = vadd.f32 %v9552_v33, %v9438_v35  ;;  %v9667_v61 = vpack.c.bf16 %v9042_v13, %v9034_v46 }
 0x333   :  { %v9632_v22 = vpack.c.bf16 %v1104_v21, %v1089_v45  ;;  %v9647_v16 = vadd.f32 %v2923_v31, %v2835_v9  ;;  %v9657_v45 = vpop.f32.mrf.mxu0  ;;  %v2842_v35 = vadd.f32 %v9570_v5, %v9457_v0  ;;  %v9689_v13 = vpack.c.bf16 %v9063_v6, %v9055_v15  ;;  %v8354_v0 = vld [vmem:[#allocation5 + $0x64] sm:$0xf]  ;;  %v7194_v5 = vld [vmem:[#allocation5 + $0x70] sm:$0xf0] }
 0x334   :  { %13067 = vst [vmem:[#allocation217_spill] sm:$0xff] %v9628_v47  ;;  %3105 = vmatmul.bf16.gmra.mxu0 %v9628_v47  ;;  %3194 = vmatmul.bf16.gmra.mxu1 %v9630_v12 }
 0x335   :  { %13068 = vst [vmem:[#allocation218_spill] sm:$0xff] %v9630_v12  ;;  %7941 = vmatmul.msk.bf16.gmra.mxu2 %vm2617_vm0, %v9632_v22  ;;  %v13099_v12 = vld [vmem:[#allocation48_spill] sm:$0xff] }
 0x336   :  { %13069 = vst [vmem:[#allocation219_spill] sm:$0xff] %v9632_v22  ;;  %v13093_v22 = vld [vmem:[#allocation55_spill] sm:$0xff] }
 0x337   :  { %13071 = vst [vmem:[#allocation221_spill] sm:$0xff] %v9647_v16 }
 0x338   :  { %13073 = vst [vmem:[#allocation223_spill] sm:$0xff] %v9667_v61 }
 0x339   :  { %v9679_v20 = vpop.f32.mrf.mxu1  ;;  %13076 = vst [vmem:[#allocation226_spill] sm:$0xff] %v9689_v13 }
 0x33a   :  { %v9653_v56 = vpop.f32.mrf.mxu3  ;;  %v9655_v14 = vpop.f32.mrf.mxu2 }
 0x33b   :  { %13072 = vst [vmem:[#allocation222_spill] sm:$0xff] %v9653_v56  ;;  %v9677_v33 = vpop.f32.mrf.mxu0 }
 0x340   :  { %2976 = vmatmul.bf16.gmra.mxu3 %v9667_v61 }
 0x342   :  { %v2928_v21 = vpop.f32.mrf.mxu3  ;;  %v9673_v26 = vpop.f32.mrf.mxu2 }
 0x343   :  { %v9671_v9 = vadd.f32 %v2928_v21, %v2840_v48  ;;  %v9692_v21 = vpop.f32.mrf.mxu0 }
 0x344   :  { %3386 = vmatmul.bf16.vlgmr.msra.gmra.mxu0 %v8944_v36  ;;  %3475 = vmatmul.bf16.vlgmr.msra.gmra.mxu1 %v8946_v37  ;;  %v2767_v36 = vadd.f32 %v9040_v58, %v9036_v55  ;;  %v13077_v58 = vld [vmem:[#allocation24_spill] sm:$0xff] }
 0x345   :  { %3564 = vmatmul.bf16.vlgmr.msra.gmra.mxu2 %v9444_v2  ;;  %13074 = vst [vmem:[#allocation224_spill] sm:$0xff] %v9671_v9 }
 0x346   :  { %v2856_v15 = vadd.f32 %v9053_v54, %v2767_v36  ;;  %v13078_v54 = vld [vmem:[#allocation47_spill] sm:$0xff] }
 0x34a   :  { %v2930_v31 = vpop.f32.mrf.mxu3  ;;  %v9685_v46 = vpop.f32.mrf.mxu2 }
 0x34b   :  { %v9681_v51 = vadd.f32 %v2930_v31, %v2842_v35  ;;  %v7197_v35 = vor.u32 %v8354_v0, %v7194_v5  ;;  %v9705_v2 = vpop.f32.mrf.mxu0 }
 0x34d   :  { %13075 = vst [vmem:[#allocation225_spill] sm:$0xff] %v9681_v51  ;;  %3293 = vmatpush.bf16.msra.mxu3 %v7197_v35  ;;  %v13084_v35 = vld [vmem:[#allocation42_spill] sm:$0xff] }
 0x350   :  { %2981 = vmatmul.bf16.gmra.mxu3 %v9689_v13 }
 0x352   :  { %v2942_v48 = vpop.f32.mrf.mxu3  ;;  %v9702_v62 = vpop.f32.mrf.mxu2 }
 0x353   :  { %v2943_v31 = vadd.f32 %v2942_v48, %v9038_v57 }
 0x354   :  { %3391 = vmatmul.bf16.gmra.mxu0 %v8962_v52  ;;  %3480 = vmatmul.bf16.gmra.mxu1 %v8964_v53  ;;  %v9696_v52 = vpop.f32.mrf.mxu1 }
 0x355   :  { %3569 = vmatmul.bf16.gmra.mxu2 %v9479_v63  ;;  %v3032_v6 = vadd.f32 %v9373_v49, %v2943_v31  ;;  %v13079_v49 = vld [vmem:[#allocation51_spill] sm:$0xff] }
 0x357   :  { %v3121_v63 = vadd.f32 %v9379_v44, %v3032_v6  ;;  %v9717_v44 = vpack.c.bf16 %v13079_v49, %v13078_v54 }
 0x359   :  { %v3210_v5 = vadd.f32 %v9392_v4, %v3121_v63  ;;  %13080 = vst [vmem:[#allocation47_spill] sm:$0xff] %v9717_v44  ;;  %v13082_v63 = vld [vmem:[#allocation41_spill] sm:$0xff] }
 0x35a   :  { %v2944_v47 = vpop.f32.mrf.mxu3  ;;  %v9724_v6 = vpop.f32.mrf.mxu2 }
 0x35b   :  { %v2945_v53 = vadd.f32 %v2944_v47, %v2856_v15  ;;  %v13081_v47 = vld [vmem:[#allocation187_spill] sm:$0xff] }
 0x35c   :  { %v9708_v0 = vpop.f32.mrf.mxu1 }
 0x35d   :  { %v3034_v57 = vadd.f32 %v9396_v27, %v2945_v53  ;;  %v5158_v53 = vmax.f32 %v3210_v5, 0.0  ;;  %v13087_v5 = vld [vmem:[#allocation149_spill] sm:$0xff] }
 0x35f   :  { %v3123_v55 = vadd.f32 %v9398_v23, %v3034_v57  ;;  %v13083_v23 = vld [vmem:[#allocation40_spill] sm:$0xff] }
 0x360   :  { %2986 = vmatmul.bf16.gmra.mxu3 %v9717_v44  ;;  %v2772_v31 = vadd.f32 %v13084_v35, %v13083_v23  ;;  %v13090_v35 = vld [vmem:[#allocation26_spill] sm:$0xff] }
 0x361   :  { %v3212_v36 = vadd.f32 %v9402_v10, %v3123_v55  ;;  %v9728_v10 = vpop.f32.mrf.mxu0  ;;  %v13086_v55 = vld [vmem:[#allocation46_spill] sm:$0xff] }
 0x362   :  { %v2947_v48 = vpop.f32.mrf.mxu3  ;;  %v2861_v54 = vadd.f32 %v13086_v55, %v2772_v31  ;;  %v13094_v31 = vld [vmem:[#allocation56_spill] sm:$0xff] }
 0x363   :  { %v5162_v27 = vmax.f32 %v3212_v36, 0.0  ;;  %v2948_v4 = vadd.f32 %v2947_v48, %v13082_v63  ;;  %v9735_v48 = vpop.f32.mrf.mxu2  ;;  %v13089_v63 = vld [vmem:[#allocation150_spill] sm:$0xff]  ;;  %v9745_v55 = vpack.c.bf16 %v13094_v31, %v13093_v22  ;;  %v13101_v22 = vld [vmem:[#allocation159_spill] sm:$0xff] }
 0x364   :  { %3396 = vmatmul.bf16.gmra.mxu0 %v8975_v11  ;;  %3485 = vmatmul.bf16.gmra.mxu1 %v13077_v58  ;;  %v9730_v57 = vpop.f32.mrf.mxu1 }
 0x365   :  { %3574 = vmatmul.bf16.gmra.mxu2 %v13081_v47  ;;  %v9726_v15 = vpack.c.bf16 %v5162_v27, %v5158_v53  ;;  %v3037_v36 = vadd.f32 %v13087_v5, %v2948_v4  ;;  %v13088_v47 = vld [vmem:[#allocation155_spill] sm:$0xff]  ;;  %13095 = vst [vmem:[#allocation41_spill] sm:$0xff] %v9745_v55  ;;  %v13096_v4 = vld [vmem:[#allocation200_spill] sm:$0xff] }
 0x366   :  { %v13091_v53 = vld [vmem:[#allocation27_spill] sm:$0xff] }
 0x367   :  { %13085 = vst [vmem:[#allocation51_spill] sm:$0xff] %v9726_v15  ;;  %v3126_v23 = vadd.f32 %v13089_v63, %v3037_v36  ;;  %v13092_v15 = vld [vmem:[#allocation157_spill] sm:$0xff] }
 0x368   :  { %v13097_v36 = vld [vmem:[#allocation49_spill] sm:$0xff] }
 0x369   :  { %v9740_v27 = vpop.f32.mrf.mxu0 }
 0x36a   :  { %v2949_v49 = vpop.f32.mrf.mxu3 }
 0x36b   :  { %v2950_v11 = vadd.f32 %v2949_v49, %v2861_v54  ;;  %v9757_v9 = vpop.f32.mrf.mxu2 }
 0x36c   :  { %v9748_v54 = vpop.f32.mrf.mxu1 }
 0x36d   :  { %v3039_v58 = vadd.f32 %v13088_v47, %v2950_v11  ;;  %v8350_v11 = vld [vmem:[#allocation5 + $0x44] sm:$0xf]  ;;  %v7178_v47 = vld [vmem:[#allocation5 + $0x50] sm:$0xf0] }
 0x36e   :  { %v7181_v5 = vor.u32 %v8350_v11, %v7178_v47  ;;  %v13104_v11 = vld [vmem:[#allocation160_spill] sm:$0xff] }
 0x36f   :  { %v3128_v37 = vadd.f32 %v13092_v15, %v3039_v58  ;;  %v13100_v58 = vld [vmem:[#allocation50_spill] sm:$0xff] }
 0x370   :  { %2991 = vmatmul.bf16.gmra.mxu3 %v9745_v55  ;;  %v2777_v15 = vadd.f32 %v13100_v58, %v13099_v12  ;;  %v13105_v12 = vld [vmem:[#allocation164_spill] sm:$0xff]  ;;  %v13108_v58 = vld [vmem:[#allocation30_spill] sm:$0xff] }
 0x371   :  { %3294 = vmatpush.bf16.msra.mxu3 %v7181_v5  ;;  %v3217_v31 = vadd.f32 %v13101_v22, %v3128_v37  ;;  %v13106_v5 = vld [vmem:[#allocation161_spill] sm:$0xff] }
 0x372   :  { %v2952_v49 = vpop.f32.mrf.mxu3  ;;  %v2866_v51 = vadd.f32 %v13102_v38, %v2777_v15  ;;  %v13109_v38 = vld [vmem:[#allocation165_spill] sm:$0xff] }
 0x373   :  { %v2953_v63 = vadd.f32 %v2952_v49, %v13097_v36  ;;  %v9762_v36 = vpop.f32.mrf.mxu0 }
 0x374   :  { %3401 = vmatmul.bf16.gmra.mxu0 %v13090_v35  ;;  %3490 = vmatmul.bf16.gmra.mxu1 %v13091_v53  ;;  %v13098_v35 = vld [vmem:[#allocation152_spill] sm:$0xff] }
 0x375   :  { %3579 = vmatmul.bf16.gmra.mxu2 %v13096_v4  ;;  %v3215_v53 = vadd.f32 %v13098_v35, %v3126_v23  ;;  %v5170_v4 = vmax.f32 %v3217_v31, 0.0  ;;  %v3042_v47 = vadd.f32 %v13104_v11, %v2953_v63  ;;  %v9764_v23 = vpop.f32.mrf.mxu1  ;;  %v13114_v63 = vld [vmem:[#allocation63_spill] sm:$0xff]  ;;  %v13115_v11 = vld [vmem:[#allocation162_spill] sm:$0xff] }
 0x377   :  { %v5166_v43 = vmax.f32 %v3215_v53, 0.0  ;;  %v3131_v37 = vadd.f32 %v13106_v5, %v3042_v47  ;;  %v13107_v53 = vld [vmem:[#allocation29_spill] sm:$0xff] }
 0x379   :  { %v9759_v56 = vpack.c.bf16 %v5170_v4, %v5166_v43  ;;  %v13110_v43 = vld [vmem:[#allocation61_spill] sm:$0xff]  ;;  %v3220_v47 = vadd.f32 %v13115_v11, %v3131_v37 }
 0x37a   :  { %v2954_v16 = vpop.f32.mrf.mxu3  ;;  %v13111_v4 = vld [vmem:[#allocation65_spill] sm:$0xff] }
 0x37b   :  { %13103 = vst [vmem:[#allocation40_spill] sm:$0xff] %v9759_v56  ;;  %v2955_v49 = vadd.f32 %v2954_v16, %v2866_v51  ;;  %v9773_v22 = vpack.c.bf16 %v13111_v4, %v13110_v43  ;;  %v9776_v51 = vpop.f32.mrf.mxu2  ;;  %v13118_v56 = vld [vmem:[#allocation169_spill] sm:$0xff]  ;;  %v5174_v4 = vmax.f32 %v3220_v47, 0.0  ;;  %v13129_v47 = vld [vmem:[#allocation32_spill] sm:$0xff] }
 0x37c   :  { %13113 = vst [vmem:[#allocation46_spill] sm:$0xff] %v9776_v51  ;;  %v13123_v51 = vld [vmem:[#allocation170_spill] sm:$0xff]  ;;  %v13125_v11 = vld [vmem:[#allocation173_spill] sm:$0xff] }
 0x37d   :  { %v3044_v35 = vadd.f32 %v13105_v12, %v2955_v49  ;;  %13112 = vst [vmem:[#allocation42_spill] sm:$0xff] %v9773_v22  ;;  %v13116_v49 = vld [vmem:[#allocation62_spill] sm:$0xff]  ;;  %v13117_v12 = vld [vmem:[#allocation64_spill] sm:$0xff]  ;;  %v9786_v43 = vpop.f32.mrf.mxu1 }
 0x37e   :  { %v2782_v5 = vadd.f32 %v13117_v12, %v13116_v49  ;;  %13120 = vst [vmem:[#allocation155_spill] sm:$0xff] %v9786_v43  ;;  %v13126_v12 = vld [vmem:[#allocation171_spill] sm:$0xff]  ;;  %v13164_v43 = vld [vmem:[#allocation89_spill] sm:$0xff] }
 0x37f   :  { %v3133_v15 = vadd.f32 %v13109_v38, %v3044_v35  ;;  %v9784_v38 = vpop.f32.mrf.mxu0 }
 0x380   :  { %2996 = vmatmul.bf16.gmra.mxu3 %v9773_v22  ;;  %13119 = vst [vmem:[#allocation149_spill] sm:$0xff] %v9784_v38 }
 0x381   :  { %v3222_v35 = vadd.f32 %v13118_v56, %v3133_v15 }
 0x382   :  { %v2957_v16 = vpop.f32.mrf.mxu3 }
 0x383   :  { %v2958_v31 = vadd.f32 %v2957_v16, %v13114_v63  ;;  %v9792_v37 = vpop.f32.mrf.mxu2 }
 0x384   :  { %3406 = vmatmul.bf16.gmra.mxu0 %v13107_v53  ;;  %3495 = vmatmul.bf16.gmra.mxu1 %v13108_v58  ;;  %v5178_v53 = vmax.f32 %v3222_v35, 0.0  ;;  %13124 = vst [vmem:[#allocation157_spill] sm:$0xff] %v9792_v37  ;;  %v13130_v35 = vld [vmem:[#allocation33_spill] sm:$0xff] }
 0x385   :  { %3584 = vmatmul.bf16.gmra.mxu2 %v9582_v24  ;;  %v13121_v24 = vld [vmem:[#allocation69_spill] sm:$0xff]  ;;  %v3047_v16 = vadd.f32 %v13123_v51, %v2958_v31  ;;  %v9798_v38 = vpop.f32.mrf.mxu1 }
 0x386   :  { %v2871_v58 = vadd.f32 %v13121_v24, %v2782_v5  ;;  %v9789_v19 = vpack.c.bf16 %v5178_v53, %v5174_v4  ;;  %13128 = vst [vmem:[#allocation56_spill] sm:$0xff] %v9798_v38  ;;  %v13131_v24 = vld [vmem:[#allocation174_spill] sm:$0xff]  ;;  %v13141_v37 = vld [vmem:[#allocation73_spill] sm:$0xff] }
 0x387   :  { %v3136_v56 = vadd.f32 %v13126_v12, %v3047_v16  ;;  %v9796_v15 = vpop.f32.mrf.mxu0  ;;  %v13132_v5 = vld [vmem:[#allocation70_spill] sm:$0xff]  ;;  %v13135_v16 = vld [vmem:[#allocation172_spill] sm:$0xff] }
 0x388   :  { %13122 = vst [vmem:[#allocation150_spill] sm:$0xff] %v9789_v19  ;;  %v13133_v4 = vld [vmem:[#allocation74_spill] sm:$0xff] }
 0x389   :  { %13127 = vst [vmem:[#allocation55_spill] sm:$0xff] %v9796_v15  ;;  %v9805_v51 = vpack.c.bf16 %v13133_v4, %v13132_v5 }
 0x38a   :  { %v2959_v40 = vpop.f32.mrf.mxu3 }
 0x38b   :  { %v2960_v63 = vadd.f32 %v2959_v40, %v2871_v58  ;;  %13134 = vst [vmem:[#allocation49_spill] sm:$0xff] %v9805_v51  ;;  %v8346_v40 = vld [vmem:[#allocation5 + $0x24] sm:$0xf]  ;;  %v7162_v58 = vld [vmem:[#allocation5 + $0x30] sm:$0xf0]  ;;  %v9811_v19 = vpop.f32.mrf.mxu2 }
 0x38c   :  { %v7165_v31 = vor.u32 %v8346_v40, %v7162_v58  ;;  %13137 = vst [vmem:[#allocation152_spill] sm:$0xff] %v9811_v19 }
 0x38d   :  { %v3049_v49 = vadd.f32 %v13125_v11, %v2960_v63  ;;  %v3225_v63 = vadd.f32 %v13135_v16, %v3136_v56  ;;  %v13136_v11 = vld [vmem:[#allocation179_spill] sm:$0xff]  ;;  %v13144_v56 = vld [vmem:[#allocation181_spill] sm:$0xff] }
 0x38e   :  { %3295 = vmatpush.bf16.msra.mxu3 %v7165_v31  ;;  %v13145_v31 = vld [vmem:[#allocation79_spill] sm:$0xff] }
 0x38f   :  { %v3138_v53 = vadd.f32 %v13131_v24, %v3049_v49  ;;  %v5182_v49 = vmax.f32 %v3225_v63, 0.0 }
 0x390   :  { %3001 = vmatmul.bf16.gmra.mxu3 %v9805_v51 }
 0x391   :  { %v3227_v12 = vadd.f32 %v13136_v11, %v3138_v53  ;;  %v13146_v11 = vld [vmem:[#allocation182_spill] sm:$0xff] }
 0x393   :  { %v5186_v24 = vmax.f32 %v3227_v12, 0.0  ;;  %v13147_v12 = vld [vmem:[#allocation35_spill] sm:$0xff] }
 0x394   :  { %3411 = vmatmul.bf16.gmra.mxu0 %v13129_v47  ;;  %3500 = vmatmul.bf16.gmra.mxu1 %v13130_v35  ;;  %v2962_v47 = vpop.f32.mrf.mxu3  ;;  %v13138_v35 = vld [vmem:[#allocation72_spill] sm:$0xff] }
 0x395   :  { %3589 = vmatmul.bf16.gmra.mxu2 %v9613_v7  ;;  %v2963_v5 = vadd.f32 %v2962_v47, %v13138_v35  ;;  %v9814_v4 = vpack.c.bf16 %v5186_v24, %v5182_v49  ;;  %v13140_v7 = vld [vmem:[#allocation71_spill] sm:$0xff]  ;;  %v13148_v47 = vld [vmem:[#allocation36_spill] sm:$0xff] }
 0x396   :  { %v2787_v38 = vadd.f32 %v13141_v37, %v13140_v7  ;;  %v9818_v15 = vpop.f32.mrf.mxu0  ;;  %v9820_v40 = vpop.f32.mrf.mxu1  ;;  %v13150_v49 = vld [vmem:[#allocation80_spill] sm:$0xff] }
 0x397   :  { %13139 = vst [vmem:[#allocation48_spill] sm:$0xff] %v9814_v4  ;;  %v3052_v58 = vadd.f32 %v13144_v56, %v2963_v5  ;;  %v13151_v7 = vld [vmem:[#allocation84_spill] sm:$0xff] }
 0x398   :  { %13142 = vst [vmem:[#allocation50_spill] sm:$0xff] %v9818_v15  ;;  %v2876_v53 = vadd.f32 %v13145_v31, %v2787_v38  ;;  %v9831_v37 = vpack.c.bf16 %v13151_v7, %v13150_v49  ;;  %v13153_v24 = vld [vmem:[#allocation184_spill] sm:$0xff] }
 0x399   :  { %13143 = vst [vmem:[#allocation159_spill] sm:$0xff] %v9820_v40  ;;  %v3141_v19 = vadd.f32 %v13146_v11, %v3052_v58  ;;  %v13156_v58 = vld [vmem:[#allocation185_spill] sm:$0xff]  ;;  %v13158_v11 = vld [vmem:[#allocation188_spill] sm:$0xff]  ;;  %v13161_v40 = vld [vmem:[#allocation83_spill] sm:$0xff] }
 0x39a   :  { %13152 = vst [vmem:[#allocation160_spill] sm:$0xff] %v9831_v37 }
 0x39c   :  { %v2964_v16 = vpop.f32.mrf.mxu3 }
 0x39d   :  { %v2965_v63 = vadd.f32 %v2964_v16, %v2876_v53  ;;  %v9827_v35 = vpop.f32.mrf.mxu2  ;;  %v13157_v53 = vld [vmem:[#allocation183_spill] sm:$0xff] }
 0x39e   :  { %13149 = vst [vmem:[#allocation60_spill] sm:$0xff] %v9827_v35  ;;  %v9836_v38 = vpop.f32.mrf.mxu0  ;;  %v9838_v56 = vpop.f32.mrf.mxu1  ;;  %v3230_v16 = vadd.f32 %v13157_v53, %v3141_v19  ;;  %v13167_v53 = vld [vmem:[#allocation190_spill] sm:$0xff] }
 0x39f   :  { %v3054_v5 = vadd.f32 %v13153_v24, %v2965_v63  ;;  %13154 = vst [vmem:[#allocation164_spill] sm:$0xff] %v9836_v38  ;;  %v13163_v38 = vld [vmem:[#allocation189_spill] sm:$0xff] }
 0x3a0   :  { %3006 = vmatmul.bf16.gmra.mxu3 %v9831_v37  ;;  %13155 = vst [vmem:[#allocation161_spill] sm:$0xff] %v9838_v56  ;;  %v5190_v7 = vmax.f32 %v3230_v16, 0.0  ;;  %v13169_v16 = vld [vmem:[#allocation39_spill] sm:$0xff] }
 0x3a1   :  { %v3143_v31 = vadd.f32 %v13156_v58, %v3054_v5 }
 0x3a3   :  { %v3232_v4 = vadd.f32 %v13158_v11, %v3143_v31  ;;  %v8342_v11 = vld [vmem:[#allocation5 + $0x4] sm:$0xf] }
 0x3a4   :  { %3416 = vmatmul.bf16.gmra.mxu0 %v13147_v12  ;;  %3505 = vmatmul.bf16.gmra.mxu1 %v13148_v47  ;;  %v2967_v12 = vpop.f32.mrf.mxu3  ;;  %v13159_v47 = vld [vmem:[#allocation82_spill] sm:$0xff] }
 0x3a5   :  { %3594 = vmatmul.bf16.gmra.mxu2 %v9640_v28  ;;  %v2968_v49 = vadd.f32 %v2967_v12, %v13159_v47  ;;  %v5194_v35 = vmax.f32 %v3232_v4, 0.0  ;;  %v13160_v28 = vld [vmem:[#allocation81_spill] sm:$0xff]  ;;  %v9848_v15 = vpop.f32.mrf.mxu2  ;;  %v13168_v4 = vld [vmem:[#allocation38_spill] sm:$0xff] }
 0x3a6   :  { %v2792_v63 = vadd.f32 %v13161_v40, %v13160_v28  ;;  %v13170_v28 = vld [vmem:[#allocation90_spill] sm:$0xff] }
 0x3a7   :  { %v9846_v24 = vpack.c.bf16 %v5194_v35, %v5190_v7  ;;  %v3057_v56 = vadd.f32 %v13163_v38, %v2968_v49  ;;  %v13171_v40 = vld [vmem:[#allocation94_spill] sm:$0xff]  ;;  %v13173_v38 = vld [vmem:[#allocation195_spill] sm:$0xff] }
 0x3a8   :  { %v2881_v5 = vadd.f32 %v13164_v43, %v2792_v63  ;;  %v9861_v35 = vpack.c.bf16 %v13171_v40, %v13170_v28  ;;  %v7146_v49 = vld [vmem:[#allocation5 + $0x10] sm:$0xf0]  ;;  %v13174_v63 = vld [vmem:[#allocation196_spill] sm:$0xff] }
 0x3a9   :  { %13162 = vst [vmem:[#allocation165_spill] sm:$0xff] %v9846_v24  ;;  %v3146_v12 = vadd.f32 %v13167_v53, %v3057_v56  ;;  %v7149_v7 = vor.u32 %v8342_v11, %v7146_v49  ;;  %v13179_v40 = vld [vmem:[#allocation198_spill] sm:$0xff]  ;;  %v13182_v11 = vld [vmem:[#allocation93_spill] sm:$0xff] }
 0x3aa   :  { %13172 = vst [vmem:[#allocation63_spill] sm:$0xff] %v9861_v35 }
 0x3ab   :  { %3296 = vmatpush.bf16.msra.mxu3 %v7149_v7  ;;  %v13185_v7 = vld [vmem:[#allocation96_spill] sm:$0xff] }
 0x3ac   :  { %v2969_v31 = vpop.f32.mrf.mxu3 }
 0x3ad   :  { %v2970_v47 = vadd.f32 %v2969_v31, %v2881_v5  ;;  %v13175_v5 = vld [vmem:[#allocation194_spill] sm:$0xff] }
 0x3ae   :  { %v3235_v31 = vadd.f32 %v13175_v5, %v3146_v12  ;;  %v13184_v12 = vld [vmem:[#allocation199_spill] sm:$0xff] }
 0x3af   :  { %v3059_v43 = vadd.f32 %v13173_v38, %v2970_v47  ;;  %v13180_v47 = vld [vmem:[#allocation92_spill] sm:$0xff] }
 0x3b0   :  { %3011 = vmatmul.bf16.gmra.mxu3 %v9861_v35 }
 0x3b1   :  { %v9852_v58 = vpop.f32.mrf.mxu0  ;;  %v9854_v19 = vpop.f32.mrf.mxu1  ;;  %v3148_v56 = vadd.f32 %v13174_v63, %v3059_v43 }
 0x3b2   :  { %13165 = vst [vmem:[#allocation61_spill] sm:$0xff] %v9852_v58  ;;  %v13181_v58 = vld [vmem:[#allocation91_spill] sm:$0xff] }
 0x3b3   :  { %13166 = vst [vmem:[#allocation65_spill] sm:$0xff] %v9854_v19  ;;  %v2797_v49 = vadd.f32 %v13182_v11, %v13181_v58  ;;  %v13188_v58 = vld [vmem:[#allocation45_spill] sm:$0xff] }
 0x3b4   :  { %3421 = vmatmul.bf16.gmra.mxu0 %v13168_v4  ;;  %3510 = vmatmul.bf16.gmra.mxu1 %v13169_v16  ;;  %v3237_v4 = vadd.f32 %v13179_v40, %v3148_v56  ;;  %v5198_v16 = vmax.f32 %v3235_v31, 0.0  ;;  %v13186_v40 = vld [vmem:[#allocation201_spill] sm:$0xff] }
 0x3b5   :  { %3599 = vmatmul.bf16.gmra.mxu2 %v9667_v61  ;;  %v2972_v61 = vpop.f32.mrf.mxu3 }
 0x3b6   :  { %v2973_v38 = vadd.f32 %v2972_v61, %v13180_v47  ;;  %v5202_v19 = vmax.f32 %v3237_v4, 0.0  ;;  %v1101_v4 = vld.sshfl [vmem:[#allocation1 + $0x18] sm:$0xff pattern:$0x73625140]  ;;  %v13187_v47 = vld [vmem:[#allocation44_spill] sm:$0xff] }
 0x3b8   :  { %v9868_v53 = vpop.f32.mrf.mxu2  ;;  %v9878_v43 = vpack.c.bf16 %v5202_v19, %v5198_v16  ;;  %v3062_v63 = vadd.f32 %v13184_v12, %v2973_v38  ;;  %v13189_v19 = vld [vmem:[#allocation103_spill] sm:$0xff] }
 0x3b9   :  { %13176 = vst [vmem:[#allocation162_spill] sm:$0xff] %v9868_v53  ;;  %v9870_v24 = vpop.f32.mrf.mxu0  ;;  %v9872_v28 = vpop.f32.mrf.mxu1  ;;  %v2886_v53 = vadd.f32 %v13185_v7, %v2797_v49  ;;  %v9892_v16 = vpack.c.bf16 %v1101_v4, %v13189_v19  ;;  %v13194_v7 = vld [vmem:[#allocation205_spill] sm:$0xff] }
 0x3ba   :  { %13177 = vst [vmem:[#allocation62_spill] sm:$0xff] %v9870_v24  ;;  %v3151_v61 = vadd.f32 %v13186_v40, %v3062_v63  ;;  %v13195_v4 = vld [vmem:[#allocation101_spill] sm:$0xff] }
 0x3bb   :  { %13178 = vst [vmem:[#allocation64_spill] sm:$0xff] %v9872_v28 }
 0x3bc   :  { %13183 = vst [vmem:[#allocation169_spill] sm:$0xff] %v9878_v43  ;;  %v3240_v49 = vadd.f32 %v9562_v18, %v3151_v61 }
 0x3bd   :  { %v2974_v56 = vpop.f32.mrf.mxu3  ;;  %13190 = vst [vmem:[#allocation69_spill] sm:$0xff] %v9892_v16 }
 0x3be   :  { %v2975_v31 = vadd.f32 %v2974_v56, %v2886_v53  ;;  %v5206_v43 = vmax.f32 %v3240_v49, 0.0 }
 0x3c0   :  { %v9881_v5 = vpop.f32.mrf.mxu2  ;;  %v3064_v38 = vadd.f32 %v9566_v60, %v2975_v31  ;;  %3016 = vmatmul.bf16.gmra.mxu3 %v9892_v16  ;;  %v13196_v60 = vld [vmem:[#allocation100_spill] sm:$0xff]  ;;  %v13197_v31 = vld [vmem:[#allocation102_spill] sm:$0xff] }
 0x3c1   :  { %v9884_v24 = vpop.f32.mrf.mxu0  ;;  %v9886_v28 = vpop.f32.mrf.mxu1 }
 0x3c2   :  { %v3153_v11 = vadd.f32 %v9568_v3, %v3064_v38  ;;  %v13199_v3 = vld [vmem:[#allocation206_spill] sm:$0xff]  ;;  %v13200_v38 = vld [vmem:[#allocation104_spill] sm:$0xff] }
 0x3c4   :  { %3426 = vmatmul.bf16.gmra.mxu0 %v13187_v47  ;;  %3515 = vmatmul.bf16.gmra.mxu1 %v13188_v58  ;;  %v3242_v56 = vadd.f32 %v13194_v7, %v3153_v11  ;;  %v13201_v7 = vld [vmem:[#allocation207_spill] sm:$0xff] }
 0x3c5   :  { %3604 = vmatmul.bf16.gmra.mxu2 %v9689_v13  ;;  %v2977_v40 = vpop.f32.mrf.mxu3  ;;  %v2802_v13 = vadd.f32 %v13197_v31, %v13196_v60  ;;  %v13204_v60 = vld [vmem:[#allocation16_spill] sm:$0xff] }
 0x3c6   :  { %v2978_v19 = vadd.f32 %v2977_v40, %v13195_v4  ;;  %v5210_v47 = vmax.f32 %v3242_v56, 0.0  ;;  %v13202_v56 = vld [vmem:[#allocation53_spill] sm:$0xff]  ;;  %v13203_v4 = vld [vmem:[#allocation54_spill] sm:$0xff] }
 0x3c8   :  { %v9899_v12 = vpop.f32.mrf.mxu2  ;;  %v9909_v58 = vpack.c.bf16 %v5210_v47, %v5206_v43  ;;  %v3067_v18 = vadd.f32 %v13199_v3, %v2978_v19  ;;  %v8498_v47 = vld [vmem:[#allocation5 + $0x4e4] sm:$0xf]  ;;  %v7770_v19 = vld [vmem:[#allocation5 + $0x4f0] sm:$0xf0] }
 0x3c9   :  { %13191 = vst [vmem:[#allocation170_spill] sm:$0xff] %v9899_v12  ;;  %v9901_v53 = vpop.f32.mrf.mxu0  ;;  %v9903_v63 = vpop.f32.mrf.mxu1  ;;  %v2891_v12 = vadd.f32 %v13200_v38, %v2802_v13  ;;  %v7773_v13 = vor.u32 %v8498_v47, %v7770_v19  ;;  %v13205_v3 = vld [vmem:[#allocation210_spill] sm:$0xff]  ;;  %v13210_v47 = vld [vmem:[#allocation109_spill] sm:$0xff] }
 0x3ca   :  { %13192 = vst [vmem:[#allocation173_spill] sm:$0xff] %v9901_v53  ;;  %v3156_v40 = vadd.f32 %v13201_v7, %v3067_v18 }
 0x3cb   :  { %13193 = vst [vmem:[#allocation171_spill] sm:$0xff] %v9903_v63  ;;  %3645 = vmatpush.bf16.msrb.mxu3 %v7773_v13  ;;  %v13212_v13 = vld [vmem:[#allocation114_spill] sm:$0xff] }
 0x3cc   :  { %13198 = vst [vmem:[#allocation174_spill] sm:$0xff] %v9909_v58  ;;  %v3245_v38 = vadd.f32 %v13205_v3, %v3156_v40 }
 0x3cd   :  { %v2979_v11 = vpop.f32.mrf.mxu3 }
 0x3ce   :  { %v2980_v49 = vadd.f32 %v2979_v11, %v2891_v12 }
 0x3d0   :  { %v9912_v61 = vpop.f32.mrf.mxu2  ;;  %v3069_v43 = vadd.f32 %v9593_v29, %v2980_v49  ;;  %3297 = vmatmul.bf16.vlgmr.msra.gmra.mxu3 %v13204_v60  ;;  %v13208_v29 = vld [vmem:[#allocation108_spill] sm:$0xff] }
 0x3d1   :  { %v9915_v53 = vpop.f32.mrf.mxu0  ;;  %v9917_v63 = vpop.f32.mrf.mxu1 }
 0x3d2   :  { %v3158_v31 = vadd.f32 %v9597_v25, %v3069_v43 }
 0x3d4   :  { %3431 = vmatmul.bf16.gmra.mxu0 %v13202_v56  ;;  %3520 = vmatmul.bf16.gmra.mxu1 %v13203_v4  ;;  %v3247_v11 = vadd.f32 %v9605_v8, %v3158_v31  ;;  %v5214_v56 = vmax.f32 %v3245_v38, 0.0  ;;  %v13209_v4 = vld [vmem:[#allocation107_spill] sm:$0xff] }
 0x3d5   :  { %3609 = vmatmul.bf16.gmra.mxu2 %v9717_v44  ;;  %v2982_v7 = vpop.f32.mrf.mxu3  ;;  %v2807_v19 = vadd.f32 %v13210_v47, %v13209_v4 }
 0x3d6   :  { %v2983_v49 = vadd.f32 %v2982_v7, %v13208_v29  ;;  %v5218_v44 = vmax.f32 %v3247_v11, 0.0  ;;  %v13213_v11 = vld [vmem:[#allocation58_spill] sm:$0xff]  ;;  %v13214_v7 = vld [vmem:[#allocation59_spill] sm:$0xff] }
 0x3d7   :  { %v2896_v3 = vadd.f32 %v13212_v13, %v2807_v19 }
 0x3d8   :  { %v9927_v58 = vpop.f32.mrf.mxu2  ;;  %v9937_v25 = vpack.c.bf16 %v5218_v44, %v5214_v56  ;;  %v3072_v40 = vadd.f32 %v9609_v42, %v2983_v49  ;;  %v13215_v44 = vld [vmem:[#allocation19_spill] sm:$0xff] }
 0x3d9   :  { %13206 = vst [vmem:[#allocation70_spill] sm:$0xff] %v9927_v58  ;;  %v9929_v12 = vpop.f32.mrf.mxu0  ;;  %v9931_v18 = vpop.f32.mrf.mxu1 }
 0x3da   :  { %13207 = vst [vmem:[#allocation74_spill] sm:$0xff] %v9931_v18  ;;  %v3161_v31 = vadd.f32 %v9615_v17, %v3072_v40  ;;  %v13216_v40 = vld [vmem:[#allocation117_spill] sm:$0xff] }
 0x3db   :  { %13211 = vst [vmem:[#allocation172_spill] sm:$0xff] %v9937_v25 }
 0x3dc   :  { %v3250_v4 = vadd.f32 %v9620_v34, %v3161_v31  ;;  %v13220_v31 = vld [vmem:[#allocation122_spill] sm:$0xff] }
 0x3dd   :  { %v2984_v8 = vpop.f32.mrf.mxu3 }
 0x3de   :  { %v2985_v38 = vadd.f32 %v2984_v8, %v2896_v3  ;;  %v5222_v3 = vmax.f32 %v3250_v4, 0.0 }
 0x3e0   :  { %v9940_v43 = vpop.f32.mrf.mxu2  ;;  %v3074_v42 = vadd.f32 %v9624_v32, %v2985_v38  ;;  %3302 = vmatmul.bf16.gmra.mxu3 %v13215_v44  ;;  %v13217_v32 = vld [vmem:[#allocation116_spill] sm:$0xff]  ;;  %v13218_v38 = vld [vmem:[#allocation118_spill] sm:$0xff] }
 0x3e1   :  { %v9943_v58 = vpop.f32.mrf.mxu0  ;;  %v9945_v18 = vpop.f32.mrf.mxu1  ;;  %v2812_v25 = vadd.f32 %v13218_v38, %v13217_v32 }
 0x3e2   :  { %v3163_v56 = vadd.f32 %v9626_v39, %v3074_v42 }
 0x3e3   :  { %v2901_v42 = vadd.f32 %v13220_v31, %v2812_v25 }
 0x3e4   :  { %3436 = vmatmul.bf16.gmra.mxu0 %v13213_v11  ;;  %3525 = vmatmul.bf16.gmra.mxu1 %v13214_v7  ;;  %v3252_v47 = vadd.f32 %v9644_v50, %v3163_v56 }
 0x3e5   :  { %3614 = vmatmul.bf16.gmra.mxu2 %v9745_v55  ;;  %v2987_v19 = vpop.f32.mrf.mxu3 }
 0x3e6   :  { %v2988_v13 = vadd.f32 %v2987_v19, %v13216_v40  ;;  %v5226_v8 = vmax.f32 %v3252_v47, 0.0  ;;  %v13221_v47 = vld [vmem:[#allocation67_spill] sm:$0xff]  ;;  %v13222_v19 = vld [vmem:[#allocation68_spill] sm:$0xff] }
 0x3e7   :  { %v8494_v40 = vld [vmem:[#allocation5 + $0x4c4] sm:$0xf] }
 0x3e8   :  { %v9955_v29 = vpop.f32.mrf.mxu2  ;;  %v9965_v11 = vpack.c.bf16 %v5226_v8, %v5222_v3  ;;  %v3077_v34 = vadd.f32 %v9649_v1, %v2988_v13  ;;  %v7754_v13 = vld [vmem:[#allocation5 + $0x4d0] sm:$0xf0] }
 0x3e9   :  { %v9957_v49 = vpop.f32.mrf.mxu0  ;;  %v9959_v17 = vpop.f32.mrf.mxu1  ;;  %v13223_v3 = vld [vmem:[#allocation22_spill] sm:$0xff]  ;;  %v7757_v25 = vor.u32 %v8494_v40, %v7754_v13  ;;  %v13226_v40 = vld [vmem:[#allocation125_spill] sm:$0xff] }
 0x3ea   :  { %13219 = vst [vmem:[#allocation179_spill] sm:$0xff] %v9965_v11  ;;  %v3166_v56 = vadd.f32 %v9651_v59, %v3077_v34 }
 0x3eb   :  { %3646 = vmatpush.bf16.msrb.mxu3 %v7757_v25 }
 0x3ec   :  { %v3255_v32 = vadd.f32 %v9655_v14, %v3166_v56 }
 0x3ed   :  { %v2989_v50 = vpop.f32.mrf.mxu3 }
 0x3ee   :  { %v2990_v4 = vadd.f32 %v2989_v50, %v2901_v42 }
 0x3f0   :  { %v9968_v39 = vpop.f32.mrf.mxu2  ;;  %v3079_v1 = vadd.f32 %v9657_v45, %v2990_v4  ;;  %3307 = vmatmul.bf16.gmra.mxu3 %v13223_v3  ;;  %v13224_v45 = vld [vmem:[#allocation124_spill] sm:$0xff]  ;;  %v5230_v4 = vmax.f32 %v3255_v32, 0.0 }
 0x3f1   :  { %v9971_v55 = vpop.f32.mrf.mxu0  ;;  %v9973_v7 = vpop.f32.mrf.mxu1 }
 0x3f2   :  { %v3168_v8 = vadd.f32 %v9659_v41, %v3079_v1  ;;  %v13229_v1 = vld [vmem:[#allocation130_spill] sm:$0xff] }
 0x3f4   :  { %3441 = vmatmul.bf16.gmra.mxu0 %v13221_v47  ;;  %3530 = vmatmul.bf16.gmra.mxu1 %v13222_v19  ;;  %v3257_v31 = vadd.f32 %v9673_v26, %v3168_v8  ;;  %v13225_v47 = vld [vmem:[#allocation123_spill] sm:$0xff] }
 0x3f5   :  { %3619 = vmatmul.bf16.gmra.mxu2 %v9773_v22  ;;  %v2992_v42 = vpop.f32.mrf.mxu3  ;;  %v2817_v13 = vadd.f32 %v13226_v40, %v13225_v47  ;;  %v13232_v47 = vld [vmem:[#allocation113_spill] sm:$0xff] }
 0x3f6   :  { %v2993_v50 = vadd.f32 %v2992_v42, %v13224_v45  ;;  %v5234_v11 = vmax.f32 %v3257_v31, 0.0  ;;  %v8530_v31 = vld [vmem:[#allocation5 + $0x5e4] sm:$0xf]  ;;  %v7898_v42 = vld [vmem:[#allocation5 + $0x5f0] sm:$0xf0] }
 0x3f7   :  { %v2906_v25 = vadd.f32 %v13229_v1, %v2817_v13  ;;  %v7264_v45 = vld [vmem:[#allocation5 + $0xe8] sm:$0xf]  ;;  %v7882_v1 = vld [vmem:[#allocation5 + $0x5d0] sm:$0xf0] }
 0x3f8   :  { %v9983_v38 = vpop.f32.mrf.mxu2  ;;  %v9993_v41 = vpack.c.bf16 %v5234_v11, %v5230_v4  ;;  %v3082_v14 = vadd.f32 %v9677_v33, %v2993_v50  ;;  %v13233_v11 = vld [vmem:[#allocation135_spill] sm:$0xff]  ;;  %v7901_v33 = vor.u32 %v8530_v31, %v7898_v42  ;;  %v13234_v13 = vld [vmem:[#allocation25_spill] sm:$0xff] }
 0x3f9   :  { %v9985_v59 = vpop.f32.mrf.mxu0  ;;  %v9987_v34 = vpop.f32.mrf.mxu1  ;;  %v8373_v50 = vld [vmem:[#allocation5 + $0xf4] sm:$0xf0] }
 0x3fa   :  { %13227 = vst [vmem:[#allocation72_spill] sm:$0xff] %v9993_v41  ;;  %v3171_v8 = vadd.f32 %v9679_v20, %v3082_v14  ;;  %v7265_v40 = vor.u32 %v8373_v50, %v7264_v45  ;;  %3734 = vmatpush.bf16.msrb.mxu0 %v7901_v33  ;;  %v8526_v14 = vld [vmem:[#allocation5 + $0x5c4] sm:$0xf]  ;;  %v8369_v42 = vld [vmem:[#allocation5 + $0xd4] sm:$0xf0] }
 0x3fb   :  { %v7885_v31 = vor.u32 %v8526_v14, %v7882_v1  ;;  %v7866_v45 = vld [vmem:[#allocation5 + $0x5b0] sm:$0xf0]  ;;  %v7232_v33 = vld [vmem:[#allocation5 + $0xa8] sm:$0xf] }
 0x3fc   :  { %3912 = vmatpush.bf16.msrb.mxu2 %v7265_v40  ;;  %v8365_v40 = vld [vmem:[#allocation5 + $0xb4] sm:$0xf0] }
 0x3fd   :  { %v2994_v26 = vpop.f32.mrf.mxu3 }
 0x3fe   :  { %v2995_v32 = vadd.f32 %v2994_v26, %v2906_v25  ;;  %v7248_v25 = vld [vmem:[#allocation5 + $0xc8] sm:$0xf]  ;;  %v3260_v26 = vadd.f32 %v9685_v46, %v3171_v8  ;;  %3735 = vmatpush.bf16.msrb.mxu0 %v7885_v31  ;;  %v7233_v8 = vor.u32 %v8365_v40, %v7232_v33 }
 0x3ff   :  { %v7216_v31 = vld [vmem:[#allocation5 + $0x88] sm:$0xf] }
 0x400   :  { %v9996_v56 = vpop.f32.mrf.mxu2  ;;  %v3084_v4 = vadd.f32 %v9692_v21, %v2995_v32  ;;  %3312 = vmatmul.bf16.gmra.mxu3 %v13234_v13  ;;  %v7249_v21 = vor.u32 %v8369_v42, %v7248_v25  ;;  %v8522_v32 = vld [vmem:[#allocation5 + $0x5a4] sm:$0xf]  ;;  %v5238_v14 = vmax.f32 %v3260_v26, 0.0  ;;  %v7200_v40 = vld [vmem:[#allocation5 + $0x68] sm:$0xf] }
 0x401   :  { %13228 = vst [vmem:[#allocation71_spill] sm:$0xff] %v9996_v56  ;;  %v9999_v22 = vpop.f32.mrf.mxu0  ;;  %v10001_v19 = vpop.f32.mrf.mxu1 }
 0x402   :  { %13230 = vst [vmem:[#allocation73_spill] sm:$0xff] %v9999_v22  ;;  %v3173_v20 = vadd.f32 %v9696_v52, %v3084_v4  ;;  %v7869_v4 = vor.u32 %v8522_v32, %v7866_v45  ;;  %3913 = vmatpush.bf16.msrb.mxu2 %v7249_v21  ;;  %v13243_v21 = vld [vmem:[#allocation143_spill] sm:$0xff] }
 0x403   :  { %13231 = vst [vmem:[#allocation181_spill] sm:$0xff] %v10001_v19 }
 0x404   :  { %3446 = vmatmul.bf16.gmra.mxu0 %v13232_v47  ;;  %3535 = vmatmul.bf16.gmra.mxu1 %v13233_v11  ;;  %v3262_v52 = vadd.f32 %v9702_v62, %v3173_v20  ;;  %v13238_v11 = vld [vmem:[#allocation131_spill] sm:$0xff]  ;;  %v8518_v62 = vld [vmem:[#allocation5 + $0x584] sm:$0xf]  ;;  %v7850_v20 = vld [vmem:[#allocation5 + $0x590] sm:$0xf0] }
 0x405   :  { %3624 = vmatmul.bf16.gmra.mxu2 %v9805_v51  ;;  %v2997_v50 = vpop.f32.mrf.mxu3  ;;  %3736 = vmatpush.bf16.msrb.mxu0 %v7869_v4  ;;  %v7853_v32 = vor.u32 %v8518_v62, %v7850_v20  ;;  %v7834_v4 = vld [vmem:[#allocation5 + $0x570] sm:$0xf0]  ;;  %v8490_v62 = vld [vmem:[#allocation5 + $0x4a4] sm:$0xf] }
 0x406   :  { %v2998_v46 = vadd.f32 %v2997_v50, %v13238_v11  ;;  %v5242_v1 = vmax.f32 %v3262_v52, 0.0  ;;  %3914 = vmatpush.bf16.msrb.mxu2 %v7233_v8  ;;  %v8361_v11 = vld [vmem:[#allocation5 + $0x94] sm:$0xf0]  ;;  %v8514_v50 = vld [vmem:[#allocation5 + $0x564] sm:$0xf] }
 0x407   :  { %v13247_v8 = vld [vmem:[#allocation136_spill] sm:$0xff]  ;;  %v7738_v20 = vld [vmem:[#allocation5 + $0x4b0] sm:$0xf0] }
 0x408   :  { %v10011_v41 = vpop.f32.mrf.mxu2  ;;  %v3087_v25 = vadd.f32 %v9705_v2, %v2998_v46  ;;  %v13246_v46 = vld [vmem:[#allocation106_spill] sm:$0xff] }
 0x409   :  { %13235 = vst [vmem:[#allocation79_spill] sm:$0xff] %v10011_v41  ;;  %v10013_v47 = vpop.f32.mrf.mxu0  ;;  %v10015_v51 = vpop.f32.mrf.mxu1  ;;  %v13239_v41 = vld [vmem:[#allocation140_spill] sm:$0xff]  ;;  %3737 = vmatpush.bf16.msrb.mxu0 %v7853_v32 }
 0x40a   :  { %13236 = vst [vmem:[#allocation182_spill] sm:$0xff] %v10013_v47  ;;  %v13240_v47 = vld [vmem:[#allocation141_spill] sm:$0xff]  ;;  %v3176_v52 = vadd.f32 %v9708_v0, %v3087_v25  ;;  %v13248_v32 = vld [vmem:[#allocation28_spill] sm:$0xff]  ;;  %v7741_v0 = vor.u32 %v8490_v62, %v7738_v20 }
 0x40b   :  { %13237 = vst [vmem:[#allocation80_spill] sm:$0xff] %v10015_v51  ;;  %v2822_v19 = vadd.f32 %v13240_v47, %v13239_v41  ;;  %v10021_v51 = vpack.c.bf16 %v5242_v1, %v5238_v14  ;;  %v7217_v41 = vor.u32 %v8361_v11, %v7216_v31  ;;  %v7837_v14 = vor.u32 %v8514_v50, %v7834_v4  ;;  %v8510_v11 = vld [vmem:[#allocation5 + $0x544] sm:$0xf]  ;;  %v7168_v62 = vld [vmem:[#allocation5 + $0x28] sm:$0xf] }
 0x40c   :  { %3647 = vmatpush.bf16.msrb.mxu3 %v7741_v0 }
 0x40d   :  { %13241 = vst [vmem:[#allocation84_spill] sm:$0xff] %v10021_v51  ;;  %v2911_v45 = vadd.f32 %v13243_v21, %v2822_v19  ;;  %v2999_v47 = vpop.f32.mrf.mxu3  ;;  %3915 = vmatpush.bf16.msrb.mxu2 %v7217_v41  ;;  %v8357_v19 = vld [vmem:[#allocation5 + $0x74] sm:$0xf0]  ;;  %3738 = vmatpush.bf16.msrb.mxu0 %v7837_v14  ;;  %v7818_v21 = vld [vmem:[#allocation5 + $0x550] sm:$0xf0]  ;;  %v3265_v41 = vadd.f32 %v9724_v6, %v3176_v52  ;;  %v13252_v6 = vld [vmem:[#allocation209_spill] sm:$0xff] }
 0x40e   :  { %v7201_v31 = vor.u32 %v8357_v19, %v7200_v40  ;;  %v7821_v50 = vor.u32 %v8510_v11, %v7818_v21  ;;  %v8506_v19 = vld [vmem:[#allocation5 + $0x524] sm:$0xf]  ;;  %v7802_v14 = vld [vmem:[#allocation5 + $0x530] sm:$0xf0] }
 0x40f   :  { %v3000_v2 = vadd.f32 %v2999_v47, %v2911_v45  ;;  %v7184_v45 = vld [vmem:[#allocation5 + $0x48] sm:$0xf]  ;;  %v7805_v20 = vor.u32 %v8506_v19, %v7802_v14  ;;  %v5246_v11 = vmax.f32 %v3265_v41, 0.0 }
 0x410   :  { %v10024_v42 = vpop.f32.mrf.mxu2  ;;  %3317 = vmatmul.bf16.gmra.mxu3 %v13248_v32 }
 0x411   :  { %13242 = vst [vmem:[#allocation184_spill] sm:$0xff] %v10024_v42  ;;  %v10027_v26 = vpop.f32.mrf.mxu0  ;;  %v10029_v33 = vpop.f32.mrf.mxu1  ;;  %v3089_v1 = vadd.f32 %v9728_v10, %v3000_v2  ;;  %3916 = vmatpush.bf16.msrb.mxu2 %v7201_v31  ;;  %v8353_v10 = vld [vmem:[#allocation5 + $0x54] sm:$0xf0]  ;;  %3739 = vmatpush.bf16.msrb.mxu0 %v7821_v50  ;;  %v8534_v50 = vld [vmem:[#allocation5 + $0x604] sm:$0xf] }
 0x412   :  { %13244 = vst [vmem:[#allocation185_spill] sm:$0xff] %v10027_v26  ;;  %v7185_v40 = vor.u32 %v8353_v10, %v7184_v45  ;;  %v8349_v31 = vld [vmem:[#allocation5 + $0x34] sm:$0xf0]  ;;  %v13255_v45 = vld [vmem:[#allocation176_spill] sm:$0xff]  ;;  %v7520_v26 = vld [vmem:[#allocation5 + $0x2e8] sm:$0xf] }
 0x413   :  { %13245 = vst [vmem:[#allocation183_spill] sm:$0xff] %v10029_v33  ;;  %v3178_v25 = vadd.f32 %v9730_v57, %v3089_v1  ;;  %v7169_v0 = vor.u32 %v8349_v31, %v7168_v62  ;;  %v8345_v62 = vld [vmem:[#allocation5 + $0x14] sm:$0xf0] }
 0x414   :  { %3451 = vmatmul.bf16.gmra.mxu0 %v13246_v46  ;;  %3540 = vmatmul.bf16.gmra.mxu1 %v13247_v8  ;;  %v13254_v46 = vld [vmem:[#allocation142_spill] sm:$0xff] }
 0x415   :  { %3629 = vmatmul.bf16.gmra.mxu2 %v9831_v37  ;;  %v3267_v57 = vadd.f32 %v9735_v48, %v3178_v25  ;;  %v3002_v1 = vpop.f32.mrf.mxu3  ;;  %3740 = vmatpush.bf16.msrb.mxu0 %v7805_v20  ;;  %v2827_v10 = vadd.f32 %v13255_v45, %v13254_v46  ;;  %v8502_v48 = vld [vmem:[#allocation5 + $0x504] sm:$0xf]  ;;  %v7786_v25 = vld [vmem:[#allocation5 + $0x510] sm:$0xf0] }
 0x416   :  { %v3003_v52 = vadd.f32 %v3002_v1, %v13252_v6  ;;  %3917 = vmatpush.bf16.msrb.mxu2 %v7185_v40  ;;  %v7789_v14 = vor.u32 %v8502_v48, %v7786_v25  ;;  %v7914_v1 = vld [vmem:[#allocation5 + $0x610] sm:$0xf0]  ;;  %v7152_v40 = vld [vmem:[#allocation5 + $0x8] sm:$0xf] }
 0x417   :  { %v5250_v21 = vmax.f32 %v3267_v57, 0.0  ;;  %v2916_v41 = vadd.f32 %v9603_v30, %v2827_v10  ;;  %v7917_v31 = vor.u32 %v8534_v50, %v7914_v1  ;;  %v7153_v46 = vor.u32 %v8345_v62, %v7152_v40  ;;  %v13265_v25 = vld [vmem:[#allocation46_spill] sm:$0xff]  ;;  %v13266_v1 = vld [vmem:[#allocation215_spill] sm:$0xff] }
 0x418   :  { %v10039_v47 = vpop.f32.mrf.mxu2  ;;  %v3092_v37 = vadd.f32 %v9740_v27, %v3003_v52 }
 0x419   :  { %13249 = vst [vmem:[#allocation188_spill] sm:$0xff] %v10039_v47  ;;  %v10041_v2 = vpop.f32.mrf.mxu0  ;;  %v10043_v4 = vpop.f32.mrf.mxu1  ;;  %v10047_v51 = vpack.c.bf16 %v5250_v21, %v5246_v11  ;;  %3741 = vmatpush.bf16.msrb.mxu0 %v7789_v14  ;;  %3830 = vmatpush.bf16.msrb.mxu1 %v7917_v31  ;;  %v13260_v11 = vld [vmem:[#allocation144_spill] sm:$0xff]  ;;  %v13261_v21 = vld [vmem:[#allocation31_spill] sm:$0xff] }
 0x41a   :  { %13250 = vst [vmem:[#allocation82_spill] sm:$0xff] %v10041_v2  ;;  %3918 = vmatpush.bf16.msrb.mxu2 %v7169_v0  ;;  %v3181_v27 = vadd.f32 %v9748_v54, %v3092_v37  ;;  %v13259_v0 = vld [vmem:[#allocation115_spill] sm:$0xff]  ;;  %v13268_v31 = vld [vmem:[#allocation148_spill] sm:$0xff]  ;;  %v13409_v2 = vld [vmem:[#allocation97_spill] sm:$0xff] }
 0x41b   :  { %13251 = vst [vmem:[#allocation81_spill] sm:$0xff] %v10043_v4  ;;  %v8401_v47 = vld [vmem:[#allocation5 + $0x1d4] sm:$0xf0] }
 0x41c   :  { %13253 = vst [vmem:[#allocation83_spill] sm:$0xff] %v10047_v51  ;;  %v3270_v10 = vadd.f32 %v9757_v9, %v3181_v27 }
 0x41d   :  { %v3004_v6 = vpop.f32.mrf.mxu3 }
 0x41e   :  { %v3005_v52 = vadd.f32 %v3004_v6, %v2916_v41  ;;  %3919 = vmatpush.bf16.msrb.mxu2 %v7153_v46  ;;  %v5254_v62 = vmax.f32 %v3270_v10, 0.0  ;;  %v13269_v46 = vld [vmem:[#allocation186_spill] sm:$0xff]  ;;  %v13270_v6 = vld [vmem:[#allocation149_spill] sm:$0xff] }
 0x420   :  { %v10052_v19 = vpop.f32.mrf.mxu2  ;;  %v3094_v30 = vadd.f32 %v9762_v36, %v3005_v52  ;;  %3322 = vmatmul.bf16.gmra.mxu3 %v13261_v21  ;;  %v13272_v52 = vld [vmem:[#allocation216_spill] sm:$0xff] }
 0x421   :  { %13256 = vst [vmem:[#allocation189_spill] sm:$0xff] %v10052_v19  ;;  %v10055_v57 = vpop.f32.mrf.mxu0  ;;  %v10057_v20 = vpop.f32.mrf.mxu1 }
 0x422   :  { %13257 = vst [vmem:[#allocation89_spill] sm:$0xff] %v10055_v57  ;;  %v3183_v45 = vadd.f32 %v9764_v23, %v3094_v30  ;;  %v2832_v23 = vadd.f32 %v13269_v46, %v13268_v31  ;;  %v7722_v31 = vld [vmem:[#allocation5 + $0x490] sm:$0xf0]  ;;  %v13398_v57 = vld [vmem:[#allocation167_spill] sm:$0xff] }
 0x423   :  { %13258 = vst [vmem:[#allocation190_spill] sm:$0xff] %v10057_v20  ;;  %v13279_v46 = vld [vmem:[#allocation34_spill] sm:$0xff] }
 0x424   :  { %3456 = vmatmul.bf16.gmra.mxu0 %v13259_v0  ;;  %3545 = vmatmul.bf16.gmra.mxu1 %v13260_v11  ;;  %v3272_v50 = vadd.f32 %v13265_v25, %v3183_v45  ;;  %v2921_v30 = vadd.f32 %v13272_v52, %v2832_v23  ;;  %v13275_v25 = vld [vmem:[#allocation155_spill] sm:$0xff] }
 0x425   :  { %3634 = vmatmul.bf16.gmra.mxu2 %v9861_v35  ;;  %v3007_v14 = vpop.f32.mrf.mxu3 }
 0x426   :  { %v3008_v40 = vadd.f32 %v3007_v14, %v13266_v1  ;;  %v5258_v41 = vmax.f32 %v3272_v50, 0.0  ;;  %v13276_v50 = vld [vmem:[#allocation129_spill] sm:$0xff]  ;;  %v13277_v1 = vld [vmem:[#allocation151_spill] sm:$0xff] }
 0x428   :  { %v10067_v48 = vpop.f32.mrf.mxu2  ;;  %v10075_v36 = vpack.c.bf16 %v5258_v41, %v5254_v62  ;;  %v3097_v9 = vadd.f32 %v13270_v6, %v3008_v40  ;;  %v13278_v62 = vld [vmem:[#allocation55_spill] sm:$0xff]  ;;  %v8486_v41 = vld [vmem:[#allocation5 + $0x484] sm:$0xf] }
 0x429   :  { %13262 = vst [vmem:[#allocation90_spill] sm:$0xff] %v10067_v48  ;;  %v10069_v54 = vpop.f32.mrf.mxu0  ;;  %v10071_v37 = vpop.f32.mrf.mxu1  ;;  %v7725_v23 = vor.u32 %v8486_v41, %v7722_v31  ;;  %v13280_v6 = vld [vmem:[#allocation56_spill] sm:$0xff]  ;;  %v13288_v41 = vld [vmem:[#allocation158_spill] sm:$0xff]  ;;  %v8405_v48 = vld [vmem:[#allocation5 + $0x1f4] sm:$0xf0] }
 0x42a   :  { %13263 = vst [vmem:[#allocation94_spill] sm:$0xff] %v10069_v54  ;;  %v3186_v14 = vadd.f32 %v13275_v25, %v3097_v9  ;;  %v13393_v54 = vld [vmem:[#allocation76_spill] sm:$0xff] }
 0x42b   :  { %13264 = vst [vmem:[#allocation195_spill] sm:$0xff] %v10071_v37  ;;  %3648 = vmatpush.bf16.msrb.mxu3 %v7725_v23  ;;  %v13292_v23 = vld [vmem:[#allocation222_spill] sm:$0xff] }
 0x42c   :  { %13267 = vst [vmem:[#allocation196_spill] sm:$0xff] %v10075_v36  ;;  %v13281_v36 = vld [vmem:[#allocation157_spill] sm:$0xff] }
 0x42d   :  { %v3009_v45 = vpop.f32.mrf.mxu3  ;;  %v3275_v35 = vadd.f32 %v13281_v36, %v3186_v14  ;;  %v13290_v36 = vld [vmem:[#allocation50_spill] sm:$0xff] }
 0x42e   :  { %v3010_v10 = vadd.f32 %v3009_v45, %v2921_v30  ;;  %v13285_v45 = vld [vmem:[#allocation152_spill] sm:$0xff] }
 0x430   :  { %v10080_v27 = vpop.f32.mrf.mxu2  ;;  %v3099_v40 = vadd.f32 %v13278_v62, %v3010_v10  ;;  %3327 = vmatmul.bf16.gmra.mxu3 %v13279_v46  ;;  %v13286_v10 = vld [vmem:[#allocation221_spill] sm:$0xff] }
 0x431   :  { %13271 = vst [vmem:[#allocation194_spill] sm:$0xff] %v10080_v27  ;;  %v10083_v51 = vpop.f32.mrf.mxu0  ;;  %v10085_v0 = vpop.f32.mrf.mxu1  ;;  %v13384_v27 = vld [vmem:[#allocation146_spill] sm:$0xff] }
 0x432   :  { %13273 = vst [vmem:[#allocation198_spill] sm:$0xff] %v10083_v51  ;;  %v3188_v52 = vadd.f32 %v13280_v6, %v3099_v40  ;;  %v13289_v40 = vld [vmem:[#allocation197_spill] sm:$0xff] }
 0x433   :  { %13274 = vst [vmem:[#allocation92_spill] sm:$0xff] %v10085_v0  ;;  %v2837_v31 = vadd.f32 %v13289_v40, %v13288_v41  ;;  %v13300_v41 = vld [vmem:[#allocation161_spill] sm:$0xff] }
 0x434   :  { %3461 = vmatmul.bf16.gmra.mxu0 %v13276_v50  ;;  %3550 = vmatmul.bf16.gmra.mxu1 %v13277_v1  ;;  %v3277_v25 = vadd.f32 %v13285_v45, %v3188_v52  ;;  %v13295_v45 = vld [vmem:[#allocation159_spill] sm:$0xff] }
 0x435   :  { %3639 = vmatmul.bf16.gmra.mxu2 %v9892_v16  ;;  %v3012_v50 = vpop.f32.mrf.mxu3  ;;  %v5262_v16 = vmax.f32 %v3275_v35, 0.0 }
 0x436   :  { %v3013_v62 = vadd.f32 %v3012_v50, %v13286_v10  ;;  %v5266_v1 = vmax.f32 %v3277_v25, 0.0  ;;  %v13296_v25 = vld [vmem:[#allocation77_spill] sm:$0xff] }
 0x438   :  { %v10095_v11 = vpop.f32.mrf.mxu2  ;;  %v10103_v8 = vpack.c.bf16 %v5266_v1, %v5262_v16  ;;  %v3102_v14 = vadd.f32 %v13290_v36, %v3013_v62  ;;  %v13297_v16 = vld [vmem:[#allocation78_spill] sm:$0xff]  ;;  %v13298_v1 = vld [vmem:[#allocation164_spill] sm:$0xff]  ;;  %v13299_v62 = vld [vmem:[#allocation37_spill] sm:$0xff] }
 0x439   :  { %13282 = vst [vmem:[#allocation91_spill] sm:$0xff] %v10095_v11  ;;  %v10097_v9 = vpop.f32.mrf.mxu0  ;;  %v10099_v30 = vpop.f32.mrf.mxu1  ;;  %v2926_v11 = vadd.f32 %v13292_v23, %v2837_v31  ;;  %v13301_v31 = vld [vmem:[#allocation60_spill] sm:$0xff] }
 0x43a   :  { %13283 = vst [vmem:[#allocation93_spill] sm:$0xff] %v10097_v9  ;;  %v3191_v50 = vadd.f32 %v13295_v45, %v3102_v14  ;;  %v13305_v45 = vld [vmem:[#allocation224_spill] sm:$0xff] }
 0x43b   :  { %13284 = vst [vmem:[#allocation199_spill] sm:$0xff] %v10099_v30 }
 0x43c   :  { %13287 = vst [vmem:[#allocation96_spill] sm:$0xff] %v10103_v8  ;;  %v3280_v36 = vadd.f32 %v13301_v31, %v3191_v50 }
 0x43d   :  { %v3014_v52 = vpop.f32.mrf.mxu3 }
 0x43e   :  { %v3015_v35 = vadd.f32 %v3014_v52, %v2926_v11 }
 0x440   :  { %v10108_v6 = vpop.f32.mrf.mxu2  ;;  %v3104_v10 = vadd.f32 %v13298_v1, %v3015_v35  ;;  %3332 = vmatmul.bf16.gmra.mxu3 %v13299_v62  ;;  %v13307_v1 = vld [vmem:[#allocation61_spill] sm:$0xff] }
 0x441   :  { %13291 = vst [vmem:[#allocation201_spill] sm:$0xff] %v10108_v6  ;;  %v10111_v9 = vpop.f32.mrf.mxu0  ;;  %v10113_v30 = vpop.f32.mrf.mxu1 }
 0x442   :  { %13293 = vst [vmem:[#allocation103_spill] sm:$0xff] %v10111_v9  ;;  %v3193_v40 = vadd.f32 %v13300_v41, %v3104_v10 }
 0x443   :  { %13294 = vst [vmem:[#allocation205_spill] sm:$0xff] %v10113_v30 }
 0x444   :  { %3742 = vmatmul.bf16.vlgmr.msrb.gmra.mxu0 %v13296_v25  ;;  %7942 = vmatmul.msk.bf16.vlgmr.msrb.gmra.mxu1 %vm2617_vm0, %v13297_v16  ;;  %v3282_v14 = vadd.f32 %v9848_v15, %v3193_v40  ;;  %v13313_v40 = vld [vmem:[#allocation87_spill] sm:$0xff] }
 0x445   :  { %3920 = vmatmul.bf16.vlgmr.msrb.gmra.mxu2 %v13204_v60  ;;  %v3017_v52 = vpop.f32.mrf.mxu3  ;;  %v5270_v60 = vmax.f32 %v3280_v36, 0.0  ;;  %v7706_v36 = vld [vmem:[#allocation5 + $0x470] sm:$0xf0] }
 0x446   :  { %v3018_v25 = vadd.f32 %v3017_v52, %v13305_v45  ;;  %v5274_v16 = vmax.f32 %v3282_v14, 0.0  ;;  %v13314_v52 = vld [vmem:[#allocation88_spill] sm:$0xff]  ;;  %v13316_v14 = vld [vmem:[#allocation43_spill] sm:$0xff] }
 0x448   :  { %v10124_v23 = vpop.f32.mrf.mxu2  ;;  %v10132_v35 = vpack.c.bf16 %v5274_v16, %v5270_v60  ;;  %v3107_v30 = vadd.f32 %v13307_v1, %v3018_v25  ;;  %v13315_v60 = vld [vmem:[#allocation62_spill] sm:$0xff]  ;;  %v8482_v16 = vld [vmem:[#allocation5 + $0x464] sm:$0xf] }
 0x449   :  { %13302 = vst [vmem:[#allocation101_spill] sm:$0xff] %v10124_v23  ;;  %v10126_v8 = vpop.f32.mrf.mxu0  ;;  %v10128_v11 = vpop.f32.mrf.mxu1  ;;  %v13311_v23 = vld [vmem:[#allocation65_spill] sm:$0xff]  ;;  %v7709_v45 = vor.u32 %v8482_v16, %v7706_v36  ;;  %v13317_v1 = vld [vmem:[#allocation64_spill] sm:$0xff]  ;;  %v13326_v36 = vld [vmem:[#allocation98_spill] sm:$0xff] }
 0x44a   :  { %13303 = vst [vmem:[#allocation100_spill] sm:$0xff] %v10126_v8  ;;  %v13312_v8 = vld [vmem:[#allocation225_spill] sm:$0xff] }
 0x44b   :  { %13304 = vst [vmem:[#allocation102_spill] sm:$0xff] %v10128_v11  ;;  %v3196_v11 = vadd.f32 %v13311_v23, %v3107_v30  ;;  %3649 = vmatpush.bf16.msrb.mxu3 %v7709_v45  ;;  %v13327_v45 = vld [vmem:[#allocation99_spill] sm:$0xff] }
 0x44c   :  { %13306 = vst [vmem:[#allocation206_spill] sm:$0xff] %v10132_v35 }
 0x44d   :  { %v3019_v31 = vpop.f32.mrf.mxu3 }
 0x44e   :  { %v3020_v15 = vadd.f32 %v3019_v31, %v13312_v8 }
 0x450   :  { %v10135_v10 = vpop.f32.mrf.mxu2  ;;  %v3109_v25 = vadd.f32 %v13315_v60, %v3020_v15  ;;  %3337 = vmatmul.bf16.gmra.mxu3 %v13316_v14 }
 0x451   :  { %13308 = vst [vmem:[#allocation104_spill] sm:$0xff] %v10135_v10  ;;  %v10137_v50 = vpop.f32.mrf.mxu0  ;;  %v10139_v41 = vpop.f32.mrf.mxu1 }
 0x452   :  { %13309 = vst [vmem:[#allocation207_spill] sm:$0xff] %v10137_v50  ;;  %v3198_v35 = vadd.f32 %v13317_v1, %v3109_v25  ;;  %v13364_v50 = vld [vmem:[#allocation133_spill] sm:$0xff] }
 0x453   :  { %13310 = vst [vmem:[#allocation210_spill] sm:$0xff] %v10139_v41  ;;  %v13318_v41 = vld [vmem:[#allocation162_spill] sm:$0xff] }
 0x454   :  { %3747 = vmatmul.bf16.gmra.mxu0 %v13313_v40  ;;  %7943 = vmatmul.msk.bf16.gmra.mxu1 %vm2617_vm0, %v13314_v52  ;;  %v3285_v30 = vadd.f32 %v13318_v41, %v3196_v11  ;;  %v3287_v40 = vadd.f32 %v9881_v5, %v3198_v35  ;;  %v13328_v5 = vld [vmem:[#allocation52_spill] sm:$0xff] }
 0x455   :  { %3925 = vmatmul.bf16.gmra.mxu2 %v13215_v44  ;;  %v10158_v44 = vpop.f32.mrf.mxu3 }
 0x456   :  { %v5278_v15 = vmax.f32 %v3285_v30, 0.0  ;;  %v5282_v60 = vmax.f32 %v3287_v40, 0.0 }
 0x458   :  { %v10151_v23 = vpop.f32.mrf.mxu2  ;;  %v10160_v52 = vpack.c.bf16 %v5282_v60, %v5278_v15 }
 0x459   :  { %13319 = vst [vmem:[#allocation108_spill] sm:$0xff] %v10151_v23  ;;  %v10153_v8 = vpop.f32.mrf.mxu0  ;;  %v10155_v31 = vpop.f32.mrf.mxu1 }
 0x45a   :  { %13320 = vst [vmem:[#allocation107_spill] sm:$0xff] %v10153_v8 }
 0x45b   :  { %13321 = vst [vmem:[#allocation109_spill] sm:$0xff] %v10155_v31  ;;  %v13344_v31 = vld [vmem:[#allocation120_spill] sm:$0xff] }
 0x45c   :  { %13322 = vst [vmem:[#allocation114_spill] sm:$0xff] %v10160_v52 }
 0x45d   :  { %v10168_v41 = vpop.f32.mrf.mxu3 }
 0x460   :  { %v10162_v16 = vpop.f32.mrf.mxu2  ;;  %3342 = vmatmul.bf16.gmra.mxu3 %v13328_v5 }
 0x461   :  { %13323 = vst [vmem:[#allocation117_spill] sm:$0xff] %v10162_v16  ;;  %v10164_v25 = vpop.f32.mrf.mxu0  ;;  %v10166_v11 = vpop.f32.mrf.mxu1 }
 0x462   :  { %13324 = vst [vmem:[#allocation116_spill] sm:$0xff] %v10164_v25 }
 0x463   :  { %13325 = vst [vmem:[#allocation118_spill] sm:$0xff] %v10166_v11 }
 0x464   :  { %3752 = vmatmul.bf16.gmra.mxu0 %v13326_v36  ;;  %7944 = vmatmul.msk.bf16.gmra.mxu1 %vm2617_vm0, %v13327_v45  ;;  %v13335_v45 = vld [vmem:[#allocation111_spill] sm:$0xff] }
 0x465   :  { %3930 = vmatmul.bf16.gmra.mxu2 %v13223_v3  ;;  %v10181_v30 = vpop.f32.mrf.mxu3  ;;  %v13336_v3 = vld [vmem:[#allocation112_spill] sm:$0xff] }
 0x468   :  { %v10175_v35 = vpop.f32.mrf.mxu2 }
 0x469   :  { %13329 = vst [vmem:[#allocation122_spill] sm:$0xff] %v10175_v35  ;;  %v10177_v40 = vpop.f32.mrf.mxu0  ;;  %v10179_v1 = vpop.f32.mrf.mxu1  ;;  %v8478_v35 = vld [vmem:[#allocation5 + $0x444] sm:$0xf] }
 0x46a   :  { %13330 = vst [vmem:[#allocation124_spill] sm:$0xff] %v10177_v40  ;;  %v7690_v40 = vld [vmem:[#allocation5 + $0x450] sm:$0xf0] }
 0x46b   :  { %13331 = vst [vmem:[#allocation123_spill] sm:$0xff] %v10179_v1  ;;  %v13337_v1 = vld [vmem:[#allocation57_spill] sm:$0xff]  ;;  %v7693_v11 = vor.u32 %v8478_v35, %v7690_v40 }
 0x46c   :  { %v13345_v35 = vld [vmem:[#allocation121_spill] sm:$0xff] }
 0x46d   :  { %v10189_v36 = vpop.f32.mrf.mxu3  ;;  %3650 = vmatpush.bf16.msrb.mxu3 %v7693_v11  ;;  %v13346_v11 = vld [vmem:[#allocation66_spill] sm:$0xff] }
 0x470   :  { %v10183_v15 = vpop.f32.mrf.mxu2  ;;  %3347 = vmatmul.bf16.gmra.mxu3 %v13337_v1 }
 0x471   :  { %13332 = vst [vmem:[#allocation125_spill] sm:$0xff] %v10183_v15  ;;  %v10185_v60 = vpop.f32.mrf.mxu0  ;;  %v10187_v52 = vpop.f32.mrf.mxu1 }
 0x472   :  { %13333 = vst [vmem:[#allocation130_spill] sm:$0xff] %v10185_v60 }
 0x473   :  { %13334 = vst [vmem:[#allocation131_spill] sm:$0xff] %v10187_v52 }
 0x474   :  { %3757 = vmatmul.bf16.gmra.mxu0 %v13335_v45  ;;  %7945 = vmatmul.msk.bf16.gmra.mxu1 %vm2617_vm0, %v13336_v3 }
 0x475   :  { %3935 = vmatmul.bf16.gmra.mxu2 %v13234_v13  ;;  %v10202_v60 = vpop.f32.mrf.mxu3 }
 0x478   :  { %v10196_v16 = vpop.f32.mrf.mxu2 }
 0x479   :  { %13338 = vst [vmem:[#allocation140_spill] sm:$0xff] %v10196_v16  ;;  %v10198_v15 = vpop.f32.mrf.mxu0  ;;  %v10200_v52 = vpop.f32.mrf.mxu1 }
 0x47a   :  { %13339 = vst [vmem:[#allocation141_spill] sm:$0xff] %v10198_v15 }
 0x47b   :  { %13340 = vst [vmem:[#allocation143_spill] sm:$0xff] %v10200_v52 }
 0x47d   :  { %v10210_v13 = vpop.f32.mrf.mxu3 }
 0x480   :  { %v10204_v45 = vpop.f32.mrf.mxu2  ;;  %3352 = vmatmul.bf16.gmra.mxu3 %v13346_v11 }
 0x481   :  { %13341 = vst [vmem:[#allocation209_spill] sm:$0xff] %v10204_v45  ;;  %v10206_v25 = vpop.f32.mrf.mxu0  ;;  %v10208_v3 = vpop.f32.mrf.mxu1 }
 0x482   :  { %13342 = vst [vmem:[#allocation142_spill] sm:$0xff] %v10206_v25 }
 0x483   :  { %13343 = vst [vmem:[#allocation176_spill] sm:$0xff] %v10208_v3 }
 0x484   :  { %3762 = vmatmul.bf16.gmra.mxu0 %v13344_v31  ;;  %7946 = vmatmul.msk.bf16.gmra.mxu1 %vm2617_vm0, %v13345_v35  ;;  %v13353_v35 = vld [vmem:[#allocation127_spill] sm:$0xff] }
 0x485   :  { %3940 = vmatmul.bf16.gmra.mxu2 %v13248_v32  ;;  %v10223_v25 = vpop.f32.mrf.mxu3  ;;  %v13354_v32 = vld [vmem:[#allocation128_spill] sm:$0xff] }
 0x488   :  { %v10217_v40 = vpop.f32.mrf.mxu2 }
 0x489   :  { %13347 = vst [vmem:[#allocation46_spill] sm:$0xff] %v10217_v40  ;;  %v10219_v52 = vpop.f32.mrf.mxu0  ;;  %v10221_v45 = vpop.f32.mrf.mxu1  ;;  %v8474_v40 = vld [vmem:[#allocation5 + $0x424] sm:$0xf] }
 0x48a   :  { %13348 = vst [vmem:[#allocation215_spill] sm:$0xff] %v10219_v52  ;;  %v7674_v52 = vld [vmem:[#allocation5 + $0x430] sm:$0xf0] }
 0x48b   :  { %13349 = vst [vmem:[#allocation148_spill] sm:$0xff] %v10221_v45  ;;  %v13355_v45 = vld [vmem:[#allocation75_spill] sm:$0xff]  ;;  %v7677_v23 = vor.u32 %v8474_v40, %v7674_v52  ;;  %v13365_v52 = vld [vmem:[#allocation134_spill] sm:$0xff] }
 0x48d   :  { %v10231_v15 = vpop.f32.mrf.mxu3  ;;  %3651 = vmatpush.bf16.msrb.mxu3 %v7677_v23  ;;  %v13366_v23 = vld [vmem:[#allocation85_spill] sm:$0xff] }
 0x490   :  { %v10225_v3 = vpop.f32.mrf.mxu2  ;;  %3357 = vmatmul.bf16.gmra.mxu3 %v13355_v45 }
 0x491   :  { %13350 = vst [vmem:[#allocation186_spill] sm:$0xff] %v10225_v3  ;;  %v10227_v16 = vpop.f32.mrf.mxu0  ;;  %v10229_v31 = vpop.f32.mrf.mxu1 }
 0x492   :  { %13351 = vst [vmem:[#allocation149_spill] sm:$0xff] %v10227_v16 }
 0x493   :  { %13352 = vst [vmem:[#allocation216_spill] sm:$0xff] %v10229_v31 }
 0x494   :  { %3767 = vmatmul.bf16.gmra.mxu0 %v13353_v35  ;;  %7947 = vmatmul.msk.bf16.gmra.mxu1 %vm2617_vm0, %v13354_v32 }
 0x495   :  { %3945 = vmatmul.bf16.gmra.mxu2 %v13261_v21  ;;  %v10244_v3 = vpop.f32.mrf.mxu3 }
 0x496   :  { %13359 = vst [vmem:[#allocation157_spill] sm:$0xff] %v10244_v3  ;;  %v7744_v3 = vld [vmem:[#allocation5 + $0x4a8] sm:$0xf] }
 0x498   :  { %v10238_v8 = vpop.f32.mrf.mxu2 }
 0x499   :  { %13356 = vst [vmem:[#allocation155_spill] sm:$0xff] %v10238_v8  ;;  %v10240_v16 = vpop.f32.mrf.mxu0  ;;  %v10242_v31 = vpop.f32.mrf.mxu1 }
 0x49a   :  { %13357 = vst [vmem:[#allocation55_spill] sm:$0xff] %v10240_v16 }
 0x49b   :  { %13358 = vst [vmem:[#allocation56_spill] sm:$0xff] %v10242_v31 }
 0x49d   :  { %v10252_v21 = vpop.f32.mrf.mxu3 }
 0x49e   :  { %13363 = vst [vmem:[#allocation197_spill] sm:$0xff] %v10252_v21  ;;  %v8469_v21 = vld [vmem:[#allocation5 + $0x3f4] sm:$0xf0] }
 0x4a0   :  { %v10246_v35 = vpop.f32.mrf.mxu2  ;;  %3362 = vmatmul.bf16.gmra.mxu3 %v13366_v23 }
 0x4a1   :  { %13360 = vst [vmem:[#allocation152_spill] sm:$0xff] %v10246_v35  ;;  %v10248_v10 = vpop.f32.mrf.mxu0  ;;  %v10250_v32 = vpop.f32.mrf.mxu1 }
 0x4a2   :  { %13361 = vst [vmem:[#allocation221_spill] sm:$0xff] %v10248_v10 }
 0x4a3   :  { %13362 = vst [vmem:[#allocation158_spill] sm:$0xff] %v10250_v32 }
 0x4a4   :  { %3772 = vmatmul.bf16.gmra.mxu0 %v13364_v50  ;;  %7948 = vmatmul.msk.bf16.gmra.mxu1 %vm2617_vm0, %v13365_v52  ;;  %v13375_v52 = vld [vmem:[#allocation138_spill] sm:$0xff] }
 0x4a5   :  { %3950 = vmatmul.bf16.gmra.mxu2 %v13279_v46  ;;  %v10265_v10 = vpop.f32.mrf.mxu3  ;;  %v13376_v46 = vld [vmem:[#allocation139_spill] sm:$0xff] }
 0x4a6   :  { %13370 = vst [vmem:[#allocation164_spill] sm:$0xff] %v10265_v10  ;;  %v8437_v10 = vld [vmem:[#allocation5 + $0x2f4] sm:$0xf0] }
 0x4a8   :  { %v10259_v40 = vpop.f32.mrf.mxu2 }
 0x4a9   :  { %13367 = vst [vmem:[#allocation50_spill] sm:$0xff] %v10259_v40  ;;  %v10261_v31 = vpop.f32.mrf.mxu0  ;;  %v10263_v35 = vpop.f32.mrf.mxu1  ;;  %v8470_v40 = vld [vmem:[#allocation5 + $0x404] sm:$0xf] }
 0x4aa   :  { %13368 = vst [vmem:[#allocation222_spill] sm:$0xff] %v10261_v31  ;;  %v7658_v31 = vld [vmem:[#allocation5 + $0x410] sm:$0xf0] }
 0x4ab   :  { %13369 = vst [vmem:[#allocation159_spill] sm:$0xff] %v10263_v35  ;;  %v13377_v35 = vld [vmem:[#allocation95_spill] sm:$0xff]  ;;  %v7661_v6 = vor.u32 %v8470_v40, %v7658_v31 }
 0x4ac   :  { %v13385_v31 = vld [vmem:[#allocation147_spill] sm:$0xff] }
 0x4ad   :  { %v10273_v16 = vpop.f32.mrf.mxu3  ;;  %3652 = vmatpush.bf16.msrb.mxu3 %v7661_v6  ;;  %v13386_v6 = vld [vmem:[#allocation105_spill] sm:$0xff] }
 0x4ae   :  { %13374 = vst [vmem:[#allocation61_spill] sm:$0xff] %v10273_v16 }
 0x4b0   :  { %v10267_v32 = vpop.f32.mrf.mxu2  ;;  %3367 = vmatmul.bf16.gmra.mxu3 %v13377_v35 }
 0x4b1   :  { %13371 = vst [vmem:[#allocation161_spill] sm:$0xff] %v10267_v32  ;;  %v10269_v8 = vpop.f32.mrf.mxu0  ;;  %v10271_v50 = vpop.f32.mrf.mxu1 }
 0x4b2   :  { %13372 = vst [vmem:[#allocation60_spill] sm:$0xff] %v10269_v8 }
 0x4b3   :  { %13373 = vst [vmem:[#allocation224_spill] sm:$0xff] %v10271_v50 }
 0x4b4   :  { %3777 = vmatmul.bf16.gmra.mxu0 %v13375_v52  ;;  %7949 = vmatmul.msk.bf16.gmra.mxu1 %vm2617_vm0, %v13376_v46 }
 0x4b5   :  { %3955 = vmatmul.bf16.gmra.mxu2 %v13299_v62  ;;  %v10286_v8 = vpop.f32.mrf.mxu3 }
 0x4b6   :  { %13381 = vst [vmem:[#allocation64_spill] sm:$0xff] %v10286_v8 }
 0x4b8   :  { %v10280_v9 = vpop.f32.mrf.mxu2 }
 0x4b9   :  { %13378 = vst [vmem:[#allocation65_spill] sm:$0xff] %v10280_v9  ;;  %v10282_v32 = vpop.f32.mrf.mxu0  ;;  %v10284_v50 = vpop.f32.mrf.mxu1 }
 0x4ba   :  { %13379 = vst [vmem:[#allocation225_spill] sm:$0xff] %v10282_v32 }
 0x4bb   :  { %13380 = vst [vmem:[#allocation62_spill] sm:$0xff] %v10284_v50 }
 0x4bd   :  { %v10294_v62 = vpop.f32.mrf.mxu3 }
 0x4be   :  { %13383 = vst [vmem:[#allocation227_spill] sm:$0xff] %v10294_v62 }
 0x4c0   :  { %v10288_v52 = vpop.f32.mrf.mxu2  ;;  %3372 = vmatmul.bf16.gmra.mxu3 %v13386_v6 }
 0x4c1   :  { %13382 = vst [vmem:[#allocation162_spill] sm:$0xff] %v10288_v52  ;;  %v10290_v0 = vpop.f32.mrf.mxu0  ;;  %v10292_v46 = vpop.f32.mrf.mxu1 }
 0x4c4   :  { %3782 = vmatmul.bf16.gmra.mxu0 %v13384_v27  ;;  %7950 = vmatmul.msk.bf16.gmra.mxu1 %vm2617_vm0, %v13385_v31  ;;  %v13391_v31 = vld [vmem:[#allocation154_spill] sm:$0xff] }
 0x4c5   :  { %3960 = vmatmul.bf16.gmra.mxu2 %v13316_v14  ;;  %v10307_v9 = vpop.f32.mrf.mxu3  ;;  %v13392_v14 = vld [vmem:[#allocation156_spill] sm:$0xff] }
 0x4c6   :  { %13388 = vst [vmem:[#allocation229_spill] sm:$0xff] %v10307_v9 }
 0x4c8   :  { %v10301_v40 = vpop.f32.mrf.mxu2 }
 0x4c9   :  { %13387 = vst [vmem:[#allocation228_spill] sm:$0xff] %v10301_v40  ;;  %v10303_v50 = vpop.f32.mrf.mxu0  ;;  %v10305_v52 = vpop.f32.mrf.mxu1  ;;  %v7392_v40 = vld [vmem:[#allocation5 + $0x1e8] sm:$0xf] }
 0x4ca   :  { %v7393_v9 = vor.u32 %v8405_v48, %v7392_v40  ;;  %v13399_v48 = vld [vmem:[#allocation168_spill] sm:$0xff] }
 0x4cc   :  { %4001 = vmatpush.bf16.msra.mxu3 %v7393_v9  ;;  %v13400_v9 = vld [vmem:[#allocation86_spill] sm:$0xff] }
 0x4cd   :  { %v10315_v37 = vpop.f32.mrf.mxu3 }
 0x4ce   :  { %13390 = vst [vmem:[#allocation231_spill] sm:$0xff] %v10315_v37 }
 0x4d0   :  { %v10309_v32 = vpop.f32.mrf.mxu2  ;;  %3653 = vmatmul.bf16.vlgmr.msrb.gmra.mxu3 %v13393_v54 }
 0x4d1   :  { %13389 = vst [vmem:[#allocation230_spill] sm:$0xff] %v10309_v32  ;;  %v10311_v51 = vpop.f32.mrf.mxu0  ;;  %v10313_v27 = vpop.f32.mrf.mxu1 }
 0x4d4   :  { %3787 = vmatmul.bf16.gmra.mxu0 %v13391_v31  ;;  %7951 = vmatmul.msk.bf16.gmra.mxu1 %vm2617_vm0, %v13392_v14 }
 0x4d5   :  { %3965 = vmatmul.bf16.gmra.mxu2 %v13328_v5  ;;  %v10328_v37 = vpop.f32.mrf.mxu3 }
 0x4d6   :  { %13395 = vst [vmem:[#allocation233_spill] sm:$0xff] %v10328_v37 }
 0x4d8   :  { %v10322_v62 = vpop.f32.mrf.mxu2 }
 0x4d9   :  { %13394 = vst [vmem:[#allocation232_spill] sm:$0xff] %v10322_v62  ;;  %v10324_v32 = vpop.f32.mrf.mxu0  ;;  %v10326_v20 = vpop.f32.mrf.mxu1 }
 0x4dd   :  { %v10336_v5 = vpop.f32.mrf.mxu3 }
 0x4de   :  { %13397 = vst [vmem:[#allocation235_spill] sm:$0xff] %v10336_v5 }
 0x4e0   :  { %v10330_v31 = vpop.f32.mrf.mxu2  ;;  %3658 = vmatmul.bf16.gmra.mxu3 %v13400_v9 }
 0x4e1   :  { %13396 = vst [vmem:[#allocation234_spill] sm:$0xff] %v10330_v31  ;;  %v10332_v19 = vpop.f32.mrf.mxu0  ;;  %v10334_v14 = vpop.f32.mrf.mxu1 }
 0x4e4   :  { %3792 = vmatmul.bf16.gmra.mxu0 %v13398_v57  ;;  %7952 = vmatmul.msk.bf16.gmra.mxu1 %vm2617_vm0, %v13399_v48  ;;  %v13407_v48 = vld [vmem:[#allocation178_spill] sm:$0xff] }
 0x4e5   :  { %3970 = vmatmul.bf16.gmra.mxu2 %v13337_v1  ;;  %v10349_v37 = vpop.f32.mrf.mxu3  ;;  %v13408_v1 = vld [vmem:[#allocation180_spill] sm:$0xff] }
 0x4e6   :  { %13402 = vst [vmem:[#allocation237_spill] sm:$0xff] %v10349_v37 }
 0x4e8   :  { %v10343_v40 = vpop.f32.mrf.mxu2 }
 0x4e9   :  { %13401 = vst [vmem:[#allocation236_spill] sm:$0xff] %v10343_v40  ;;  %v10345_v62 = vpop.f32.mrf.mxu0  ;;  %v10347_v31 = vpop.f32.mrf.mxu1  ;;  %v7376_v40 = vld [vmem:[#allocation5 + $0x1c8] sm:$0xf] }
 0x4ea   :  { %v7377_v37 = vor.u32 %v8401_v47, %v7376_v40  ;;  %v7648_v47 = vld [vmem:[#allocation5 + $0x3e8] sm:$0xf]  ;;  %v13418_v40 = vld [vmem:[#allocation192_spill] sm:$0xff] }
 0x4ec   :  { %4002 = vmatpush.bf16.msra.mxu3 %v7377_v37  ;;  %v13419_v37 = vld [vmem:[#allocation193_spill] sm:$0xff] }
 0x4ed   :  { %v10357_v4 = vpop.f32.mrf.mxu3 }
 0x4ee   :  { %13406 = vst [vmem:[#allocation241_spill] sm:$0xff] %v10357_v4 }
 0x4f0   :  { %v10351_v8 = vpop.f32.mrf.mxu2  ;;  %3663 = vmatmul.bf16.gmra.mxu3 %v13409_v2 }
 0x4f1   :  { %13403 = vst [vmem:[#allocation238_spill] sm:$0xff] %v10351_v8  ;;  %v10353_v5 = vpop.f32.mrf.mxu0  ;;  %v10355_v57 = vpop.f32.mrf.mxu1 }
 0x4f2   :  { %13404 = vst [vmem:[#allocation239_spill] sm:$0xff] %v10353_v5 }
 0x4f3   :  { %13405 = vst [vmem:[#allocation240_spill] sm:$0xff] %v10355_v57  ;;  %v7632_v57 = vld [vmem:[#allocation5 + $0x3c8] sm:$0xf] }
 0x4f4   :  { %3797 = vmatmul.bf16.gmra.mxu0 %v13407_v48  ;;  %7953 = vmatmul.msk.bf16.gmra.mxu1 %vm2617_vm0, %v13408_v1 }
 0x4f5   :  { %3975 = vmatmul.bf16.gmra.mxu2 %v13346_v11  ;;  %v10370_v4 = vpop.f32.mrf.mxu3 }
 0x4f6   :  { %13413 = vst [vmem:[#allocation244_spill] sm:$0xff] %v10370_v4  ;;  %v8501_v4 = vld [vmem:[#allocation5 + $0x4f4] sm:$0xf0] }
 0x4f8   :  { %v10364_v16 = vpop.f32.mrf.mxu2 }
 0x4f9   :  { %13410 = vst [vmem:[#allocation97_spill] sm:$0xff] %v10364_v16  ;;  %v10366_v8 = vpop.f32.mrf.mxu0  ;;  %v10368_v33 = vpop.f32.mrf.mxu1  ;;  %v7521_v16 = vor.u32 %v8437_v10, %v7520_v26  ;;  %v7760_v26 = vld [vmem:[#allocation5 + $0x4c8] sm:$0xf]  ;;  %v8497_v10 = vld [vmem:[#allocation5 + $0x4d4] sm:$0xf0] }
 0x4fa   :  { %13411 = vst [vmem:[#allocation242_spill] sm:$0xff] %v10366_v8  ;;  %v13420_v8 = vld [vmem:[#allocation110_spill] sm:$0xff] }
 0x4fb   :  { %13412 = vst [vmem:[#allocation243_spill] sm:$0xff] %v10368_v33  ;;  %v7776_v33 = vld [vmem:[#allocation5 + $0x4e8] sm:$0xf]  ;;  %4090 = vmatpush.bf16.msra.mxu0 %v7521_v16 }
 0x4fc   :  { %v7616_v16 = vld [vmem:[#allocation5 + $0x3a8] sm:$0xf] }
 0x4fd   :  { %v10378_v11 = vpop.f32.mrf.mxu3 }
 0x4fe   :  { %13417 = vst [vmem:[#allocation248_spill] sm:$0xff] %v10378_v11  ;;  %v7504_v11 = vld [vmem:[#allocation5 + $0x2c8] sm:$0xf] }
 0x500   :  { %v10372_v48 = vpop.f32.mrf.mxu2  ;;  %3668 = vmatmul.bf16.gmra.mxu3 %v13420_v8 }
 0x501   :  { %13414 = vst [vmem:[#allocation245_spill] sm:$0xff] %v10372_v48  ;;  %v10374_v42 = vpop.f32.mrf.mxu0  ;;  %v10376_v1 = vpop.f32.mrf.mxu1  ;;  %v7649_v48 = vor.u32 %v8469_v21, %v7648_v47  ;;  %v8429_v47 = vld [vmem:[#allocation5 + $0x2b4] sm:$0xf0] }
 0x502   :  { %13415 = vst [vmem:[#allocation246_spill] sm:$0xff] %v10374_v42  ;;  %v7777_v42 = vor.u32 %v8501_v4, %v7776_v33  ;;  %v7761_v33 = vor.u32 %v8497_v10, %v7760_v26  ;;  %v7488_v4 = vld [vmem:[#allocation5 + $0x2a8] sm:$0xf] }
 0x503   :  { %13416 = vst [vmem:[#allocation247_spill] sm:$0xff] %v10376_v1  ;;  %4179 = vmatpush.bf16.msra.mxu1 %v7649_v48  ;;  %v8433_v1 = vld [vmem:[#allocation5 + $0x2d4] sm:$0xf0] }
 0x504   :  { %3802 = vmatmul.bf16.gmra.mxu0 %v13418_v40  ;;  %7954 = vmatmul.msk.bf16.gmra.mxu1 %vm2617_vm0, %v13419_v37  ;;  %v7505_v56 = vor.u32 %v8433_v1, %v7504_v11  ;;  %v8465_v37 = vld [vmem:[#allocation5 + $0x3d4] sm:$0xf0] }
 0x505   :  { %3980 = vmatmul.bf16.gmra.mxu2 %v13355_v45  ;;  %v7633_v21 = vor.u32 %v8465_v37, %v7632_v57  ;;  %v10391_v48 = vpop.f32.mrf.mxu3  ;;  %v8461_v45 = vld [vmem:[#allocation5 + $0x3b4] sm:$0xf0]  ;;  %v7600_v37 = vld [vmem:[#allocation5 + $0x388] sm:$0xf] }
 0x506   :  { %4268 = vmatpush.bf16.msra.mxu2 %v7777_v42  ;;  %13424 = vst [vmem:[#allocation252_spill] sm:$0xff] %v10391_v48  ;;  %4091 = vmatpush.bf16.msra.mxu0 %v7505_v56  ;;  %v7489_v42 = vor.u32 %v8429_v47, %v7488_v4  ;;  %v7617_v1 = vor.u32 %v8461_v45, %v7616_v16  ;;  %v8425_v57 = vld [vmem:[#allocation5 + $0x294] sm:$0xf0]  ;;  %v7728_v48 = vld [vmem:[#allocation5 + $0x488] sm:$0xf] }
 0x507   :  { %4180 = vmatpush.bf16.msra.mxu1 %v7633_v21  ;;  %v8489_v56 = vld [vmem:[#allocation5 + $0x494] sm:$0xf0]  ;;  %v7584_v16 = vld [vmem:[#allocation5 + $0x368] sm:$0xf] }
 0x508   :  { %v10385_v40 = vpop.f32.mrf.mxu2 }
 0x509   :  { %13421 = vst [vmem:[#allocation249_spill] sm:$0xff] %v10385_v40  ;;  %v10387_v5 = vpop.f32.mrf.mxu0  ;;  %v10389_v22 = vpop.f32.mrf.mxu1  ;;  %v8493_v40 = vld [vmem:[#allocation5 + $0x4b4] sm:$0xf0] }
 0x50a   :  { %13422 = vst [vmem:[#allocation250_spill] sm:$0xff] %v10387_v5  ;;  %4269 = vmatpush.bf16.msra.mxu2 %v7761_v33  ;;  %v7745_v11 = vor.u32 %v8493_v40, %v7744_v3  ;;  %4092 = vmatpush.bf16.msra.mxu0 %v7489_v42  ;;  %v8457_v5 = vld [vmem:[#allocation5 + $0x394] sm:$0xf0]  ;;  %v7729_v33 = vor.u32 %v8489_v56, %v7728_v48  ;;  %v7456_v3 = vld [vmem:[#allocation5 + $0x268] sm:$0xf] }
 0x50b   :  { %13423 = vst [vmem:[#allocation251_spill] sm:$0xff] %v10389_v22  ;;  %4181 = vmatpush.bf16.msra.mxu1 %v7617_v1  ;;  %v7472_v22 = vld [vmem:[#allocation5 + $0x288] sm:$0xf]  ;;  %v7601_v21 = vor.u32 %v8457_v5, %v7600_v37  ;;  %v8421_v40 = vld [vmem:[#allocation5 + $0x274] sm:$0xf0] }
 0x50c   :  { %v7473_v10 = vor.u32 %v8425_v57, %v7472_v22  ;;  %v13429_v42 = vld [vmem:[#allocation203_spill] sm:$0xff]  ;;  %v13430_v22 = vld [vmem:[#allocation204_spill] sm:$0xff]  ;;  %v7457_v1 = vor.u32 %v8421_v40, %v7456_v3  ;;  %v7712_v57 = vld [vmem:[#allocation5 + $0x468] sm:$0xf] }
 0x50d   :  { %v10399_v45 = vpop.f32.mrf.mxu3  ;;  %v7360_v5 = vld [vmem:[#allocation5 + $0x1a8] sm:$0xf]  ;;  %v8397_v48 = vld [vmem:[#allocation5 + $0x1b4] sm:$0xf0] }
 0x50e   :  { %4270 = vmatpush.bf16.msra.mxu2 %v7745_v11  ;;  %13428 = vst [vmem:[#allocation256_spill] sm:$0xff] %v10399_v45  ;;  %4093 = vmatpush.bf16.msra.mxu0 %v7473_v10  ;;  %v8453_v11 = vld [vmem:[#allocation5 + $0x374] sm:$0xf0]  ;;  %v7568_v45 = vld [vmem:[#allocation5 + $0x348] sm:$0xf] }
 0x50f   :  { %4182 = vmatpush.bf16.msra.mxu1 %v7601_v21  ;;  %v7585_v37 = vor.u32 %v8453_v11, %v7584_v16  ;;  %v13431_v56 = vld [vmem:[#allocation119_spill] sm:$0xff]  ;;  %v7361_v21 = vor.u32 %v8397_v48, %v7360_v5  ;;  %v7552_v5 = vld [vmem:[#allocation5 + $0x328] sm:$0xf] }
 0x510   :  { %v10393_v26 = vpop.f32.mrf.mxu2  ;;  %3673 = vmatmul.bf16.gmra.mxu3 %v13431_v56  ;;  %v8449_v40 = vld [vmem:[#allocation5 + $0x354] sm:$0xf0] }
 0x511   :  { %13425 = vst [vmem:[#allocation253_spill] sm:$0xff] %v10393_v26  ;;  %v10395_v4 = vpop.f32.mrf.mxu0  ;;  %v10397_v47 = vpop.f32.mrf.mxu1  ;;  %v8485_v26 = vld [vmem:[#allocation5 + $0x474] sm:$0xf0]  ;;  %4003 = vmatpush.bf16.msra.mxu3 %v7361_v21 }
 0x512   :  { %13426 = vst [vmem:[#allocation254_spill] sm:$0xff] %v10395_v4  ;;  %4271 = vmatpush.bf16.msra.mxu2 %v7729_v33  ;;  %v7713_v10 = vor.u32 %v8485_v26, %v7712_v57  ;;  %4094 = vmatpush.bf16.msra.mxu0 %v7457_v1  ;;  %v7440_v33 = vld [vmem:[#allocation5 + $0x248] sm:$0xf]  ;;  %v7569_v26 = vor.u32 %v8449_v40, %v7568_v45  ;;  %v8413_v1 = vld [vmem:[#allocation5 + $0x234] sm:$0xf0] }
 0x513   :  { %13427 = vst [vmem:[#allocation255_spill] sm:$0xff] %v10397_v47  ;;  %4183 = vmatpush.bf16.msra.mxu1 %v7585_v37  ;;  %v7696_v47 = vld [vmem:[#allocation5 + $0x448] sm:$0xf]  ;;  %v8477_v21 = vld [vmem:[#allocation5 + $0x434] sm:$0xf0] }
 0x514   :  { %3807 = vmatmul.bf16.gmra.mxu0 %v13429_v42  ;;  %7955 = vmatmul.msk.bf16.gmra.mxu1 %vm2617_vm0, %v13430_v22  ;;  %v8417_v42 = vld [vmem:[#allocation5 + $0x254] sm:$0xf0]  ;;  %v7424_v57 = vld [vmem:[#allocation5 + $0x228] sm:$0xf] }
 0x515   :  { %3985 = vmatmul.bf16.gmra.mxu2 %v13366_v23  ;;  %v7441_v3 = vor.u32 %v8417_v42, %v7440_v33  ;;  %v8481_v23 = vld [vmem:[#allocation5 + $0x454] sm:$0xf0]  ;;  %v10412_v48 = vpop.f32.mrf.mxu3  ;;  %v7425_v37 = vor.u32 %v8413_v1, %v7424_v57 }
 0x516   :  { %4272 = vmatpush.bf16.msra.mxu2 %v7713_v10  ;;  %v7697_v11 = vor.u32 %v8481_v23, %v7696_v47  ;;  %13435 = vst [vmem:[#allocation260_spill] sm:$0xff] %v10412_v48  ;;  %v8445_v10 = vld [vmem:[#allocation5 + $0x334] sm:$0xf0]  ;;  %v7536_v23 = vld [vmem:[#allocation5 + $0x308] sm:$0xf] }
 0x517   :  { %4095 = vmatpush.bf16.msra.mxu0 %v7441_v3  ;;  %4184 = vmatpush.bf16.msra.mxu1 %v7569_v26  ;;  %v7553_v42 = vor.u32 %v8445_v10, %v7552_v5  ;;  %v8409_v45 = vld [vmem:[#allocation5 + $0x214] sm:$0xf0]  ;;  %v7664_v48 = vld [vmem:[#allocation5 + $0x408] sm:$0xf] }
 0x518   :  { %v10406_v22 = vpop.f32.mrf.mxu2  ;;  %v8473_v3 = vld [vmem:[#allocation5 + $0x414] sm:$0xf0] }
 0x519   :  { %13432 = vst [vmem:[#allocation257_spill] sm:$0xff] %v10406_v22  ;;  %v10408_v4 = vpop.f32.mrf.mxu0  ;;  %v10410_v16 = vpop.f32.mrf.mxu1  ;;  %v7680_v22 = vld [vmem:[#allocation5 + $0x428] sm:$0xf] }
 0x51a   :  { %13433 = vst [vmem:[#allocation258_spill] sm:$0xff] %v10408_v4  ;;  %4273 = vmatpush.bf16.msra.mxu2 %v7697_v11  ;;  %v7681_v33 = vor.u32 %v8477_v21, %v7680_v22  ;;  %v8441_v4 = vld [vmem:[#allocation5 + $0x314] sm:$0xf0]  ;;  %v7665_v11 = vor.u32 %v8473_v3, %v7664_v48  ;;  %v13438_v22 = vld [vmem:[#allocation212_spill] sm:$0xff] }
 0x51b   :  { %13434 = vst [vmem:[#allocation259_spill] sm:$0xff] %v10410_v16  ;;  %4096 = vmatpush.bf16.msra.mxu0 %v7425_v37  ;;  %4185 = vmatpush.bf16.msra.mxu1 %v7553_v42  ;;  %v7408_v16 = vld [vmem:[#allocation5 + $0x208] sm:$0xf]  ;;  %v7537_v26 = vor.u32 %v8441_v4, %v7536_v23  ;;  %v13446_v3 = vld [vmem:[#allocation219_spill] sm:$0xff] }
 0x51c   :  { %v7409_v40 = vor.u32 %v8409_v45, %v7408_v16  ;;  %v13439_v37 = vld [vmem:[#allocation213_spill] sm:$0xff]  ;;  %v13440_v16 = vld [vmem:[#allocation126_spill] sm:$0xff] }
 0x51d   :  { %v10420_v5 = vpop.f32.mrf.mxu3 }
 0x51e   :  { %4274 = vmatpush.bf16.msra.mxu2 %v7681_v33  ;;  %13437 = vst [vmem:[#allocation262_spill] sm:$0xff] %v10420_v5 }
 0x51f   :  { %4097 = vmatpush.bf16.msra.mxu0 %v7409_v40  ;;  %4186 = vmatpush.bf16.msra.mxu1 %v7537_v26  ;;  %v13445_v40 = vld [vmem:[#allocation218_spill] sm:$0xff]  ;;  %v7344_v26 = vld [vmem:[#allocation5 + $0x188] sm:$0xf] }
 0x520   :  { %v10414_v47 = vpop.f32.mrf.mxu2  ;;  %3678 = vmatmul.bf16.gmra.mxu3 %v13440_v16 }
 0x521   :  { %13436 = vst [vmem:[#allocation261_spill] sm:$0xff] %v10414_v47  ;;  %v10416_v57 = vpop.f32.mrf.mxu0  ;;  %v10418_v1 = vpop.f32.mrf.mxu1 }
 0x522   :  { %4275 = vmatpush.bf16.msra.mxu2 %v7665_v11  ;;  %v8393_v11 = vld [vmem:[#allocation5 + $0x194] sm:$0xf0] }
 0x524   :  { %3812 = vmatmul.bf16.gmra.mxu0 %v13438_v22  ;;  %7956 = vmatmul.msk.bf16.gmra.mxu1 %vm2617_vm0, %v13439_v37  ;;  %v13447_v22 = vld [vmem:[#allocation132_spill] sm:$0xff] }
 0x525   :  { %3990 = vmatmul.bf16.gmra.mxu2 %v13377_v35  ;;  %v10433_v48 = vpop.f32.mrf.mxu3 }
 0x526   :  { %13442 = vst [vmem:[#allocation264_spill] sm:$0xff] %v10433_v48  ;;  %v13456_v48 = vld [vmem:[#allocation18_spill] sm:$0xff] }
 0x528   :  { %v10427_v10 = vpop.f32.mrf.mxu2 }
 0x529   :  { %13441 = vst [vmem:[#allocation263_spill] sm:$0xff] %v10427_v10  ;;  %v10429_v21 = vpop.f32.mrf.mxu0  ;;  %v10431_v4 = vpop.f32.mrf.mxu1  ;;  %v7345_v10 = vor.u32 %v8393_v11, %v7344_v26  ;;  %v13457_v26 = vld [vmem:[#allocation163_spill] sm:$0xff] }
 0x52b   :  { %4004 = vmatpush.bf16.msra.mxu3 %v7345_v10  ;;  %v13458_v10 = vld [vmem:[#allocation137_spill] sm:$0xff] }
 0x52d   :  { %v10441_v23 = vpop.f32.mrf.mxu3 }
 0x52e   :  { %13444 = vst [vmem:[#allocation266_spill] sm:$0xff] %v10441_v23 }
 0x530   :  { %v10435_v42 = vpop.f32.mrf.mxu2  ;;  %3683 = vmatmul.bf16.gmra.mxu3 %v13447_v22 }
 0x531   :  { %13443 = vst [vmem:[#allocation265_spill] sm:$0xff] %v10435_v42  ;;  %v10437_v33 = vpop.f32.mrf.mxu0  ;;  %v10439_v45 = vpop.f32.mrf.mxu1 }
 0x534   :  { %3817 = vmatmul.bf16.gmra.mxu0 %v13445_v40  ;;  %7957 = vmatmul.msk.bf16.gmra.mxu1 %vm2617_vm0, %v13446_v3 }
 0x535   :  { %3995 = vmatmul.bf16.gmra.mxu2 %v13386_v6  ;;  %v10454_v37 = vpop.f32.mrf.mxu3 }
 0x536   :  { %13451 = vst [vmem:[#allocation270_spill] sm:$0xff] %v10454_v37 }
 0x538   :  { %v10448_v47 = vpop.f32.mrf.mxu2 }
 0x539   :  { %13448 = vst [vmem:[#allocation267_spill] sm:$0xff] %v10448_v47  ;;  %v10450_v42 = vpop.f32.mrf.mxu0  ;;  %v10452_v35 = vpop.f32.mrf.mxu1 }
 0x53a   :  { %13449 = vst [vmem:[#allocation268_spill] sm:$0xff] %v10450_v42 }
 0x53b   :  { %13450 = vst [vmem:[#allocation269_spill] sm:$0xff] %v10452_v35 }
 0x53d   :  { %v10462_v6 = vpop.f32.mrf.mxu3 }
 0x53e   :  { %13455 = vst [vmem:[#allocation274_spill] sm:$0xff] %v10462_v6  ;;  %v3388_v6 = vadd.f32 %v9884_v24, %v10158_v44  ;;  %v13471_v44 = vld [vmem:[#allocation173_spill] sm:$0xff] }
 0x540   :  { %v10456_v40 = vpop.f32.mrf.mxu2  ;;  %3688 = vmatmul.bf16.gmra.mxu3 %v13458_v10 }
 0x541   :  { %13452 = vst [vmem:[#allocation271_spill] sm:$0xff] %v10456_v40  ;;  %v10458_v23 = vpop.f32.mrf.mxu0  ;;  %v10460_v3 = vpop.f32.mrf.mxu1 }
 0x542   :  { %13453 = vst [vmem:[#allocation272_spill] sm:$0xff] %v10458_v23 }
 0x543   :  { %13454 = vst [vmem:[#allocation273_spill] sm:$0xff] %v10460_v3  ;;  %v13467_v3 = vld [vmem:[#allocation21_spill] sm:$0xff] }
 0x544   :  { %4098 = vmatmul.bf16.vlgmr.msra.gmra.mxu0 %v13456_v48  ;;  %4187 = vmatmul.bf16.vlgmr.msra.gmra.mxu1 %v13457_v26 }
 0x545   :  { %4276 = vmatmul.bf16.vlgmr.msra.gmra.mxu2 %v13393_v54  ;;  %v10474_v40 = vpop.f32.mrf.mxu3 }
 0x546   :  { %13462 = vst [vmem:[#allocation278_spill] sm:$0xff] %v10474_v40  ;;  %v7328_v40 = vld [vmem:[#allocation5 + $0x168] sm:$0xf] }
 0x548   :  { %v10468_v11 = vpop.f32.mrf.mxu2 }
 0x549   :  { %13459 = vst [vmem:[#allocation275_spill] sm:$0xff] %v10468_v11  ;;  %v10470_v47 = vpop.f32.mrf.mxu0  ;;  %v10472_v37 = vpop.f32.mrf.mxu1  ;;  %v13468_v11 = vld [vmem:[#allocation175_spill] sm:$0xff] }
 0x54a   :  { %13460 = vst [vmem:[#allocation276_spill] sm:$0xff] %v10470_v47  ;;  %v3477_v47 = vadd.f32 %v9886_v28, %v3388_v6 }
 0x54b   :  { %13461 = vst [vmem:[#allocation277_spill] sm:$0xff] %v10472_v37  ;;  %v8389_v37 = vld [vmem:[#allocation5 + $0x174] sm:$0xf0] }
 0x54c   :  { %v7329_v23 = vor.u32 %v8389_v37, %v7328_v40  ;;  %v3393_v37 = vadd.f32 %v9915_v53, %v10181_v30 }
 0x54d   :  { %v10484_v54 = vpop.f32.mrf.mxu3 }
 0x54e   :  { %13466 = vst [vmem:[#allocation282_spill] sm:$0xff] %v10484_v54  ;;  %4005 = vmatpush.bf16.msra.mxu3 %v7329_v23 }
 0x550   :  { %v10476_v5 = vpop.f32.mrf.mxu2 }
 0x551   :  { %13463 = vst [vmem:[#allocation279_spill] sm:$0xff] %v10476_v5  ;;  %v10480_v48 = vpop.f32.mrf.mxu0  ;;  %v10482_v26 = vpop.f32.mrf.mxu1  ;;  %v13469_v5 = vld [vmem:[#allocation145_spill] sm:$0xff] }
 0x552   :  { %13464 = vst [vmem:[#allocation280_spill] sm:$0xff] %v10480_v48  ;;  %3693 = vmatmul.bf16.gmra.mxu3 %v13469_v5 }
 0x553   :  { %13465 = vst [vmem:[#allocation281_spill] sm:$0xff] %v10482_v26  ;;  %v3390_v26 = vadd.f32 %v13471_v44, %v10168_v41 }
 0x554   :  { %4103 = vmatmul.bf16.gmra.mxu0 %v13467_v3  ;;  %4192 = vmatmul.bf16.gmra.mxu1 %v13468_v11  ;;  %v13473_v11 = vld [vmem:[#allocation170_spill] sm:$0xff] }
 0x555   :  { %4281 = vmatmul.bf16.gmra.mxu2 %v13400_v9  ;;  %v3566_v48 = vadd.f32 %v13473_v11, %v3477_v47  ;;  %v3654_v28 = vpop.f32.mrf.mxu3  ;;  %v13474_v9 = vld [vmem:[#allocation171_spill] sm:$0xff]  ;;  %v13476_v47 = vld [vmem:[#allocation24_spill] sm:$0xff] }
 0x556   :  { %v3479_v35 = vadd.f32 %v13474_v9, %v3390_v26  ;;  %v3482_v9 = vadd.f32 %v9917_v63, %v3393_v37  ;;  %v13478_v26 = vld [vmem:[#allocation153_spill] sm:$0xff] }
 0x557   :  { %v3655_v6 = vadd.f32 %v3654_v28, %v3566_v48  ;;  %v13477_v48 = vld [vmem:[#allocation187_spill] sm:$0xff] }
 0x558   :  { %v10491_v24 = vpop.f32.mrf.mxu2  ;;  %v3568_v44 = vadd.f32 %v9912_v61, %v3479_v35  ;;  %v3395_v61 = vadd.f32 %v9929_v12, %v10189_v36 }
 0x559   :  { %13470 = vst [vmem:[#allocation283_spill] sm:$0xff] %v10491_v24  ;;  %v10495_v54 = vpop.f32.mrf.mxu0  ;;  %v10497_v3 = vpop.f32.mrf.mxu1  ;;  %v3744_v41 = vadd.f32 %v10290_v0, %v3655_v6  ;;  %v13480_v6 = vld [vmem:[#allocation70_spill] sm:$0xff] }
 0x55a   :  { %13472 = vst [vmem:[#allocation173_spill] sm:$0xff] %v10497_v3  ;;  %v3571_v37 = vadd.f32 %v13480_v6, %v3482_v9 }
 0x55b   :  { %v3833_v53 = vadd.f32 %v10292_v46, %v3744_v41 }
 0x55d   :  { %v3656_v24 = vpop.f32.mrf.mxu3  ;;  %v5159_v63 = vmax.f32 %v3833_v53, 0.0 }
 0x55e   :  { %v3657_v3 = vadd.f32 %v3656_v24, %v3568_v44 }
 0x560   :  { %v10501_v42 = vpop.f32.mrf.mxu2  ;;  %v3746_v30 = vadd.f32 %v10303_v50, %v3657_v3  ;;  %v13482_v3 = vld [vmem:[#allocation74_spill] sm:$0xff] }
 0x561   :  { %13475 = vst [vmem:[#allocation170_spill] sm:$0xff] %v10501_v42  ;;  %v10505_v40 = vpop.f32.mrf.mxu0  ;;  %v10507_v23 = vpop.f32.mrf.mxu1  ;;  %v3484_v44 = vadd.f32 %v13482_v3, %v3395_v61  ;;  %v13486_v3 = vld [vmem:[#allocation166_spill] sm:$0xff] }
 0x562   :  { %3698 = vmatmul.bf16.gmra.mxu3 %v13478_v26  ;;  %v3835_v0 = vadd.f32 %v10305_v52, %v3746_v30  ;;  %v3398_v30 = vadd.f32 %v9943_v58, %v10202_v60  ;;  %v13534_v42 = vld [vmem:[#allocation254_spill] sm:$0xff] }
 0x564   :  { %4108 = vmatmul.bf16.gmra.mxu0 %v13476_v47  ;;  %4197 = vmatmul.bf16.gmra.mxu1 %v13477_v48  ;;  %v5163_v28 = vmax.f32 %v3835_v0, 0.0  ;;  %v3573_v0 = vadd.f32 %v9940_v43, %v3484_v44  ;;  %v3487_v61 = vadd.f32 %v9945_v18, %v3398_v30  ;;  %v3400_v44 = vadd.f32 %v9957_v49, %v10210_v13 }
 0x565   :  { %4286 = vmatmul.bf16.gmra.mxu2 %v13409_v2  ;;  %v3659_v46 = vpop.f32.mrf.mxu3 }
 0x566   :  { %v10528_v41 = vpack.c.bf16 %v5163_v28, %v5159_v63  ;;  %v3660_v50 = vadd.f32 %v3659_v46, %v3571_v37  ;;  %v13484_v63 = vld [vmem:[#allocation27_spill] sm:$0xff]  ;;  %v13485_v28 = vld [vmem:[#allocation200_spill] sm:$0xff]  ;;  %v7312_v37 = vld [vmem:[#allocation5 + $0x148] sm:$0xf] }
 0x567   :  { %v8385_v46 = vld [vmem:[#allocation5 + $0x154] sm:$0xf0] }
 0x568   :  { %v10519_v11 = vpop.f32.mrf.mxu2  ;;  %13481 = vst [vmem:[#allocation187_spill] sm:$0xff] %v10528_v41  ;;  %v3749_v53 = vadd.f32 %v10311_v51, %v3660_v50  ;;  %v7313_v51 = vor.u32 %v8385_v46, %v7312_v37  ;;  %v3403_v37 = vadd.f32 %v9971_v55, %v10223_v25  ;;  %v13505_v41 = vld [vmem:[#allocation191_spill] sm:$0xff] }
 0x569   :  { %13479 = vst [vmem:[#allocation171_spill] sm:$0xff] %v10519_v11  ;;  %v10523_v35 = vpop.f32.mrf.mxu0  ;;  %v10525_v24 = vpop.f32.mrf.mxu1 }
 0x56a   :  { %v3838_v58 = vadd.f32 %v10313_v27, %v3749_v53  ;;  %4006 = vmatpush.bf16.msra.mxu3 %v7313_v51  ;;  %v13490_v51 = vld [vmem:[#allocation30_spill] sm:$0xff] }
 0x56c   :  { %v5167_v27 = vmax.f32 %v3838_v58, 0.0 }
 0x56d   :  { %v3661_v9 = vpop.f32.mrf.mxu3 }
 0x56e   :  { %v3662_v6 = vadd.f32 %v3661_v9, %v3573_v0 }
 0x570   :  { %v10531_v52 = vpop.f32.mrf.mxu2  ;;  %v3751_v60 = vadd.f32 %v10324_v32, %v3662_v6  ;;  %v3576_v32 = vadd.f32 %v9955_v29, %v3487_v61 }
 0x571   :  { %13483 = vst [vmem:[#allocation70_spill] sm:$0xff] %v10531_v52  ;;  %v10535_v12 = vpop.f32.mrf.mxu0  ;;  %v10537_v36 = vpop.f32.mrf.mxu1 }
 0x572   :  { %3703 = vmatmul.bf16.gmra.mxu3 %v13486_v3  ;;  %v3840_v43 = vadd.f32 %v10326_v20, %v3751_v60  ;;  %v3489_v20 = vadd.f32 %v9959_v17, %v3400_v44  ;;  %v3492_v17 = vadd.f32 %v9973_v7, %v3403_v37  ;;  %v13492_v44 = vld [vmem:[#allocation177_spill] sm:$0xff] }
 0x574   :  { %4113 = vmatmul.bf16.gmra.mxu0 %v13484_v63  ;;  %4202 = vmatmul.bf16.gmra.mxu1 %v13485_v28  ;;  %v5171_v53 = vmax.f32 %v3840_v43, 0.0  ;;  %v3578_v29 = vadd.f32 %v9968_v39, %v3489_v20  ;;  %v13491_v43 = vld [vmem:[#allocation208_spill] sm:$0xff]  ;;  %v3405_v39 = vadd.f32 %v9985_v59, %v10231_v15  ;;  %v13516_v63 = vld [vmem:[#allocation246_spill] sm:$0xff] }
 0x575   :  { %4291 = vmatmul.bf16.gmra.mxu2 %v13420_v8  ;;  %v3664_v0 = vpop.f32.mrf.mxu3 }
 0x576   :  { %v3665_v9 = vadd.f32 %v3664_v0, %v3576_v32  ;;  %v10558_v6 = vpack.c.bf16 %v5171_v53, %v5167_v27  ;;  %v3581_v0 = vadd.f32 %v9983_v38, %v3492_v17  ;;  %v3494_v37 = vadd.f32 %v9987_v34, %v3405_v39  ;;  %v13502_v34 = vld [vmem:[#allocation181_spill] sm:$0xff] }
 0x578   :  { %v10549_v50 = vpop.f32.mrf.mxu2  ;;  %13488 = vst [vmem:[#allocation284_spill] sm:$0xff] %v10558_v6  ;;  %v3754_v58 = vadd.f32 %v10332_v19, %v3665_v9  ;;  %v8381_v6 = vld [vmem:[#allocation5 + $0x134] sm:$0xf0] }
 0x579   :  { %13487 = vst [vmem:[#allocation74_spill] sm:$0xff] %v10549_v50  ;;  %v10553_v18 = vpop.f32.mrf.mxu0  ;;  %v10555_v30 = vpop.f32.mrf.mxu1 }
 0x57a   :  { %v3843_v55 = vadd.f32 %v10334_v14, %v3754_v58  ;;  %v13496_v58 = vld [vmem:[#allocation157_spill] sm:$0xff] }
 0x57c   :  { %v5175_v7 = vmax.f32 %v3843_v55, 0.0 }
 0x57d   :  { %v3666_v61 = vpop.f32.mrf.mxu3 }
 0x57e   :  { %v3667_v46 = vadd.f32 %v3666_v61, %v3578_v29  ;;  %v13497_v29 = vld [vmem:[#allocation73_spill] sm:$0xff] }
 0x57f   :  { %v3408_v61 = vadd.f32 %v13497_v29, %v13496_v58  ;;  %v13504_v58 = vld [vmem:[#allocation242_spill] sm:$0xff] }
 0x580   :  { %v10561_v60 = vpop.f32.mrf.mxu2  ;;  %v3756_v25 = vadd.f32 %v10345_v62, %v3667_v46  ;;  %v13498_v46 = vld [vmem:[#allocation239_spill] sm:$0xff] }
 0x581   :  { %13489 = vst [vmem:[#allocation285_spill] sm:$0xff] %v10561_v60  ;;  %v10565_v49 = vpop.f32.mrf.mxu0  ;;  %v10567_v13 = vpop.f32.mrf.mxu1  ;;  %v3497_v39 = vadd.f32 %v13502_v34, %v3408_v61  ;;  %v13517_v60 = vld [vmem:[#allocation184_spill] sm:$0xff] }
 0x582   :  { %3708 = vmatmul.bf16.gmra.mxu3 %v13492_v44  ;;  %v3845_v19 = vadd.f32 %v10347_v31, %v3756_v25  ;;  %v13499_v25 = vld [vmem:[#allocation71_spill] sm:$0xff] }
 0x583   :  { %v3583_v38 = vadd.f32 %v13499_v25, %v3494_v37  ;;  %v13506_v37 = vld [vmem:[#allocation243_spill] sm:$0xff] }
 0x584   :  { %4118 = vmatmul.bf16.gmra.mxu0 %v13490_v51  ;;  %4207 = vmatmul.bf16.gmra.mxu1 %v13491_v43  ;;  %v5179_v9 = vmax.f32 %v3845_v19, 0.0  ;;  %v13569_v43 = vld [vmem:[#allocation17_spill] sm:$0xff] }
 0x585   :  { %4296 = vmatmul.bf16.gmra.mxu2 %v13431_v56  ;;  %v3669_v14 = vpop.f32.mrf.mxu3  ;;  %v13564_v56 = vld [vmem:[#allocation201_spill] sm:$0xff] }
 0x586   :  { %v3670_v20 = vadd.f32 %v3669_v14, %v3581_v0  ;;  %v10588_v62 = vpack.c.bf16 %v5179_v9, %v5175_v7  ;;  %v13500_v0 = vld [vmem:[#allocation33_spill] sm:$0xff]  ;;  %v13501_v7 = vld [vmem:[#allocation214_spill] sm:$0xff]  ;;  %v13503_v9 = vld [vmem:[#allocation240_spill] sm:$0xff] }
 0x588   :  { %v10579_v27 = vpop.f32.mrf.mxu2  ;;  %13494 = vst [vmem:[#allocation287_spill] sm:$0xff] %v10588_v62  ;;  %v3759_v55 = vadd.f32 %v13498_v46, %v3670_v20  ;;  %v7296_v62 = vld [vmem:[#allocation5 + $0x128] sm:$0xf] }
 0x589   :  { %13493 = vst [vmem:[#allocation286_spill] sm:$0xff] %v10579_v27  ;;  %v10583_v32 = vpop.f32.mrf.mxu0  ;;  %v10585_v53 = vpop.f32.mrf.mxu1  ;;  %v7297_v20 = vor.u32 %v8381_v6, %v7296_v62  ;;  %v13512_v6 = vld [vmem:[#allocation80_spill] sm:$0xff] }
 0x58a   :  { %v3848_v14 = vadd.f32 %v13503_v9, %v3759_v55  ;;  %v13510_v9 = vld [vmem:[#allocation79_spill] sm:$0xff] }
 0x58b   :  { %4007 = vmatpush.bf16.msra.mxu3 %v7297_v20  ;;  %v13514_v20 = vld [vmem:[#allocation164_spill] sm:$0xff] }
 0x58c   :  { %v5183_v55 = vmax.f32 %v3848_v14, 0.0 }
 0x58d   :  { %v3671_v17 = vpop.f32.mrf.mxu3 }
 0x58e   :  { %v3672_v19 = vadd.f32 %v3671_v17, %v3583_v38  ;;  %v13508_v38 = vld [vmem:[#allocation197_spill] sm:$0xff]  ;;  %v13509_v17 = vld [vmem:[#allocation182_spill] sm:$0xff] }
 0x590   :  { %v10591_v31 = vpop.f32.mrf.mxu2  ;;  %v3761_v29 = vadd.f32 %v13504_v58, %v3672_v19  ;;  %v3586_v19 = vadd.f32 %v13510_v9, %v3497_v39 }
 0x591   :  { %13495 = vst [vmem:[#allocation288_spill] sm:$0xff] %v10591_v31  ;;  %v10595_v59 = vpop.f32.mrf.mxu0  ;;  %v10597_v15 = vpop.f32.mrf.mxu1 }
 0x592   :  { %3713 = vmatmul.bf16.gmra.mxu3 %v13505_v41  ;;  %v3850_v46 = vadd.f32 %v13506_v37, %v3761_v29  ;;  %v13515_v37 = vld [vmem:[#allocation185_spill] sm:$0xff] }
 0x594   :  { %4123 = vmatmul.bf16.gmra.mxu0 %v13500_v0  ;;  %4212 = vmatmul.bf16.gmra.mxu1 %v13501_v7  ;;  %v3410_v0 = vadd.f32 %v13509_v17, %v13508_v38  ;;  %v5187_v58 = vmax.f32 %v3850_v46, 0.0  ;;  %v13552_v7 = vld [vmem:[#allocation194_spill] sm:$0xff] }
 0x595   :  { %4301 = vmatmul.bf16.gmra.mxu2 %v13440_v16  ;;  %v3674_v51 = vpop.f32.mrf.mxu3 }
 0x596   :  { %v3675_v31 = vadd.f32 %v3674_v51, %v3586_v19  ;;  %v10618_v27 = vpack.c.bf16 %v5187_v58, %v5183_v55  ;;  %v3499_v62 = vadd.f32 %v13512_v6, %v3410_v0  ;;  %v13518_v51 = vld [vmem:[#allocation36_spill] sm:$0xff]  ;;  %v13520_v0 = vld [vmem:[#allocation183_spill] sm:$0xff] }
 0x597   :  { %v13519_v55 = vld [vmem:[#allocation220_spill] sm:$0xff]  ;;  %v13521_v58 = vld [vmem:[#allocation247_spill] sm:$0xff] }
 0x598   :  { %v10609_v25 = vpop.f32.mrf.mxu2  ;;  %13511 = vst [vmem:[#allocation73_spill] sm:$0xff] %v10618_v27  ;;  %v3764_v14 = vadd.f32 %v13516_v63, %v3675_v31  ;;  %v3588_v39 = vadd.f32 %v13517_v60, %v3499_v62  ;;  %v13523_v27 = vld [vmem:[#allocation202_spill] sm:$0xff]  ;;  %v13526_v60 = vld [vmem:[#allocation61_spill] sm:$0xff] }
 0x599   :  { %13507 = vst [vmem:[#allocation157_spill] sm:$0xff] %v10609_v25  ;;  %v10613_v61 = vpop.f32.mrf.mxu0  ;;  %v10615_v34 = vpop.f32.mrf.mxu1  ;;  %v3413_v25 = vadd.f32 %v13515_v37, %v13514_v20  ;;  %v13522_v20 = vld [vmem:[#allocation250_spill] sm:$0xff] }
 0x59a   :  { %v3853_v6 = vadd.f32 %v13521_v58, %v3764_v14  ;;  %v13527_v62 = vld [vmem:[#allocation82_spill] sm:$0xff] }
 0x59b   :  { %v3502_v19 = vadd.f32 %v13520_v0, %v3413_v25  ;;  %v13528_v0 = vld [vmem:[#allocation188_spill] sm:$0xff] }
 0x59c   :  { %v5191_v25 = vmax.f32 %v3853_v6, 0.0 }
 0x59d   :  { %v3676_v46 = vpop.f32.mrf.mxu3  ;;  %v3591_v50 = vadd.f32 %v13528_v0, %v3502_v19 }
 0x59e   :  { %v3677_v9 = vadd.f32 %v3676_v46, %v3588_v39  ;;  %v3415_v39 = vadd.f32 %v13527_v62, %v13526_v60 }
 0x5a0   :  { %v10621_v29 = vpop.f32.mrf.mxu2  ;;  %v3766_v37 = vadd.f32 %v13522_v20, %v3677_v9  ;;  %v13530_v20 = vld [vmem:[#allocation81_spill] sm:$0xff] }
 0x5a1   :  { %13513 = vst [vmem:[#allocation239_spill] sm:$0xff] %v10621_v29  ;;  %v10625_v38 = vpop.f32.mrf.mxu0  ;;  %v10627_v17 = vpop.f32.mrf.mxu1  ;;  %v13524_v29 = vld [vmem:[#allocation251_spill] sm:$0xff]  ;;  %v3504_v52 = vadd.f32 %v13530_v20, %v3415_v39  ;;  %v13538_v39 = vld [vmem:[#allocation190_spill] sm:$0xff] }
 0x5a2   :  { %3718 = vmatmul.bf16.gmra.mxu3 %v13523_v27  ;;  %v3855_v63 = vadd.f32 %v13524_v29, %v3766_v37  ;;  %v13532_v37 = vld [vmem:[#allocation64_spill] sm:$0xff]  ;;  %v13540_v20 = vld [vmem:[#allocation258_spill] sm:$0xff] }
 0x5a4   :  { %4128 = vmatmul.bf16.gmra.mxu0 %v13518_v51  ;;  %4217 = vmatmul.bf16.gmra.mxu1 %v13519_v55  ;;  %v5195_v47 = vmax.f32 %v3855_v63, 0.0  ;;  %v13541_v55 = vld [vmem:[#allocation211_spill] sm:$0xff] }
 0x5a5   :  { %4306 = vmatmul.bf16.gmra.mxu2 %v13447_v22  ;;  %v3679_v14 = vpop.f32.mrf.mxu3  ;;  %v13535_v22 = vld [vmem:[#allocation189_spill] sm:$0xff] }
 0x5a6   :  { %v3680_v58 = vadd.f32 %v3679_v14, %v3591_v50  ;;  %v10648_v9 = vpack.c.bf16 %v5195_v47, %v5191_v25  ;;  %v3593_v19 = vadd.f32 %v13535_v22, %v3504_v52  ;;  %v13536_v50 = vld [vmem:[#allocation39_spill] sm:$0xff] }
 0x5a7   :  { %v13537_v47 = vld [vmem:[#allocation223_spill] sm:$0xff] }
 0x5a8   :  { %v10639_v31 = vpop.f32.mrf.mxu2  ;;  %13529 = vst [vmem:[#allocation181_spill] sm:$0xff] %v10648_v9  ;;  %v3769_v6 = vadd.f32 %v13534_v42, %v3680_v58  ;;  %v13539_v14 = vld [vmem:[#allocation255_spill] sm:$0xff]  ;;  %v7280_v9 = vld [vmem:[#allocation5 + $0x108] sm:$0xf] }
 0x5a9   :  { %13525 = vst [vmem:[#allocation71_spill] sm:$0xff] %v10639_v31  ;;  %v10643_v46 = vpop.f32.mrf.mxu0  ;;  %v10645_v51 = vpop.f32.mrf.mxu1  ;;  %v13533_v31 = vld [vmem:[#allocation89_spill] sm:$0xff]  ;;  %v13542_v22 = vld [vmem:[#allocation259_spill] sm:$0xff] }
 0x5aa   :  { %v3418_v11 = vadd.f32 %v13533_v31, %v13532_v37  ;;  %v3858_v31 = vadd.f32 %v13539_v14, %v3769_v6  ;;  %v13546_v14 = vld [vmem:[#allocation90_spill] sm:$0xff] }
 0x5ac   :  { %v3507_v25 = vadd.f32 %v13538_v39, %v3418_v11  ;;  %v5199_v6 = vmax.f32 %v3858_v31, 0.0 }
 0x5ad   :  { %v3681_v63 = vpop.f32.mrf.mxu3 }
 0x5ae   :  { %v3682_v0 = vadd.f32 %v3681_v63, %v3593_v19  ;;  %v13544_v19 = vld [vmem:[#allocation227_spill] sm:$0xff]  ;;  %v13545_v63 = vld [vmem:[#allocation94_spill] sm:$0xff] }
 0x5b0   :  { %v10651_v29 = vpop.f32.mrf.mxu2  ;;  %v3771_v37 = vadd.f32 %v13540_v20, %v3682_v0  ;;  %v3596_v0 = vadd.f32 %v13546_v14, %v3507_v25 }
 0x5b1   :  { %13531 = vst [vmem:[#allocation240_spill] sm:$0xff] %v10651_v29  ;;  %v10655_v60 = vpop.f32.mrf.mxu0  ;;  %v10657_v62 = vpop.f32.mrf.mxu1  ;;  %v8377_v29 = vld [vmem:[#allocation5 + $0x114] sm:$0xf0] }
 0x5b2   :  { %3723 = vmatmul.bf16.gmra.mxu3 %v13541_v55  ;;  %v7281_v42 = vor.u32 %v8377_v29, %v7280_v9  ;;  %v3860_v52 = vadd.f32 %v13542_v22, %v3771_v37  ;;  %v13548_v9 = vld [vmem:[#allocation195_spill] sm:$0xff]  ;;  %v13551_v22 = vld [vmem:[#allocation198_spill] sm:$0xff] }
 0x5b4   :  { %4133 = vmatmul.bf16.gmra.mxu0 %v13536_v50  ;;  %4222 = vmatmul.bf16.gmra.mxu1 %v13537_v47  ;;  %v3420_v50 = vadd.f32 %v13545_v63, %v13544_v19  ;;  %v5203_v20 = vmax.f32 %v3860_v52, 0.0 }
 0x5b5   :  { %4311 = vmatmul.bf16.gmra.mxu2 %v13458_v10  ;;  %4008 = vmatpush.bf16.msra.mxu3 %v7281_v42  ;;  %v3684_v10 = vpop.f32.mrf.mxu3  ;;  %v13550_v42 = vld [vmem:[#allocation229_spill] sm:$0xff] }
 0x5b6   :  { %v3685_v47 = vadd.f32 %v3684_v10, %v3596_v0  ;;  %v10678_v16 = vpack.c.bf16 %v5203_v20, %v5199_v6  ;;  %v3509_v29 = vadd.f32 %v13548_v9, %v3420_v50  ;;  %v13553_v10 = vld [vmem:[#allocation45_spill] sm:$0xff]  ;;  %v13554_v6 = vld [vmem:[#allocation226_spill] sm:$0xff]  ;;  %v13555_v50 = vld [vmem:[#allocation92_spill] sm:$0xff] }
 0x5b8   :  { %v10669_v58 = vpop.f32.mrf.mxu2  ;;  %13547 = vst [vmem:[#allocation243_spill] sm:$0xff] %v10678_v16  ;;  %v3774_v31 = vadd.f32 %v10416_v57, %v3685_v47  ;;  %v3598_v25 = vadd.f32 %v13552_v7, %v3509_v29  ;;  %v13557_v7 = vld [vmem:[#allocation231_spill] sm:$0xff]  ;;  %v13558_v29 = vld [vmem:[#allocation93_spill] sm:$0xff] }
 0x5b9   :  { %13543 = vst [vmem:[#allocation242_spill] sm:$0xff] %v10669_v58  ;;  %v10673_v11 = vpop.f32.mrf.mxu0  ;;  %v10675_v39 = vpop.f32.mrf.mxu1  ;;  %v3423_v58 = vadd.f32 %v13551_v22, %v13550_v42  ;;  %v13556_v42 = vld [vmem:[#allocation217_spill] sm:$0xff]  ;;  %v3425_v22 = vadd.f32 %v13558_v29, %v13557_v7 }
 0x5ba   :  { %v3863_v20 = vadd.f32 %v10418_v1, %v3774_v31 }
 0x5bb   :  { %v3512_v0 = vadd.f32 %v13555_v50, %v3423_v58  ;;  %v13559_v50 = vld [vmem:[#allocation91_spill] sm:$0xff] }
 0x5bc   :  { %v5207_v58 = vmax.f32 %v3863_v20, 0.0 }
 0x5bd   :  { %v3686_v52 = vpop.f32.mrf.mxu3  ;;  %v3601_v16 = vadd.f32 %v13559_v50, %v3512_v0 }
 0x5be   :  { %v3687_v14 = vadd.f32 %v3686_v52, %v3598_v25 }
 0x5c0   :  { %v10681_v37 = vpop.f32.mrf.mxu2  ;;  %v3776_v9 = vadd.f32 %v10429_v21, %v3687_v14  ;;  %v13561_v14 = vld [vmem:[#allocation199_spill] sm:$0xff] }
 0x5c1   :  { %13549 = vst [vmem:[#allocation197_spill] sm:$0xff] %v10681_v37  ;;  %v10685_v19 = vpop.f32.mrf.mxu0  ;;  %v10687_v63 = vpop.f32.mrf.mxu1  ;;  %v3514_v37 = vadd.f32 %v13561_v14, %v3425_v22  ;;  %v13567_v22 = vld [vmem:[#allocation205_spill] sm:$0xff] }
 0x5c2   :  { %3728 = vmatmul.bf16.gmra.mxu3 %v13556_v42  ;;  %v3865_v57 = vadd.f32 %v10431_v4, %v3776_v9  ;;  %v13562_v9 = vld [vmem:[#allocation233_spill] sm:$0xff] }
 0x5c3   :  { %v3603_v0 = vadd.f32 %v13564_v56, %v3514_v37  ;;  %v13570_v56 = vld [vmem:[#allocation269_spill] sm:$0xff] }
 0x5c4   :  { %4138 = vmatmul.bf16.gmra.mxu0 %v13553_v10  ;;  %4227 = vmatmul.bf16.gmra.mxu1 %v13554_v6  ;;  %v5211_v10 = vmax.f32 %v3865_v57, 0.0 }
 0x5c5   :  { %4316 = vmatmul.bf16.gmra.mxu2 %v13469_v5  ;;  %v3689_v1 = vpop.f32.mrf.mxu3  ;;  %v13563_v5 = vld [vmem:[#allocation103_spill] sm:$0xff] }
 0x5c6   :  { %v3690_v31 = vadd.f32 %v3689_v1, %v3601_v16  ;;  %v10708_v21 = vpack.c.bf16 %v5211_v10, %v5207_v58  ;;  %v3428_v6 = vadd.f32 %v13563_v5, %v13562_v9  ;;  %v13565_v16 = vld [vmem:[#allocation54_spill] sm:$0xff]  ;;  %v13566_v10 = vld [vmem:[#allocation47_spill] sm:$0xff]  ;;  %v13568_v1 = vld [vmem:[#allocation268_spill] sm:$0xff] }
 0x5c7   :  { %v7904_v9 = vld [vmem:[#allocation5 + $0x5e8] sm:$0xf] }
 0x5c8   :  { %v10699_v47 = vpop.f32.mrf.mxu2  ;;  %13560 = vst [vmem:[#allocation182_spill] sm:$0xff] %v10708_v21  ;;  %v3779_v20 = vadd.f32 %v10437_v33, %v3690_v31  ;;  %v3517_v58 = vadd.f32 %v13567_v22, %v3428_v6  ;;  %v8533_v21 = vld [vmem:[#allocation5 + $0x5f4] sm:$0xf0] }
 0x5c9   :  { %v10703_v25 = vpop.f32.mrf.mxu0  ;;  %v10705_v52 = vpop.f32.mrf.mxu1  ;;  %v7905_v33 = vor.u32 %v8533_v21, %v7904_v9  ;;  %v13577_v21 = vld [vmem:[#allocation102_spill] sm:$0xff] }
 0x5ca   :  { %v3868_v5 = vadd.f32 %v10439_v45, %v3779_v20  ;;  %v13575_v20 = vld [vmem:[#allocation101_spill] sm:$0xff] }
 0x5cb   :  { %4357 = vmatpush.bf16.msrb.mxu3 %v7905_v33  ;;  %v13579_v33 = vld [vmem:[#allocation237_spill] sm:$0xff] }
 0x5cc   :  { %v5215_v45 = vmax.f32 %v3868_v5, 0.0 }
 0x5cd   :  { %v3691_v57 = vpop.f32.mrf.mxu3 }
 0x5ce   :  { %v3692_v50 = vadd.f32 %v3691_v57, %v3603_v0  ;;  %v13572_v0 = vld [vmem:[#allocation235_spill] sm:$0xff]  ;;  %v13573_v57 = vld [vmem:[#allocation100_spill] sm:$0xff] }
 0x5d0   :  { %v10711_v4 = vpop.f32.mrf.mxu2  ;;  %v3781_v14 = vadd.f32 %v13568_v1, %v3692_v50  ;;  %v3606_v50 = vadd.f32 %v13575_v20, %v3517_v58 }
 0x5d1   :  { %v10715_v7 = vpop.f32.mrf.mxu0  ;;  %v10717_v29 = vpop.f32.mrf.mxu1 }
 0x5d2   :  { %4009 = vmatmul.bf16.vlgmr.msra.gmra.mxu3 %v13569_v43  ;;  %v3870_v37 = vadd.f32 %v13570_v56, %v3781_v14  ;;  %v13580_v56 = vld [vmem:[#allocation207_spill] sm:$0xff] }
 0x5d3   :  { %v3433_v28 = vadd.f32 %v13580_v56, %v13579_v33  ;;  %v13589_v33 = vld [vmem:[#allocation276_spill] sm:$0xff] }
 0x5d4   :  { %4143 = vmatmul.bf16.gmra.mxu0 %v13565_v16  ;;  %4232 = vmatmul.bf16.gmra.mxu1 %v13566_v10  ;;  %v3430_v16 = vadd.f32 %v13573_v57, %v13572_v0  ;;  %v5219_v1 = vmax.f32 %v3870_v37, 0.0 }
 0x5d5   :  { %4321 = vmatmul.bf16.gmra.mxu2 %v13478_v26  ;;  %v3694_v26 = vpop.f32.mrf.mxu3 }
 0x5d6   :  { %v3695_v10 = vadd.f32 %v3694_v26, %v3606_v50  ;;  %v10738_v8 = vpack.c.bf16 %v5219_v1, %v5215_v45  ;;  %v3519_v14 = vadd.f32 %v13577_v21, %v3430_v16  ;;  %v13585_v26 = vld [vmem:[#allocation59_spill] sm:$0xff]  ;;  %v13586_v45 = vld [vmem:[#allocation41_spill] sm:$0xff]  ;;  %v13587_v16 = vld [vmem:[#allocation210_spill] sm:$0xff] }
 0x5d7   :  { %v3522_v50 = vadd.f32 %v13587_v16, %v3433_v28  ;;  %v13588_v1 = vld [vmem:[#allocation273_spill] sm:$0xff]  ;;  %v13597_v16 = vld [vmem:[#allocation108_spill] sm:$0xff] }
 0x5d8   :  { %v10729_v31 = vpop.f32.mrf.mxu2  ;;  %13576 = vst [vmem:[#allocation164_spill] sm:$0xff] %v10738_v8  ;;  %v13590_v8 = vld [vmem:[#allocation20_spill] sm:$0xff] }
 0x5d9   :  { %13571 = vst [vmem:[#allocation79_spill] sm:$0xff] %v10729_v31  ;;  %v10733_v6 = vpop.f32.mrf.mxu0  ;;  %v10735_v22 = vpop.f32.mrf.mxu1  ;;  %v13584_v31 = vld [vmem:[#allocation104_spill] sm:$0xff] }
 0x5da   :  { %13574 = vst [vmem:[#allocation80_spill] sm:$0xff] %v10735_v22  ;;  %v13583_v22 = vld [vmem:[#allocation272_spill] sm:$0xff]  ;;  %v3608_v58 = vadd.f32 %v13584_v31, %v3519_v14  ;;  %v13593_v31 = vld [vmem:[#allocation241_spill] sm:$0xff]  ;;  %v13594_v14 = vld [vmem:[#allocation107_spill] sm:$0xff] }
 0x5db   :  { %v3784_v5 = vadd.f32 %v13583_v22, %v3695_v10 }
 0x5dd   :  { %v3696_v37 = vpop.f32.mrf.mxu3  ;;  %v3873_v21 = vadd.f32 %v13588_v1, %v3784_v5 }
 0x5de   :  { %v3697_v20 = vadd.f32 %v3696_v37, %v3608_v58  ;;  %v3435_v58 = vadd.f32 %v13594_v14, %v13593_v31 }
 0x5df   :  { %v5223_v28 = vmax.f32 %v3873_v21, 0.0 }
 0x5e0   :  { %v10741_v9 = vpop.f32.mrf.mxu2  ;;  %v3786_v56 = vadd.f32 %v13589_v33, %v3697_v20  ;;  %v13599_v33 = vld [vmem:[#allocation109_spill] sm:$0xff] }
 0x5e1   :  { %13578 = vst [vmem:[#allocation185_spill] sm:$0xff] %v10741_v9  ;;  %v10745_v0 = vpop.f32.mrf.mxu0  ;;  %v10747_v57 = vpop.f32.mrf.mxu1  ;;  %v3524_v9 = vadd.f32 %v13599_v33, %v3435_v58  ;;  %v13608_v58 = vld [vmem:[#allocation118_spill] sm:$0xff] }
 0x5e2   :  { %13581 = vst [vmem:[#allocation246_spill] sm:$0xff] %v10745_v0  ;;  %4014 = vmatmul.bf16.gmra.mxu3 %v13590_v8 }
 0x5e3   :  { %13582 = vst [vmem:[#allocation184_spill] sm:$0xff] %v10747_v57  ;;  %v13591_v57 = vld [vmem:[#allocation277_spill] sm:$0xff] }
 0x5e4   :  { %4148 = vmatmul.bf16.gmra.mxu0 %v13585_v26  ;;  %4237 = vmatmul.bf16.gmra.mxu1 %v13586_v45  ;;  %v3875_v10 = vadd.f32 %v13591_v57, %v3786_v56  ;;  %v13601_v56 = vld [vmem:[#allocation244_spill] sm:$0xff] }
 0x5e5   :  { %4326 = vmatmul.bf16.gmra.mxu2 %v13486_v3  ;;  %v3611_v3 = vadd.f32 %v13597_v16, %v3522_v50  ;;  %v3699_v5 = vpop.f32.mrf.mxu3 }
 0x5e6   :  { %v5227_v45 = vmax.f32 %v3875_v10, 0.0 }
 0x5e7   :  { %v3700_v1 = vadd.f32 %v3699_v5, %v3611_v3  ;;  %v13606_v3 = vld [vmem:[#allocation68_spill] sm:$0xff]  ;;  %v13609_v5 = vld [vmem:[#allocation281_spill] sm:$0xff] }
 0x5e8   :  { %v10759_v22 = vpop.f32.mrf.mxu2  ;;  %v10768_v20 = vpack.c.bf16 %v5227_v45, %v5223_v28  ;;  %v13607_v45 = vld [vmem:[#allocation42_spill] sm:$0xff] }
 0x5e9   :  { %13592 = vst [vmem:[#allocation183_spill] sm:$0xff] %v10759_v22  ;;  %v10763_v37 = vpop.f32.mrf.mxu0  ;;  %v10765_v26 = vpop.f32.mrf.mxu1  ;;  %v13602_v22 = vld [vmem:[#allocation116_spill] sm:$0xff] }
 0x5ea   :  { %13595 = vst [vmem:[#allocation247_spill] sm:$0xff] %v10763_v37  ;;  %v3438_v0 = vadd.f32 %v13602_v22, %v13601_v56  ;;  %v13605_v37 = vld [vmem:[#allocation117_spill] sm:$0xff] }
 0x5eb   :  { %13596 = vst [vmem:[#allocation250_spill] sm:$0xff] %v10765_v26  ;;  %v13604_v26 = vld [vmem:[#allocation280_spill] sm:$0xff]  ;;  %v3613_v50 = vadd.f32 %v13605_v37, %v3524_v9  ;;  %v7888_v56 = vld [vmem:[#allocation5 + $0x5c8] sm:$0xf] }
 0x5ec   :  { %13598 = vst [vmem:[#allocation251_spill] sm:$0xff] %v10768_v20  ;;  %v3789_v21 = vadd.f32 %v13604_v26, %v3700_v1  ;;  %v3527_v28 = vadd.f32 %v13608_v58, %v3438_v0  ;;  %v8529_v20 = vld [vmem:[#allocation5 + $0x5d4] sm:$0xf0]  ;;  %v13611_v9 = vld [vmem:[#allocation173_spill] sm:$0xff] }
 0x5ed   :  { %v3701_v10 = vpop.f32.mrf.mxu3  ;;  %v7889_v26 = vor.u32 %v8529_v20, %v7888_v56  ;;  %v13618_v20 = vld [vmem:[#allocation123_spill] sm:$0xff] }
 0x5ee   :  { %v3702_v16 = vadd.f32 %v3701_v10, %v3613_v50  ;;  %v3878_v22 = vadd.f32 %v13609_v5, %v3789_v21  ;;  %v13613_v50 = vld [vmem:[#allocation248_spill] sm:$0xff]  ;;  %v13616_v5 = vld [vmem:[#allocation122_spill] sm:$0xff] }
 0x5ef   :  { %4358 = vmatpush.bf16.msrb.mxu3 %v7889_v26  ;;  %v13614_v10 = vld [vmem:[#allocation124_spill] sm:$0xff] }
 0x5f0   :  { %v10771_v57 = vpop.f32.mrf.mxu2  ;;  %v3791_v33 = vadd.f32 %v10495_v54, %v3702_v16  ;;  %v5231_v21 = vmax.f32 %v3878_v22, 0.0  ;;  %v3616_v54 = vadd.f32 %v13616_v5, %v3527_v28  ;;  %v13620_v26 = vld [vmem:[#allocation252_spill] sm:$0xff] }
 0x5f1   :  { %13600 = vst [vmem:[#allocation61_spill] sm:$0xff] %v10771_v57  ;;  %v10775_v31 = vpop.f32.mrf.mxu0  ;;  %v10777_v14 = vpop.f32.mrf.mxu1 }
 0x5f2   :  { %13603 = vst [vmem:[#allocation82_spill] sm:$0xff] %v10777_v14  ;;  %v13610_v14 = vld [vmem:[#allocation23_spill] sm:$0xff]  ;;  %v3880_v37 = vadd.f32 %v13611_v9, %v3791_v33  ;;  %v13621_v9 = vld [vmem:[#allocation130_spill] sm:$0xff] }
 0x5f3   :  { %4019 = vmatmul.bf16.gmra.mxu3 %v13610_v14 }
 0x5f4   :  { %4153 = vmatmul.bf16.gmra.mxu0 %v13606_v3  ;;  %4242 = vmatmul.bf16.gmra.mxu1 %v13607_v45  ;;  %v3440_v3 = vadd.f32 %v13614_v10, %v13613_v50  ;;  %v5235_v16 = vmax.f32 %v3880_v37, 0.0 }
 0x5f5   :  { %4331 = vmatmul.bf16.gmra.mxu2 %v13492_v44  ;;  %v3704_v44 = vpop.f32.mrf.mxu3 }
 0x5f6   :  { %v3705_v45 = vadd.f32 %v3704_v44, %v3616_v54  ;;  %v10798_v57 = vpack.c.bf16 %v5235_v16, %v5231_v21  ;;  %v3529_v33 = vadd.f32 %v13618_v20, %v3440_v3  ;;  %v8371_v44 = vld [vmem:[#allocation5 + $0xec] sm:$0xf]  ;;  %v7266_v21 = vld [vmem:[#allocation5 + $0xf8] sm:$0xf0] }
 0x5f7   :  { %v8403_v54 = vld [vmem:[#allocation5 + $0x1ec] sm:$0xf]  ;;  %v13625_v16 = vld [vmem:[#allocation135_spill] sm:$0xff]  ;;  %v7269_v20 = vor.u32 %v8371_v44, %v7266_v21 }
 0x5f8   :  { %v10789_v1 = vpop.f32.mrf.mxu2  ;;  %13617 = vst [vmem:[#allocation64_spill] sm:$0xff] %v10798_v57  ;;  %v3794_v28 = vadd.f32 %v10505_v40, %v3705_v45  ;;  %v13626_v3 = vld [vmem:[#allocation49_spill] sm:$0xff]  ;;  %v7394_v57 = vld [vmem:[#allocation5 + $0x1f8] sm:$0xf0]  ;;  %v13628_v45 = vld [vmem:[#allocation26_spill] sm:$0xff] }
 0x5f9   :  { %13612 = vst [vmem:[#allocation188_spill] sm:$0xff] %v10789_v1  ;;  %v10793_v0 = vpop.f32.mrf.mxu0  ;;  %v10795_v58 = vpop.f32.mrf.mxu1  ;;  %v3443_v1 = vadd.f32 %v13621_v9, %v13620_v26  ;;  %v13627_v26 = vld [vmem:[#allocation131_spill] sm:$0xff]  ;;  %4535 = vmatpush.bf16.msrb.mxu1 %v7269_v20 }
 0x5fa   :  { %13615 = vst [vmem:[#allocation81_spill] sm:$0xff] %v10795_v58  ;;  %v13624_v58 = vld [vmem:[#allocation125_spill] sm:$0xff]  ;;  %v3883_v40 = vadd.f32 %v10507_v23, %v3794_v28  ;;  %v13634_v23 = vld [vmem:[#allocation140_spill] sm:$0xff] }
 0x5fb   :  { %v3618_v22 = vadd.f32 %v13624_v58, %v3529_v33  ;;  %v3532_v9 = vadd.f32 %v13627_v26, %v3443_v1  ;;  %v7397_v58 = vor.u32 %v8403_v54, %v7394_v57  ;;  %v7378_v1 = vld [vmem:[#allocation5 + $0x1d8] sm:$0xf0]  ;;  %v13630_v26 = vld [vmem:[#allocation256_spill] sm:$0xff]  ;;  %v8363_v54 = vld [vmem:[#allocation5 + $0xac] sm:$0xf] }
 0x5fc   :  { %v5239_v20 = vmax.f32 %v3883_v40, 0.0 }
 0x5fd   :  { %v3706_v37 = vpop.f32.mrf.mxu3  ;;  %4624 = vmatpush.bf16.msrb.mxu2 %v7397_v58  ;;  %v3621_v28 = vadd.f32 %v13634_v23, %v3532_v9  ;;  %v8359_v9 = vld [vmem:[#allocation5 + $0x8c] sm:$0xf] }
 0x5fe   :  { %v3707_v5 = vadd.f32 %v3706_v37, %v3618_v22  ;;  %v8367_v22 = vld [vmem:[#allocation5 + $0xcc] sm:$0xf]  ;;  %v7250_v37 = vld [vmem:[#allocation5 + $0xd8] sm:$0xf0] }
 0x5ff   :  { %v7253_v21 = vor.u32 %v8367_v22, %v7250_v37 }
 0x600   :  { %v10801_v56 = vpop.f32.mrf.mxu2 }
 0x601   :  { %13619 = vst [vmem:[#allocation89_spill] sm:$0xff] %v10801_v56  ;;  %v10805_v50 = vpop.f32.mrf.mxu0  ;;  %v10807_v10 = vpop.f32.mrf.mxu1  ;;  %4536 = vmatpush.bf16.msrb.mxu1 %v7253_v21  ;;  %v13637_v21 = vld [vmem:[#allocation260_spill] sm:$0xff] }
 0x602   :  { %13622 = vst [vmem:[#allocation254_spill] sm:$0xff] %v10805_v50 }
 0x603   :  { %13623 = vst [vmem:[#allocation189_spill] sm:$0xff] %v10807_v10  ;;  %v3796_v10 = vadd.f32 %v10523_v35, %v3707_v5  ;;  %4024 = vmatmul.bf16.gmra.mxu3 %v13628_v45 }
 0x604   :  { %4158 = vmatmul.bf16.gmra.mxu0 %v13625_v16  ;;  %4247 = vmatmul.bf16.gmra.mxu1 %v13626_v3  ;;  %v8399_v16 = vld [vmem:[#allocation5 + $0x1cc] sm:$0xf] }
 0x605   :  { %4336 = vmatmul.bf16.gmra.mxu2 %v13505_v41  ;;  %v3885_v33 = vadd.f32 %v10525_v24, %v3796_v10  ;;  %v13631_v41 = vld [vmem:[#allocation141_spill] sm:$0xff]  ;;  %v7381_v5 = vor.u32 %v8399_v16, %v7378_v1  ;;  %v7234_v24 = vld [vmem:[#allocation5 + $0xb8] sm:$0xf0]  ;;  %v3709_v58 = vpop.f32.mrf.mxu3 }
 0x606   :  { %v3445_v3 = vadd.f32 %v13631_v41, %v13630_v26  ;;  %v8395_v10 = vld [vmem:[#allocation5 + $0x1ac] sm:$0xf]  ;;  %v7237_v56 = vor.u32 %v8363_v54, %v7234_v24  ;;  %v3710_v37 = vadd.f32 %v3709_v58, %v3621_v28  ;;  %v13636_v26 = vld [vmem:[#allocation143_spill] sm:$0xff]  ;;  %v13638_v54 = vld [vmem:[#allocation142_spill] sm:$0xff] }
 0x607   :  { %v5243_v22 = vmax.f32 %v3885_v33, 0.0  ;;  %4625 = vmatpush.bf16.msrb.mxu2 %v7381_v5  ;;  %v7218_v16 = vld [vmem:[#allocation5 + $0x98] sm:$0xf0]  ;;  %v8391_v1 = vld [vmem:[#allocation5 + $0x18c] sm:$0xf]  ;;  %v3448_v24 = vadd.f32 %v13638_v54, %v13637_v21  ;;  %v13643_v54 = vld [vmem:[#allocation176_spill] sm:$0xff] }
 0x608   :  { %v10819_v44 = vpop.f32.mrf.mxu2  ;;  %4537 = vmatpush.bf16.msrb.mxu1 %v7237_v56  ;;  %v7221_v40 = vor.u32 %v8359_v9, %v7218_v16  ;;  %v3799_v56 = vadd.f32 %v10535_v12, %v3710_v37  ;;  %v7202_v58 = vld [vmem:[#allocation5 + $0x78] sm:$0xf0]  ;;  %v13642_v9 = vld [vmem:[#allocation160_spill] sm:$0xff]  ;;  %v7872_v12 = vld [vmem:[#allocation5 + $0x5a8] sm:$0xf] }
 0x609   :  { %13629 = vst [vmem:[#allocation190_spill] sm:$0xff] %v10819_v44  ;;  %v10823_v35 = vpop.f32.mrf.mxu0  ;;  %v10825_v57 = vpop.f32.mrf.mxu1  ;;  %v7362_v44 = vld [vmem:[#allocation5 + $0x1b8] sm:$0xf0]  ;;  %v10828_v41 = vpack.c.bf16 %v5243_v22, %v5239_v20  ;;  %v8355_v20 = vld [vmem:[#allocation5 + $0x6c] sm:$0xf] }
 0x60a   :  { %13632 = vst [vmem:[#allocation255_spill] sm:$0xff] %v10823_v35  ;;  %v7365_v50 = vor.u32 %v8395_v10, %v7362_v44  ;;  %v3534_v35 = vadd.f32 %v13636_v26, %v3445_v3  ;;  %v13640_v44 = vld [vmem:[#allocation209_spill] sm:$0xff]  ;;  %v13641_v26 = vld [vmem:[#allocation136_spill] sm:$0xff]  ;;  %v7205_v16 = vor.u32 %v8355_v20, %v7202_v58  ;;  %v7330_v21 = vld [vmem:[#allocation5 + $0x178] sm:$0xf0] }
 0x60b   :  { %13633 = vst [vmem:[#allocation258_spill] sm:$0xff] %v10825_v57  ;;  %v7346_v57 = vld [vmem:[#allocation5 + $0x198] sm:$0xf0]  ;;  %v8387_v22 = vld [vmem:[#allocation5 + $0x16c] sm:$0xf] }
 0x60c   :  { %13635 = vst [vmem:[#allocation259_spill] sm:$0xff] %v10828_v41  ;;  %4626 = vmatpush.bf16.msrb.mxu2 %v7365_v50  ;;  %v3623_v5 = vadd.f32 %v13640_v44, %v3534_v35  ;;  %v7349_v10 = vor.u32 %v8391_v1, %v7346_v57  ;;  %4538 = vmatpush.bf16.msrb.mxu1 %v7221_v40  ;;  %v8525_v57 = vld [vmem:[#allocation5 + $0x5b4] sm:$0xf0]  ;;  %v13644_v40 = vld [vmem:[#allocation29_spill] sm:$0xff] }
 0x60d   :  { %v3711_v50 = vpop.f32.mrf.mxu3  ;;  %v3537_v41 = vadd.f32 %v13643_v54, %v3448_v24  ;;  %v7333_v37 = vor.u32 %v8387_v22, %v7330_v21  ;;  %v3888_v1 = vadd.f32 %v10537_v36, %v3799_v56  ;;  %v7873_v44 = vor.u32 %v8525_v57, %v7872_v12  ;;  %v8383_v20 = vld [vmem:[#allocation5 + $0x14c] sm:$0xf]  ;;  %v13645_v24 = vld [vmem:[#allocation262_spill] sm:$0xff]  ;;  %v13646_v58 = vld [vmem:[#allocation215_spill] sm:$0xff] }
 0x60e   :  { %v3712_v3 = vadd.f32 %v3711_v50, %v3623_v5  ;;  %v7186_v50 = vld [vmem:[#allocation5 + $0x58] sm:$0xf0]  ;;  %v3450_v54 = vadd.f32 %v13646_v58, %v13645_v24  ;;  %v13650_v56 = vld [vmem:[#allocation46_spill] sm:$0xff]  ;;  %v8379_v12 = vld [vmem:[#allocation5 + $0x12c] sm:$0xf] }
 0x60f   :  { %4359 = vmatpush.bf16.msrb.mxu3 %v7873_v44  ;;  %v5247_v57 = vmax.f32 %v3888_v1, 0.0  ;;  %v7298_v24 = vld [vmem:[#allocation5 + $0x138] sm:$0xf0]  ;;  %v13654_v1 = vld [vmem:[#allocation186_spill] sm:$0xff] }
 0x610   :  { %v10831_v23 = vpop.f32.mrf.mxu2  ;;  %4627 = vmatpush.bf16.msrb.mxu2 %v7349_v10  ;;  %v3801_v35 = vadd.f32 %v10553_v18, %v3712_v3  ;;  %4539 = vmatpush.bf16.msrb.mxu1 %v7205_v16  ;;  %v8351_v10 = vld [vmem:[#allocation5 + $0x4c] sm:$0xf]  ;;  %v7314_v3 = vld [vmem:[#allocation5 + $0x158] sm:$0xf0]  ;;  %v3626_v16 = vadd.f32 %v13650_v56, %v3537_v41  ;;  %v7301_v44 = vor.u32 %v8379_v12, %v7298_v24  ;;  %v7920_v41 = vld [vmem:[#allocation5 + $0x608] sm:$0xf] }
 0x611   :  { %v10835_v33 = vpop.f32.mrf.mxu0  ;;  %v10837_v28 = vpop.f32.mrf.mxu1  ;;  %v7189_v18 = vor.u32 %v8351_v10, %v7186_v50  ;;  %v7317_v21 = vor.u32 %v8383_v20, %v7314_v3  ;;  %v13651_v10 = vld [vmem:[#allocation148_spill] sm:$0xff]  ;;  %v8537_v20 = vld [vmem:[#allocation5 + $0x614] sm:$0xf0]  ;;  %v8343_v3 = vld [vmem:[#allocation5 + $0xc] sm:$0xf] }
 0x612   :  { %13639 = vst [vmem:[#allocation227_spill] sm:$0xff] %v10837_v28  ;;  %v3890_v5 = vadd.f32 %v10555_v30, %v3801_v35  ;;  %v8347_v30 = vld [vmem:[#allocation5 + $0x2c] sm:$0xf]  ;;  %v7170_v35 = vld [vmem:[#allocation5 + $0x38] sm:$0xf0]  ;;  %v3539_v50 = vadd.f32 %v13651_v10, %v3450_v54  ;;  %v13659_v10 = vld [vmem:[#allocation144_spill] sm:$0xff] }
 0x613   :  { %4029 = vmatmul.bf16.gmra.mxu3 %v13644_v40  ;;  %v8523_v28 = vld [vmem:[#allocation5 + $0x5ac] sm:$0xf] }
 0x614   :  { %4163 = vmatmul.bf16.gmra.mxu0 %v13641_v26  ;;  %4252 = vmatmul.bf16.gmra.mxu1 %v13642_v9  ;;  %v5251_v58 = vmax.f32 %v3890_v5, 0.0  ;;  %v7282_v5 = vld [vmem:[#allocation5 + $0x118] sm:$0xf0] }
 0x615   :  { %4341 = vmatmul.bf16.gmra.mxu2 %v13523_v27  ;;  %4540 = vmatpush.bf16.msrb.mxu1 %v7189_v18  ;;  %v7173_v27 = vor.u32 %v8347_v30, %v7170_v35  ;;  %v7921_v18 = vor.u32 %v8537_v20, %v7920_v41  ;;  %v7154_v30 = vld [vmem:[#allocation5 + $0x18] sm:$0xf0]  ;;  %v8375_v35 = vld [vmem:[#allocation5 + $0x10c] sm:$0xf]  ;;  %v13661_v41 = vld [vmem:[#allocation216_spill] sm:$0xff] }
 0x616   :  { %4628 = vmatpush.bf16.msrb.mxu2 %v7333_v37  ;;  %v3714_v37 = vpop.f32.mrf.mxu3  ;;  %v7285_v24 = vor.u32 %v8375_v35, %v7282_v5 }
 0x617   :  { %v3715_v9 = vadd.f32 %v3714_v37, %v3626_v16  ;;  %v13655_v16 = vld [vmem:[#allocation264_spill] sm:$0xff]  ;;  %4453 = vmatpush.bf16.msrb.mxu0 %v7921_v18  ;;  %v13665_v18 = vld [vmem:[#allocation55_spill] sm:$0xff] }
 0x618   :  { %v10851_v26 = vpop.f32.mrf.mxu2 }
 0x619   :  { %13647 = vst [vmem:[#allocation94_spill] sm:$0xff] %v10851_v26  ;;  %v10853_v22 = vpop.f32.mrf.mxu0  ;;  %v10855_v36 = vpop.f32.mrf.mxu1  ;;  %v10859_v26 = vpack.c.bf16 %v5251_v58, %v5247_v57  ;;  %4541 = vmatpush.bf16.msrb.mxu1 %v7173_v27  ;;  %v3804_v27 = vadd.f32 %v10565_v49, %v3715_v9  ;;  %v7157_v57 = vor.u32 %v8343_v3, %v7154_v30  ;;  %v13662_v49 = vld [vmem:[#allocation32_spill] sm:$0xff] }
 0x61a   :  { %13648 = vst [vmem:[#allocation90_spill] sm:$0xff] %v10853_v22  ;;  %4629 = vmatpush.bf16.msrb.mxu2 %v7317_v21  ;;  %v13656_v21 = vld [vmem:[#allocation149_spill] sm:$0xff]  ;;  %v7746_v22 = vld [vmem:[#allocation5 + $0x4b8] sm:$0xf0] }
 0x61b   :  { %13649 = vst [vmem:[#allocation195_spill] sm:$0xff] %v10855_v36  ;;  %v3628_v36 = vadd.f32 %v13654_v1, %v3539_v50  ;;  %v3453_v12 = vadd.f32 %v13656_v21, %v13655_v16  ;;  %v13660_v50 = vld [vmem:[#allocation63_spill] sm:$0xff]  ;;  %v3893_v1 = vadd.f32 %v10567_v13, %v3804_v27 }
 0x61c   :  { %13652 = vst [vmem:[#allocation229_spill] sm:$0xff] %v10859_v26 }
 0x61d   :  { %4542 = vmatpush.bf16.msrb.mxu1 %v7157_v57  ;;  %v3542_v20 = vadd.f32 %v13661_v41, %v3453_v12  ;;  %v5255_v21 = vmax.f32 %v3893_v1, 0.0  ;;  %v13668_v12 = vld [vmem:[#allocation155_spill] sm:$0xff]  ;;  %v13672_v41 = vld [vmem:[#allocation270_spill] sm:$0xff] }
 0x61e   :  { %4630 = vmatpush.bf16.msrb.mxu2 %v7301_v44  ;;  %v3716_v58 = vpop.f32.mrf.mxu3 }
 0x61f   :  { %v3717_v44 = vadd.f32 %v3716_v58, %v3628_v36  ;;  %v13664_v36 = vld [vmem:[#allocation266_spill] sm:$0xff]  ;;  %v3631_v57 = vadd.f32 %v13668_v12, %v3542_v20  ;;  %v13670_v58 = vld [vmem:[#allocation56_spill] sm:$0xff] }
 0x620   :  { %v10861_v56 = vpop.f32.mrf.mxu2  ;;  %v3455_v30 = vadd.f32 %v13665_v18, %v13664_v36 }
 0x621   :  { %13653 = vst [vmem:[#allocation198_spill] sm:$0xff] %v10861_v56  ;;  %v10866_v37 = vpop.f32.mrf.mxu0  ;;  %v10868_v54 = vpop.f32.mrf.mxu1  ;;  %v3806_v16 = vadd.f32 %v10583_v32, %v3717_v44 }
 0x622   :  { %13657 = vst [vmem:[#allocation194_spill] sm:$0xff] %v10866_v37  ;;  %4631 = vmatpush.bf16.msrb.mxu2 %v7285_v24  ;;  %v3544_v44 = vadd.f32 %v13670_v58, %v3455_v30  ;;  %v13679_v30 = vld [vmem:[#allocation158_spill] sm:$0xff]  ;;  %v7762_v37 = vld [vmem:[#allocation5 + $0x4d8] sm:$0xf0] }
 0x623   :  { %13658 = vst [vmem:[#allocation92_spill] sm:$0xff] %v10868_v54  ;;  %4034 = vmatmul.bf16.gmra.mxu3 %v13662_v49  ;;  %v3895_v9 = vadd.f32 %v10585_v53, %v3806_v16  ;;  %v13673_v16 = vld [vmem:[#allocation221_spill] sm:$0xff]  ;;  %v7634_v54 = vld [vmem:[#allocation5 + $0x3d8] sm:$0xf0] }
 0x624   :  { %4168 = vmatmul.bf16.gmra.mxu0 %v13659_v10  ;;  %4257 = vmatmul.bf16.gmra.mxu1 %v13660_v50  ;;  %v3458_v26 = vadd.f32 %v13673_v16, %v13672_v41  ;;  %v13676_v10 = vld [vmem:[#allocation152_spill] sm:$0xff]  ;;  %v7856_v41 = vld [vmem:[#allocation5 + $0x588] sm:$0xf]  ;;  %v8521_v16 = vld [vmem:[#allocation5 + $0x594] sm:$0xf0] }
 0x625   :  { %4346 = vmatmul.bf16.gmra.mxu2 %v13541_v55  ;;  %v5259_v24 = vmax.f32 %v3895_v9, 0.0  ;;  %v3633_v20 = vadd.f32 %v13676_v10, %v3544_v44  ;;  %v13682_v44 = vld [vmem:[#allocation274_spill] sm:$0xff]  ;;  %v13694_v50 = vld [vmem:[#allocation161_spill] sm:$0xff] }
 0x626   :  { %v3719_v13 = vpop.f32.mrf.mxu3 }
 0x627   :  { %v3720_v27 = vadd.f32 %v3719_v13, %v3631_v57  ;;  %v10888_v32 = vpack.c.bf16 %v5259_v24, %v5255_v21  ;;  %v13677_v57 = vld [vmem:[#allocation151_spill] sm:$0xff]  ;;  %v13678_v21 = vld [vmem:[#allocation69_spill] sm:$0xff]  ;;  %v3547_v24 = vadd.f32 %v13679_v30, %v3458_v26 }
 0x628   :  { %v10879_v3 = vpop.f32.mrf.mxu2 }
 0x629   :  { %13663 = vst [vmem:[#allocation231_spill] sm:$0xff] %v10879_v3  ;;  %v10883_v35 = vpop.f32.mrf.mxu0  ;;  %v10885_v5 = vpop.f32.mrf.mxu1  ;;  %v3809_v1 = vadd.f32 %v10595_v59, %v3720_v27  ;;  %v7857_v59 = vor.u32 %v8521_v16, %v7856_v41  ;;  %v13688_v41 = vld [vmem:[#allocation159_spill] sm:$0xff]  ;;  %v13690_v16 = vld [vmem:[#allocation278_spill] sm:$0xff]  ;;  %v8467_v3 = vld [vmem:[#allocation5 + $0x3ec] sm:$0xf] }
 0x62a   :  { %13666 = vst [vmem:[#allocation93_spill] sm:$0xff] %v10883_v35  ;;  %v7650_v35 = vld [vmem:[#allocation5 + $0x3f8] sm:$0xf0] }
 0x62b   :  { %13667 = vst [vmem:[#allocation91_spill] sm:$0xff] %v10885_v5  ;;  %v3898_v13 = vadd.f32 %v10597_v15, %v3809_v1  ;;  %4360 = vmatpush.bf16.msrb.mxu3 %v7857_v59  ;;  %v13686_v1 = vld [vmem:[#allocation50_spill] sm:$0xff]  ;;  %v13691_v59 = vld [vmem:[#allocation60_spill] sm:$0xff] }
 0x62c   :  { %13669 = vst [vmem:[#allocation199_spill] sm:$0xff] %v10888_v32  ;;  %v13680_v32 = vld [vmem:[#allocation35_spill] sm:$0xff]  ;;  %v3463_v55 = vadd.f32 %v13691_v59, %v13690_v16  ;;  %v13698_v16 = vld [vmem:[#allocation38_spill] sm:$0xff] }
 0x62d   :  { %v5263_v15 = vmax.f32 %v3898_v13, 0.0 }
 0x62e   :  { %v3721_v9 = vpop.f32.mrf.mxu3 }
 0x62f   :  { %v3722_v12 = vadd.f32 %v3721_v9, %v3633_v20  ;;  %v13683_v20 = vld [vmem:[#allocation222_spill] sm:$0xff] }
 0x630   :  { %v10891_v53 = vpop.f32.mrf.mxu2  ;;  %v3460_v9 = vadd.f32 %v13683_v20, %v13682_v44 }
 0x631   :  { %13671 = vst [vmem:[#allocation233_spill] sm:$0xff] %v10891_v53  ;;  %v10895_v36 = vpop.f32.mrf.mxu0  ;;  %v10897_v18 = vpop.f32.mrf.mxu1  ;;  %v3811_v58 = vadd.f32 %v10613_v61, %v3722_v12  ;;  %v3636_v61 = vadd.f32 %v13686_v1, %v3547_v24  ;;  %v13789_v53 = vld [vmem:[#allocation168_spill] sm:$0xff] }
 0x632   :  { %13674 = vst [vmem:[#allocation103_spill] sm:$0xff] %v10895_v36 }
 0x633   :  { %13675 = vst [vmem:[#allocation201_spill] sm:$0xff] %v10897_v18  ;;  %4039 = vmatmul.bf16.gmra.mxu3 %v13680_v32  ;;  %v3900_v10 = vadd.f32 %v10615_v34, %v3811_v58  ;;  %v3549_v34 = vadd.f32 %v13688_v41, %v3460_v9  ;;  %v13697_v9 = vld [vmem:[#allocation224_spill] sm:$0xff] }
 0x634   :  { %4173 = vmatmul.bf16.gmra.mxu0 %v13677_v57  ;;  %4262 = vmatmul.bf16.gmra.mxu1 %v13678_v21 }
 0x635   :  { %4351 = vmatmul.bf16.gmra.mxu2 %v13556_v42  ;;  %v5267_v12 = vmax.f32 %v3900_v10, 0.0  ;;  %v3638_v24 = vadd.f32 %v13694_v50, %v3549_v34  ;;  %v13700_v50 = vld [vmem:[#allocation282_spill] sm:$0xff]  ;;  %v13701_v34 = vld [vmem:[#allocation225_spill] sm:$0xff] }
 0x636   :  { %v3724_v57 = vpop.f32.mrf.mxu3  ;;  %v3465_v59 = vadd.f32 %v13701_v34, %v13700_v50  ;;  %v13710_v34 = vld [vmem:[#allocation162_spill] sm:$0xff] }
 0x637   :  { %v3725_v42 = vadd.f32 %v3724_v57, %v3636_v61  ;;  %v10918_v21 = vpack.c.bf16 %v5267_v12, %v5263_v15  ;;  %v13695_v57 = vld [vmem:[#allocation78_spill] sm:$0xff]  ;;  %v13696_v15 = vld [vmem:[#allocation16_spill] sm:$0xff]  ;;  %v3552_v61 = vadd.f32 %v13697_v9, %v3463_v55 }
 0x638   :  { %v10909_v27 = vpop.f32.mrf.mxu2 }
 0x639   :  { %13681 = vst [vmem:[#allocation205_spill] sm:$0xff] %v10909_v27  ;;  %v10913_v26 = vpop.f32.mrf.mxu0  ;;  %v10915_v30 = vpop.f32.mrf.mxu1  ;;  %v3814_v13 = vadd.f32 %v10625_v38, %v3725_v42 }
 0x63a   :  { %13684 = vst [vmem:[#allocation268_spill] sm:$0xff] %v10913_v26 }
 0x63b   :  { %13685 = vst [vmem:[#allocation17_spill] sm:$0xff] %v10915_v30  ;;  %v3903_v12 = vadd.f32 %v10627_v17, %v3814_v13 }
 0x63c   :  { %13687 = vst [vmem:[#allocation269_spill] sm:$0xff] %v10918_v21 }
 0x63d   :  { %v5271_v55 = vmax.f32 %v3903_v12, 0.0 }
 0x63e   :  { %v3726_v10 = vpop.f32.mrf.mxu3 }
 0x63f   :  { %v3727_v1 = vadd.f32 %v3726_v10, %v3638_v24 }
 0x640   :  { %v10921_v58 = vpop.f32.mrf.mxu2 }
 0x641   :  { %13689 = vst [vmem:[#allocation235_spill] sm:$0xff] %v10921_v58  ;;  %v10925_v44 = vpop.f32.mrf.mxu0  ;;  %v10927_v20 = vpop.f32.mrf.mxu1  ;;  %v3816_v41 = vadd.f32 %v10643_v46, %v3727_v1  ;;  %v13706_v1 = vld [vmem:[#allocation62_spill] sm:$0xff] }
 0x642   :  { %13692 = vst [vmem:[#allocation100_spill] sm:$0xff] %v10925_v44  ;;  %v3554_v21 = vadd.f32 %v13706_v1, %v3465_v59 }
 0x643   :  { %13693 = vst [vmem:[#allocation101_spill] sm:$0xff] %v10927_v20  ;;  %4044 = vmatmul.bf16.gmra.mxu3 %v13698_v16  ;;  %v3905_v38 = vadd.f32 %v10645_v51, %v3816_v41 }
 0x644   :  { %7958 = vmatmul.msk.bf16.vlgmr.msrb.gmra.mxu0 %vm2617_vm0, %v13695_v57  ;;  %4543 = vmatmul.bf16.vlgmr.msrb.gmra.mxu1 %v13696_v15  ;;  %v13704_v15 = vld [vmem:[#allocation65_spill] sm:$0xff] }
 0x645   :  { %4632 = vmatmul.bf16.vlgmr.msrb.gmra.mxu2 %v13569_v43  ;;  %v3641_v43 = vadd.f32 %v13704_v15, %v3552_v61  ;;  %v5275_v9 = vmax.f32 %v3905_v38, 0.0  ;;  %v13711_v61 = vld [vmem:[#allocation88_spill] sm:$0xff]  ;;  %v13712_v38 = vld [vmem:[#allocation19_spill] sm:$0xff]  ;;  %v7840_v15 = vld [vmem:[#allocation5 + $0x568] sm:$0xf] }
 0x646   :  { %v3729_v17 = vpop.f32.mrf.mxu3 }
 0x647   :  { %v3730_v13 = vadd.f32 %v3729_v17, %v3641_v43  ;;  %v10949_v46 = vpack.c.bf16 %v5275_v9, %v5271_v55  ;;  %v8517_v43 = vld [vmem:[#allocation5 + $0x574] sm:$0xf0]  ;;  %v13713_v9 = vld [vmem:[#allocation44_spill] sm:$0xff] }
 0x648   :  { %v10940_v42 = vpop.f32.mrf.mxu2 }
 0x649   :  { %13699 = vst [vmem:[#allocation102_spill] sm:$0xff] %v10940_v42  ;;  %v10944_v24 = vpop.f32.mrf.mxu0  ;;  %v10946_v10 = vpop.f32.mrf.mxu1  ;;  %v3819_v50 = vadd.f32 %v10655_v60, %v3730_v13  ;;  %v7841_v60 = vor.u32 %v8517_v43, %v7840_v15 }
 0x64a   :  { %13702 = vst [vmem:[#allocation237_spill] sm:$0xff] %v10944_v24 }
 0x64b   :  { %13703 = vst [vmem:[#allocation207_spill] sm:$0xff] %v10946_v10  ;;  %v3643_v10 = vadd.f32 %v13710_v34, %v3554_v21  ;;  %v3908_v59 = vadd.f32 %v10657_v62, %v3819_v50  ;;  %4361 = vmatpush.bf16.msrb.mxu3 %v7841_v60 }
 0x64c   :  { %13705 = vst [vmem:[#allocation272_spill] sm:$0xff] %v10949_v46  ;;  %v7824_v46 = vld [vmem:[#allocation5 + $0x548] sm:$0xf] }
 0x64d   :  { %v5279_v1 = vmax.f32 %v3908_v59, 0.0  ;;  %v13723_v59 = vld [vmem:[#allocation53_spill] sm:$0xff] }
 0x64e   :  { %v3731_v12 = vpop.f32.mrf.mxu3 }
 0x64f   :  { %v3732_v42 = vadd.f32 %v3731_v12, %v3643_v10  ;;  %v13721_v12 = vld [vmem:[#allocation99_spill] sm:$0xff] }
 0x650   :  { %v10952_v51 = vpop.f32.mrf.mxu2 }
 0x651   :  { %13707 = vst [vmem:[#allocation104_spill] sm:$0xff] %v10952_v51  ;;  %v10954_v41 = vpop.f32.mrf.mxu0  ;;  %v10956_v57 = vpop.f32.mrf.mxu1  ;;  %v3821_v55 = vadd.f32 %v10673_v11, %v3732_v42 }
 0x652   :  { %13708 = vst [vmem:[#allocation210_spill] sm:$0xff] %v10954_v41  ;;  %v13775_v41 = vld [vmem:[#allocation147_spill] sm:$0xff] }
 0x653   :  { %13709 = vst [vmem:[#allocation273_spill] sm:$0xff] %v10956_v57  ;;  %4049 = vmatmul.bf16.gmra.mxu3 %v13713_v9  ;;  %v3910_v21 = vadd.f32 %v10675_v39, %v3821_v55 }
 0x654   :  { %7959 = vmatmul.msk.bf16.gmra.mxu0 %vm2617_vm0, %v13711_v61  ;;  %4548 = vmatmul.bf16.gmra.mxu1 %v13712_v38  ;;  %v13722_v38 = vld [vmem:[#allocation22_spill] sm:$0xff] }
 0x655   :  { %4637 = vmatmul.bf16.gmra.mxu2 %v13590_v8  ;;  %v5283_v8 = vmax.f32 %v3910_v21, 0.0  ;;  %v13732_v61 = vld [vmem:[#allocation58_spill] sm:$0xff] }
 0x656   :  { %v10974_v34 = vpop.f32.mrf.mxu3 }
 0x657   :  { %v10976_v62 = vpack.c.bf16 %v5283_v8, %v5279_v1 }
 0x658   :  { %v10968_v17 = vpop.f32.mrf.mxu2 }
 0x659   :  { %13714 = vst [vmem:[#allocation276_spill] sm:$0xff] %v10968_v17  ;;  %v10970_v10 = vpop.f32.mrf.mxu0  ;;  %v10972_v13 = vpop.f32.mrf.mxu1  ;;  %v13757_v17 = vld [vmem:[#allocation134_spill] sm:$0xff] }
 0x65a   :  { %13715 = vst [vmem:[#allocation20_spill] sm:$0xff] %v10970_v10 }
 0x65b   :  { %13716 = vst [vmem:[#allocation277_spill] sm:$0xff] %v10972_v13 }
 0x65c   :  { %13717 = vst [vmem:[#allocation241_spill] sm:$0xff] %v10976_v62 }
 0x65e   :  { %v10984_v39 = vpop.f32.mrf.mxu3 }
 0x660   :  { %v10978_v11 = vpop.f32.mrf.mxu2 }
 0x661   :  { %13718 = vst [vmem:[#allocation107_spill] sm:$0xff] %v10978_v11  ;;  %v10980_v42 = vpop.f32.mrf.mxu0  ;;  %v10982_v50 = vpop.f32.mrf.mxu1 }
 0x662   :  { %13719 = vst [vmem:[#allocation108_spill] sm:$0xff] %v10980_v42 }
 0x663   :  { %13720 = vst [vmem:[#allocation109_spill] sm:$0xff] %v10982_v50  ;;  %4054 = vmatmul.bf16.gmra.mxu3 %v13723_v59  ;;  %v13739_v50 = vld [vmem:[#allocation121_spill] sm:$0xff] }
 0x664   :  { %7960 = vmatmul.msk.bf16.gmra.mxu0 %vm2617_vm0, %v13721_v12  ;;  %4553 = vmatmul.bf16.gmra.mxu1 %v13722_v38  ;;  %v13730_v38 = vld [vmem:[#allocation112_spill] sm:$0xff]  ;;  %v8513_v12 = vld [vmem:[#allocation5 + $0x554] sm:$0xf0] }
 0x665   :  { %4642 = vmatmul.bf16.gmra.mxu2 %v13610_v14  ;;  %v13731_v14 = vld [vmem:[#allocation25_spill] sm:$0xff] }
 0x666   :  { %v10997_v60 = vpop.f32.mrf.mxu3 }
 0x668   :  { %v10991_v55 = vpop.f32.mrf.mxu2 }
 0x669   :  { %13724 = vst [vmem:[#allocation244_spill] sm:$0xff] %v10991_v55  ;;  %v10993_v15 = vpop.f32.mrf.mxu0  ;;  %v10995_v43 = vpop.f32.mrf.mxu1 }
 0x66a   :  { %13725 = vst [vmem:[#allocation116_spill] sm:$0xff] %v10993_v15 }
 0x66b   :  { %13726 = vst [vmem:[#allocation280_spill] sm:$0xff] %v10995_v43  ;;  %v7825_v43 = vor.u32 %v8513_v12, %v7824_v46  ;;  %v13740_v46 = vld [vmem:[#allocation28_spill] sm:$0xff]  ;;  %v13741_v12 = vld [vmem:[#allocation67_spill] sm:$0xff] }
 0x66d   :  { %4362 = vmatpush.bf16.msrb.mxu3 %v7825_v43 }
 0x66e   :  { %v11005_v62 = vpop.f32.mrf.mxu3 }
 0x670   :  { %v10999_v21 = vpop.f32.mrf.mxu2 }
 0x671   :  { %13727 = vst [vmem:[#allocation117_spill] sm:$0xff] %v10999_v21  ;;  %v11001_v1 = vpop.f32.mrf.mxu0  ;;  %v11003_v8 = vpop.f32.mrf.mxu1 }
 0x672   :  { %13728 = vst [vmem:[#allocation118_spill] sm:$0xff] %v11001_v1 }
 0x673   :  { %13729 = vst [vmem:[#allocation281_spill] sm:$0xff] %v11003_v8  ;;  %4059 = vmatmul.bf16.gmra.mxu3 %v13732_v61 }
 0x674   :  { %7961 = vmatmul.msk.bf16.gmra.mxu0 %vm2617_vm0, %v13730_v38  ;;  %4558 = vmatmul.bf16.gmra.mxu1 %v13731_v14 }
 0x675   :  { %4647 = vmatmul.bf16.gmra.mxu2 %v13628_v45 }
 0x676   :  { %v11018_v1 = vpop.f32.mrf.mxu3 }
 0x678   :  { %v11012_v55 = vpop.f32.mrf.mxu2 }
 0x679   :  { %13733 = vst [vmem:[#allocation23_spill] sm:$0xff] %v11012_v55  ;;  %v11014_v21 = vpop.f32.mrf.mxu0  ;;  %v11016_v8 = vpop.f32.mrf.mxu1 }
 0x67a   :  { %13734 = vst [vmem:[#allocation173_spill] sm:$0xff] %v11014_v21 }
 0x67b   :  { %13735 = vst [vmem:[#allocation248_spill] sm:$0xff] %v11016_v8 }
 0x67e   :  { %v11026_v45 = vpop.f32.mrf.mxu3 }
 0x680   :  { %v11020_v15 = vpop.f32.mrf.mxu2 }
 0x681   :  { %13736 = vst [vmem:[#allocation124_spill] sm:$0xff] %v11020_v15  ;;  %v11022_v38 = vpop.f32.mrf.mxu0  ;;  %v11024_v14 = vpop.f32.mrf.mxu1 }
 0x682   :  { %13737 = vst [vmem:[#allocation122_spill] sm:$0xff] %v11022_v38 }
 0x683   :  { %13738 = vst [vmem:[#allocation123_spill] sm:$0xff] %v11024_v14  ;;  %4064 = vmatmul.bf16.gmra.mxu3 %v13741_v12 }
 0x684   :  { %7962 = vmatmul.msk.bf16.gmra.mxu0 %vm2617_vm0, %v13739_v50  ;;  %4563 = vmatmul.bf16.gmra.mxu1 %v13740_v46  ;;  %v13748_v46 = vld [vmem:[#allocation128_spill] sm:$0xff] }
 0x685   :  { %4652 = vmatmul.bf16.gmra.mxu2 %v13644_v40  ;;  %v13749_v40 = vld [vmem:[#allocation31_spill] sm:$0xff] }
 0x686   :  { %v11039_v38 = vpop.f32.mrf.mxu3 }
 0x688   :  { %v11033_v43 = vpop.f32.mrf.mxu2 }
 0x689   :  { %13742 = vst [vmem:[#allocation252_spill] sm:$0xff] %v11033_v43  ;;  %v11035_v8 = vpop.f32.mrf.mxu0  ;;  %v11037_v15 = vpop.f32.mrf.mxu1  ;;  %v7808_v43 = vld [vmem:[#allocation5 + $0x528] sm:$0xf] }
 0x68a   :  { %13743 = vst [vmem:[#allocation130_spill] sm:$0xff] %v11035_v8  ;;  %v8509_v8 = vld [vmem:[#allocation5 + $0x534] sm:$0xf0] }
 0x68b   :  { %13744 = vst [vmem:[#allocation125_spill] sm:$0xff] %v11037_v15  ;;  %v13750_v15 = vld [vmem:[#allocation113_spill] sm:$0xff]  ;;  %v7809_v11 = vor.u32 %v8509_v8, %v7808_v43  ;;  %v13758_v8 = vld [vmem:[#allocation34_spill] sm:$0xff] }
 0x68d   :  { %4363 = vmatpush.bf16.msrb.mxu3 %v7809_v11  ;;  %v13759_v11 = vld [vmem:[#allocation106_spill] sm:$0xff] }
 0x68e   :  { %v11047_v50 = vpop.f32.mrf.mxu3 }
 0x690   :  { %v11041_v14 = vpop.f32.mrf.mxu2 }
 0x691   :  { %13745 = vst [vmem:[#allocation131_spill] sm:$0xff] %v11041_v14  ;;  %v11043_v55 = vpop.f32.mrf.mxu0  ;;  %v11045_v21 = vpop.f32.mrf.mxu1 }
 0x692   :  { %13746 = vst [vmem:[#allocation26_spill] sm:$0xff] %v11043_v55 }
 0x693   :  { %13747 = vst [vmem:[#allocation256_spill] sm:$0xff] %v11045_v21  ;;  %4069 = vmatmul.bf16.gmra.mxu3 %v13750_v15 }
 0x694   :  { %7963 = vmatmul.msk.bf16.gmra.mxu0 %vm2617_vm0, %v13748_v46  ;;  %4568 = vmatmul.bf16.gmra.mxu1 %v13749_v40 }
 0x695   :  { %4657 = vmatmul.bf16.gmra.mxu2 %v13662_v49 }
 0x696   :  { %v11060_v55 = vpop.f32.mrf.mxu3 }
 0x698   :  { %v11054_v42 = vpop.f32.mrf.mxu2 }
 0x699   :  { %13751 = vst [vmem:[#allocation141_spill] sm:$0xff] %v11054_v42  ;;  %v11056_v14 = vpop.f32.mrf.mxu0  ;;  %v11058_v21 = vpop.f32.mrf.mxu1 }
 0x69a   :  { %13752 = vst [vmem:[#allocation140_spill] sm:$0xff] %v11056_v14 }
 0x69b   :  { %13753 = vst [vmem:[#allocation143_spill] sm:$0xff] %v11058_v21 }
 0x69e   :  { %v11068_v49 = vpop.f32.mrf.mxu3 }
 0x6a0   :  { %v11062_v13 = vpop.f32.mrf.mxu2 }
 0x6a1   :  { %13754 = vst [vmem:[#allocation260_spill] sm:$0xff] %v11062_v13  ;;  %v11064_v46 = vpop.f32.mrf.mxu0  ;;  %v11066_v40 = vpop.f32.mrf.mxu1 }
 0x6a2   :  { %13755 = vst [vmem:[#allocation142_spill] sm:$0xff] %v11064_v46 }
 0x6a3   :  { %13756 = vst [vmem:[#allocation209_spill] sm:$0xff] %v11066_v40  ;;  %4074 = vmatmul.bf16.gmra.mxu3 %v13759_v11 }
 0x6a4   :  { %7964 = vmatmul.msk.bf16.gmra.mxu0 %vm2617_vm0, %v13757_v17  ;;  %4573 = vmatmul.bf16.gmra.mxu1 %v13758_v8  ;;  %v13766_v8 = vld [vmem:[#allocation139_spill] sm:$0xff] }
 0x6a5   :  { %4662 = vmatmul.bf16.gmra.mxu2 %v13680_v32  ;;  %v13767_v32 = vld [vmem:[#allocation37_spill] sm:$0xff] }
 0x6a6   :  { %v11081_v46 = vpop.f32.mrf.mxu3 }
 0x6a8   :  { %v11075_v43 = vpop.f32.mrf.mxu2 }
 0x6a9   :  { %13760 = vst [vmem:[#allocation176_spill] sm:$0xff] %v11075_v43  ;;  %v11077_v21 = vpop.f32.mrf.mxu0  ;;  %v11079_v13 = vpop.f32.mrf.mxu1  ;;  %v7792_v43 = vld [vmem:[#allocation5 + $0x508] sm:$0xf] }
 0x6aa   :  { %13761 = vst [vmem:[#allocation29_spill] sm:$0xff] %v11077_v21  ;;  %v8505_v21 = vld [vmem:[#allocation5 + $0x514] sm:$0xf0] }
 0x6ab   :  { %13762 = vst [vmem:[#allocation262_spill] sm:$0xff] %v11079_v13  ;;  %v13768_v13 = vld [vmem:[#allocation115_spill] sm:$0xff]  ;;  %v7793_v10 = vor.u32 %v8505_v21, %v7792_v43 }
 0x6ac   :  { %v13776_v21 = vld [vmem:[#allocation43_spill] sm:$0xff] }
 0x6ad   :  { %4364 = vmatpush.bf16.msrb.mxu3 %v7793_v10  ;;  %v13777_v10 = vld [vmem:[#allocation129_spill] sm:$0xff] }
 0x6ae   :  { %v11089_v17 = vpop.f32.mrf.mxu3 }
 0x6b0   :  { %v11083_v40 = vpop.f32.mrf.mxu2 }
 0x6b1   :  { %13763 = vst [vmem:[#allocation215_spill] sm:$0xff] %v11083_v40  ;;  %v11085_v42 = vpop.f32.mrf.mxu0  ;;  %v11087_v14 = vpop.f32.mrf.mxu1 }
 0x6b2   :  { %13764 = vst [vmem:[#allocation46_spill] sm:$0xff] %v11085_v42 }
 0x6b3   :  { %13765 = vst [vmem:[#allocation148_spill] sm:$0xff] %v11087_v14  ;;  %4079 = vmatmul.bf16.gmra.mxu3 %v13768_v13 }
 0x6b4   :  { %7965 = vmatmul.msk.bf16.gmra.mxu0 %vm2617_vm0, %v13766_v8  ;;  %4578 = vmatmul.bf16.gmra.mxu1 %v13767_v32 }
 0x6b5   :  { %4667 = vmatmul.bf16.gmra.mxu2 %v13698_v16 }
 0x6b6   :  { %v11102_v42 = vpop.f32.mrf.mxu3 }
 0x6b7   :  { %13772 = vst [vmem:[#allocation216_spill] sm:$0xff] %v11102_v42 }
 0x6b8   :  { %v11096_v57 = vpop.f32.mrf.mxu2 }
 0x6b9   :  { %13769 = vst [vmem:[#allocation186_spill] sm:$0xff] %v11096_v57  ;;  %v11098_v40 = vpop.f32.mrf.mxu0  ;;  %v11100_v14 = vpop.f32.mrf.mxu1 }
 0x6ba   :  { %13770 = vst [vmem:[#allocation264_spill] sm:$0xff] %v11098_v40 }
 0x6bb   :  { %13771 = vst [vmem:[#allocation149_spill] sm:$0xff] %v11100_v14 }
 0x6be   :  { %v11108_v16 = vpop.f32.mrf.mxu3 }
 0x6bf   :  { %13774 = vst [vmem:[#allocation266_spill] sm:$0xff] %v11108_v16  ;;  %v8495_v16 = vld [vmem:[#allocation5 + $0x4cc] sm:$0xf] }
 0x6c0   :  { %v11104_v51 = vpop.f32.mrf.mxu2 }
 0x6c1   :  { %13773 = vst [vmem:[#allocation32_spill] sm:$0xff] %v11104_v51  ;;  %v11106_v8 = vpop.f32.mrf.mxu0  ;;  %v4544_v32 = vpop.f32.mrf.mxu1 }
 0x6c3   :  { %4084 = vmatmul.bf16.gmra.mxu3 %v13777_v10 }
 0x6c4   :  { %7966 = vmatmul.msk.bf16.gmra.mxu0 %vm2617_vm0, %v13775_v41  ;;  %4583 = vmatmul.bf16.gmra.mxu1 %v13776_v21  ;;  %v13782_v21 = vld [vmem:[#allocation156_spill] sm:$0xff] }
 0x6c5   :  { %4672 = vmatmul.bf16.gmra.mxu2 %v13713_v9  ;;  %v13783_v9 = vld [vmem:[#allocation52_spill] sm:$0xff] }
 0x6c6   :  { %v11119_v40 = vpop.f32.mrf.mxu3 }
 0x6c7   :  { %13779 = vst [vmem:[#allocation155_spill] sm:$0xff] %v11119_v40 }
 0x6c8   :  { %v4633_v43 = vpop.f32.mrf.mxu2 }
 0x6c9   :  { %v11115_v14 = vadd.f32 %v4633_v43, %v4544_v32  ;;  %v11117_v57 = vpop.f32.mrf.mxu0  ;;  %v4546_v51 = vpop.f32.mrf.mxu1  ;;  %v8435_v32 = vld [vmem:[#allocation5 + $0x2ec] sm:$0xf]  ;;  %v7522_v43 = vld [vmem:[#allocation5 + $0x2f8] sm:$0xf0] }
 0x6ca   :  { %v7525_v30 = vor.u32 %v8435_v32, %v7522_v43  ;;  %v13790_v32 = vld [vmem:[#allocation57_spill] sm:$0xff] }
 0x6cb   :  { %13778 = vst [vmem:[#allocation55_spill] sm:$0xff] %v11115_v14  ;;  %v13784_v14 = vld [vmem:[#allocation77_spill] sm:$0xff] }
 0x6cc   :  { %4713 = vmatpush.bf16.msra.mxu3 %v7525_v30 }
 0x6ce   :  { %v11125_v44 = vpop.f32.mrf.mxu3 }
 0x6cf   :  { %13781 = vst [vmem:[#allocation270_spill] sm:$0xff] %v11125_v44 }
 0x6d0   :  { %v4635_v24 = vpop.f32.mrf.mxu2 }
 0x6d1   :  { %v11121_v20 = vadd.f32 %v4635_v24, %v4546_v51  ;;  %v11123_v58 = vpop.f32.mrf.mxu0  ;;  %v4549_v41 = vpop.f32.mrf.mxu1 }
 0x6d3   :  { %13780 = vst [vmem:[#allocation56_spill] sm:$0xff] %v11121_v20  ;;  %4365 = vmatmul.bf16.vlgmr.msrb.gmra.mxu3 %v13784_v14 }
 0x6d4   :  { %7967 = vmatmul.msk.bf16.gmra.mxu0 %vm2617_vm0, %v13782_v21  ;;  %4588 = vmatmul.bf16.gmra.mxu1 %v13783_v9 }
 0x6d5   :  { %4677 = vmatmul.bf16.gmra.mxu2 %v13723_v59 }
 0x6d6   :  { %v11136_v26 = vpop.f32.mrf.mxu3 }
 0x6d7   :  { %13786 = vst [vmem:[#allocation152_spill] sm:$0xff] %v11136_v26 }
 0x6d8   :  { %v4638_v27 = vpop.f32.mrf.mxu2 }
 0x6d9   :  { %v11132_v24 = vadd.f32 %v4638_v27, %v4549_v41  ;;  %v11134_v51 = vpop.f32.mrf.mxu0  ;;  %v4551_v20 = vpop.f32.mrf.mxu1  ;;  %v13791_v27 = vld [vmem:[#allocation87_spill] sm:$0xff] }
 0x6db   :  { %13785 = vst [vmem:[#allocation221_spill] sm:$0xff] %v11132_v24 }
 0x6de   :  { %v11142_v44 = vpop.f32.mrf.mxu3 }
 0x6df   :  { %13788 = vst [vmem:[#allocation35_spill] sm:$0xff] %v11142_v44 }
 0x6e0   :  { %v4640_v18 = vpop.f32.mrf.mxu2 }
 0x6e1   :  { %v11138_v21 = vadd.f32 %v4640_v18, %v4551_v20  ;;  %v11140_v9 = vpop.f32.mrf.mxu0  ;;  %v4554_v59 = vpop.f32.mrf.mxu1 }
 0x6e3   :  { %13787 = vst [vmem:[#allocation158_spill] sm:$0xff] %v11138_v21  ;;  %4370 = vmatmul.bf16.gmra.mxu3 %v13791_v27 }
 0x6e4   :  { %7968 = vmatmul.msk.bf16.gmra.mxu0 %vm2617_vm0, %v13789_v53  ;;  %4593 = vmatmul.bf16.gmra.mxu1 %v13790_v32  ;;  %v13796_v32 = vld [vmem:[#allocation180_spill] sm:$0xff] }
 0x6e5   :  { %4682 = vmatmul.bf16.gmra.mxu2 %v13732_v61  ;;  %v13797_v61 = vld [vmem:[#allocation66_spill] sm:$0xff] }
 0x6e6   :  { %v11153_v20 = vpop.f32.mrf.mxu3 }
 0x6e7   :  { %13793 = vst [vmem:[#allocation222_spill] sm:$0xff] %v11153_v20 }
 0x6e8   :  { %v4643_v30 = vpop.f32.mrf.mxu2 }
 0x6e9   :  { %v11149_v41 = vadd.f32 %v4643_v30, %v4554_v59  ;;  %v11151_v43 = vpop.f32.mrf.mxu0  ;;  %v4556_v18 = vpop.f32.mrf.mxu1  ;;  %v8431_v59 = vld [vmem:[#allocation5 + $0x2cc] sm:$0xf]  ;;  %v7506_v30 = vld [vmem:[#allocation5 + $0x2d8] sm:$0xf0] }
 0x6ea   :  { %v7509_v20 = vor.u32 %v8431_v59, %v7506_v30  ;;  %v8499_v59 = vld [vmem:[#allocation5 + $0x4ec] sm:$0xf] }
 0x6eb   :  { %13792 = vst [vmem:[#allocation274_spill] sm:$0xff] %v11149_v41  ;;  %v13798_v41 = vld [vmem:[#allocation98_spill] sm:$0xff]  ;;  %v13803_v30 = vld [vmem:[#allocation193_spill] sm:$0xff] }
 0x6ec   :  { %4714 = vmatpush.bf16.msra.mxu3 %v7509_v20  ;;  %v7778_v20 = vld [vmem:[#allocation5 + $0x4f8] sm:$0xf0] }
 0x6ee   :  { %v11159_v26 = vpop.f32.mrf.mxu3 }
 0x6ef   :  { %13795 = vst [vmem:[#allocation159_spill] sm:$0xff] %v11159_v26 }
 0x6f0   :  { %v4645_v21 = vpop.f32.mrf.mxu2 }
 0x6f1   :  { %v11155_v24 = vadd.f32 %v4645_v21, %v4556_v18  ;;  %v11157_v44 = vpop.f32.mrf.mxu0  ;;  %v4559_v53 = vpop.f32.mrf.mxu1 }
 0x6f3   :  { %13794 = vst [vmem:[#allocation50_spill] sm:$0xff] %v11155_v24  ;;  %4375 = vmatmul.bf16.gmra.mxu3 %v13798_v41 }
 0x6f4   :  { %7969 = vmatmul.msk.bf16.gmra.mxu0 %vm2617_vm0, %v13796_v32  ;;  %4598 = vmatmul.bf16.gmra.mxu1 %v13797_v61 }
 0x6f5   :  { %4687 = vmatmul.bf16.gmra.mxu2 %v13741_v12 }
 0x6f6   :  { %v11170_v26 = vpop.f32.mrf.mxu3 }
 0x6f7   :  { %13800 = vst [vmem:[#allocation60_spill] sm:$0xff] %v11170_v26  ;;  %v7906_v26 = vld [vmem:[#allocation5 + $0x5f8] sm:$0xf0] }
 0x6f8   :  { %v4648_v36 = vpop.f32.mrf.mxu2 }
 0x6f9   :  { %v11166_v21 = vadd.f32 %v4648_v36, %v4559_v53  ;;  %v11168_v18 = vpop.f32.mrf.mxu0  ;;  %v4561_v24 = vpop.f32.mrf.mxu1  ;;  %v13804_v53 = vld [vmem:[#allocation75_spill] sm:$0xff]  ;;  %v7653_v36 = vor.u32 %v8467_v3, %v7650_v35 }
 0x6fa   :  { %v7890_v3 = vld [vmem:[#allocation5 + $0x5d8] sm:$0xf0] }
 0x6fb   :  { %13799 = vst [vmem:[#allocation278_spill] sm:$0xff] %v11166_v21  ;;  %v8531_v21 = vld [vmem:[#allocation5 + $0x5ec] sm:$0xf]  ;;  %4802 = vmatpush.bf16.msra.mxu0 %v7653_v36 }
 0x6fc   :  { %v8491_v36 = vld [vmem:[#allocation5 + $0x4ac] sm:$0xf] }
 0x6fe   :  { %v11176_v40 = vpop.f32.mrf.mxu3 }
 0x6ff   :  { %13802 = vst [vmem:[#allocation16_spill] sm:$0xff] %v11176_v40  ;;  %v8463_v40 = vld [vmem:[#allocation5 + $0x3cc] sm:$0xf] }
 0x700   :  { %v4650_v5 = vpop.f32.mrf.mxu2 }
 0x701   :  { %v11172_v32 = vadd.f32 %v4650_v5, %v4561_v24  ;;  %v11174_v61 = vpop.f32.mrf.mxu0  ;;  %v4564_v12 = vpop.f32.mrf.mxu1  ;;  %v7781_v5 = vor.u32 %v8499_v59, %v7778_v20  ;;  %v7909_v24 = vor.u32 %v8531_v21, %v7906_v26  ;;  %v7765_v59 = vor.u32 %v8495_v16, %v7762_v37  ;;  %v8459_v21 = vld [vmem:[#allocation5 + $0x3ac] sm:$0xf]  ;;  %v7618_v20 = vld [vmem:[#allocation5 + $0x3b8] sm:$0xf0] }
 0x702   :  { %v7602_v37 = vld [vmem:[#allocation5 + $0x398] sm:$0xf0]  ;;  %v8487_v16 = vld [vmem:[#allocation5 + $0x48c] sm:$0xf] }
 0x703   :  { %13801 = vst [vmem:[#allocation161_spill] sm:$0xff] %v11172_v32  ;;  %v13805_v32 = vld [vmem:[#allocation111_spill] sm:$0xff]  ;;  %4891 = vmatpush.bf16.msra.mxu1 %v7781_v5  ;;  %4980 = vmatpush.bf16.msra.mxu2 %v7909_v24  ;;  %v7621_v24 = vor.u32 %v8459_v21, %v7618_v20 }
 0x704   :  { %7970 = vmatmul.msk.bf16.gmra.mxu0 %vm2617_vm0, %v13803_v30  ;;  %4603 = vmatmul.bf16.gmra.mxu1 %v13804_v53  ;;  %v7637_v30 = vor.u32 %v8463_v40, %v7634_v54  ;;  %v8527_v53 = vld [vmem:[#allocation5 + $0x5cc] sm:$0xf]  ;;  %v7874_v54 = vld [vmem:[#allocation5 + $0x5b8] sm:$0xf0]  ;;  %v7749_v40 = vor.u32 %v8491_v36, %v7746_v22 }
 0x705   :  { %4692 = vmatmul.bf16.gmra.mxu2 %v13750_v15  ;;  %4380 = vmatmul.bf16.gmra.mxu3 %v13805_v32  ;;  %v7893_v26 = vor.u32 %v8527_v53, %v7890_v3  ;;  %v7586_v36 = vld [vmem:[#allocation5 + $0x378] sm:$0xf0] }
 0x706   :  { %v11187_v5 = vpop.f32.mrf.mxu3  ;;  %4803 = vmatpush.bf16.msra.mxu0 %v7637_v30 }
 0x707   :  { %13808 = vst [vmem:[#allocation282_spill] sm:$0xff] %v11187_v5  ;;  %4892 = vmatpush.bf16.msra.mxu1 %v7765_v59  ;;  %4981 = vmatpush.bf16.msra.mxu2 %v7893_v26  ;;  %v7858_v5 = vld [vmem:[#allocation5 + $0x598] sm:$0xf0] }
 0x708   :  { %v4653_v56 = vpop.f32.mrf.mxu2 }
 0x709   :  { %v11183_v35 = vadd.f32 %v4653_v56, %v4564_v12  ;;  %v11185_v42 = vpop.f32.mrf.mxu0  ;;  %v4566_v15 = vpop.f32.mrf.mxu1  ;;  %v7877_v56 = vor.u32 %v8523_v28, %v7874_v54  ;;  %v8455_v12 = vld [vmem:[#allocation5 + $0x38c] sm:$0xf]  ;;  %v13812_v54 = vld [vmem:[#allocation204_spill] sm:$0xff] }
 0x70a   :  { %13807 = vst [vmem:[#allocation38_spill] sm:$0xff] %v11185_v42  ;;  %4804 = vmatpush.bf16.msra.mxu0 %v7621_v24  ;;  %v7605_v3 = vor.u32 %v8455_v12, %v7602_v37  ;;  %v8519_v42 = vld [vmem:[#allocation5 + $0x58c] sm:$0xf]  ;;  %v7842_v37 = vld [vmem:[#allocation5 + $0x578] sm:$0xf0] }
 0x70b   :  { %13806 = vst [vmem:[#allocation224_spill] sm:$0xff] %v11183_v35  ;;  %4893 = vmatpush.bf16.msra.mxu1 %v7749_v40  ;;  %4982 = vmatpush.bf16.msra.mxu2 %v7877_v56  ;;  %v7730_v35 = vld [vmem:[#allocation5 + $0x498] sm:$0xf0]  ;;  %v7861_v26 = vor.u32 %v8519_v42, %v7858_v5  ;;  %v8451_v28 = vld [vmem:[#allocation5 + $0x36c] sm:$0xf] }
 0x70c   :  { %v7733_v59 = vor.u32 %v8487_v16, %v7730_v35  ;;  %v8483_v24 = vld [vmem:[#allocation5 + $0x46c] sm:$0xf]  ;;  %v7714_v56 = vld [vmem:[#allocation5 + $0x478] sm:$0xf0] }
 0x70d   :  { %v13813_v40 = vld [vmem:[#allocation85_spill] sm:$0xff]  ;;  %v7490_v35 = vld [vmem:[#allocation5 + $0x2b8] sm:$0xf0]  ;;  %v7717_v5 = vor.u32 %v8483_v24, %v7714_v56 }
 0x70e   :  { %v11193_v22 = vpop.f32.mrf.mxu3  ;;  %4805 = vmatpush.bf16.msra.mxu0 %v7605_v3  ;;  %v8515_v12 = vld [vmem:[#allocation5 + $0x56c] sm:$0xf] }
 0x70f   :  { %13811 = vst [vmem:[#allocation62_spill] sm:$0xff] %v11193_v22  ;;  %4894 = vmatpush.bf16.msra.mxu1 %v7733_v59  ;;  %4983 = vmatpush.bf16.msra.mxu2 %v7861_v26  ;;  %v8427_v42 = vld [vmem:[#allocation5 + $0x2ac] sm:$0xf]  ;;  %v7845_v16 = vor.u32 %v8515_v12, %v7842_v37  ;;  %v7570_v26 = vld [vmem:[#allocation5 + $0x358] sm:$0xf0] }
 0x710   :  { %v4655_v53 = vpop.f32.mrf.mxu2  ;;  %v7493_v3 = vor.u32 %v8427_v42, %v7490_v35  ;;  %v8447_v59 = vld [vmem:[#allocation5 + $0x34c] sm:$0xf]  ;;  %v7826_v22 = vld [vmem:[#allocation5 + $0x558] sm:$0xf0] }
 0x711   :  { %v11189_v30 = vadd.f32 %v4655_v53, %v4566_v15  ;;  %v11191_v21 = vpop.f32.mrf.mxu0  ;;  %v4569_v20 = vpop.f32.mrf.mxu1  ;;  %v7589_v15 = vor.u32 %v8451_v28, %v7586_v36  ;;  %v13814_v53 = vld [vmem:[#allocation120_spill] sm:$0xff]  ;;  %v7573_v28 = vor.u32 %v8447_v59, %v7570_v26  ;;  %v7698_v36 = vld [vmem:[#allocation5 + $0x458] sm:$0xf0]  ;;  %v8443_v37 = vld [vmem:[#allocation5 + $0x32c] sm:$0xf] }
 0x712   :  { %13810 = vst [vmem:[#allocation65_spill] sm:$0xff] %v11191_v21  ;;  %4715 = vmatpush.bf16.msra.mxu3 %v7493_v3  ;;  %v8475_v42 = vld [vmem:[#allocation5 + $0x42c] sm:$0xf]  ;;  %v7810_v59 = vld [vmem:[#allocation5 + $0x538] sm:$0xf0] }
 0x713   :  { %13809 = vst [vmem:[#allocation225_spill] sm:$0xff] %v11189_v30  ;;  %4806 = vmatpush.bf16.msra.mxu0 %v7589_v15  ;;  %4895 = vmatpush.bf16.msra.mxu1 %v7717_v5  ;;  %v8511_v30 = vld [vmem:[#allocation5 + $0x54c] sm:$0xf]  ;;  %v7554_v15 = vld [vmem:[#allocation5 + $0x338] sm:$0xf0] }
 0x714   :  { %7971 = vmatmul.msk.bf16.gmra.mxu0 %vm2617_vm0, %v13812_v54  ;;  %4608 = vmatmul.bf16.gmra.mxu1 %v13813_v40  ;;  %v8479_v54 = vld [vmem:[#allocation5 + $0x44c] sm:$0xf]  ;;  %v7829_v12 = vor.u32 %v8511_v30, %v7826_v22  ;;  %v7557_v5 = vor.u32 %v8443_v37, %v7554_v15 }
 0x715   :  { %4697 = vmatmul.bf16.gmra.mxu2 %v13759_v11  ;;  %4385 = vmatmul.bf16.gmra.mxu3 %v13814_v53  ;;  %v7701_v56 = vor.u32 %v8479_v54, %v7698_v36  ;;  %v8507_v3 = vld [vmem:[#allocation5 + $0x52c] sm:$0xf]  ;;  %v7538_v54 = vld [vmem:[#allocation5 + $0x318] sm:$0xf0] }
 0x716   :  { %4984 = vmatpush.bf16.msra.mxu2 %v7845_v16  ;;  %v11204_v35 = vpop.f32.mrf.mxu3  ;;  %v7682_v16 = vld [vmem:[#allocation5 + $0x438] sm:$0xf0]  ;;  %v8471_v30 = vld [vmem:[#allocation5 + $0x40c] sm:$0xf] }
 0x717   :  { %13817 = vst [vmem:[#allocation44_spill] sm:$0xff] %v11204_v35  ;;  %4807 = vmatpush.bf16.msra.mxu0 %v7573_v28  ;;  %4896 = vmatpush.bf16.msra.mxu1 %v7701_v56  ;;  %v7685_v26 = vor.u32 %v8475_v42, %v7682_v16  ;;  %v7794_v35 = vld [vmem:[#allocation5 + $0x518] sm:$0xf0] }
 0x718   :  { %v4658_v40 = vpop.f32.mrf.mxu2  ;;  %v13821_v16 = vld [vmem:[#allocation95_spill] sm:$0xff] }
 0x719   :  { %v11200_v11 = vadd.f32 %v4658_v40, %v4569_v20  ;;  %v11202_v21 = vpop.f32.mrf.mxu0  ;;  %v4571_v24 = vpop.f32.mrf.mxu1  ;;  %v7813_v20 = vor.u32 %v8507_v3, %v7810_v59  ;;  %v8439_v40 = vld [vmem:[#allocation5 + $0x30c] sm:$0xf]  ;;  %v13822_v3 = vld [vmem:[#allocation127_spill] sm:$0xff] }
 0x71a   :  { %13816 = vst [vmem:[#allocation19_spill] sm:$0xff] %v11202_v21  ;;  %4985 = vmatpush.bf16.msra.mxu2 %v7829_v12  ;;  %v7541_v36 = vor.u32 %v8439_v40, %v7538_v54  ;;  %v8503_v21 = vld [vmem:[#allocation5 + $0x50c] sm:$0xf] }
 0x71b   :  { %13815 = vst [vmem:[#allocation162_spill] sm:$0xff] %v11200_v11  ;;  %4808 = vmatpush.bf16.msra.mxu0 %v7557_v5  ;;  %4897 = vmatpush.bf16.msra.mxu1 %v7685_v26  ;;  %v7666_v11 = vld [vmem:[#allocation5 + $0x418] sm:$0xf0]  ;;  %v7797_v12 = vor.u32 %v8503_v21, %v7794_v35  ;;  %v13820_v5 = vld [vmem:[#allocation213_spill] sm:$0xff] }
 0x71c   :  { %v7669_v56 = vor.u32 %v8471_v30, %v7666_v11 }
 0x71e   :  { %4986 = vmatpush.bf16.msra.mxu2 %v7813_v20  ;;  %v11210_v42 = vpop.f32.mrf.mxu3 }
 0x71f   :  { %13819 = vst [vmem:[#allocation53_spill] sm:$0xff] %v11210_v42  ;;  %4809 = vmatpush.bf16.msra.mxu0 %v7541_v36  ;;  %4898 = vmatpush.bf16.msra.mxu1 %v7669_v56  ;;  %v8423_v36 = vld [vmem:[#allocation5 + $0x28c] sm:$0xf] }
 0x720   :  { %v4660_v22 = vpop.f32.mrf.mxu2  ;;  %v13829_v56 = vld [vmem:[#allocation133_spill] sm:$0xff] }
 0x721   :  { %v11206_v28 = vadd.f32 %v4660_v22, %v4571_v24  ;;  %v11208_v37 = vpop.f32.mrf.mxu0  ;;  %v4574_v15 = vpop.f32.mrf.mxu1  ;;  %v13827_v22 = vld [vmem:[#allocation219_spill] sm:$0xff] }
 0x722   :  { %4987 = vmatpush.bf16.msra.mxu2 %v7797_v12 }
 0x723   :  { %13818 = vst [vmem:[#allocation22_spill] sm:$0xff] %v11206_v28  ;;  %v13834_v28 = vld [vmem:[#allocation163_spill] sm:$0xff] }
 0x724   :  { %7972 = vmatmul.msk.bf16.gmra.mxu0 %vm2617_vm0, %v13820_v5  ;;  %4613 = vmatmul.bf16.gmra.mxu1 %v13821_v16 }
 0x725   :  { %4702 = vmatmul.bf16.gmra.mxu2 %v13768_v13  ;;  %4390 = vmatmul.bf16.gmra.mxu3 %v13822_v3  ;;  %v13828_v13 = vld [vmem:[#allocation105_spill] sm:$0xff] }
 0x726   :  { %v11221_v11 = vpop.f32.mrf.mxu3 }
 0x727   :  { %13824 = vst [vmem:[#allocation58_spill] sm:$0xff] %v11221_v11  ;;  %v13846_v11 = vld [vmem:[#allocation232_spill] sm:$0xff] }
 0x728   :  { %v4663_v24 = vpop.f32.mrf.mxu2  ;;  %v4016_v42 = vadd.f32 %v10997_v60, %v13846_v11  ;;  %v13847_v60 = vld [vmem:[#allocation234_spill] sm:$0xff] }
 0x729   :  { %v11217_v59 = vadd.f32 %v4663_v24, %v4574_v15  ;;  %v11219_v26 = vpop.f32.mrf.mxu0  ;;  %v4576_v21 = vpop.f32.mrf.mxu1  ;;  %v7474_v15 = vld [vmem:[#allocation5 + $0x298] sm:$0xf0] }
 0x72a   :  { %v7477_v12 = vor.u32 %v8423_v36, %v7474_v15  ;;  %v13835_v36 = vld [vmem:[#allocation76_spill] sm:$0xff] }
 0x72b   :  { %13823 = vst [vmem:[#allocation25_spill] sm:$0xff] %v11217_v59 }
 0x72c   :  { %4716 = vmatpush.bf16.msra.mxu3 %v7477_v12 }
 0x72e   :  { %v11227_v30 = vpop.f32.mrf.mxu3 }
 0x72f   :  { %13826 = vst [vmem:[#allocation67_spill] sm:$0xff] %v11227_v30 }
 0x730   :  { %v4665_v35 = vpop.f32.mrf.mxu2 }
 0x731   :  { %v11223_v20 = vadd.f32 %v4665_v35, %v4576_v21  ;;  %v11225_v40 = vpop.f32.mrf.mxu0  ;;  %v4579_v54 = vpop.f32.mrf.mxu1 }
 0x733   :  { %13825 = vst [vmem:[#allocation28_spill] sm:$0xff] %v11223_v20 }
 0x734   :  { %7973 = vmatmul.msk.bf16.gmra.mxu0 %vm2617_vm0, %v13827_v22  ;;  %4618 = vmatmul.bf16.gmra.mxu1 %v13828_v13 }
 0x735   :  { %4707 = vmatmul.bf16.gmra.mxu2 %v13777_v10  ;;  %4395 = vmatmul.bf16.gmra.mxu3 %v13829_v56 }
 0x736   :  { %v11238_v5 = vpop.f32.mrf.mxu3 }
 0x737   :  { %13831 = vst [vmem:[#allocation113_spill] sm:$0xff] %v11238_v5 }
 0x738   :  { %v4668_v16 = vpop.f32.mrf.mxu2 }
 0x739   :  { %v11234_v24 = vadd.f32 %v4668_v16, %v4579_v54  ;;  %v11236_v21 = vpop.f32.mrf.mxu0  ;;  %v4581_v35 = vpop.f32.mrf.mxu1  ;;  %v13836_v54 = vld [vmem:[#allocation138_spill] sm:$0xff] }
 0x73b   :  { %13830 = vst [vmem:[#allocation31_spill] sm:$0xff] %v11234_v24 }
 0x73e   :  { %v11244_v59 = vpop.f32.mrf.mxu3 }
 0x73f   :  { %13833 = vst [vmem:[#allocation106_spill] sm:$0xff] %v11244_v59 }
 0x740   :  { %v4670_v20 = vpop.f32.mrf.mxu2 }
 0x741   :  { %v11240_v22 = vadd.f32 %v4670_v20, %v4581_v35  ;;  %v11242_v13 = vpop.f32.mrf.mxu0  ;;  %v4584_v10 = vpop.f32.mrf.mxu1 }
 0x743   :  { %13832 = vst [vmem:[#allocation34_spill] sm:$0xff] %v11240_v22  ;;  %v13839_v22 = vld [vmem:[#allocation228_spill] sm:$0xff] }
 0x744   :  { %4810 = vmatmul.bf16.vlgmr.msra.gmra.mxu0 %v13834_v28  ;;  %4899 = vmatmul.bf16.vlgmr.msra.gmra.mxu1 %v13835_v36  ;;  %v4011_v24 = vadd.f32 %v10974_v34, %v13839_v22  ;;  %v8419_v34 = vld [vmem:[#allocation5 + $0x26c] sm:$0xf]  ;;  %v7458_v22 = vld [vmem:[#allocation5 + $0x278] sm:$0xf0] }
 0x745   :  { %4988 = vmatmul.bf16.vlgmr.msra.gmra.mxu2 %v13784_v14  ;;  %4400 = vmatmul.bf16.gmra.mxu3 %v13836_v54 }
 0x746   :  { %v11254_v35 = vpop.f32.mrf.mxu3  ;;  %v4100_v28 = vadd.f32 %v10685_v19, %v4011_v24  ;;  %v7461_v24 = vor.u32 %v8419_v34, %v7458_v22  ;;  %v4105_v34 = vadd.f32 %v10715_v7, %v4016_v42 }
 0x747   :  { %13838 = vst [vmem:[#allocation115_spill] sm:$0xff] %v11254_v35 }
 0x748   :  { %v4673_v15 = vpop.f32.mrf.mxu2  ;;  %v4189_v19 = vadd.f32 %v10687_v63, %v4100_v28  ;;  %4717 = vmatpush.bf16.msra.mxu3 %v7461_v24  ;;  %v4194_v42 = vadd.f32 %v10717_v29, %v4105_v34 }
 0x749   :  { %v11250_v12 = vadd.f32 %v4673_v15, %v4584_v10  ;;  %v11252_v16 = vpop.f32.mrf.mxu0  ;;  %v4586_v20 = vpop.f32.mrf.mxu1  ;;  %v13842_v10 = vld [vmem:[#allocation175_spill] sm:$0xff]  ;;  %v13843_v15 = vld [vmem:[#allocation86_spill] sm:$0xff] }
 0x74b   :  { %13837 = vst [vmem:[#allocation37_spill] sm:$0xff] %v11250_v12  ;;  %v13844_v12 = vld [vmem:[#allocation230_spill] sm:$0xff] }
 0x74c   :  { %v4013_v35 = vadd.f32 %v10984_v39, %v13844_v12  ;;  %v4278_v39 = vadd.f32 %v10699_v47, %v4189_v19 }
 0x74e   :  { %v11263_v30 = vpop.f32.mrf.mxu3 }
 0x74f   :  { %13841 = vst [vmem:[#allocation129_spill] sm:$0xff] %v11263_v30 }
 0x750   :  { %v4675_v59 = vpop.f32.mrf.mxu2 }
 0x751   :  { %v11259_v5 = vadd.f32 %v4675_v59, %v4586_v20  ;;  %v11261_v36 = vpop.f32.mrf.mxu0  ;;  %v4589_v14 = vpop.f32.mrf.mxu1  ;;  %v13845_v59 = vld [vmem:[#allocation146_spill] sm:$0xff] }
 0x753   :  { %13840 = vst [vmem:[#allocation43_spill] sm:$0xff] %v11259_v5  ;;  %v4102_v5 = vadd.f32 %v10703_v25, %v4013_v35 }
 0x754   :  { %4815 = vmatmul.bf16.gmra.mxu0 %v13842_v10  ;;  %4904 = vmatmul.bf16.gmra.mxu1 %v13843_v15 }
 0x755   :  { %4993 = vmatmul.bf16.gmra.mxu2 %v13791_v27  ;;  %4405 = vmatmul.bf16.gmra.mxu3 %v13845_v59  ;;  %v4191_v63 = vadd.f32 %v10705_v52, %v4102_v5  ;;  %v4018_v52 = vadd.f32 %v11005_v62, %v13847_v60  ;;  %v13848_v5 = vld [vmem:[#allocation154_spill] sm:$0xff]  ;;  %v13849_v62 = vld [vmem:[#allocation79_spill] sm:$0xff] }
 0x756   :  { %v4366_v12 = vpop.f32.mrf.mxu3 }
 0x757   :  { %v4367_v27 = vadd.f32 %v4366_v12, %v4278_v39 }
 0x758   :  { %v4678_v20 = vpop.f32.mrf.mxu2 }
 0x759   :  { %v11273_v30 = vadd.f32 %v4678_v20, %v4589_v14  ;;  %v11275_v10 = vpop.f32.mrf.mxu0  ;;  %v4591_v15 = vpop.f32.mrf.mxu1  ;;  %v4280_v14 = vadd.f32 %v10711_v4, %v4191_v63  ;;  %v4456_v47 = vadd.f32 %v11106_v8, %v4367_v27  ;;  %v4107_v8 = vadd.f32 %v10733_v6, %v4018_v52  ;;  %v13850_v27 = vld [vmem:[#allocation236_spill] sm:$0xff] }
 0x75a   :  { %v4021_v29 = vadd.f32 %v11018_v1, %v13850_v27  ;;  %v13851_v63 = vld [vmem:[#allocation80_spill] sm:$0xff]  ;;  %v13856_v1 = vld [vmem:[#allocation238_spill] sm:$0xff]  ;;  %v13858_v27 = vld [vmem:[#allocation167_spill] sm:$0xff] }
 0x75b   :  { %v5160_v4 = vmax.f32 %v4456_v47, 0.0 }
 0x75e   :  { %v4368_v24 = vpop.f32.mrf.mxu3 }
 0x75f   :  { %v4369_v19 = vadd.f32 %v4368_v24, %v4280_v14  ;;  %v13852_v14 = vld [vmem:[#allocation246_spill] sm:$0xff] }
 0x760   :  { %v4680_v28 = vpop.f32.mrf.mxu2  ;;  %v4110_v24 = vadd.f32 %v13852_v14, %v4021_v29 }
 0x761   :  { %v11282_v22 = vadd.f32 %v4680_v28, %v4591_v15  ;;  %v11284_v25 = vpop.f32.mrf.mxu0  ;;  %v4594_v35 = vpop.f32.mrf.mxu1  ;;  %v4458_v7 = vadd.f32 %v11117_v57, %v4369_v19  ;;  %v4196_v28 = vadd.f32 %v13851_v63, %v4107_v8  ;;  %v13853_v19 = vld [vmem:[#allocation185_spill] sm:$0xff] }
 0x763   :  { %v5164_v11 = vmax.f32 %v4458_v7, 0.0  ;;  %v4285_v60 = vadd.f32 %v13853_v19, %v4196_v28  ;;  %v13859_v28 = vld [vmem:[#allocation247_spill] sm:$0xff] }
 0x764   :  { %4820 = vmatmul.bf16.gmra.mxu0 %v13477_v48  ;;  %4909 = vmatmul.bf16.gmra.mxu1 %v13409_v2  ;;  %v13860_v19 = vld [vmem:[#allocation183_spill] sm:$0xff] }
 0x765   :  { %4998 = vmatmul.bf16.gmra.mxu2 %v13798_v41  ;;  %4410 = vmatmul.bf16.gmra.mxu3 %v13848_v5  ;;  %v11301_v39 = vpack.c.bf16 %v5164_v11, %v5160_v4  ;;  %v4283_v41 = vadd.f32 %v13849_v62, %v4194_v42  ;;  %v13854_v4 = vld [vmem:[#allocation200_spill] sm:$0xff]  ;;  %v13855_v11 = vld [vmem:[#allocation110_spill] sm:$0xff]  ;;  %v7442_v62 = vld [vmem:[#allocation5 + $0x258] sm:$0xf0] }
 0x766   :  { %v4371_v12 = vpop.f32.mrf.mxu3 }
 0x767   :  { %v4372_v57 = vadd.f32 %v4371_v12, %v4283_v41  ;;  %v13857_v41 = vld [vmem:[#allocation184_spill] sm:$0xff] }
 0x768   :  { %v4683_v20 = vpop.f32.mrf.mxu2  ;;  %v4199_v12 = vadd.f32 %v13857_v41, %v4110_v24 }
 0x769   :  { %v11297_v15 = vadd.f32 %v4683_v20, %v4594_v35  ;;  %v11299_v48 = vpop.f32.mrf.mxu0  ;;  %v4596_v2 = vpop.f32.mrf.mxu1  ;;  %v4461_v7 = vadd.f32 %v11123_v58, %v4372_v57  ;;  %v4023_v20 = vadd.f32 %v11026_v45, %v13856_v1 }
 0x76b   :  { %v5168_v58 = vmax.f32 %v4461_v7, 0.0  ;;  %v13862_v7 = vld [vmem:[#allocation250_spill] sm:$0xff] }
 0x76e   :  { %v4373_v52 = vpop.f32.mrf.mxu3 }
 0x76f   :  { %v4374_v42 = vadd.f32 %v4373_v52, %v4285_v60 }
 0x770   :  { %v4685_v34 = vpop.f32.mrf.mxu2 }
 0x771   :  { %v11308_v6 = vadd.f32 %v4685_v34, %v4596_v2  ;;  %v11310_v35 = vpop.f32.mrf.mxu0  ;;  %v4599_v47 = vpop.f32.mrf.mxu1  ;;  %v4463_v8 = vadd.f32 %v11134_v51, %v4374_v42  ;;  %v8415_v2 = vld [vmem:[#allocation5 + $0x24c] sm:$0xf]  ;;  %v4112_v34 = vadd.f32 %v13859_v28, %v4023_v20  ;;  %v4288_v51 = vadd.f32 %v13860_v19, %v4199_v12  ;;  %v13868_v19 = vld [vmem:[#allocation178_spill] sm:$0xff] }
 0x772   :  { %v7445_v29 = vor.u32 %v8415_v2, %v7442_v62  ;;  %v13861_v42 = vld [vmem:[#allocation97_spill] sm:$0xff] }
 0x773   :  { %v5172_v57 = vmax.f32 %v4463_v8, 0.0  ;;  %v13863_v62 = vld [vmem:[#allocation61_spill] sm:$0xff] }
 0x774   :  { %4825 = vmatmul.bf16.gmra.mxu0 %v13854_v4  ;;  %4914 = vmatmul.bf16.gmra.mxu1 %v13855_v11  ;;  %v4026_v4 = vadd.f32 %v11039_v38, %v13861_v42  ;;  %v4201_v11 = vadd.f32 %v13862_v7, %v4112_v34  ;;  %v13866_v38 = vld [vmem:[#allocation245_spill] sm:$0xff]  ;;  %v13867_v34 = vld [vmem:[#allocation82_spill] sm:$0xff] }
 0x775   :  { %5003 = vmatmul.bf16.gmra.mxu2 %v13805_v32  ;;  %4415 = vmatmul.bf16.gmra.mxu3 %v13858_v27  ;;  %v11328_v60 = vpack.c.bf16 %v5172_v57, %v5168_v58  ;;  %v13864_v57 = vld [vmem:[#allocation208_spill] sm:$0xff]  ;;  %v4028_v28 = vadd.f32 %v11047_v50, %v13866_v38  ;;  %v13873_v38 = vld [vmem:[#allocation89_spill] sm:$0xff] }
 0x776   :  { %4718 = vmatpush.bf16.msra.mxu3 %v7445_v29  ;;  %v4376_v52 = vpop.f32.mrf.mxu3  ;;  %v4115_v8 = vadd.f32 %v10775_v31, %v4026_v4  ;;  %v4290_v41 = vadd.f32 %v13863_v62, %v4201_v11  ;;  %v13869_v11 = vld [vmem:[#allocation188_spill] sm:$0xff]  ;;  %v13870_v62 = vld [vmem:[#allocation249_spill] sm:$0xff] }
 0x777   :  { %v4377_v24 = vadd.f32 %v4376_v52, %v4288_v51 }
 0x778   :  { %v4688_v63 = vpop.f32.mrf.mxu2 }
 0x779   :  { %v11323_v14 = vadd.f32 %v4688_v63, %v4599_v47  ;;  %v11325_v45 = vpop.f32.mrf.mxu0  ;;  %v4601_v32 = vpop.f32.mrf.mxu1  ;;  %v4466_v29 = vadd.f32 %v11140_v9, %v4377_v24  ;;  %v13865_v63 = vld [vmem:[#allocation119_spill] sm:$0xff]  ;;  %v4117_v9 = vadd.f32 %v10793_v0, %v4028_v28 }
 0x77b   :  { %v5176_v51 = vmax.f32 %v4466_v29, 0.0 }
 0x77e   :  { %v4378_v12 = vpop.f32.mrf.mxu3 }
 0x77f   :  { %v4379_v58 = vadd.f32 %v4378_v12, %v4290_v41  ;;  %v13871_v41 = vld [vmem:[#allocation81_spill] sm:$0xff] }
 0x780   :  { %v4690_v1 = vpop.f32.mrf.mxu2  ;;  %v4206_v12 = vadd.f32 %v13871_v41, %v4117_v9 }
 0x781   :  { %v11334_v20 = vadd.f32 %v4690_v1, %v4601_v32  ;;  %v11336_v47 = vpop.f32.mrf.mxu0  ;;  %v4604_v2 = vpop.f32.mrf.mxu1  ;;  %v4468_v31 = vadd.f32 %v11151_v43, %v4379_v58  ;;  %v4204_v32 = vadd.f32 %v13867_v34, %v4115_v8  ;;  %v4031_v8 = vadd.f32 %v11060_v55, %v13870_v62  ;;  %v13872_v58 = vld [vmem:[#allocation254_spill] sm:$0xff]  ;;  %v13876_v55 = vld [vmem:[#allocation253_spill] sm:$0xff]  ;;  %v13878_v62 = vld [vmem:[#allocation192_spill] sm:$0xff] }
 0x782   :  { %v4295_v28 = vadd.f32 %v13873_v38, %v4206_v12  ;;  %v13879_v12 = vld [vmem:[#allocation255_spill] sm:$0xff]  ;;  %v13880_v38 = vld [vmem:[#allocation190_spill] sm:$0xff] }
 0x783   :  { %v5180_v52 = vmax.f32 %v4468_v31, 0.0  ;;  %v4293_v50 = vadd.f32 %v13869_v11, %v4204_v32  ;;  %v7426_v11 = vld [vmem:[#allocation5 + $0x238] sm:$0xf0] }
 0x784   :  { %4830 = vmatmul.bf16.gmra.mxu0 %v13864_v57  ;;  %4919 = vmatmul.bf16.gmra.mxu1 %v13865_v63  ;;  %v4120_v57 = vadd.f32 %v13872_v58, %v4031_v8 }
 0x785   :  { %5008 = vmatmul.bf16.gmra.mxu2 %v13814_v53  ;;  %4420 = vmatmul.bf16.gmra.mxu3 %v13868_v19  ;;  %v11354_v1 = vpack.c.bf16 %v5180_v52, %v5176_v51  ;;  %v13874_v51 = vld [vmem:[#allocation214_spill] sm:$0xff] }
 0x786   :  { %v13875_v52 = vld [vmem:[#allocation126_spill] sm:$0xff] }
 0x788   :  { %v4693_v42 = vpop.f32.mrf.mxu2  ;;  %v4381_v53 = vpop.f32.mrf.mxu3 }
 0x789   :  { %v11349_v24 = vadd.f32 %v4693_v42, %v4604_v2  ;;  %v11351_v4 = vpop.f32.mrf.mxu0  ;;  %v4606_v7 = vpop.f32.mrf.mxu1  ;;  %v4382_v43 = vadd.f32 %v4381_v53, %v4293_v50  ;;  %v4033_v42 = vadd.f32 %v11068_v49, %v13876_v55  ;;  %v13877_v50 = vld [vmem:[#allocation189_spill] sm:$0xff] }
 0x78a   :  { %v4209_v53 = vadd.f32 %v13877_v50, %v4120_v57 }
 0x78b   :  { %v4471_v34 = vadd.f32 %v11157_v44, %v4382_v43 }
 0x78d   :  { %v5184_v44 = vmax.f32 %v4471_v34, 0.0  ;;  %v13882_v34 = vld [vmem:[#allocation258_spill] sm:$0xff] }
 0x790   :  { %v4695_v29 = vpop.f32.mrf.mxu2  ;;  %v4383_v31 = vpop.f32.mrf.mxu3 }
 0x791   :  { %v11360_v0 = vadd.f32 %v4695_v29, %v4606_v7  ;;  %v11362_v2 = vpop.f32.mrf.mxu0  ;;  %v4609_v63 = vpop.f32.mrf.mxu1  ;;  %v4384_v32 = vadd.f32 %v4383_v31, %v4295_v28  ;;  %v8411_v7 = vld [vmem:[#allocation5 + $0x22c] sm:$0xf]  ;;  %v4122_v29 = vadd.f32 %v13879_v12, %v4033_v42 }
 0x792   :  { %v7429_v8 = vor.u32 %v8411_v7, %v7426_v11 }
 0x793   :  { %v4473_v9 = vadd.f32 %v11168_v18, %v4384_v32  ;;  %v4298_v18 = vadd.f32 %v13880_v38, %v4209_v53  ;;  %v13881_v32 = vld [vmem:[#allocation257_spill] sm:$0xff]  ;;  %v13889_v38 = vld [vmem:[#allocation203_spill] sm:$0xff] }
 0x794   :  { %4835 = vmatmul.bf16.gmra.mxu0 %v13874_v51  ;;  %4924 = vmatmul.bf16.gmra.mxu1 %v13875_v52  ;;  %v4036_v51 = vadd.f32 %v11081_v46, %v13881_v32  ;;  %v4211_v52 = vadd.f32 %v13882_v34, %v4122_v29  ;;  %v13886_v46 = vld [vmem:[#allocation261_spill] sm:$0xff]  ;;  %v13888_v29 = vld [vmem:[#allocation227_spill] sm:$0xff] }
 0x795   :  { %5013 = vmatmul.bf16.gmra.mxu2 %v13822_v3  ;;  %4425 = vmatmul.bf16.gmra.mxu3 %v13878_v62  ;;  %v5188_v43 = vmax.f32 %v4473_v9, 0.0 }
 0x796   :  { %4719 = vmatpush.bf16.msra.mxu3 %v7429_v8  ;;  %v4125_v9 = vadd.f32 %v10835_v33, %v4036_v51  ;;  %v4300_v11 = vadd.f32 %v10831_v23, %v4211_v52  ;;  %v13887_v33 = vld [vmem:[#allocation38_spill] sm:$0xff] }
 0x797   :  { %v11380_v28 = vpack.c.bf16 %v5188_v43, %v5184_v44  ;;  %v13884_v44 = vld [vmem:[#allocation220_spill] sm:$0xff]  ;;  %v13892_v52 = vld [vmem:[#allocation94_spill] sm:$0xff] }
 0x798   :  { %v4698_v41 = vpop.f32.mrf.mxu2  ;;  %v4386_v31 = vpop.f32.mrf.mxu3  ;;  %v13885_v43 = vld [vmem:[#allocation132_spill] sm:$0xff] }
 0x799   :  { %v11375_v58 = vadd.f32 %v4698_v41, %v4609_v63  ;;  %v11377_v49 = vpop.f32.mrf.mxu0  ;;  %v4611_v3 = vpop.f32.mrf.mxu1  ;;  %v4387_v57 = vadd.f32 %v4386_v31, %v4298_v18  ;;  %v4038_v41 = vadd.f32 %v11089_v17, %v13886_v46  ;;  %v13896_v46 = vld [vmem:[#allocation194_spill] sm:$0xff] }
 0x79b   :  { %v4476_v53 = vadd.f32 %v11174_v61, %v4387_v57  ;;  %v13890_v61 = vld [vmem:[#allocation90_spill] sm:$0xff] }
 0x79c   :  { %v4127_v57 = vadd.f32 %v13890_v61, %v4038_v41 }
 0x79d   :  { %v5192_v23 = vmax.f32 %v4476_v53, 0.0 }
 0x7a0   :  { %v4700_v55 = vpop.f32.mrf.mxu2  ;;  %v4388_v50 = vpop.f32.mrf.mxu3 }
 0x7a1   :  { %v11386_v42 = vadd.f32 %v4700_v55, %v4611_v3  ;;  %v11388_v63 = vpop.f32.mrf.mxu0  ;;  %v4614_v7 = vpop.f32.mrf.mxu1  ;;  %v4389_v8 = vadd.f32 %v4388_v50, %v4300_v11  ;;  %v4214_v3 = vadd.f32 %v13888_v29, %v4125_v9  ;;  %v13893_v50 = vld [vmem:[#allocation263_spill] sm:$0xff]  ;;  %v13894_v9 = vld [vmem:[#allocation216_spill] sm:$0xff]  ;;  %v13898_v29 = vld [vmem:[#allocation198_spill] sm:$0xff] }
 0x7a3   :  { %13883 = vst [vmem:[#allocation52_spill] sm:$0xff] %v11386_v42  ;;  %v4478_v12 = vadd.f32 %v13887_v33, %v4389_v8  ;;  %v4303_v17 = vadd.f32 %v13892_v52, %v4214_v3  ;;  %v4041_v8 = vadd.f32 %v13894_v9, %v13893_v50  ;;  %v13900_v52 = vld [vmem:[#allocation223_spill] sm:$0xff] }
 0x7a4   :  { %4840 = vmatmul.bf16.gmra.mxu0 %v13884_v44  ;;  %4929 = vmatmul.bf16.gmra.mxu1 %v13885_v43  ;;  %v13895_v44 = vld [vmem:[#allocation195_spill] sm:$0xff] }
 0x7a5   :  { %5018 = vmatmul.bf16.gmra.mxu2 %v13829_v56  ;;  %4430 = vmatmul.bf16.gmra.mxu3 %v13889_v38  ;;  %v5196_v18 = vmax.f32 %v4478_v12, 0.0  ;;  %v4216_v53 = vadd.f32 %v13895_v44, %v4127_v57  ;;  %v4130_v33 = vadd.f32 %v13896_v46, %v4041_v8  ;;  %v13903_v57 = vld [vmem:[#allocation266_spill] sm:$0xff]  ;;  %v8407_v8 = vld [vmem:[#allocation5 + $0x20c] sm:$0xf]  ;;  %v7410_v44 = vld [vmem:[#allocation5 + $0x218] sm:$0xf0] }
 0x7a7   :  { %v11406_v55 = vpack.c.bf16 %v5196_v18, %v5192_v23  ;;  %v13899_v23 = vld [vmem:[#allocation65_spill] sm:$0xff] }
 0x7a8   :  { %v4703_v31 = vpop.f32.mrf.mxu2  ;;  %v4391_v56 = vpop.f32.mrf.mxu3 }
 0x7a9   :  { %v11401_v32 = vadd.f32 %v4703_v31, %v4614_v7  ;;  %v11403_v51 = vpop.f32.mrf.mxu0  ;;  %v4616_v34 = vpop.f32.mrf.mxu1  ;;  %v4392_v11 = vadd.f32 %v4391_v56, %v4303_v17  ;;  %v4305_v31 = vadd.f32 %v13898_v29, %v4216_v53  ;;  %v13901_v17 = vld [vmem:[#allocation137_spill] sm:$0xff]  ;;  %v13906_v53 = vld [vmem:[#allocation212_spill] sm:$0xff]  ;;  %v7413_v29 = vor.u32 %v8407_v8, %v7410_v44 }
 0x7aa   :  { %v13902_v56 = vld [vmem:[#allocation265_spill] sm:$0xff] }
 0x7ab   :  { %13891 = vst [vmem:[#allocation77_spill] sm:$0xff] %v11401_v32  ;;  %v4481_v18 = vadd.f32 %v13899_v23, %v4392_v11  ;;  %v4043_v50 = vadd.f32 %v13903_v57, %v13902_v56  ;;  %4720 = vmatpush.bf16.msra.mxu3 %v7413_v29  ;;  %v13907_v23 = vld [vmem:[#allocation93_spill] sm:$0xff]  ;;  %v13908_v57 = vld [vmem:[#allocation231_spill] sm:$0xff] }
 0x7ac   :  { %v13911_v32 = vld [vmem:[#allocation155_spill] sm:$0xff] }
 0x7ad   :  { %v5200_v11 = vmax.f32 %v4481_v18, 0.0  ;;  %v13912_v18 = vld [vmem:[#allocation91_spill] sm:$0xff] }
 0x7ae   :  { %v13913_v29 = vld [vmem:[#allocation103_spill] sm:$0xff] }
 0x7b0   :  { %v4705_v43 = vpop.f32.mrf.mxu2  ;;  %v4393_v3 = vpop.f32.mrf.mxu3 }
 0x7b1   :  { %v11412_v41 = vadd.f32 %v4705_v43, %v4616_v34  ;;  %v11414_v7 = vpop.f32.mrf.mxu0  ;;  %v4619_v12 = vpop.f32.mrf.mxu1  ;;  %v4394_v61 = vadd.f32 %v4393_v3, %v4305_v31  ;;  %v13904_v34 = vld [vmem:[#allocation19_spill] sm:$0xff]  ;;  %v13905_v43 = vld [vmem:[#allocation92_spill] sm:$0xff] }
 0x7b2   :  { %v4219_v46 = vadd.f32 %v13905_v43, %v4130_v33  ;;  %v13910_v43 = vld [vmem:[#allocation267_spill] sm:$0xff] }
 0x7b3   :  { %13897 = vst [vmem:[#allocation57_spill] sm:$0xff] %v11412_v41  ;;  %v4483_v9 = vadd.f32 %v13904_v34, %v4394_v61  ;;  %v4046_v8 = vadd.f32 %v13911_v32, %v13910_v43  ;;  %v13917_v32 = vld [vmem:[#allocation145_spill] sm:$0xff] }
 0x7b4   :  { %4845 = vmatmul.bf16.gmra.mxu0 %v13900_v52  ;;  %4934 = vmatmul.bf16.gmra.mxu1 %v13901_v17  ;;  %v4132_v52 = vadd.f32 %v13907_v23, %v4043_v50  ;;  %v4308_v61 = vadd.f32 %v13908_v57, %v4219_v46  ;;  %v13915_v23 = vld [vmem:[#allocation233_spill] sm:$0xff]  ;;  %v13916_v57 = vld [vmem:[#allocation226_spill] sm:$0xff] }
 0x7b5   :  { %5023 = vmatmul.bf16.gmra.mxu2 %v13836_v54  ;;  %4435 = vmatmul.bf16.gmra.mxu3 %v13906_v53  ;;  %v5204_v31 = vmax.f32 %v4483_v9, 0.0  ;;  %v4135_v42 = vadd.f32 %v13913_v29, %v4046_v8  ;;  %v13920_v8 = vld [vmem:[#allocation201_spill] sm:$0xff] }
 0x7b6   :  { %v4221_v9 = vadd.f32 %v13912_v18, %v4132_v52  ;;  %v13918_v52 = vld [vmem:[#allocation271_spill] sm:$0xff] }
 0x7b7   :  { %v11432_v34 = vpack.c.bf16 %v5204_v31, %v5200_v11  ;;  %v4224_v18 = vadd.f32 %v13920_v8, %v4135_v42  ;;  %v13929_v42 = vld [vmem:[#allocation152_spill] sm:$0xff]  ;;  %v13930_v8 = vld [vmem:[#allocation17_spill] sm:$0xff] }
 0x7b8   :  { %v4708_v3 = vpop.f32.mrf.mxu2  ;;  %v4396_v41 = vpop.f32.mrf.mxu3  ;;  %v4310_v46 = vadd.f32 %v13915_v23, %v4221_v9 }
 0x7b9   :  { %v11427_v17 = vadd.f32 %v4708_v3, %v4619_v12  ;;  %v11429_v56 = vpop.f32.mrf.mxu0  ;;  %v4621_v54 = vpop.f32.mrf.mxu1  ;;  %13909 = vst [vmem:[#allocation87_spill] sm:$0xff] %v11432_v34  ;;  %v4397_v33 = vadd.f32 %v4396_v41, %v4308_v61  ;;  %v13919_v61 = vld [vmem:[#allocation270_spill] sm:$0xff] }
 0x7ba   :  { %v4048_v43 = vadd.f32 %v13919_v61, %v13918_v52 }
 0x7bb   :  { %v4486_v31 = vadd.f32 %v11208_v37, %v4397_v33  ;;  %v13923_v37 = vld [vmem:[#allocation268_spill] sm:$0xff] }
 0x7bc   :  { %v4137_v33 = vadd.f32 %v13923_v37, %v4048_v43 }
 0x7bd   :  { %v5208_v9 = vmax.f32 %v4486_v31, 0.0 }
 0x7be   :  { %v4226_v31 = vadd.f32 %v13930_v8, %v4137_v33  ;;  %v13937_v33 = vld [vmem:[#allocation35_spill] sm:$0xff]  ;;  %v13938_v8 = vld [vmem:[#allocation101_spill] sm:$0xff] }
 0x7c0   :  { %v4710_v44 = vpop.f32.mrf.mxu2  ;;  %v4398_v11 = vpop.f32.mrf.mxu3 }
 0x7c1   :  { %v11438_v50 = vadd.f32 %v4710_v44, %v4621_v54  ;;  %v11440_v12 = vpop.f32.mrf.mxu0  ;;  %v11442_v3 = vpop.f32.mrf.mxu1  ;;  %v4399_v41 = vadd.f32 %v4398_v11, %v4310_v46  ;;  %v13921_v44 = vld [vmem:[#allocation218_spill] sm:$0xff] }
 0x7c2   :  { %13914 = vst [vmem:[#allocation66_spill] sm:$0xff] %v11442_v3 }
 0x7c3   :  { %v4488_v54 = vadd.f32 %v11219_v26, %v4399_v41  ;;  %v13928_v41 = vld [vmem:[#allocation275_spill] sm:$0xff] }
 0x7c4   :  { %4850 = vmatmul.bf16.gmra.mxu0 %v13916_v57  ;;  %4939 = vmatmul.bf16.gmra.mxu1 %v13917_v32  ;;  %v13926_v57 = vld [vmem:[#allocation205_spill] sm:$0xff]  ;;  %v4051_v61 = vadd.f32 %v13929_v42, %v13928_v41 }
 0x7c5   :  { %5028 = vmatmul.bf16.gmra.mxu2 %v13845_v59  ;;  %4440 = vmatmul.bf16.gmra.mxu3 %v13921_v44  ;;  %v5212_v29 = vmax.f32 %v4488_v54, 0.0  ;;  %v4313_v32 = vadd.f32 %v13926_v57, %v4224_v18  ;;  %v13934_v57 = vld [vmem:[#allocation47_spill] sm:$0xff]  ;;  %v8535_v42 = vld [vmem:[#allocation5 + $0x60c] sm:$0xf] }
 0x7c7   :  { %v11462_v52 = vpack.c.bf16 %v5212_v29, %v5208_v9 }
 0x7c8   :  { %v11454_v23 = vpop.f32.mrf.mxu2  ;;  %v4401_v59 = vpop.f32.mrf.mxu3 }
 0x7c9   :  { %13922 = vst [vmem:[#allocation98_spill] sm:$0xff] %v11454_v23  ;;  %v11457_v46 = vpop.f32.mrf.mxu0  ;;  %v11459_v11 = vpop.f32.mrf.mxu1  ;;  %v4402_v26 = vadd.f32 %v4401_v59, %v4313_v32  ;;  %v13931_v23 = vld [vmem:[#allocation100_spill] sm:$0xff]  ;;  %v13935_v32 = vld [vmem:[#allocation153_spill] sm:$0xff]  ;;  %v13936_v59 = vld [vmem:[#allocation279_spill] sm:$0xff] }
 0x7ca   :  { %13924 = vst [vmem:[#allocation75_spill] sm:$0xff] %v11457_v46  ;;  %v4140_v3 = vadd.f32 %v13931_v23, %v4051_v61  ;;  %v4053_v41 = vadd.f32 %v13937_v33, %v13936_v59  ;;  %v7922_v61 = vld [vmem:[#allocation5 + $0x618] sm:$0xf0] }
 0x7cb   :  { %13925 = vst [vmem:[#allocation111_spill] sm:$0xff] %v11459_v11  ;;  %v13933_v11 = vld [vmem:[#allocation235_spill] sm:$0xff]  ;;  %v4491_v9 = vadd.f32 %v11225_v40, %v4402_v26 }
 0x7cc   :  { %13927 = vst [vmem:[#allocation85_spill] sm:$0xff] %v11462_v52  ;;  %v4315_v46 = vadd.f32 %v13933_v11, %v4226_v31  ;;  %v13939_v11 = vld [vmem:[#allocation18_spill] sm:$0xff]  ;;  %v7925_v31 = vor.u32 %v8535_v42, %v7922_v61 }
 0x7cd   :  { %v5216_v40 = vmax.f32 %v4491_v9, 0.0  ;;  %v13948_v9 = vld [vmem:[#allocation207_spill] sm:$0xff] }
 0x7ce   :  { %5076 = vmatpush.bf16.msrb.mxu3 %v7925_v31  ;;  %v13950_v31 = vld [vmem:[#allocation210_spill] sm:$0xff] }
 0x7d0   :  { %v11467_v54 = vpop.f32.mrf.mxu2  ;;  %v4403_v18 = vpop.f32.mrf.mxu3 }
 0x7d1   :  { %v11470_v43 = vpop.f32.mrf.mxu0  ;;  %v11472_v37 = vpop.f32.mrf.mxu1  ;;  %v4404_v29 = vadd.f32 %v4403_v18, %v4315_v46  ;;  %v13941_v18 = vld [vmem:[#allocation237_spill] sm:$0xff] }
 0x7d2   :  { %13932 = vst [vmem:[#allocation120_spill] sm:$0xff] %v11472_v37  ;;  %v4229_v37 = vadd.f32 %v13938_v8, %v4140_v3  ;;  %v13946_v8 = vld [vmem:[#allocation283_spill] sm:$0xff] }
 0x7d3   :  { %v4493_v23 = vadd.f32 %v11236_v21, %v4404_v29 }
 0x7d4   :  { %4855 = vmatmul.bf16.gmra.mxu0 %v13934_v57  ;;  %4944 = vmatmul.bf16.gmra.mxu1 %v13935_v32  ;;  %v4142_v57 = vadd.f32 %v13941_v18, %v4053_v41 }
 0x7d5   :  { %5033 = vmatmul.bf16.gmra.mxu2 %v13848_v5  ;;  %4721 = vmatmul.bf16.vlgmr.msra.gmra.mxu3 %v13939_v11  ;;  %v5220_v46 = vmax.f32 %v4493_v23, 0.0  ;;  %v13944_v5 = vld [vmem:[#allocation102_spill] sm:$0xff] }
 0x7d6   :  { %v4318_v21 = vadd.f32 %v13944_v5, %v4229_v37  ;;  %v13947_v11 = vld [vmem:[#allocation222_spill] sm:$0xff]  ;;  %v4231_v23 = vadd.f32 %v13948_v9, %v4142_v57  ;;  %v13953_v5 = vld [vmem:[#allocation41_spill] sm:$0xff]  ;;  %v13956_v57 = vld [vmem:[#allocation159_spill] sm:$0xff] }
 0x7d7   :  { %v11492_v29 = vpack.c.bf16 %v5220_v46, %v5216_v40  ;;  %v4056_v42 = vadd.f32 %v13947_v11, %v13946_v8 }
 0x7d8   :  { %v11484_v26 = vpop.f32.mrf.mxu2  ;;  %v4406_v33 = vpop.f32.mrf.mxu3 }
 0x7d9   :  { %13940 = vst [vmem:[#allocation95_spill] sm:$0xff] %v11484_v26  ;;  %v11487_v32 = vpop.f32.mrf.mxu0  ;;  %v11489_v59 = vpop.f32.mrf.mxu1  ;;  %v4407_v3 = vadd.f32 %v4406_v33, %v4318_v21  ;;  %v4145_v26 = vadd.f32 %v13950_v31, %v4056_v42  ;;  %v13954_v21 = vld [vmem:[#allocation166_spill] sm:$0xff]  ;;  %v13957_v42 = vld [vmem:[#allocation273_spill] sm:$0xff] }
 0x7da   :  { %13942 = vst [vmem:[#allocation127_spill] sm:$0xff] %v11487_v32  ;;  %v13955_v33 = vld [vmem:[#allocation170_spill] sm:$0xff]  ;;  %v13958_v31 = vld [vmem:[#allocation21_spill] sm:$0xff] }
 0x7db   :  { %13943 = vst [vmem:[#allocation105_spill] sm:$0xff] %v11489_v59  ;;  %v13952_v59 = vld [vmem:[#allocation104_spill] sm:$0xff]  ;;  %v4496_v40 = vadd.f32 %v11242_v13, %v4407_v3  ;;  %v4058_v8 = vadd.f32 %v13956_v57, %v13955_v33  ;;  %v4234_v9 = vadd.f32 %v13957_v42, %v4145_v26  ;;  %v13967_v42 = vld [vmem:[#allocation277_spill] sm:$0xff] }
 0x7dc   :  { %13945 = vst [vmem:[#allocation133_spill] sm:$0xff] %v11492_v29  ;;  %v4320_v32 = vadd.f32 %v13952_v59, %v4231_v23  ;;  %v13960_v13 = vld [vmem:[#allocation20_spill] sm:$0xff] }
 0x7dd   :  { %v5224_v59 = vmax.f32 %v4496_v40, 0.0  ;;  %v13966_v26 = vld [vmem:[#allocation60_spill] sm:$0xff] }
 0x7e0   :  { %v11497_v61 = vpop.f32.mrf.mxu2  ;;  %v4408_v37 = vpop.f32.mrf.mxu3 }
 0x7e1   :  { %13949 = vst [vmem:[#allocation163_spill] sm:$0xff] %v11497_v61  ;;  %v11500_v41 = vpop.f32.mrf.mxu0  ;;  %v11502_v18 = vpop.f32.mrf.mxu1  ;;  %v4409_v46 = vadd.f32 %v4408_v37, %v4320_v32  ;;  %v4147_v32 = vadd.f32 %v13960_v13, %v4058_v8 }
 0x7e2   :  { %13951 = vst [vmem:[#allocation76_spill] sm:$0xff] %v11502_v18 }
 0x7e3   :  { %v4498_v11 = vadd.f32 %v11252_v16, %v4409_v46  ;;  %v13965_v46 = vld [vmem:[#allocation171_spill] sm:$0xff]  ;;  %v4236_v40 = vadd.f32 %v13967_v42, %v4147_v32  ;;  %v13976_v32 = vld [vmem:[#allocation16_spill] sm:$0xff] }
 0x7e4   :  { %4860 = vmatmul.bf16.gmra.mxu0 %v13953_v5  ;;  %4949 = vmatmul.bf16.gmra.mxu1 %v13954_v21  ;;  %v13963_v5 = vld [vmem:[#allocation276_spill] sm:$0xff]  ;;  %v4061_v57 = vadd.f32 %v13966_v26, %v13965_v46 }
 0x7e5   :  { %5038 = vmatmul.bf16.gmra.mxu2 %v13858_v27  ;;  %4726 = vmatmul.bf16.gmra.mxu3 %v13958_v31  ;;  %v5228_v23 = vmax.f32 %v4498_v11, 0.0  ;;  %v4323_v21 = vadd.f32 %v13963_v5, %v4234_v9  ;;  %v13969_v31 = vld [vmem:[#allocation108_spill] sm:$0xff]  ;;  %v13973_v5 = vld [vmem:[#allocation42_spill] sm:$0xff] }
 0x7e7   :  { %v11522_v33 = vpack.c.bf16 %v5228_v23, %v5224_v59 }
 0x7e8   :  { %v11514_v18 = vpop.f32.mrf.mxu2  ;;  %v4411_v27 = vpop.f32.mrf.mxu3 }
 0x7e9   :  { %13959 = vst [vmem:[#allocation138_spill] sm:$0xff] %v11514_v18  ;;  %v11517_v3 = vpop.f32.mrf.mxu0  ;;  %v11519_v37 = vpop.f32.mrf.mxu1  ;;  %v4412_v16 = vadd.f32 %v4411_v27, %v4323_v21  ;;  %v4150_v18 = vadd.f32 %v13969_v31, %v4061_v57  ;;  %v13974_v21 = vld [vmem:[#allocation177_spill] sm:$0xff]  ;;  %v13975_v27 = vld [vmem:[#allocation70_spill] sm:$0xff]  ;;  %v13978_v31 = vld [vmem:[#allocation24_spill] sm:$0xff] }
 0x7ea   :  { %13961 = vst [vmem:[#allocation228_spill] sm:$0xff] %v11517_v3  ;;  %v4063_v46 = vadd.f32 %v13976_v32, %v13975_v27  ;;  %v13977_v57 = vld [vmem:[#allocation109_spill] sm:$0xff] }
 0x7eb   :  { %13962 = vst [vmem:[#allocation175_spill] sm:$0xff] %v11519_v37  ;;  %v13972_v37 = vld [vmem:[#allocation107_spill] sm:$0xff]  ;;  %v4501_v59 = vadd.f32 %v11261_v36, %v4412_v16  ;;  %v4239_v42 = vadd.f32 %v13977_v57, %v4150_v18  ;;  %v13980_v36 = vld [vmem:[#allocation116_spill] sm:$0xff]  ;;  %v13986_v18 = vld [vmem:[#allocation282_spill] sm:$0xff] }
 0x7ec   :  { %13964 = vst [vmem:[#allocation86_spill] sm:$0xff] %v11522_v33  ;;  %v4325_v3 = vadd.f32 %v13972_v37, %v4236_v40  ;;  %v13987_v57 = vld [vmem:[#allocation280_spill] sm:$0xff] }
 0x7ed   :  { %v5232_v37 = vmax.f32 %v4501_v59, 0.0 }
 0x7f0   :  { %v11527_v11 = vpop.f32.mrf.mxu2  ;;  %v4413_v9 = vpop.f32.mrf.mxu3 }
 0x7f1   :  { %13968 = vst [vmem:[#allocation230_spill] sm:$0xff] %v11527_v11  ;;  %v11530_v8 = vpop.f32.mrf.mxu0  ;;  %v11532_v13 = vpop.f32.mrf.mxu1  ;;  %v4414_v23 = vadd.f32 %v4413_v9, %v4325_v3  ;;  %v4152_v3 = vadd.f32 %v13980_v36, %v4063_v46  ;;  %v13997_v11 = vld [vmem:[#allocation62_spill] sm:$0xff] }
 0x7f2   :  { %13970 = vst [vmem:[#allocation146_spill] sm:$0xff] %v11530_v8 }
 0x7f3   :  { %13971 = vst [vmem:[#allocation232_spill] sm:$0xff] %v11532_v13  ;;  %v4503_v26 = vadd.f32 %v11275_v10, %v4414_v23  ;;  %v13985_v23 = vld [vmem:[#allocation74_spill] sm:$0xff]  ;;  %v4241_v59 = vadd.f32 %v13987_v57, %v4152_v3  ;;  %v13994_v3 = vld [vmem:[#allocation191_spill] sm:$0xff] }
 0x7f4   :  { %4865 = vmatmul.bf16.gmra.mxu0 %v13973_v5  ;;  %4954 = vmatmul.bf16.gmra.mxu1 %v13974_v21  ;;  %v13983_v5 = vld [vmem:[#allocation244_spill] sm:$0xff]  ;;  %v4066_v32 = vadd.f32 %v13986_v18, %v13985_v23  ;;  %v13993_v23 = vld [vmem:[#allocation49_spill] sm:$0xff]  ;;  %v8176_v57 = vld [vmem:[#allocation7 + $0x170] sm:$0xf] }
 0x7f5   :  { %5043 = vmatmul.bf16.gmra.mxu2 %v13868_v19  ;;  %4731 = vmatmul.bf16.gmra.mxu3 %v13978_v31  ;;  %v5236_v40 = vmax.f32 %v4503_v26, 0.0  ;;  %v4328_v21 = vadd.f32 %v13983_v5, %v4239_v42  ;;  %v13988_v26 = vld [vmem:[#allocation118_spill] sm:$0xff] }
 0x7f6   :  { %v4155_v31 = vadd.f32 %v13988_v26, %v4066_v32  ;;  %v8048_v5 = vld [vmem:[#allocation7 + $0x70] sm:$0xf]  ;;  %v8569_v32 = vld [vmem:[#allocation7 + $0xf4] sm:$0xf0] }
 0x7f7   :  { %v11552_v27 = vpack.c.bf16 %v5236_v40, %v5232_v37  ;;  %v8585_v26 = vld [vmem:[#allocation7 + $0x174] sm:$0xf0] }
 0x7f8   :  { %v11544_v13 = vpop.f32.mrf.mxu2  ;;  %v4416_v19 = vpop.f32.mrf.mxu3 }
 0x7f9   :  { %13979 = vst [vmem:[#allocation234_spill] sm:$0xff] %v11544_v13  ;;  %v11547_v16 = vpop.f32.mrf.mxu0  ;;  %v11549_v9 = vpop.f32.mrf.mxu1  ;;  %v4417_v10 = vadd.f32 %v4416_v19, %v4328_v21  ;;  %v8553_v21 = vld [vmem:[#allocation7 + $0x74] sm:$0xf0]  ;;  %v8112_v19 = vld [vmem:[#allocation7 + $0xf0] sm:$0xf] }
 0x7fa   :  { %13981 = vst [vmem:[#allocation154_spill] sm:$0xff] %v11547_v16  ;;  %v8049_v18 = vor.u32 %v8553_v21, %v8048_v5  ;;  %v8040_v5 = vld [vmem:[#allocation7 + $0x60] sm:$0xf]  ;;  %v8551_v21 = vld [vmem:[#allocation7 + $0x64] sm:$0xf0] }
 0x7fb   :  { %13982 = vst [vmem:[#allocation79_spill] sm:$0xff] %v11549_v9  ;;  %v13992_v9 = vld [vmem:[#allocation117_spill] sm:$0xff]  ;;  %v4506_v37 = vadd.f32 %v11284_v25, %v4417_v10  ;;  %v8177_v10 = vor.u32 %v8585_v26, %v8176_v57  ;;  %v8032_v57 = vld [vmem:[#allocation7 + $0x50] sm:$0xf]  ;;  %v8549_v26 = vld [vmem:[#allocation7 + $0x54] sm:$0xf0] }
 0x7fc   :  { %13984 = vst [vmem:[#allocation236_spill] sm:$0xff] %v11552_v27  ;;  %v4330_v16 = vadd.f32 %v13992_v9, %v4241_v59  ;;  %v13998_v59 = vld [vmem:[#allocation27_spill] sm:$0xff]  ;;  %5734 = vmatpush.bf16.msrb.mxu0 %v8049_v18 }
 0x7fd   :  { %5912 = vmatpush.bf16.msrb.mxu2 %v8177_v10 }
 0x800   :  { %v11558_v13 = vpop.f32.mrf.mxu2  ;;  %v4418_v42 = vpop.f32.mrf.mxu3 }
 0x801   :  { %13989 = vst [vmem:[#allocation80_spill] sm:$0xff] %v11558_v13  ;;  %v11560_v46 = vpop.f32.mrf.mxu0  ;;  %v11562_v36 = vpop.f32.mrf.mxu1  ;;  %v4419_v40 = vadd.f32 %v4418_v42, %v4330_v16  ;;  %v13995_v13 = vld [vmem:[#allocation281_spill] sm:$0xff]  ;;  %v8113_v16 = vor.u32 %v8569_v32, %v8112_v19  ;;  %v5240_v42 = vmax.f32 %v4506_v37, 0.0  ;;  %v14003_v19 = vld [vmem:[#allocation23_spill] sm:$0xff] }
 0x802   :  { %13990 = vst [vmem:[#allocation246_spill] sm:$0xff] %v11560_v46  ;;  %v4244_v46 = vadd.f32 %v13995_v13, %v4155_v31  ;;  %v8041_v13 = vor.u32 %v8551_v21, %v8040_v5  ;;  %v8104_v31 = vld [vmem:[#allocation7 + $0xe0] sm:$0xf]  ;;  %v8583_v32 = vld [vmem:[#allocation7 + $0x164] sm:$0xf0] }
 0x803   :  { %13991 = vst [vmem:[#allocation185_spill] sm:$0xff] %v11562_v36  ;;  %v13996_v36 = vld [vmem:[#allocation285_spill] sm:$0xff]  ;;  %v4508_v25 = vadd.f32 %v11299_v48, %v4419_v40  ;;  %5823 = vmatpush.bf16.msrb.mxu1 %v8113_v16  ;;  %v8096_v5 = vld [vmem:[#allocation7 + $0xd0] sm:$0xf]  ;;  %v8565_v21 = vld [vmem:[#allocation7 + $0xd4] sm:$0xf0] }
 0x804   :  { %4870 = vmatmul.bf16.gmra.mxu0 %v13993_v23  ;;  %4959 = vmatmul.bf16.gmra.mxu1 %v13994_v3  ;;  %v4068_v9 = vadd.f32 %v13997_v11, %v13996_v36  ;;  %v8567_v11 = vld [vmem:[#allocation7 + $0xe4] sm:$0xf0]  ;;  %v8168_v36 = vld [vmem:[#allocation7 + $0x160] sm:$0xf]  ;;  %v4333_v18 = vadd.f32 %v14003_v19, %v4244_v46  ;;  %v14005_v46 = vld [vmem:[#allocation286_spill] sm:$0xff] }
 0x805   :  { %5048 = vmatmul.bf16.gmra.mxu2 %v13878_v62  ;;  %4736 = vmatmul.bf16.gmra.mxu3 %v13998_v59  ;;  %v5244_v23 = vmax.f32 %v4508_v25, 0.0  ;;  %v14000_v62 = vld [vmem:[#allocation173_spill] sm:$0xff]  ;;  %v8105_v37 = vor.u32 %v8567_v11, %v8104_v31  ;;  %v8169_v10 = vor.u32 %v8583_v32, %v8168_v36  ;;  %v8033_v59 = vor.u32 %v8549_v26, %v8032_v57  ;;  %v14006_v31 = vld [vmem:[#allocation44_spill] sm:$0xff]  ;;  %v14009_v57 = vld [vmem:[#allocation122_spill] sm:$0xff] }
 0x806   :  { %v4157_v8 = vadd.f32 %v14000_v62, %v4068_v9  ;;  %5735 = vmatpush.bf16.msrb.mxu0 %v8041_v13  ;;  %v8097_v62 = vor.u32 %v8565_v21, %v8096_v5  ;;  %v4071_v11 = vadd.f32 %v14006_v31, %v14005_v46  ;;  %v14007_v19 = vld [vmem:[#allocation248_spill] sm:$0xff]  ;;  %v8016_v46 = vld [vmem:[#allocation7 + $0x30] sm:$0xf]  ;;  %v8545_v31 = vld [vmem:[#allocation7 + $0x34] sm:$0xf0] }
 0x807   :  { %v11582_v25 = vpack.c.bf16 %v5244_v23, %v5240_v42  ;;  %5824 = vmatpush.bf16.msrb.mxu1 %v8105_v37  ;;  %5913 = vmatpush.bf16.msrb.mxu2 %v8169_v10  ;;  %v8024_v42 = vld [vmem:[#allocation7 + $0x40] sm:$0xf]  ;;  %v8547_v23 = vld [vmem:[#allocation7 + $0x44] sm:$0xf0] }
 0x808   :  { %v11574_v3 = vpop.f32.mrf.mxu2  ;;  %v4421_v16 = vpop.f32.mrf.mxu3  ;;  %v4246_v61 = vadd.f32 %v14007_v19, %v4157_v8  ;;  %v8025_v36 = vor.u32 %v8547_v23, %v8024_v42  ;;  %v8088_v32 = vld [vmem:[#allocation7 + $0xc0] sm:$0xf]  ;;  %v4160_v26 = vadd.f32 %v14009_v57, %v4071_v11  ;;  %v8080_v19 = vld [vmem:[#allocation7 + $0xb0] sm:$0xf]  ;;  %v8017_v23 = vor.u32 %v8545_v31, %v8016_v46  ;;  %v8561_v57 = vld [vmem:[#allocation7 + $0xb4] sm:$0xf0] }
 0x809   :  { %13999 = vst [vmem:[#allocation200_spill] sm:$0xff] %v11574_v3  ;;  %v11577_v48 = vpop.f32.mrf.mxu0  ;;  %v11579_v40 = vpop.f32.mrf.mxu1  ;;  %v8160_v3 = vld [vmem:[#allocation7 + $0x150] sm:$0xf]  ;;  %v4422_v9 = vadd.f32 %v4421_v16, %v4333_v18  ;;  %v8563_v18 = vld [vmem:[#allocation7 + $0xc4] sm:$0xf0]  ;;  %v14013_v42 = vld [vmem:[#allocation160_spill] sm:$0xff] }
 0x80a   :  { %14001 = vst [vmem:[#allocation110_spill] sm:$0xff] %v11577_v48  ;;  %v8581_v48 = vld [vmem:[#allocation7 + $0x154] sm:$0xf0]  ;;  %5736 = vmatpush.bf16.msrb.mxu0 %v8033_v59  ;;  %v8152_v37 = vld [vmem:[#allocation7 + $0x140] sm:$0xf]  ;;  %v8089_v8 = vor.u32 %v8563_v18, %v8088_v32  ;;  %v14014_v11 = vld [vmem:[#allocation202_spill] sm:$0xff] }
 0x80b   :  { %14002 = vst [vmem:[#allocation238_spill] sm:$0xff] %v11579_v40  ;;  %v8161_v40 = vor.u32 %v8581_v48, %v8160_v3  ;;  %5825 = vmatpush.bf16.msrb.mxu1 %v8097_v62  ;;  %v14012_v48 = vld [vmem:[#allocation124_spill] sm:$0xff]  ;;  %v8579_v59 = vld [vmem:[#allocation7 + $0x144] sm:$0xf0]  ;;  %v4511_v62 = vadd.f32 %v11310_v35, %v4422_v9  ;;  %v8081_v9 = vor.u32 %v8561_v57, %v8080_v19 }
 0x80c   :  { %14004 = vst [vmem:[#allocation184_spill] sm:$0xff] %v11582_v25  ;;  %v4335_v10 = vadd.f32 %v14012_v48, %v4246_v61  ;;  %v8153_v21 = vor.u32 %v8579_v59, %v8152_v37  ;;  %v8577_v61 = vld [vmem:[#allocation7 + $0x134] sm:$0xf0]  ;;  %v14015_v32 = vld [vmem:[#allocation288_spill] sm:$0xff]  ;;  %v14016_v18 = vld [vmem:[#allocation53_spill] sm:$0xff] }
 0x80d   :  { %5914 = vmatpush.bf16.msrb.mxu2 %v8161_v40  ;;  %v4073_v48 = vadd.f32 %v14016_v18, %v14015_v32  ;;  %v5248_v59 = vmax.f32 %v4511_v62, 0.0  ;;  %v8008_v46 = vld [vmem:[#allocation7 + $0x20] sm:$0xf]  ;;  %v8543_v31 = vld [vmem:[#allocation7 + $0x24] sm:$0xf0] }
 0x80e   :  { %5737 = vmatpush.bf16.msrb.mxu0 %v8025_v36  ;;  %v14017_v36 = vld [vmem:[#allocation123_spill] sm:$0xff]  ;;  %v8072_v32 = vld [vmem:[#allocation7 + $0xa0] sm:$0xf]  ;;  %v8575_v57 = vld [vmem:[#allocation7 + $0x124] sm:$0xf0] }
 0x80f   :  { %5826 = vmatpush.bf16.msrb.mxu1 %v8089_v8  ;;  %v4249_v37 = vadd.f32 %v14017_v36, %v4160_v26  ;;  %v8136_v18 = vld [vmem:[#allocation7 + $0x120] sm:$0xf] }
 0x810   :  { %v11587_v13 = vpop.f32.mrf.mxu2  ;;  %v4423_v5 = vpop.f32.mrf.mxu3  ;;  %v8137_v36 = vor.u32 %v8575_v57, %v8136_v18  ;;  %v8120_v57 = vld [vmem:[#allocation7 + $0x100] sm:$0xf] }
 0x811   :  { %14008 = vst [vmem:[#allocation167_spill] sm:$0xff] %v11587_v13  ;;  %v11590_v16 = vpop.f32.mrf.mxu0  ;;  %v11592_v3 = vpop.f32.mrf.mxu1  ;;  %v4424_v40 = vadd.f32 %v4423_v5, %v4335_v10  ;;  %5915 = vmatpush.bf16.msrb.mxu2 %v8153_v21  ;;  %v14018_v10 = vld [vmem:[#allocation30_spill] sm:$0xff]  ;;  %v14023_v21 = vld [vmem:[#allocation252_spill] sm:$0xff]  ;;  %v14144_v13 = vld [vmem:[#allocation225_spill] sm:$0xff] }
 0x812   :  { %14010 = vst [vmem:[#allocation247_spill] sm:$0xff] %v11590_v16  ;;  %5738 = vmatpush.bf16.msrb.mxu0 %v8017_v23  ;;  %v8000_v23 = vld [vmem:[#allocation7 + $0x10] sm:$0xf] }
 0x813   :  { %14011 = vst [vmem:[#allocation183_spill] sm:$0xff] %v11592_v3  ;;  %v8144_v3 = vld [vmem:[#allocation7 + $0x130] sm:$0xf]  ;;  %v4513_v35 = vadd.f32 %v11325_v45, %v4424_v40  ;;  %5827 = vmatpush.bf16.msrb.mxu1 %v8081_v9 }
 0x814   :  { %4875 = vmatmul.bf16.gmra.mxu0 %v14013_v42  ;;  %4964 = vmatmul.bf16.gmra.mxu1 %v14014_v11  ;;  %v8145_v8 = vor.u32 %v8577_v61, %v8144_v3  ;;  %v8009_v11 = vor.u32 %v8543_v31, %v8008_v46  ;;  %v14020_v45 = vld [vmem:[#allocation130_spill] sm:$0xff]  ;;  %v4338_v3 = vadd.f32 %v14023_v21, %v4249_v37  ;;  %v8541_v61 = vld [vmem:[#allocation7 + $0x14] sm:$0xf0] }
 0x815   :  { %5053 = vmatmul.bf16.gmra.mxu2 %v13889_v38  ;;  %4741 = vmatmul.bf16.gmra.mxu3 %v14018_v10  ;;  %v5252_v5 = vmax.f32 %v4513_v35, 0.0  ;;  %v8559_v38 = vld [vmem:[#allocation7 + $0xa4] sm:$0xf0]  ;;  %v4162_v40 = vadd.f32 %v14020_v45, %v4073_v48  ;;  %v8064_v10 = vld [vmem:[#allocation7 + $0x90] sm:$0xf]  ;;  %v8001_v48 = vor.u32 %v8541_v61, %v8000_v23 }
 0x816   :  { %v8073_v62 = vor.u32 %v8559_v38, %v8072_v32  ;;  %5916 = vmatpush.bf16.msrb.mxu2 %v8145_v8  ;;  %v8557_v46 = vld [vmem:[#allocation7 + $0x94] sm:$0xf0]  ;;  %5739 = vmatpush.bf16.msrb.mxu0 %v8009_v11  ;;  %v14026_v37 = vld [vmem:[#allocation58_spill] sm:$0xff]  ;;  %v14027_v38 = vld [vmem:[#allocation125_spill] sm:$0xff] }
 0x817   :  { %v11612_v35 = vpack.c.bf16 %v5252_v5, %v5248_v59  ;;  %v8065_v45 = vor.u32 %v8557_v46, %v8064_v10  ;;  %v4251_v21 = vadd.f32 %v14027_v38, %v4162_v40  ;;  %v7992_v8 = vld [vmem:[#allocation7] sm:$0xf]  ;;  %v8539_v5 = vld [vmem:[#allocation7 + $0x4] sm:$0xf0]  ;;  %v14029_v23 = vld [vmem:[#allocation26_spill] sm:$0xff] }
 0x818   :  { %v11604_v42 = vpop.f32.mrf.mxu2  ;;  %v4426_v9 = vpop.f32.mrf.mxu3  ;;  %5828 = vmatpush.bf16.msrb.mxu1 %v8073_v62  ;;  %v8056_v11 = vld [vmem:[#allocation7 + $0x80] sm:$0xf]  ;;  %v8555_v62 = vld [vmem:[#allocation7 + $0x84] sm:$0xf0]  ;;  %v14034_v38 = vld [vmem:[#allocation211_spill] sm:$0xff] }
 0x819   :  { %14019 = vst [vmem:[#allocation97_spill] sm:$0xff] %v11604_v42  ;;  %v11607_v19 = vpop.f32.mrf.mxu0  ;;  %v11609_v26 = vpop.f32.mrf.mxu1  ;;  %v4427_v31 = vadd.f32 %v4426_v9, %v4338_v3  ;;  %v8128_v42 = vld [vmem:[#allocation7 + $0x110] sm:$0xf]  ;;  %v7993_v3 = vor.u32 %v8539_v5, %v7992_v8  ;;  %v14036_v8 = vld [vmem:[#allocation67_spill] sm:$0xff] }
 0x81a   :  { %14021 = vst [vmem:[#allocation250_spill] sm:$0xff] %v11607_v19  ;;  %v14025_v19 = vld [vmem:[#allocation157_spill] sm:$0xff]  ;;  %5917 = vmatpush.bf16.msrb.mxu2 %v8137_v36  ;;  %5740 = vmatpush.bf16.msrb.mxu0 %v8001_v48  ;;  %v8057_v36 = vor.u32 %v8555_v62, %v8056_v11  ;;  %v14037_v11 = vld [vmem:[#allocation256_spill] sm:$0xff] }
 0x81b   :  { %14022 = vst [vmem:[#allocation61_spill] sm:$0xff] %v11609_v26  ;;  %v8573_v26 = vld [vmem:[#allocation7 + $0x114] sm:$0xf0]  ;;  %v4076_v32 = vadd.f32 %v14026_v37, %v14025_v19  ;;  %v4516_v48 = vadd.f32 %v11336_v47, %v4427_v31  ;;  %v14038_v62 = vld [vmem:[#allocation33_spill] sm:$0xff] }
 0x81c   :  { %14024 = vst [vmem:[#allocation208_spill] sm:$0xff] %v11612_v35  ;;  %v8129_v59 = vor.u32 %v8573_v26, %v8128_v42  ;;  %5829 = vmatpush.bf16.msrb.mxu1 %v8065_v45  ;;  %v14032_v19 = vld [vmem:[#allocation131_spill] sm:$0xff]  ;;  %v8571_v42 = vld [vmem:[#allocation7 + $0x104] sm:$0xf0] }
 0x81d   :  { %v4165_v61 = vadd.f32 %v14029_v23, %v4076_v32  ;;  %v4340_v40 = vadd.f32 %v14032_v19, %v4251_v21  ;;  %v8121_v46 = vor.u32 %v8571_v42, %v8120_v57  ;;  %v14033_v37 = vld [vmem:[#allocation63_spill] sm:$0xff]  ;;  %v5256_v47 = vmax.f32 %v4516_v48, 0.0  ;;  %v14040_v57 = vld [vmem:[#allocation140_spill] sm:$0xff] }
 0x81e   :  { %5918 = vmatpush.bf16.msrb.mxu2 %v8129_v59  ;;  %5741 = vmatpush.bf16.msrb.mxu0 %v7993_v3  ;;  %v14035_v32 = vld [vmem:[#allocation239_spill] sm:$0xff] }
 0x81f   :  { %v4078_v5 = vadd.f32 %v14036_v8, %v14035_v32  ;;  %v4254_v59 = vadd.f32 %v14037_v11, %v4165_v61  ;;  %v14045_v61 = vld [vmem:[#allocation71_spill] sm:$0xff]  ;;  %v14049_v32 = vld [vmem:[#allocation142_spill] sm:$0xff]  ;;  %v14052_v11 = vld [vmem:[#allocation260_spill] sm:$0xff] }
 0x820   :  { %v11617_v18 = vpop.f32.mrf.mxu2  ;;  %v4428_v26 = vpop.f32.mrf.mxu3  ;;  %5830 = vmatpush.bf16.msrb.mxu1 %v8057_v36  ;;  %v14043_v36 = vld [vmem:[#allocation141_spill] sm:$0xff] }
 0x821   :  { %14028 = vst [vmem:[#allocation119_spill] sm:$0xff] %v11617_v18  ;;  %v11620_v9 = vpop.f32.mrf.mxu0  ;;  %v11622_v10 = vpop.f32.mrf.mxu1  ;;  %v4429_v45 = vadd.f32 %v4428_v26, %v4340_v40  ;;  %v4167_v23 = vadd.f32 %v14040_v57, %v4078_v5  ;;  %v4343_v42 = vadd.f32 %v14043_v36, %v4254_v59  ;;  %v14053_v57 = vld [vmem:[#allocation69_spill] sm:$0xff] }
 0x822   :  { %14030 = vst [vmem:[#allocation245_spill] sm:$0xff] %v11620_v9  ;;  %5919 = vmatpush.bf16.msrb.mxu2 %v8121_v46  ;;  %v14046_v46 = vld [vmem:[#allocation113_spill] sm:$0xff] }
 0x823   :  { %14031 = vst [vmem:[#allocation82_spill] sm:$0xff] %v11622_v10  ;;  %v4518_v21 = vadd.f32 %v11351_v4, %v4429_v45  ;;  %v4081_v45 = vadd.f32 %v14046_v46, %v14045_v61  ;;  %v14054_v36 = vld [vmem:[#allocation217_spill] sm:$0xff] }
 0x824   :  { %4880 = vmatmul.bf16.gmra.mxu0 %v14033_v37  ;;  %4969 = vmatmul.bf16.gmra.mxu1 %v14034_v38  ;;  %v14047_v37 = vld [vmem:[#allocation143_spill] sm:$0xff]  ;;  %v14057_v46 = vld [vmem:[#allocation209_spill] sm:$0xff] }
 0x825   :  { %5058 = vmatmul.bf16.gmra.mxu2 %v13906_v53  ;;  %4746 = vmatmul.bf16.gmra.mxu3 %v14038_v62  ;;  %v5260_v31 = vmax.f32 %v4518_v21, 0.0  ;;  %v4256_v48 = vadd.f32 %v14047_v37, %v4167_v23  ;;  %v4170_v8 = vadd.f32 %v14049_v32, %v4081_v45  ;;  %v14056_v23 = vld [vmem:[#allocation106_spill] sm:$0xff]  ;;  %v14058_v37 = vld [vmem:[#allocation36_spill] sm:$0xff] }
 0x827   :  { %v11642_v53 = vpack.c.bf16 %v5260_v31, %v5256_v47  ;;  %v4345_v62 = vadd.f32 %v14052_v11, %v4256_v48  ;;  %v4259_v45 = vadd.f32 %v14057_v46, %v4170_v8  ;;  %v14066_v8 = vld [vmem:[#allocation115_spill] sm:$0xff]  ;;  %v14067_v46 = vld [vmem:[#allocation262_spill] sm:$0xff] }
 0x828   :  { %v11634_v3 = vpop.f32.mrf.mxu2  ;;  %v4431_v4 = vpop.f32.mrf.mxu3 }
 0x829   :  { %14039 = vst [vmem:[#allocation178_spill] sm:$0xff] %v11634_v3  ;;  %v11637_v19 = vpop.f32.mrf.mxu0  ;;  %v11639_v40 = vpop.f32.mrf.mxu1  ;;  %v4432_v26 = vadd.f32 %v4431_v4, %v4343_v42  ;;  %v14055_v42 = vld [vmem:[#allocation240_spill] sm:$0xff] }
 0x82a   :  { %14041 = vst [vmem:[#allocation188_spill] sm:$0xff] %v11637_v19  ;;  %v4083_v4 = vadd.f32 %v14056_v23, %v14055_v42  ;;  %v14133_v19 = vld [vmem:[#allocation161_spill] sm:$0xff] }
 0x82b   :  { %14042 = vst [vmem:[#allocation249_spill] sm:$0xff] %v11639_v40  ;;  %v4521_v47 = vadd.f32 %v11362_v2, %v4432_v26  ;;  %v14060_v2 = vld [vmem:[#allocation29_spill] sm:$0xff] }
 0x82c   :  { %14044 = vst [vmem:[#allocation81_spill] sm:$0xff] %v11642_v53  ;;  %v4172_v26 = vadd.f32 %v14060_v2, %v4083_v4 }
 0x82d   :  { %v5264_v48 = vmax.f32 %v4521_v47, 0.0 }
 0x82e   :  { %v4261_v47 = vadd.f32 %v14067_v46, %v4172_v26  ;;  %v14076_v26 = vld [vmem:[#allocation129_spill] sm:$0xff] }
 0x830   :  { %v11647_v38 = vpop.f32.mrf.mxu2  ;;  %v4433_v59 = vpop.f32.mrf.mxu3 }
 0x831   :  { %14048 = vst [vmem:[#allocation254_spill] sm:$0xff] %v11647_v38  ;;  %v11650_v5 = vpop.f32.mrf.mxu0  ;;  %v11652_v21 = vpop.f32.mrf.mxu1  ;;  %v4434_v31 = vadd.f32 %v4433_v59, %v4345_v62  ;;  %v14122_v38 = vld [vmem:[#allocation50_spill] sm:$0xff] }
 0x832   :  { %14050 = vst [vmem:[#allocation89_spill] sm:$0xff] %v11650_v5 }
 0x833   :  { %14051 = vst [vmem:[#allocation214_spill] sm:$0xff] %v11652_v21  ;;  %v4523_v61 = vadd.f32 %v11377_v49, %v4434_v31  ;;  %v14065_v31 = vld [vmem:[#allocation242_spill] sm:$0xff] }
 0x834   :  { %4885 = vmatmul.bf16.gmra.mxu0 %v14053_v57  ;;  %4974 = vmatmul.bf16.gmra.mxu1 %v14054_v36  ;;  %v14063_v57 = vld [vmem:[#allocation176_spill] sm:$0xff]  ;;  %v4086_v23 = vadd.f32 %v14066_v8, %v14065_v31 }
 0x835   :  { %5063 = vmatmul.bf16.gmra.mxu2 %v13921_v44  ;;  %4751 = vmatmul.bf16.gmra.mxu3 %v14058_v37  ;;  %v5268_v32 = vmax.f32 %v4523_v61, 0.0  ;;  %v4348_v36 = vadd.f32 %v14063_v57, %v4259_v45  ;;  %v14069_v37 = vld [vmem:[#allocation46_spill] sm:$0xff]  ;;  %v14073_v57 = vld [vmem:[#allocation51_spill] sm:$0xff] }
 0x837   :  { %v11672_v42 = vpack.c.bf16 %v5268_v32, %v5264_v48 }
 0x838   :  { %v11664_v11 = vpop.f32.mrf.mxu2  ;;  %v4436_v44 = vpop.f32.mrf.mxu3 }
 0x839   :  { %14059 = vst [vmem:[#allocation126_spill] sm:$0xff] %v11664_v11  ;;  %v11667_v62 = vpop.f32.mrf.mxu0  ;;  %v11669_v59 = vpop.f32.mrf.mxu1  ;;  %v4437_v49 = vadd.f32 %v4436_v44, %v4348_v36  ;;  %v4175_v11 = vadd.f32 %v14069_v37, %v4086_v23  ;;  %v14074_v36 = vld [vmem:[#allocation187_spill] sm:$0xff]  ;;  %v14075_v44 = vld [vmem:[#allocation197_spill] sm:$0xff]  ;;  %v14077_v23 = vld [vmem:[#allocation148_spill] sm:$0xff] }
 0x83a   :  { %14061 = vst [vmem:[#allocation253_spill] sm:$0xff] %v11667_v62  ;;  %v4088_v31 = vadd.f32 %v14076_v26, %v14075_v44  ;;  %v14078_v37 = vld [vmem:[#allocation39_spill] sm:$0xff] }
 0x83b   :  { %14062 = vst [vmem:[#allocation189_spill] sm:$0xff] %v11669_v59  ;;  %v14072_v59 = vld [vmem:[#allocation215_spill] sm:$0xff]  ;;  %v4526_v48 = vadd.f32 %v11388_v63, %v4437_v49  ;;  %v4264_v46 = vadd.f32 %v14077_v23, %v4175_v11  ;;  %v14080_v63 = vld [vmem:[#allocation264_spill] sm:$0xff] }
 0x83c   :  { %14064 = vst [vmem:[#allocation192_spill] sm:$0xff] %v11672_v42  ;;  %v4350_v62 = vadd.f32 %v14072_v59, %v4261_v47 }
 0x83d   :  { %v5272_v59 = vmax.f32 %v4526_v48, 0.0 }
 0x840   :  { %v11677_v61 = vpop.f32.mrf.mxu2  ;;  %v4438_v45 = vpop.f32.mrf.mxu3 }
 0x841   :  { %14068 = vst [vmem:[#allocation255_spill] sm:$0xff] %v11677_v61  ;;  %v11680_v4 = vpop.f32.mrf.mxu0  ;;  %v11682_v2 = vpop.f32.mrf.mxu1  ;;  %v4439_v32 = vadd.f32 %v4438_v45, %v4350_v62  ;;  %v4177_v62 = vadd.f32 %v14080_v63, %v4088_v31  ;;  %v14083_v61 = vld [vmem:[#allocation186_spill] sm:$0xff] }
 0x842   :  { %14070 = vst [vmem:[#allocation190_spill] sm:$0xff] %v11680_v4  ;;  %v4353_v44 = vadd.f32 %v14083_v61, %v4264_v46  ;;  %v14090_v61 = vld [vmem:[#allocation284_spill] sm:$0xff]  ;;  %v14091_v46 = vld [vmem:[#allocation45_spill] sm:$0xff] }
 0x843   :  { %14071 = vst [vmem:[#allocation257_spill] sm:$0xff] %v11682_v2  ;;  %v4528_v8 = vadd.f32 %v11403_v51, %v4439_v32  ;;  %v14084_v32 = vld [vmem:[#allocation149_spill] sm:$0xff] }
 0x844   :  { %5742 = vmatmul.bf16.vlgmr.msrb.gmra.mxu0 %v14073_v57  ;;  %5831 = vmatmul.bf16.vlgmr.msrb.gmra.mxu1 %v14074_v36  ;;  %v4266_v11 = vadd.f32 %v14084_v32, %v4177_v62 }
 0x845   :  { %5920 = vmatmul.bf16.vlgmr.msrb.gmra.mxu2 %v11301_v39  ;;  %4756 = vmatmul.bf16.gmra.mxu3 %v14078_v37  ;;  %v5276_v47 = vmax.f32 %v4528_v8, 0.0  ;;  %v14088_v37 = vld [vmem:[#allocation32_spill] sm:$0xff] }
 0x846   :  { %v4355_v31 = vadd.f32 %v14088_v37, %v4266_v11  ;;  %v14096_v11 = vld [vmem:[#allocation55_spill] sm:$0xff] }
 0x847   :  { %v11702_v26 = vpack.c.bf16 %v5276_v47, %v5272_v59 }
 0x848   :  { %v11694_v2 = vpop.f32.mrf.mxu2  ;;  %v4441_v4 = vpop.f32.mrf.mxu3 }
 0x849   :  { %14079 = vst [vmem:[#allocation258_spill] sm:$0xff] %v11694_v2  ;;  %v11697_v49 = vpop.f32.mrf.mxu0  ;;  %v11699_v45 = vpop.f32.mrf.mxu1  ;;  %v4442_v51 = vadd.f32 %v4441_v4, %v4353_v44 }
 0x84a   :  { %14081 = vst [vmem:[#allocation220_spill] sm:$0xff] %v11697_v49  ;;  %v14089_v49 = vld [vmem:[#allocation40_spill] sm:$0xff] }
 0x84b   :  { %14082 = vst [vmem:[#allocation132_spill] sm:$0xff] %v11699_v45  ;;  %v4531_v2 = vadd.f32 %v11414_v7, %v4442_v51 }
 0x84d   :  { %v5280_v59 = vmax.f32 %v4531_v2, 0.0 }
 0x850   :  { %v11705_v23 = vpop.f32.mrf.mxu2  ;;  %v4443_v63 = vpop.f32.mrf.mxu3 }
 0x851   :  { %14085 = vst [vmem:[#allocation261_spill] sm:$0xff] %v11705_v23  ;;  %v11707_v48 = vpop.f32.mrf.mxu0  ;;  %v11709_v8 = vpop.f32.mrf.mxu1  ;;  %v4444_v45 = vadd.f32 %v4443_v63, %v4355_v31 }
 0x852   :  { %14086 = vst [vmem:[#allocation38_spill] sm:$0xff] %v11707_v48 }
 0x853   :  { %14087 = vst [vmem:[#allocation227_spill] sm:$0xff] %v11709_v8  ;;  %v4533_v4 = vadd.f32 %v11429_v56, %v4444_v45  ;;  %v14100_v45 = vld [vmem:[#allocation56_spill] sm:$0xff]  ;;  %v14111_v8 = vld [vmem:[#allocation158_spill] sm:$0xff] }
 0x854   :  { %5747 = vmatmul.bf16.gmra.mxu0 %v14089_v49  ;;  %5836 = vmatmul.bf16.gmra.mxu1 %v14090_v61 }
 0x855   :  { %5925 = vmatmul.bf16.gmra.mxu2 %v11328_v60  ;;  %4761 = vmatmul.bf16.gmra.mxu3 %v14091_v46  ;;  %v5284_v47 = vmax.f32 %v4533_v4, 0.0  ;;  %v14101_v46 = vld [vmem:[#allocation150_spill] sm:$0xff] }
 0x857   :  { %v11724_v7 = vpack.c.bf16 %v5284_v47, %v5280_v59  ;;  %v14103_v59 = vld [vmem:[#allocation54_spill] sm:$0xff] }
 0x858   :  { %v11718_v62 = vpop.f32.mrf.mxu2  ;;  %v4722_v51 = vpop.f32.mrf.mxu3 }
 0x859   :  { %14092 = vst [vmem:[#allocation203_spill] sm:$0xff] %v11718_v62  ;;  %v11720_v44 = vpop.f32.mrf.mxu0  ;;  %v11722_v32 = vpop.f32.mrf.mxu1  ;;  %v11727_v37 = vadd.f32 %v4722_v51, %v14096_v11  ;;  %v14102_v62 = vld [vmem:[#allocation287_spill] sm:$0xff] }
 0x85a   :  { %14093 = vst [vmem:[#allocation90_spill] sm:$0xff] %v11720_v44 }
 0x85b   :  { %14094 = vst [vmem:[#allocation94_spill] sm:$0xff] %v11722_v32 }
 0x85c   :  { %14095 = vst [vmem:[#allocation263_spill] sm:$0xff] %v11724_v7 }
 0x860   :  { %v11729_v31 = vpop.f32.mrf.mxu2  ;;  %v4724_v2 = vpop.f32.mrf.mxu3 }
 0x861   :  { %14097 = vst [vmem:[#allocation216_spill] sm:$0xff] %v11729_v31  ;;  %v11731_v63 = vpop.f32.mrf.mxu0  ;;  %v11733_v56 = vpop.f32.mrf.mxu1  ;;  %v11736_v4 = vadd.f32 %v4724_v2, %v14100_v45 }
 0x862   :  { %14098 = vst [vmem:[#allocation195_spill] sm:$0xff] %v11731_v63 }
 0x863   :  { %14099 = vst [vmem:[#allocation194_spill] sm:$0xff] %v11733_v56  ;;  %v14107_v56 = vld [vmem:[#allocation221_spill] sm:$0xff] }
 0x864   :  { %5752 = vmatmul.bf16.gmra.mxu0 %v14101_v46  ;;  %5841 = vmatmul.bf16.gmra.mxu1 %v14102_v62 }
 0x865   :  { %5930 = vmatmul.bf16.gmra.mxu2 %v11354_v1  ;;  %4766 = vmatmul.bf16.gmra.mxu3 %v14103_v59  ;;  %v14112_v59 = vld [vmem:[#allocation48_spill] sm:$0xff] }
 0x868   :  { %v11742_v47 = vpop.f32.mrf.mxu2  ;;  %v4727_v31 = vpop.f32.mrf.mxu3 }
 0x869   :  { %14104 = vst [vmem:[#allocation198_spill] sm:$0xff] %v11742_v47  ;;  %v11744_v51 = vpop.f32.mrf.mxu0  ;;  %v11746_v11 = vpop.f32.mrf.mxu1  ;;  %v11749_v63 = vadd.f32 %v4727_v31, %v14107_v56  ;;  %v14113_v47 = vld [vmem:[#allocation73_spill] sm:$0xff] }
 0x86a   :  { %14105 = vst [vmem:[#allocation65_spill] sm:$0xff] %v11744_v51 }
 0x86b   :  { %14106 = vst [vmem:[#allocation223_spill] sm:$0xff] %v11746_v11  ;;  %v14114_v11 = vld [vmem:[#allocation59_spill] sm:$0xff] }
 0x870   :  { %v11751_v2 = vpop.f32.mrf.mxu2  ;;  %v4729_v44 = vpop.f32.mrf.mxu3 }
 0x871   :  { %14108 = vst [vmem:[#allocation137_spill] sm:$0xff] %v11751_v2  ;;  %v11753_v45 = vpop.f32.mrf.mxu0  ;;  %v11755_v32 = vpop.f32.mrf.mxu1  ;;  %v11758_v23 = vadd.f32 %v4729_v44, %v14111_v8 }
 0x872   :  { %14109 = vst [vmem:[#allocation265_spill] sm:$0xff] %v11753_v45 }
 0x873   :  { %14110 = vst [vmem:[#allocation266_spill] sm:$0xff] %v11755_v32  ;;  %v14118_v32 = vld [vmem:[#allocation274_spill] sm:$0xff] }
 0x874   :  { %5757 = vmatmul.bf16.gmra.mxu0 %v14112_v59  ;;  %5846 = vmatmul.bf16.gmra.mxu1 %v14113_v47 }
 0x875   :  { %5935 = vmatmul.bf16.gmra.mxu2 %v11380_v28  ;;  %4771 = vmatmul.bf16.gmra.mxu3 %v14114_v11  ;;  %v14123_v11 = vld [vmem:[#allocation165_spill] sm:$0xff] }
 0x878   :  { %v11764_v31 = vpop.f32.mrf.mxu2  ;;  %v4732_v45 = vpop.f32.mrf.mxu3 }
 0x879   :  { %14115 = vst [vmem:[#allocation19_spill] sm:$0xff] %v11764_v31  ;;  %v11766_v56 = vpop.f32.mrf.mxu0  ;;  %v11768_v2 = vpop.f32.mrf.mxu1  ;;  %v11771_v51 = vadd.f32 %v4732_v45, %v14118_v32  ;;  %v14124_v31 = vld [vmem:[#allocation181_spill] sm:$0xff] }
 0x87a   :  { %14116 = vst [vmem:[#allocation92_spill] sm:$0xff] %v11766_v56 }
 0x87b   :  { %14117 = vst [vmem:[#allocation212_spill] sm:$0xff] %v11768_v2  ;;  %v14125_v2 = vld [vmem:[#allocation68_spill] sm:$0xff] }
 0x880   :  { %v11773_v8 = vpop.f32.mrf.mxu2  ;;  %v4734_v21 = vpop.f32.mrf.mxu3 }
 0x881   :  { %14119 = vst [vmem:[#allocation93_spill] sm:$0xff] %v11773_v8  ;;  %v11775_v44 = vpop.f32.mrf.mxu0  ;;  %v11777_v48 = vpop.f32.mrf.mxu1  ;;  %v11780_v5 = vadd.f32 %v4734_v21, %v14122_v38 }
 0x882   :  { %14120 = vst [vmem:[#allocation231_spill] sm:$0xff] %v11775_v44 }
 0x883   :  { %14121 = vst [vmem:[#allocation267_spill] sm:$0xff] %v11777_v48  ;;  %v14129_v48 = vld [vmem:[#allocation278_spill] sm:$0xff] }
 0x884   :  { %5762 = vmatmul.bf16.gmra.mxu0 %v14123_v11  ;;  %5851 = vmatmul.bf16.gmra.mxu1 %v14124_v31 }
 0x885   :  { %5940 = vmatmul.bf16.gmra.mxu2 %v11406_v55  ;;  %4776 = vmatmul.bf16.gmra.mxu3 %v14125_v2  ;;  %v14134_v2 = vld [vmem:[#allocation169_spill] sm:$0xff] }
 0x888   :  { %v11786_v32 = vpop.f32.mrf.mxu2  ;;  %v4737_v44 = vpop.f32.mrf.mxu3 }
 0x889   :  { %14126 = vst [vmem:[#allocation155_spill] sm:$0xff] %v11786_v32  ;;  %v11788_v45 = vpop.f32.mrf.mxu0  ;;  %v11790_v8 = vpop.f32.mrf.mxu1  ;;  %v11793_v56 = vadd.f32 %v4737_v44, %v14129_v48  ;;  %v14135_v32 = vld [vmem:[#allocation243_spill] sm:$0xff] }
 0x88a   :  { %14127 = vst [vmem:[#allocation91_spill] sm:$0xff] %v11788_v45 }
 0x88b   :  { %14128 = vst [vmem:[#allocation103_spill] sm:$0xff] %v11790_v8  ;;  %v14136_v8 = vld [vmem:[#allocation135_spill] sm:$0xff] }
 0x890   :  { %v11795_v38 = vpop.f32.mrf.mxu2  ;;  %v4739_v3 = vpop.f32.mrf.mxu3 }
 0x891   :  { %14130 = vst [vmem:[#allocation233_spill] sm:$0xff] %v11795_v38  ;;  %v11797_v21 = vpop.f32.mrf.mxu0  ;;  %v11799_v40 = vpop.f32.mrf.mxu1  ;;  %v11802_v10 = vadd.f32 %v4739_v3, %v14133_v19 }
 0x892   :  { %14131 = vst [vmem:[#allocation226_spill] sm:$0xff] %v11797_v21 }
 0x893   :  { %14132 = vst [vmem:[#allocation145_spill] sm:$0xff] %v11799_v40  ;;  %v14140_v40 = vld [vmem:[#allocation224_spill] sm:$0xff] }
 0x894   :  { %5767 = vmatmul.bf16.gmra.mxu0 %v14134_v2  ;;  %5856 = vmatmul.bf16.gmra.mxu1 %v14135_v32 }
 0x895   :  { %5945 = vmatmul.bf16.gmra.mxu2 %v11432_v34  ;;  %4781 = vmatmul.bf16.gmra.mxu3 %v14136_v8  ;;  %v14146_v8 = vld [vmem:[#allocation174_spill] sm:$0xff] }
 0x898   :  { %v11808_v48 = vpop.f32.mrf.mxu2  ;;  %v4742_v21 = vpop.f32.mrf.mxu3 }
 0x899   :  { %14137 = vst [vmem:[#allocation271_spill] sm:$0xff] %v11808_v48  ;;  %v11810_v44 = vpop.f32.mrf.mxu0  ;;  %v11812_v38 = vpop.f32.mrf.mxu1  ;;  %v11815_v45 = vadd.f32 %v4742_v21, %v14140_v40  ;;  %v14147_v48 = vld [vmem:[#allocation182_spill] sm:$0xff] }
 0x89a   :  { %14138 = vst [vmem:[#allocation270_spill] sm:$0xff] %v11810_v44 }
 0x89b   :  { %14139 = vst [vmem:[#allocation201_spill] sm:$0xff] %v11812_v38  ;;  %v14148_v38 = vld [vmem:[#allocation136_spill] sm:$0xff] }
 0x8a0   :  { %v11817_v3 = vpop.f32.mrf.mxu2  ;;  %v4744_v9 = vpop.f32.mrf.mxu3 }
 0x8a1   :  { %14141 = vst [vmem:[#allocation218_spill] sm:$0xff] %v11817_v3  ;;  %v11819_v19 = vpop.f32.mrf.mxu0  ;;  %v11821_v18 = vpop.f32.mrf.mxu1  ;;  %v11824_v16 = vadd.f32 %v4744_v9, %v14144_v13 }
 0x8a2   :  { %14142 = vst [vmem:[#allocation268_spill] sm:$0xff] %v11819_v19 }
 0x8a3   :  { %14143 = vst [vmem:[#allocation205_spill] sm:$0xff] %v11821_v18  ;;  %v14152_v18 = vld [vmem:[#allocation162_spill] sm:$0xff] }
 0x8a4   :  { %14145 = vst [vmem:[#allocation275_spill] sm:$0xff] %v11824_v16  ;;  %5772 = vmatmul.bf16.gmra.mxu0 %v14146_v8  ;;  %5861 = vmatmul.bf16.gmra.mxu1 %v14147_v48 }
 0x8a5   :  { %5950 = vmatmul.bf16.gmra.mxu2 %v11462_v52  ;;  %4786 = vmatmul.bf16.gmra.mxu3 %v14148_v38  ;;  %v14157_v52 = vld [vmem:[#allocation22_spill] sm:$0xff]  ;;  %v14159_v38 = vld [vmem:[#allocation172_spill] sm:$0xff] }
 0x8a8   :  { %v11830_v40 = vpop.f32.mrf.mxu2  ;;  %v4747_v19 = vpop.f32.mrf.mxu3 }
 0x8a9   :  { %14149 = vst [vmem:[#allocation152_spill] sm:$0xff] %v11830_v40  ;;  %v11832_v21 = vpop.f32.mrf.mxu0  ;;  %v11834_v3 = vpop.f32.mrf.mxu1  ;;  %v11837_v44 = vadd.f32 %v4747_v19, %v14152_v18  ;;  %v14160_v40 = vld [vmem:[#allocation164_spill] sm:$0xff] }
 0x8aa   :  { %14150 = vst [vmem:[#allocation17_spill] sm:$0xff] %v11832_v21 }
 0x8ab   :  { %14151 = vst [vmem:[#allocation100_spill] sm:$0xff] %v11834_v3  ;;  %v14161_v3 = vld [vmem:[#allocation144_spill] sm:$0xff] }
 0x8ac   :  { %14153 = vst [vmem:[#allocation235_spill] sm:$0xff] %v11837_v44  ;;  %v14168_v44 = vld [vmem:[#allocation28_spill] sm:$0xff] }
 0x8b0   :  { %v11839_v13 = vpop.f32.mrf.mxu2  ;;  %v4749_v48 = vpop.f32.mrf.mxu3 }
 0x8b1   :  { %14154 = vst [vmem:[#allocation47_spill] sm:$0xff] %v11839_v13  ;;  %v11841_v9 = vpop.f32.mrf.mxu0  ;;  %v11843_v8 = vpop.f32.mrf.mxu1  ;;  %v11846_v16 = vadd.f32 %v4749_v48, %v14157_v52 }
 0x8b2   :  { %14155 = vst [vmem:[#allocation153_spill] sm:$0xff] %v11841_v9 }
 0x8b3   :  { %14156 = vst [vmem:[#allocation279_spill] sm:$0xff] %v11843_v8  ;;  %v14165_v8 = vld [vmem:[#allocation25_spill] sm:$0xff] }
 0x8b4   :  { %14158 = vst [vmem:[#allocation35_spill] sm:$0xff] %v11846_v16  ;;  %5777 = vmatmul.bf16.gmra.mxu0 %v14159_v38  ;;  %5866 = vmatmul.bf16.gmra.mxu1 %v14160_v40 }
 0x8b5   :  { %5955 = vmatmul.bf16.gmra.mxu2 %v11492_v29  ;;  %4791 = vmatmul.bf16.gmra.mxu3 %v14161_v3  ;;  %v14170_v3 = vld [vmem:[#allocation179_spill] sm:$0xff] }
 0x8b8   :  { %v11852_v18 = vpop.f32.mrf.mxu2  ;;  %v4752_v9 = vpop.f32.mrf.mxu3 }
 0x8b9   :  { %14162 = vst [vmem:[#allocation101_spill] sm:$0xff] %v11852_v18  ;;  %v11854_v19 = vpop.f32.mrf.mxu0  ;;  %v11856_v13 = vpop.f32.mrf.mxu1  ;;  %v11859_v21 = vadd.f32 %v4752_v9, %v14165_v8  ;;  %v14171_v18 = vld [vmem:[#allocation251_spill] sm:$0xff] }
 0x8ba   :  { %14163 = vst [vmem:[#allocation18_spill] sm:$0xff] %v11854_v19 }
 0x8bb   :  { %14164 = vst [vmem:[#allocation237_spill] sm:$0xff] %v11856_v13  ;;  %v14172_v13 = vld [vmem:[#allocation151_spill] sm:$0xff] }
 0x8bc   :  { %14166 = vst [vmem:[#allocation102_spill] sm:$0xff] %v11859_v21 }
 0x8c0   :  { %v11861_v52 = vpop.f32.mrf.mxu2  ;;  %v4754_v40 = vpop.f32.mrf.mxu3 }
 0x8c1   :  { %14167 = vst [vmem:[#allocation283_spill] sm:$0xff] %v11861_v52  ;;  %v5743_v48 = vpop.f32.mrf.mxu0  ;;  %v5832_v38 = vpop.f32.mrf.mxu1  ;;  %v11864_v29 = vadd.f32 %v4754_v40, %v14168_v44 }
 0x8c2   :  { %v5833_v16 = vadd.f32 %v5832_v38, %v5743_v48  ;;  %v14174_v38 = vld [vmem:[#allocation31_spill] sm:$0xff] }
 0x8c3   :  { %14169 = vst [vmem:[#allocation222_spill] sm:$0xff] %v11864_v29 }
 0x8c4   :  { %5782 = vmatmul.bf16.gmra.mxu0 %v14170_v3  ;;  %5871 = vmatmul.bf16.gmra.mxu1 %v14171_v18 }
 0x8c5   :  { %5960 = vmatmul.bf16.gmra.mxu2 %v11522_v33  ;;  %4796 = vmatmul.bf16.gmra.mxu3 %v14172_v13  ;;  %v14177_v33 = vld [vmem:[#allocation34_spill] sm:$0xff]  ;;  %v14179_v13 = vld [vmem:[#allocation72_spill] sm:$0xff] }
 0x8c8   :  { %v5921_v19 = vpop.f32.mrf.mxu2  ;;  %v4757_v34 = vpop.f32.mrf.mxu3 }
 0x8c9   :  { %v11870_v8 = vadd.f32 %v5921_v19, %v5833_v16  ;;  %v5745_v9 = vpop.f32.mrf.mxu0  ;;  %v5834_v52 = vpop.f32.mrf.mxu1  ;;  %v11873_v48 = vadd.f32 %v4757_v34, %v14174_v38  ;;  %v14180_v16 = vld [vmem:[#allocation64_spill] sm:$0xff]  ;;  %v8240_v19 = vld [vmem:[#allocation7 + $0x1f0] sm:$0xf] }
 0x8ca   :  { %v5835_v21 = vadd.f32 %v5834_v52, %v5745_v9  ;;  %v8601_v52 = vld [vmem:[#allocation7 + $0x1f4] sm:$0xf0]  ;;  %v14181_v34 = vld [vmem:[#allocation78_spill] sm:$0xff] }
 0x8cb   :  { %14173 = vst [vmem:[#allocation207_spill] sm:$0xff] %v11870_v8 }
 0x8cc   :  { %14175 = vst [vmem:[#allocation210_spill] sm:$0xff] %v11873_v48 }
 0x8d0   :  { %v5923_v44 = vpop.f32.mrf.mxu2  ;;  %v4759_v32 = vpop.f32.mrf.mxu3 }
 0x8d1   :  { %v11875_v40 = vadd.f32 %v5923_v44, %v5835_v21  ;;  %v5748_v3 = vpop.f32.mrf.mxu0  ;;  %v5837_v29 = vpop.f32.mrf.mxu1  ;;  %v11878_v2 = vadd.f32 %v4759_v32, %v14177_v33  ;;  %v8241_v21 = vor.u32 %v8601_v52, %v8240_v19  ;;  %v14183_v44 = vld [vmem:[#allocation37_spill] sm:$0xff]  ;;  %v14186_v52 = vld [vmem:[#allocation84_spill] sm:$0xff] }
 0x8d2   :  { %v5838_v18 = vadd.f32 %v5837_v29, %v5748_v3 }
 0x8d3   :  { %14176 = vst [vmem:[#allocation104_spill] sm:$0xff] %v11875_v40  ;;  %6001 = vmatpush.bf16.msra.mxu3 %v8241_v21  ;;  %v14188_v21 = vld [vmem:[#allocation88_spill] sm:$0xff] }
 0x8d4   :  { %14178 = vst [vmem:[#allocation41_spill] sm:$0xff] %v11878_v2  ;;  %5787 = vmatmul.bf16.gmra.mxu0 %v14179_v13  ;;  %5876 = vmatmul.bf16.gmra.mxu1 %v14180_v16 }
 0x8d5   :  { %5965 = vmatmul.bf16.gmra.mxu2 %v11552_v27  ;;  %7974 = vmatmul.msk.bf16.vlgmr.msrb.gmra.mxu3 %vm2617_vm0, %v14181_v34  ;;  %v14185_v34 = vld [vmem:[#allocation43_spill] sm:$0xff] }
 0x8d8   :  { %v5926_v9 = vpop.f32.mrf.mxu2  ;;  %v4762_v32 = vpop.f32.mrf.mxu3 }
 0x8d9   :  { %v11885_v38 = vadd.f32 %v5926_v9, %v5838_v18  ;;  %v5750_v29 = vpop.f32.mrf.mxu0  ;;  %v5839_v3 = vpop.f32.mrf.mxu1  ;;  %v11888_v40 = vadd.f32 %v4762_v32, %v14183_v44  ;;  %v14187_v18 = vld [vmem:[#allocation259_spill] sm:$0xff] }
 0x8da   :  { %v5840_v33 = vadd.f32 %v5839_v3, %v5750_v29 }
 0x8db   :  { %14182 = vst [vmem:[#allocation166_spill] sm:$0xff] %v11885_v38 }
 0x8e0   :  { %v5928_v8 = vpop.f32.mrf.mxu2  ;;  %v4764_v48 = vpop.f32.mrf.mxu3 }
 0x8e1   :  { %v11890_v16 = vadd.f32 %v5928_v8, %v5840_v33  ;;  %v5753_v27 = vpop.f32.mrf.mxu0  ;;  %v5842_v13 = vpop.f32.mrf.mxu1  ;;  %v11893_v19 = vadd.f32 %v4764_v48, %v14185_v34 }
 0x8e2   :  { %v5843_v2 = vadd.f32 %v5842_v13, %v5753_v27 }
 0x8e3   :  { %14184 = vst [vmem:[#allocation170_spill] sm:$0xff] %v11890_v16 }
 0x8e4   :  { %5792 = vmatmul.bf16.gmra.mxu0 %v14186_v52  ;;  %5881 = vmatmul.bf16.gmra.mxu1 %v14187_v18 }
 0x8e5   :  { %5970 = vmatmul.bf16.gmra.mxu2 %v11582_v25  ;;  %7975 = vmatmul.msk.bf16.gmra.mxu3 %vm2617_vm0, %v14188_v21  ;;  %v14192_v21 = vld [vmem:[#allocation83_spill] sm:$0xff] }
 0x8e8   :  { %v5931_v9 = vpop.f32.mrf.mxu2  ;;  %v4767_v27 = vpop.f32.mrf.mxu3 }
 0x8e9   :  { %v11900_v29 = vadd.f32 %v5931_v9, %v5843_v2  ;;  %v5755_v8 = vpop.f32.mrf.mxu0  ;;  %v5844_v3 = vpop.f32.mrf.mxu1  ;;  %v11903_v13 = vadd.f32 %v4767_v27, %v11273_v30  ;;  %v14193_v2 = vld [vmem:[#allocation229_spill] sm:$0xff]  ;;  %v8232_v9 = vld [vmem:[#allocation7 + $0x1e0] sm:$0xf]  ;;  %v14194_v30 = vld [vmem:[#allocation99_spill] sm:$0xff] }
 0x8ea   :  { %v5845_v33 = vadd.f32 %v5844_v3, %v5755_v8  ;;  %v8599_v8 = vld [vmem:[#allocation7 + $0x1e4] sm:$0xf0] }
 0x8eb   :  { %14189 = vst [vmem:[#allocation159_spill] sm:$0xff] %v11900_v29  ;;  %v8233_v3 = vor.u32 %v8599_v8, %v8232_v9  ;;  %v8552_v8 = vld [vmem:[#allocation7 + $0x74] sm:$0xf] }
 0x8ed   :  { %6002 = vmatpush.bf16.msra.mxu3 %v8233_v3  ;;  %v14199_v3 = vld [vmem:[#allocation196_spill] sm:$0xff] }
 0x8f0   :  { %v5933_v48 = vpop.f32.mrf.mxu2  ;;  %v4769_v38 = vpop.f32.mrf.mxu3 }
 0x8f1   :  { %v11905_v32 = vadd.f32 %v5933_v48, %v5845_v33  ;;  %v5758_v44 = vpop.f32.mrf.mxu0  ;;  %v5847_v34 = vpop.f32.mrf.mxu1  ;;  %v11908_v25 = vadd.f32 %v4769_v38, %v11282_v22 }
 0x8f2   :  { %v5848_v16 = vadd.f32 %v5847_v34, %v5758_v44 }
 0x8f3   :  { %14190 = vst [vmem:[#allocation273_spill] sm:$0xff] %v11905_v32 }
 0x8f4   :  { %14191 = vst [vmem:[#allocation21_spill] sm:$0xff] %v11908_v25  ;;  %5797 = vmatmul.bf16.gmra.mxu0 %v14192_v21  ;;  %5886 = vmatmul.bf16.gmra.mxu1 %v14193_v2 }
 0x8f5   :  { %5975 = vmatmul.bf16.gmra.mxu2 %v11612_v35  ;;  %7976 = vmatmul.msk.bf16.gmra.mxu3 %vm2617_vm0, %v14194_v30  ;;  %v8568_v30 = vld [vmem:[#allocation7 + $0xf4] sm:$0xf] }
 0x8f8   :  { %v5936_v33 = vpop.f32.mrf.mxu2  ;;  %v4772_v38 = vpop.f32.mrf.mxu3 }
 0x8f9   :  { %v11915_v27 = vadd.f32 %v5936_v33, %v5848_v16  ;;  %v5760_v48 = vpop.f32.mrf.mxu0  ;;  %v5849_v44 = vpop.f32.mrf.mxu1  ;;  %v11918_v34 = vadd.f32 %v4772_v38, %v11297_v15  ;;  %v8050_v16 = vld [vmem:[#allocation7 + $0x78] sm:$0xf0] }
 0x8fa   :  { %v5850_v22 = vadd.f32 %v5849_v44, %v5760_v48  ;;  %v14200_v33 = vld [vmem:[#allocation199_spill] sm:$0xff]  ;;  %v8053_v48 = vor.u32 %v8552_v8, %v8050_v16  ;;  %v8584_v44 = vld [vmem:[#allocation7 + $0x174] sm:$0xf]  ;;  %v8582_v8 = vld [vmem:[#allocation7 + $0x164] sm:$0xf] }
 0x8fb   :  { %14195 = vst [vmem:[#allocation20_spill] sm:$0xff] %v11915_v27  ;;  %v8114_v15 = vld [vmem:[#allocation7 + $0xf8] sm:$0xf0]  ;;  %v8170_v16 = vld [vmem:[#allocation7 + $0x168] sm:$0xf0] }
 0x8fc   :  { %14196 = vst [vmem:[#allocation276_spill] sm:$0xff] %v11918_v34  ;;  %v8178_v38 = vld [vmem:[#allocation7 + $0x178] sm:$0xf0]  ;;  %6090 = vmatpush.bf16.msra.mxu0 %v8053_v48  ;;  %v8548_v48 = vld [vmem:[#allocation7 + $0x54] sm:$0xf] }
 0x8fd   :  { %v8580_v34 = vld [vmem:[#allocation7 + $0x154] sm:$0xf] }
 0x900   :  { %v5938_v32 = vpop.f32.mrf.mxu2  ;;  %v4774_v25 = vpop.f32.mrf.mxu3 }
 0x901   :  { %v11920_v29 = vadd.f32 %v5938_v32, %v5850_v22  ;;  %v5763_v35 = vpop.f32.mrf.mxu0  ;;  %v5852_v2 = vpop.f32.mrf.mxu1  ;;  %v11923_v9 = vadd.f32 %v4774_v25, %v11308_v6  ;;  %v8117_v32 = vor.u32 %v8568_v30, %v8114_v15  ;;  %v8181_v22 = vor.u32 %v8584_v44, %v8178_v38  ;;  %v8550_v6 = vld [vmem:[#allocation7 + $0x64] sm:$0xf]  ;;  %v8042_v25 = vld [vmem:[#allocation7 + $0x68] sm:$0xf0] }
 0x902   :  { %v5853_v21 = vadd.f32 %v5852_v2, %v5763_v35  ;;  %v14201_v35 = vld [vmem:[#allocation112_spill] sm:$0xff]  ;;  %v8045_v27 = vor.u32 %v8550_v6, %v8042_v25  ;;  %v8173_v15 = vor.u32 %v8582_v8, %v8170_v16  ;;  %v8098_v25 = vld [vmem:[#allocation7 + $0xd8] sm:$0xf0]  ;;  %v8090_v8 = vld [vmem:[#allocation7 + $0xc8] sm:$0xf0] }
 0x903   :  { %14197 = vst [vmem:[#allocation171_spill] sm:$0xff] %v11920_v29  ;;  %6179 = vmatpush.bf16.msra.mxu1 %v8117_v32  ;;  %6268 = vmatpush.bf16.msra.mxu2 %v8181_v22  ;;  %v8566_v2 = vld [vmem:[#allocation7 + $0xe4] sm:$0xf]  ;;  %v8034_v32 = vld [vmem:[#allocation7 + $0x58] sm:$0xf0] }
 0x904   :  { %14198 = vst [vmem:[#allocation60_spill] sm:$0xff] %v11923_v9  ;;  %5802 = vmatmul.bf16.gmra.mxu0 %v14199_v3  ;;  %5891 = vmatmul.bf16.gmra.mxu1 %v14200_v33  ;;  %v8106_v33 = vld [vmem:[#allocation7 + $0xe8] sm:$0xf0]  ;;  %v8564_v22 = vld [vmem:[#allocation7 + $0xd4] sm:$0xf]  ;;  %v8037_v6 = vor.u32 %v8548_v48, %v8034_v32 }
 0x905   :  { %5980 = vmatmul.bf16.gmra.mxu2 %v11642_v53  ;;  %7977 = vmatmul.msk.bf16.gmra.mxu3 %vm2617_vm0, %v14201_v35  ;;  %v8109_v30 = vor.u32 %v8566_v2, %v8106_v33  ;;  %v8578_v16 = vld [vmem:[#allocation7 + $0x144] sm:$0xf] }
 0x906   :  { %6091 = vmatpush.bf16.msra.mxu0 %v8045_v27  ;;  %v8562_v27 = vld [vmem:[#allocation7 + $0xc4] sm:$0xf] }
 0x907   :  { %6180 = vmatpush.bf16.msra.mxu1 %v8109_v30  ;;  %6269 = vmatpush.bf16.msra.mxu2 %v8173_v15  ;;  %v8093_v48 = vor.u32 %v8562_v27, %v8090_v8  ;;  %v8146_v27 = vld [vmem:[#allocation7 + $0x138] sm:$0xf0] }
 0x908   :  { %v5941_v29 = vpop.f32.mrf.mxu2  ;;  %v4777_v38 = vpop.f32.mrf.mxu3 }
 0x909   :  { %v11930_v3 = vadd.f32 %v5941_v29, %v5853_v21  ;;  %v5765_v9 = vpop.f32.mrf.mxu0  ;;  %v5854_v53 = vpop.f32.mrf.mxu1  ;;  %v11933_v35 = vadd.f32 %v4777_v38, %v11323_v14  ;;  %v8162_v29 = vld [vmem:[#allocation7 + $0x158] sm:$0xf0]  ;;  %v8101_v21 = vor.u32 %v8564_v22, %v8098_v25  ;;  %v8154_v14 = vld [vmem:[#allocation7 + $0x148] sm:$0xf0]  ;;  %v8560_v25 = vld [vmem:[#allocation7 + $0xb4] sm:$0xf] }
 0x90a   :  { %v5855_v44 = vadd.f32 %v5854_v53, %v5765_v9  ;;  %6092 = vmatpush.bf16.msra.mxu0 %v8037_v6  ;;  %v8546_v53 = vld [vmem:[#allocation7 + $0x44] sm:$0xf]  ;;  %v8026_v9 = vld [vmem:[#allocation7 + $0x48] sm:$0xf0]  ;;  %v8157_v32 = vor.u32 %v8578_v16, %v8154_v14  ;;  %v8018_v6 = vld [vmem:[#allocation7 + $0x38] sm:$0xf0] }
 0x90b   :  { %14202 = vst [vmem:[#allocation277_spill] sm:$0xff] %v11930_v3  ;;  %v8165_v3 = vor.u32 %v8580_v34, %v8162_v29  ;;  %6181 = vmatpush.bf16.msra.mxu1 %v8101_v21  ;;  %v8029_v2 = vor.u32 %v8546_v53, %v8026_v9  ;;  %v14205_v29 = vld [vmem:[#allocation96_spill] sm:$0xff]  ;;  %v14206_v21 = vld [vmem:[#allocation269_spill] sm:$0xff]  ;;  %v8082_v53 = vld [vmem:[#allocation7 + $0xb8] sm:$0xf0] }
 0x90c   :  { %14203 = vst [vmem:[#allocation108_spill] sm:$0xff] %v11933_v35  ;;  %v8576_v9 = vld [vmem:[#allocation7 + $0x134] sm:$0xf]  ;;  %v8085_v8 = vor.u32 %v8560_v25, %v8082_v53  ;;  %v14207_v16 = vld [vmem:[#allocation121_spill] sm:$0xff] }
 0x90d   :  { %6270 = vmatpush.bf16.msra.mxu2 %v8165_v3  ;;  %v8544_v3 = vld [vmem:[#allocation7 + $0x34] sm:$0xf] }
 0x90e   :  { %6093 = vmatpush.bf16.msra.mxu0 %v8029_v2  ;;  %v8597_v2 = vld [vmem:[#allocation7 + $0x1d4] sm:$0xf0] }
 0x90f   :  { %6182 = vmatpush.bf16.msra.mxu1 %v8093_v48  ;;  %v8558_v48 = vld [vmem:[#allocation7 + $0xa4] sm:$0xf] }
 0x910   :  { %v5943_v33 = vpop.f32.mrf.mxu2  ;;  %v4779_v22 = vpop.f32.mrf.mxu3 }
 0x911   :  { %v11935_v38 = vadd.f32 %v5943_v33, %v5855_v44  ;;  %v5768_v30 = vpop.f32.mrf.mxu0  ;;  %v5857_v15 = vpop.f32.mrf.mxu1  ;;  %v11938_v34 = vadd.f32 %v4779_v22, %v11334_v20  ;;  %6271 = vmatpush.bf16.msra.mxu2 %v8157_v32  ;;  %v8021_v44 = vor.u32 %v8544_v3, %v8018_v6  ;;  %v8224_v33 = vld [vmem:[#allocation7 + $0x1d0] sm:$0xf]  ;;  %v8149_v20 = vor.u32 %v8576_v9, %v8146_v27  ;;  %v8074_v3 = vld [vmem:[#allocation7 + $0xa8] sm:$0xf0]  ;;  %v8574_v6 = vld [vmem:[#allocation7 + $0x124] sm:$0xf] }
 0x912   :  { %v5858_v35 = vadd.f32 %v5857_v15, %v5768_v30  ;;  %v8225_v14 = vor.u32 %v8597_v2, %v8224_v33  ;;  %v8542_v30 = vld [vmem:[#allocation7 + $0x24] sm:$0xf]  ;;  %v8010_v15 = vld [vmem:[#allocation7 + $0x28] sm:$0xf0]  ;;  %v8077_v9 = vor.u32 %v8558_v48, %v8074_v3  ;;  %v8002_v2 = vld [vmem:[#allocation7 + $0x18] sm:$0xf0] }
 0x913   :  { %14204 = vst [vmem:[#allocation107_spill] sm:$0xff] %v11935_v38  ;;  %6094 = vmatpush.bf16.msra.mxu0 %v8021_v44  ;;  %6183 = vmatpush.bf16.msra.mxu1 %v8085_v8  ;;  %v8013_v22 = vor.u32 %v8542_v30, %v8010_v15  ;;  %v8138_v38 = vld [vmem:[#allocation7 + $0x128] sm:$0xf0]  ;;  %v8540_v44 = vld [vmem:[#allocation7 + $0x14] sm:$0xf] }
 0x914   :  { %5807 = vmatmul.bf16.gmra.mxu0 %v14205_v29  ;;  %5896 = vmatmul.bf16.gmra.mxu1 %v14206_v21  ;;  %v8141_v27 = vor.u32 %v8574_v6, %v8138_v38  ;;  %v8556_v8 = vld [vmem:[#allocation7 + $0x94] sm:$0xf]  ;;  %v8066_v30 = vld [vmem:[#allocation7 + $0x98] sm:$0xf0]  ;;  %v8538_v38 = vld [vmem:[#allocation7 + $0x4] sm:$0xf] }
 0x915   :  { %5985 = vmatmul.bf16.gmra.mxu2 %v11672_v42  ;;  %7978 = vmatmul.msk.bf16.gmra.mxu3 %vm2617_vm0, %v14207_v16  ;;  %v8572_v15 = vld [vmem:[#allocation7 + $0x114] sm:$0xf]  ;;  %v7994_v48 = vld [vmem:[#allocation7 + $0x8] sm:$0xf0] }
 0x916   :  { %6272 = vmatpush.bf16.msra.mxu2 %v8149_v20  ;;  %6003 = vmatpush.bf16.msra.mxu3 %v8225_v14  ;;  %v8005_v14 = vor.u32 %v8540_v44, %v8002_v2  ;;  %v7997_v6 = vor.u32 %v8538_v38, %v7994_v48 }
 0x917   :  { %6095 = vmatpush.bf16.msra.mxu0 %v8013_v22  ;;  %6184 = vmatpush.bf16.msra.mxu1 %v8077_v9  ;;  %v8554_v22 = vld [vmem:[#allocation7 + $0x84] sm:$0xf] }
 0x918   :  { %v5946_v32 = vpop.f32.mrf.mxu2  ;;  %v4782_v33 = vpop.f32.mrf.mxu3 }
 0x919   :  { %v11945_v42 = vadd.f32 %v5946_v32, %v5858_v35  ;;  %v5770_v25 = vpop.f32.mrf.mxu0  ;;  %v5859_v53 = vpop.f32.mrf.mxu1  ;;  %v11948_v20 = vadd.f32 %v4782_v33, %v11349_v24  ;;  %v8130_v35 = vld [vmem:[#allocation7 + $0x118] sm:$0xf0]  ;;  %v8069_v32 = vor.u32 %v8556_v8, %v8066_v30  ;;  %v8122_v24 = vld [vmem:[#allocation7 + $0x108] sm:$0xf0]  ;;  %v14211_v30 = vld [vmem:[#allocation272_spill] sm:$0xff] }
 0x91a   :  { %v5860_v16 = vadd.f32 %v5859_v53, %v5770_v25  ;;  %6273 = vmatpush.bf16.msra.mxu2 %v8141_v27  ;;  %v8058_v25 = vld [vmem:[#allocation7 + $0x88] sm:$0xf0]  ;;  %v8570_v53 = vld [vmem:[#allocation7 + $0x104] sm:$0xf] }
 0x91b   :  { %14208 = vst [vmem:[#allocation42_spill] sm:$0xff] %v11945_v42  ;;  %v8133_v42 = vor.u32 %v8572_v15, %v8130_v35  ;;  %6096 = vmatpush.bf16.msra.mxu0 %v8005_v14  ;;  %6185 = vmatpush.bf16.msra.mxu1 %v8069_v32  ;;  %v8061_v44 = vor.u32 %v8554_v22, %v8058_v25 }
 0x91c   :  { %v8125_v2 = vor.u32 %v8570_v53, %v8122_v24 }
 0x91e   :  { %6274 = vmatpush.bf16.msra.mxu2 %v8133_v42  ;;  %v14210_v42 = vld [vmem:[#allocation206_spill] sm:$0xff] }
 0x91f   :  { %6097 = vmatpush.bf16.msra.mxu0 %v7997_v6  ;;  %6186 = vmatpush.bf16.msra.mxu1 %v8061_v44 }
 0x920   :  { %v5948_v3 = vpop.f32.mrf.mxu2  ;;  %v4784_v8 = vpop.f32.mrf.mxu3 }
 0x921   :  { %v11950_v33 = vadd.f32 %v5948_v3, %v5860_v16  ;;  %v5773_v9 = vpop.f32.mrf.mxu0  ;;  %v5862_v27 = vpop.f32.mrf.mxu1  ;;  %v11953_v14 = vadd.f32 %v4784_v8, %v11360_v0  ;;  %v14212_v16 = vld [vmem:[#allocation128_spill] sm:$0xff] }
 0x922   :  { %v5863_v21 = vadd.f32 %v5862_v27, %v5773_v9  ;;  %6275 = vmatpush.bf16.msra.mxu2 %v8125_v2  ;;  %v14215_v27 = vld [vmem:[#allocation52_spill] sm:$0xff]  ;;  %v14216_v2 = vld [vmem:[#allocation114_spill] sm:$0xff] }
 0x923   :  { %14209 = vst [vmem:[#allocation177_spill] sm:$0xff] %v11950_v33  ;;  %v8216_v8 = vld [vmem:[#allocation7 + $0x1c0] sm:$0xf] }
 0x924   :  { %5812 = vmatmul.bf16.gmra.mxu0 %v14210_v42  ;;  %5901 = vmatmul.bf16.gmra.mxu1 %v14211_v30 }
 0x925   :  { %5990 = vmatmul.bf16.gmra.mxu2 %v11702_v26  ;;  %7979 = vmatmul.msk.bf16.gmra.mxu3 %vm2617_vm0, %v14212_v16  ;;  %v8595_v16 = vld [vmem:[#allocation7 + $0x1c4] sm:$0xf0] }
 0x928   :  { %v5951_v15 = vpop.f32.mrf.mxu2  ;;  %v4787_v22 = vpop.f32.mrf.mxu3 }
 0x929   :  { %v11960_v35 = vadd.f32 %v5951_v15, %v5863_v21  ;;  %v5775_v32 = vpop.f32.mrf.mxu0  ;;  %v5864_v38 = vpop.f32.mrf.mxu1  ;;  %v11963_v0 = vadd.f32 %v4787_v22, %v11375_v58  ;;  %v14217_v21 = vld [vmem:[#allocation241_spill] sm:$0xff]  ;;  %v14218_v58 = vld [vmem:[#allocation134_spill] sm:$0xff]  ;;  %v8217_v15 = vor.u32 %v8595_v16, %v8216_v8 }
 0x92a   :  { %v5865_v48 = vadd.f32 %v5864_v38, %v5775_v32 }
 0x92b   :  { %14213 = vst [vmem:[#allocation70_spill] sm:$0xff] %v11960_v35  ;;  %6004 = vmatpush.bf16.msra.mxu3 %v8217_v15 }
 0x930   :  { %v5953_v3 = vpop.f32.mrf.mxu2  ;;  %v4789_v9 = vpop.f32.mrf.mxu3 }
 0x931   :  { %v11965_v6 = vadd.f32 %v5953_v3, %v5865_v48  ;;  %v5778_v25 = vpop.f32.mrf.mxu0  ;;  %v5867_v53 = vpop.f32.mrf.mxu1  ;;  %v11968_v44 = vadd.f32 %v4789_v9, %v14215_v27 }
 0x932   :  { %v5868_v24 = vadd.f32 %v5867_v53, %v5778_v25  ;;  %v14219_v53 = vld [vmem:[#allocation77_spill] sm:$0xff] }
 0x933   :  { %14214 = vst [vmem:[#allocation16_spill] sm:$0xff] %v11965_v6 }
 0x934   :  { %5817 = vmatmul.bf16.gmra.mxu0 %v14216_v2  ;;  %5906 = vmatmul.bf16.gmra.mxu1 %v14217_v21 }
 0x935   :  { %5995 = vmatmul.bf16.gmra.mxu2 %v11724_v7  ;;  %7980 = vmatmul.msk.bf16.gmra.mxu3 %vm2617_vm0, %v14218_v58  ;;  %v14220_v58 = vld [vmem:[#allocation57_spill] sm:$0xff] }
 0x938   :  { %v5956_v32 = vpop.f32.mrf.mxu2  ;;  %v4792_v25 = vpop.f32.mrf.mxu3 }
 0x939   :  { %v11975_v38 = vadd.f32 %v5956_v32, %v5868_v24  ;;  %v5780_v48 = vpop.f32.mrf.mxu0  ;;  %v5869_v22 = vpop.f32.mrf.mxu1  ;;  %v11978_v9 = vadd.f32 %v4792_v25, %v14219_v53  ;;  %v14221_v24 = vld [vmem:[#allocation139_spill] sm:$0xff] }
 0x93a   :  { %v5870_v3 = vadd.f32 %v5869_v22, %v5780_v48 }
 0x940   :  { %v5958_v27 = vpop.f32.mrf.mxu2  ;;  %v4794_v21 = vpop.f32.mrf.mxu3 }
 0x941   :  { %v11980_v6 = vadd.f32 %v5958_v27, %v5870_v3  ;;  %v5783_v35 = vpop.f32.mrf.mxu0  ;;  %v5872_v33 = vpop.f32.mrf.mxu1  ;;  %v11983_v8 = vadd.f32 %v4794_v21, %v14220_v58  ;;  %v8593_v27 = vld [vmem:[#allocation7 + $0x1b4] sm:$0xf0]  ;;  %v14222_v58 = vld [vmem:[#allocation66_spill] sm:$0xff] }
 0x942   :  { %v5873_v7 = vadd.f32 %v5872_v33, %v5783_v35 }
 0x944   :  { %6098 = vmatmul.bf16.vlgmr.msra.gmra.mxu0 %v14073_v57  ;;  %6187 = vmatmul.bf16.vlgmr.msra.gmra.mxu1 %v14074_v36  ;;  %v4812_v57 = vadd.f32 %v11440_v12, %v11727_v37  ;;  %v14223_v12 = vld [vmem:[#allocation147_spill] sm:$0xff] }
 0x945   :  { %6276 = vmatmul.bf16.vlgmr.msra.gmra.mxu2 %v11301_v39  ;;  %7981 = vmatmul.msk.bf16.gmra.mxu3 %vm2617_vm0, %v14221_v24 }
 0x946   :  { %v4901_v24 = vadd.f32 %v14222_v58, %v4812_v57 }
 0x948   :  { %v5961_v16 = vpop.f32.mrf.mxu2  ;;  %v4797_v33 = vpop.f32.mrf.mxu3 }
 0x949   :  { %v11990_v15 = vadd.f32 %v5961_v16, %v5873_v7  ;;  %v5785_v32 = vpop.f32.mrf.mxu0  ;;  %v5874_v48 = vpop.f32.mrf.mxu1  ;;  %v11993_v35 = vadd.f32 %v4797_v33, %v11427_v17  ;;  %v8208_v17 = vld [vmem:[#allocation7 + $0x1b0] sm:$0xf] }
 0x94a   :  { %v5875_v22 = vadd.f32 %v5874_v48, %v5785_v32  ;;  %v8209_v37 = vor.u32 %v8593_v27, %v8208_v17  ;;  %v14224_v32 = vld [vmem:[#allocation75_spill] sm:$0xff]  ;;  %v4817_v17 = vadd.f32 %v11470_v43, %v11749_v63  ;;  %v14228_v43 = vld [vmem:[#allocation156_spill] sm:$0xff] }
 0x94c   :  { %6005 = vmatpush.bf16.msra.mxu3 %v8209_v37 }
 0x950   :  { %v5963_v21 = vpop.f32.mrf.mxu2  ;;  %v4799_v53 = vpop.f32.mrf.mxu3 }
 0x951   :  { %v11997_v36 = vadd.f32 %v5963_v21, %v5875_v22  ;;  %v5788_v39 = vpop.f32.mrf.mxu0  ;;  %v5877_v3 = vpop.f32.mrf.mxu1  ;;  %v12000_v7 = vadd.f32 %v4799_v53, %v11438_v50  ;;  %v4814_v50 = vadd.f32 %v14224_v32, %v11736_v4 }
 0x952   :  { %v5878_v25 = vadd.f32 %v5877_v3, %v5788_v39  ;;  %v14226_v3 = vld [vmem:[#allocation111_spill] sm:$0xff] }
 0x953   :  { %v4903_v57 = vadd.f32 %v14226_v3, %v4814_v50  ;;  %v14227_v50 = vld [vmem:[#allocation120_spill] sm:$0xff] }
 0x954   :  { %6103 = vmatmul.bf16.gmra.mxu0 %v14089_v49  ;;  %6192 = vmatmul.bf16.gmra.mxu1 %v14090_v61  ;;  %v14225_v61 = vld [vmem:[#allocation98_spill] sm:$0xff] }
 0x955   :  { %6281 = vmatmul.bf16.gmra.mxu2 %v11328_v60  ;;  %7982 = vmatmul.msk.bf16.gmra.mxu3 %vm2617_vm0, %v14223_v12  ;;  %v4990_v33 = vadd.f32 %v14225_v61, %v4901_v24  ;;  %v4992_v4 = vadd.f32 %v11467_v54, %v4903_v57  ;;  %v14229_v54 = vld [vmem:[#allocation127_spill] sm:$0xff]  ;;  %v14231_v57 = vld [vmem:[#allocation105_spill] sm:$0xff] }
 0x956   :  { %v4819_v61 = vadd.f32 %v14229_v54, %v11758_v23  ;;  %v14232_v23 = vld [vmem:[#allocation163_spill] sm:$0xff]  ;;  %v14234_v54 = vld [vmem:[#allocation168_spill] sm:$0xff] }
 0x958   :  { %v5966_v16 = vpop.f32.mrf.mxu2  ;;  %v5078_v21 = vpop.f32.mrf.mxu3 }
 0x959   :  { %v12010_v48 = vadd.f32 %v5966_v16, %v5878_v25  ;;  %v5790_v49 = vpop.f32.mrf.mxu0  ;;  %v5879_v22 = vpop.f32.mrf.mxu1  ;;  %v5079_v39 = vadd.f32 %v5078_v21, %v4990_v33 }
 0x95a   :  { %v5880_v60 = vadd.f32 %v5879_v22, %v5790_v49  ;;  %v4906_v49 = vadd.f32 %v14227_v50, %v4817_v17 }
 0x95b   :  { %v5161_v24 = vmax.f32 %v5079_v39, 0.0 }
 0x960   :  { %v5968_v53 = vpop.f32.mrf.mxu2  ;;  %v5080_v37 = vpop.f32.mrf.mxu3 }
 0x961   :  { %v12016_v27 = vadd.f32 %v5968_v53, %v5880_v60  ;;  %v5793_v58 = vpop.f32.mrf.mxu0  ;;  %v5882_v12 = vpop.f32.mrf.mxu1  ;;  %v5081_v16 = vadd.f32 %v5080_v37, %v4992_v4  ;;  %v4908_v53 = vadd.f32 %v14231_v57, %v4819_v61 }
 0x962   :  { %v5883_v25 = vadd.f32 %v5882_v12, %v5793_v58  ;;  %v4822_v58 = vadd.f32 %v11500_v41, %v11771_v51  ;;  %v14233_v41 = vld [vmem:[#allocation76_spill] sm:$0xff] }
 0x963   :  { %v5165_v32 = vmax.f32 %v5081_v16, 0.0 }
 0x964   :  { %6108 = vmatmul.bf16.gmra.mxu0 %v14101_v46  ;;  %6197 = vmatmul.bf16.gmra.mxu1 %v14102_v62  ;;  %v14230_v62 = vld [vmem:[#allocation95_spill] sm:$0xff]  ;;  %v4911_v51 = vadd.f32 %v14233_v41, %v4822_v58 }
 0x965   :  { %6286 = vmatmul.bf16.gmra.mxu2 %v11354_v1  ;;  %7983 = vmatmul.msk.bf16.gmra.mxu3 %vm2617_vm0, %v14228_v43  ;;  %v12025_v63 = vpack.c.bf16 %v5165_v32, %v5161_v24  ;;  %v4995_v21 = vadd.f32 %v14230_v62, %v4906_v49  ;;  %v8200_v43 = vld [vmem:[#allocation7 + $0x1a0] sm:$0xf] }
 0x968   :  { %v5971_v22 = vpop.f32.mrf.mxu2  ;;  %v5083_v39 = vpop.f32.mrf.mxu3 }
 0x969   :  { %v12029_v33 = vadd.f32 %v5971_v22, %v5883_v25  ;;  %v5795_v46 = vpop.f32.mrf.mxu0  ;;  %v5884_v60 = vpop.f32.mrf.mxu1  ;;  %v5084_v3 = vadd.f32 %v5083_v39, %v4995_v21  ;;  %v4997_v25 = vadd.f32 %v14232_v23, %v4908_v53  ;;  %v8591_v22 = vld [vmem:[#allocation7 + $0x1a4] sm:$0xf0] }
 0x96a   :  { %v5885_v1 = vadd.f32 %v5884_v60, %v5795_v46  ;;  %v8201_v61 = vor.u32 %v8591_v22, %v8200_v43 }
 0x96b   :  { %v5169_v50 = vmax.f32 %v5084_v3, 0.0 }
 0x96c   :  { %6006 = vmatpush.bf16.msra.mxu3 %v8201_v61 }
 0x970   :  { %v5973_v17 = vpop.f32.mrf.mxu2  ;;  %v5085_v24 = vpop.f32.mrf.mxu3 }
 0x971   :  { %v12035_v12 = vadd.f32 %v5973_v17, %v5885_v1  ;;  %v5798_v4 = vpop.f32.mrf.mxu0  ;;  %v5887_v37 = vpop.f32.mrf.mxu1  ;;  %v5086_v32 = vadd.f32 %v5085_v24, %v4997_v25  ;;  %v14236_v1 = vld [vmem:[#allocation138_spill] sm:$0xff]  ;;  %v14237_v17 = vld [vmem:[#allocation175_spill] sm:$0xff] }
 0x972   :  { %v5888_v16 = vadd.f32 %v5887_v37, %v5798_v4  ;;  %v5000_v39 = vadd.f32 %v14236_v1, %v4911_v51  ;;  %v14238_v37 = vld [vmem:[#allocation146_spill] sm:$0xff]  ;;  %v14240_v51 = vld [vmem:[#allocation232_spill] sm:$0xff] }
 0x973   :  { %v5173_v49 = vmax.f32 %v5086_v32, 0.0  ;;  %v4827_v23 = vadd.f32 %v14238_v37, %v11793_v56  ;;  %v14241_v56 = vld [vmem:[#allocation180_spill] sm:$0xff] }
 0x974   :  { %6113 = vmatmul.bf16.gmra.mxu0 %v14112_v59  ;;  %6202 = vmatmul.bf16.gmra.mxu1 %v14113_v47  ;;  %v14235_v59 = vld [vmem:[#allocation228_spill] sm:$0xff] }
 0x975   :  { %6291 = vmatmul.bf16.gmra.mxu2 %v11380_v28  ;;  %7984 = vmatmul.msk.bf16.gmra.mxu3 %vm2617_vm0, %v14234_v54  ;;  %v12044_v46 = vpack.c.bf16 %v5173_v49, %v5169_v50  ;;  %v4824_v62 = vadd.f32 %v14235_v59, %v11780_v5  ;;  %v14239_v5 = vld [vmem:[#allocation230_spill] sm:$0xff]  ;;  %v4916_v54 = vadd.f32 %v14240_v51, %v4827_v23 }
 0x976   :  { %v14242_v59 = vld [vmem:[#allocation154_spill] sm:$0xff] }
 0x977   :  { %v4913_v58 = vadd.f32 %v14237_v17, %v4824_v62  ;;  %v4829_v62 = vadd.f32 %v14242_v59, %v11802_v10  ;;  %v14246_v10 = vld [vmem:[#allocation80_spill] sm:$0xff]  ;;  %v14251_v59 = vld [vmem:[#allocation193_spill] sm:$0xff] }
 0x978   :  { %v5976_v60 = vpop.f32.mrf.mxu2  ;;  %v5088_v57 = vpop.f32.mrf.mxu3 }
 0x979   :  { %v12048_v47 = vadd.f32 %v5976_v60, %v5888_v16  ;;  %v5800_v28 = vpop.f32.mrf.mxu0  ;;  %v5889_v21 = vpop.f32.mrf.mxu1  ;;  %v5089_v53 = vadd.f32 %v5088_v57, %v5000_v39  ;;  %v5002_v16 = vadd.f32 %v14239_v5, %v4913_v58  ;;  %v14244_v57 = vld [vmem:[#allocation79_spill] sm:$0xff]  ;;  %v14245_v58 = vld [vmem:[#allocation246_spill] sm:$0xff] }
 0x97a   :  { %v5890_v3 = vadd.f32 %v5889_v21, %v5800_v28 }
 0x97b   :  { %v5177_v22 = vmax.f32 %v5089_v53, 0.0  ;;  %v4918_v53 = vadd.f32 %v14244_v57, %v4829_v62 }
 0x980   :  { %v5978_v4 = vpop.f32.mrf.mxu2  ;;  %v5090_v49 = vpop.f32.mrf.mxu3 }
 0x981   :  { %v12054_v25 = vadd.f32 %v5978_v4, %v5890_v3  ;;  %v5803_v24 = vpop.f32.mrf.mxu0  ;;  %v5892_v32 = vpop.f32.mrf.mxu1  ;;  %v5091_v43 = vadd.f32 %v5090_v49, %v5002_v16  ;;  %v4832_v4 = vadd.f32 %v14245_v58, %v11815_v45  ;;  %v14247_v49 = vld [vmem:[#allocation169_spill] sm:$0xff] }
 0x982   :  { %v5893_v50 = vadd.f32 %v5892_v32, %v5803_v24  ;;  %v5007_v32 = vadd.f32 %v14246_v10, %v4918_v53  ;;  %v14250_v45 = vld [vmem:[#allocation185_spill] sm:$0xff]  ;;  %v14254_v53 = vld [vmem:[#allocation200_spill] sm:$0xff] }
 0x983   :  { %v5181_v41 = vmax.f32 %v5091_v43, 0.0  ;;  %v14248_v43 = vld [vmem:[#allocation243_spill] sm:$0xff] }
 0x984   :  { %6118 = vmatmul.bf16.gmra.mxu0 %v14123_v11  ;;  %6207 = vmatmul.bf16.gmra.mxu1 %v14124_v31  ;;  %v14243_v31 = vld [vmem:[#allocation234_spill] sm:$0xff] }
 0x985   :  { %6296 = vmatmul.bf16.gmra.mxu2 %v11406_v55  ;;  %7985 = vmatmul.msk.bf16.gmra.mxu3 %vm2617_vm0, %v14241_v56  ;;  %v12063_v61 = vpack.c.bf16 %v5181_v41, %v5177_v22  ;;  %v5005_v1 = vadd.f32 %v14243_v31, %v4916_v54  ;;  %v14249_v22 = vld [vmem:[#allocation87_spill] sm:$0xff]  ;;  %v8192_v54 = vld [vmem:[#allocation7 + $0x190] sm:$0xf] }
 0x986   :  { %v8589_v56 = vld [vmem:[#allocation7 + $0x194] sm:$0xf0] }
 0x987   :  { %v8193_v62 = vor.u32 %v8589_v56, %v8192_v54  ;;  %v14252_v31 = vld [vmem:[#allocation275_spill] sm:$0xff] }
 0x988   :  { %v5981_v60 = vpop.f32.mrf.mxu2  ;;  %v5093_v39 = vpop.f32.mrf.mxu3 }
 0x989   :  { %v12067_v28 = vadd.f32 %v5981_v60, %v5893_v50  ;;  %v5805_v11 = vpop.f32.mrf.mxu0  ;;  %v5894_v21 = vpop.f32.mrf.mxu1  ;;  %v5094_v3 = vadd.f32 %v5093_v39, %v5005_v1  ;;  %v4921_v60 = vadd.f32 %v14250_v45, %v4832_v4  ;;  %6007 = vmatpush.bf16.msra.mxu3 %v8193_v62  ;;  %v14253_v1 = vld [vmem:[#allocation110_spill] sm:$0xff]  ;;  %v14261_v62 = vld [vmem:[#allocation85_spill] sm:$0xff] }
 0x98a   :  { %v5895_v55 = vadd.f32 %v5894_v21, %v5805_v11 }
 0x98b   :  { %v5185_v41 = vmax.f32 %v5094_v3, 0.0 }
 0x990   :  { %v5983_v17 = vpop.f32.mrf.mxu2  ;;  %v5095_v16 = vpop.f32.mrf.mxu3 }
 0x991   :  { %v12073_v37 = vadd.f32 %v5983_v17, %v5895_v55  ;;  %v5808_v23 = vpop.f32.mrf.mxu0  ;;  %v5897_v24 = vpop.f32.mrf.mxu1  ;;  %v5096_v50 = vadd.f32 %v5095_v16, %v5007_v32  ;;  %v4834_v55 = vadd.f32 %v14253_v1, %v14252_v31  ;;  %v5010_v17 = vadd.f32 %v14254_v53, %v4921_v60  ;;  %v14256_v16 = vld [vmem:[#allocation235_spill] sm:$0xff]  ;;  %v14260_v60 = vld [vmem:[#allocation182_spill] sm:$0xff] }
 0x992   :  { %v5898_v5 = vadd.f32 %v5897_v24, %v5808_v23  ;;  %v14255_v24 = vld [vmem:[#allocation238_spill] sm:$0xff]  ;;  %v14262_v1 = vld [vmem:[#allocation183_spill] sm:$0xff] }
 0x993   :  { %v5189_v51 = vmax.f32 %v5096_v50, 0.0  ;;  %v4923_v10 = vadd.f32 %v14255_v24, %v4834_v55  ;;  %v14257_v50 = vld [vmem:[#allocation247_spill] sm:$0xff] }
 0x994   :  { %6123 = vmatmul.bf16.gmra.mxu0 %v14247_v49  ;;  %6212 = vmatmul.bf16.gmra.mxu1 %v14248_v43  ;;  %v4837_v49 = vadd.f32 %v14257_v50, %v14256_v16  ;;  %v14266_v16 = vld [vmem:[#allocation97_spill] sm:$0xff] }
 0x995   :  { %6301 = vmatmul.bf16.gmra.mxu2 %v14249_v22  ;;  %7986 = vmatmul.msk.bf16.gmra.mxu3 %vm2617_vm0, %v14251_v59  ;;  %v12082_v11 = vpack.c.bf16 %v5189_v51, %v5185_v41  ;;  %v14258_v51 = vld [vmem:[#allocation167_spill] sm:$0xff]  ;;  %v14259_v59 = vld [vmem:[#allocation174_spill] sm:$0xff] }
 0x996   :  { %v4926_v55 = vadd.f32 %v14262_v1, %v4837_v49 }
 0x998   :  { %v5986_v21 = vpop.f32.mrf.mxu2  ;;  %v5098_v23 = vpop.f32.mrf.mxu3  ;;  %v5015_v50 = vadd.f32 %v14266_v16, %v4926_v55  ;;  %v14273_v55 = vld [vmem:[#allocation164_spill] sm:$0xff]  ;;  %v8587_v16 = vld [vmem:[#allocation7 + $0x184] sm:$0xf0] }
 0x999   :  { %v12086_v39 = vadd.f32 %v5986_v21, %v5898_v5  ;;  %v5810_v57 = vpop.f32.mrf.mxu0  ;;  %v5899_v3 = vpop.f32.mrf.mxu1  ;;  %v5099_v4 = vadd.f32 %v5098_v23, %v5010_v17  ;;  %v5012_v5 = vadd.f32 %v14258_v51, %v4923_v10  ;;  %v14264_v17 = vld [vmem:[#allocation35_spill] sm:$0xff]  ;;  %v14267_v51 = vld [vmem:[#allocation61_spill] sm:$0xff] }
 0x99a   :  { %v5900_v58 = vadd.f32 %v5899_v3, %v5810_v57  ;;  %v14263_v57 = vld [vmem:[#allocation204_spill] sm:$0xff] }
 0x99b   :  { %v5193_v21 = vmax.f32 %v5099_v4, 0.0 }
 0x9a0   :  { %v5988_v32 = vpop.f32.mrf.mxu2  ;;  %v5100_v56 = vpop.f32.mrf.mxu3 }
 0x9a1   :  { %v12092_v43 = vadd.f32 %v5988_v32, %v5900_v58  ;;  %v5813_v22 = vpop.f32.mrf.mxu0  ;;  %v5902_v41 = vpop.f32.mrf.mxu1  ;;  %v5101_v45 = vadd.f32 %v5100_v56, %v5012_v5  ;;  %v14265_v58 = vld [vmem:[#allocation250_spill] sm:$0xff] }
 0x9a2   :  { %v5903_v54 = vadd.f32 %v5902_v41, %v5813_v22  ;;  %v4839_v23 = vadd.f32 %v14265_v58, %v14264_v17  ;;  %v14268_v56 = vld [vmem:[#allocation102_spill] sm:$0xff]  ;;  %v14272_v17 = vld [vmem:[#allocation172_spill] sm:$0xff]  ;;  %v14274_v58 = vld [vmem:[#allocation133_spill] sm:$0xff] }
 0x9a3   :  { %v5197_v31 = vmax.f32 %v5101_v45, 0.0  ;;  %v14269_v45 = vld [vmem:[#allocation245_spill] sm:$0xff] }
 0x9a4   :  { %6128 = vmatmul.bf16.gmra.mxu0 %v14259_v59  ;;  %6217 = vmatmul.bf16.gmra.mxu1 %v14260_v60  ;;  %v4928_v49 = vadd.f32 %v14267_v51, %v4839_v23  ;;  %v4842_v59 = vadd.f32 %v14269_v45, %v14268_v56  ;;  %v14277_v56 = vld [vmem:[#allocation222_spill] sm:$0xff]  ;;  %v14278_v45 = vld [vmem:[#allocation188_spill] sm:$0xff] }
 0x9a5   :  { %6306 = vmatmul.bf16.gmra.mxu2 %v14261_v62  ;;  %7987 = vmatmul.msk.bf16.gmra.mxu3 %vm2617_vm0, %v14263_v57  ;;  %v12101_v3 = vpack.c.bf16 %v5197_v31, %v5193_v21  ;;  %v14271_v31 = vld [vmem:[#allocation119_spill] sm:$0xff] }
 0x9a8   :  { %v5991_v53 = vpop.f32.mrf.mxu2  ;;  %v5103_v4 = vpop.f32.mrf.mxu3 }
 0x9a9   :  { %v12105_v24 = vadd.f32 %v5991_v53, %v5903_v54  ;;  %v5815_v10 = vpop.f32.mrf.mxu0  ;;  %v5904_v32 = vpop.f32.mrf.mxu1  ;;  %v5104_v41 = vadd.f32 %v5103_v4, %v5015_v50  ;;  %v5017_v54 = vadd.f32 %v14271_v31, %v4928_v49  ;;  %v14275_v50 = vld [vmem:[#allocation82_spill] sm:$0xff]  ;;  %v14276_v4 = vld [vmem:[#allocation213_spill] sm:$0xff] }
 0x9aa   :  { %v5905_v22 = vadd.f32 %v5904_v32, %v5815_v10  ;;  %v8184_v32 = vld [vmem:[#allocation7 + $0x180] sm:$0xf] }
 0x9ab   :  { %v5201_v23 = vmax.f32 %v5104_v41, 0.0  ;;  %v8185_v51 = vor.u32 %v8587_v16, %v8184_v32  ;;  %v14282_v32 = vld [vmem:[#allocation210_spill] sm:$0xff] }
 0x9ad   :  { %6008 = vmatpush.bf16.msra.mxu3 %v8185_v51 }
 0x9b0   :  { %v5993_v5 = vpop.f32.mrf.mxu2  ;;  %v5105_v57 = vpop.f32.mrf.mxu3 }
 0x9b1   :  { %v12111_v60 = vadd.f32 %v5993_v5, %v5905_v22  ;;  %v5818_v62 = vpop.f32.mrf.mxu0  ;;  %v5907_v21 = vpop.f32.mrf.mxu1  ;;  %v5106_v53 = vadd.f32 %v5105_v57, %v5017_v54  ;;  %v4931_v22 = vadd.f32 %v14275_v50, %v4842_v59  ;;  %v14280_v54 = vld [vmem:[#allocation178_spill] sm:$0xff] }
 0x9b2   :  { %v5908_v1 = vadd.f32 %v5907_v21, %v5818_v62  ;;  %v4844_v62 = vadd.f32 %v14278_v45, %v14277_v56  ;;  %v14285_v56 = vld [vmem:[#allocation254_spill] sm:$0xff] }
 0x9b3   :  { %14270 = vst [vmem:[#allocation109_spill] sm:$0xff] %v12111_v60  ;;  %v5205_v10 = vmax.f32 %v5106_v53, 0.0  ;;  %v5020_v57 = vadd.f32 %v14280_v54, %v4931_v22  ;;  %v14286_v60 = vld [vmem:[#allocation179_spill] sm:$0xff]  ;;  %v14289_v54 = vld [vmem:[#allocation214_spill] sm:$0xff] }
 0x9b4   :  { %6133 = vmatmul.bf16.gmra.mxu0 %v14272_v17  ;;  %6222 = vmatmul.bf16.gmra.mxu1 %v14273_v55  ;;  %v14281_v55 = vld [vmem:[#allocation249_spill] sm:$0xff]  ;;  %v14287_v22 = vld [vmem:[#allocation251_spill] sm:$0xff] }
 0x9b5   :  { %6311 = vmatmul.bf16.gmra.mxu2 %v14274_v58  ;;  %7988 = vmatmul.msk.bf16.gmra.mxu3 %vm2617_vm0, %v14276_v4  ;;  %v12120_v49 = vpack.c.bf16 %v5205_v10, %v5201_v23  ;;  %v4933_v58 = vadd.f32 %v14281_v55, %v4844_v62  ;;  %v14283_v23 = vld [vmem:[#allocation89_spill] sm:$0xff] }
 0x9b6   :  { %v4847_v10 = vadd.f32 %v14283_v23, %v14282_v32 }
 0x9b8   :  { %v5996_v5 = vpop.f32.mrf.mxu2  ;;  %v5108_v17 = vpop.f32.mrf.mxu3 }
 0x9b9   :  { %v12124_v21 = vadd.f32 %v5996_v5, %v5908_v1  ;;  %v5820_v31 = vpop.f32.mrf.mxu0  ;;  %v5909_v41 = vpop.f32.mrf.mxu1  ;;  %v5109_v59 = vadd.f32 %v5108_v17, %v5020_v57  ;;  %v5022_v1 = vadd.f32 %v14285_v56, %v4933_v58  ;;  %v4936_v57 = vadd.f32 %v14289_v54, %v4847_v10  ;;  %v14290_v17 = vld [vmem:[#allocation219_spill] sm:$0xff]  ;;  %v14291_v58 = vld [vmem:[#allocation41_spill] sm:$0xff] }
 0x9ba   :  { %v5910_v53 = vadd.f32 %v5909_v41, %v5820_v31  ;;  %v14288_v31 = vld [vmem:[#allocation86_spill] sm:$0xff] }
 0x9bb   :  { %14279 = vst [vmem:[#allocation24_spill] sm:$0xff] %v12124_v21  ;;  %v5209_v62 = vmax.f32 %v5109_v59, 0.0 }
 0x9c0   :  { %v5998_v50 = vpop.f32.mrf.mxu2  ;;  %v5110_v45 = vpop.f32.mrf.mxu3 }
 0x9c1   :  { %v12130_v16 = vadd.f32 %v5998_v50, %v5910_v53  ;;  %v6099_v4 = vpop.f32.mrf.mxu0  ;;  %v6188_v51 = vpop.f32.mrf.mxu1  ;;  %v5111_v21 = vadd.f32 %v5110_v45, %v5022_v1  ;;  %v14292_v50 = vld [vmem:[#allocation253_spill] sm:$0xff] }
 0x9c2   :  { %v6189_v5 = vadd.f32 %v6188_v51, %v6099_v4  ;;  %v4849_v32 = vadd.f32 %v14292_v50, %v14291_v58  ;;  %v14294_v51 = vld [vmem:[#allocation126_spill] sm:$0xff]  ;;  %v14295_v45 = vld [vmem:[#allocation189_spill] sm:$0xff]  ;;  %v14297_v58 = vld [vmem:[#allocation255_spill] sm:$0xff] }
 0x9c3   :  { %14284 = vst [vmem:[#allocation116_spill] sm:$0xff] %v12130_v16  ;;  %v5213_v41 = vmax.f32 %v5111_v21, 0.0  ;;  %v5025_v56 = vadd.f32 %v14294_v51, %v4936_v57  ;;  %v14298_v16 = vld [vmem:[#allocation72_spill] sm:$0xff]  ;;  %v8600_v51 = vld [vmem:[#allocation7 + $0x1f4] sm:$0xf] }
 0x9c4   :  { %6138 = vmatmul.bf16.gmra.mxu0 %v14286_v60  ;;  %6227 = vmatmul.bf16.gmra.mxu1 %v14287_v22  ;;  %v4938_v10 = vadd.f32 %v14295_v45, %v4849_v32  ;;  %v14299_v57 = vld [vmem:[#allocation64_spill] sm:$0xff] }
 0x9c5   :  { %6316 = vmatmul.bf16.gmra.mxu2 %v14288_v31  ;;  %7989 = vmatmul.msk.bf16.gmra.mxu3 %vm2617_vm0, %v14290_v17  ;;  %v12139_v53 = vpack.c.bf16 %v5213_v41, %v5209_v62  ;;  %v14296_v31 = vld [vmem:[#allocation190_spill] sm:$0xff] }
 0x9c6   :  { %v4852_v62 = vadd.f32 %v14296_v31, %v11888_v40  ;;  %v14301_v40 = vld [vmem:[#allocation257_spill] sm:$0xff] }
 0x9c8   :  { %v6277_v55 = vpop.f32.mrf.mxu2  ;;  %v5113_v59 = vpop.f32.mrf.mxu3 }
 0x9c9   :  { %v12143_v23 = vadd.f32 %v6277_v55, %v6189_v5  ;;  %v6101_v60 = vpop.f32.mrf.mxu0  ;;  %v6190_v4 = vpop.f32.mrf.mxu1  ;;  %v5114_v21 = vadd.f32 %v5113_v59, %v5025_v56  ;;  %v5027_v5 = vadd.f32 %v14297_v58, %v4938_v10  ;;  %v8242_v56 = vld [vmem:[#allocation7 + $0x1f8] sm:$0xf0] }
 0x9ca   :  { %v6191_v1 = vadd.f32 %v6190_v4, %v6101_v60  ;;  %v14300_v60 = vld [vmem:[#allocation236_spill] sm:$0xff]  ;;  %v8245_v59 = vor.u32 %v8600_v51, %v8242_v56 }
 0x9cb   :  { %14293 = vst [vmem:[#allocation244_spill] sm:$0xff] %v12143_v23  ;;  %v5217_v32 = vmax.f32 %v5114_v21, 0.0  ;;  %v14303_v21 = vld [vmem:[#allocation258_spill] sm:$0xff] }
 0x9cc   :  { %6357 = vmatpush.bf16.msrb.mxu3 %v8245_v59 }
 0x9d0   :  { %v6279_v22 = vpop.f32.mrf.mxu2  ;;  %v5115_v50 = vpop.f32.mrf.mxu3 }
 0x9d1   :  { %v12149_v41 = vadd.f32 %v6279_v22, %v6191_v1  ;;  %v6104_v54 = vpop.f32.mrf.mxu0  ;;  %v6193_v17 = vpop.f32.mrf.mxu1  ;;  %v5116_v23 = vadd.f32 %v5115_v50, %v5027_v5  ;;  %v4941_v1 = vadd.f32 %v14301_v40, %v4852_v62  ;;  %v14302_v22 = vld [vmem:[#allocation220_spill] sm:$0xff] }
 0x9d2   :  { %v6194_v55 = vadd.f32 %v6193_v17, %v6104_v54  ;;  %v14304_v62 = vld [vmem:[#allocation132_spill] sm:$0xff] }
 0x9d3   :  { %v5221_v4 = vmax.f32 %v5116_v23, 0.0  ;;  %v5030_v23 = vadd.f32 %v14303_v21, %v4941_v1  ;;  %v14308_v1 = vld [vmem:[#allocation184_spill] sm:$0xff] }
 0x9d4   :  { %6143 = vmatmul.bf16.gmra.mxu0 %v14298_v16  ;;  %6232 = vmatmul.bf16.gmra.mxu1 %v14299_v57  ;;  %v4854_v16 = vadd.f32 %v14302_v22, %v11893_v19  ;;  %v14307_v19 = vld [vmem:[#allocation261_spill] sm:$0xff] }
 0x9d5   :  { %6321 = vmatmul.bf16.gmra.mxu2 %v14300_v60  ;;  %6009 = vmatmul.bf16.vlgmr.msra.gmra.mxu3 %v12025_v63  ;;  %v12157_v45 = vpack.c.bf16 %v5221_v4, %v5217_v32  ;;  %v14305_v32 = vld [vmem:[#allocation38_spill] sm:$0xff] }
 0x9d6   :  { %v4943_v57 = vadd.f32 %v14304_v62, %v4854_v16  ;;  %v4857_v4 = vadd.f32 %v14305_v32, %v11903_v13  ;;  %v14313_v32 = vld [vmem:[#allocation203_spill] sm:$0xff] }
 0x9d8   :  { %v6282_v10 = vpop.f32.mrf.mxu2  ;;  %v5118_v5 = vpop.f32.mrf.mxu3 }
 0x9d9   :  { %v12161_v31 = vadd.f32 %v6282_v10, %v6194_v55  ;;  %v6106_v54 = vpop.f32.mrf.mxu0  ;;  %v6195_v17 = vpop.f32.mrf.mxu1  ;;  %v5119_v50 = vadd.f32 %v5118_v5, %v5030_v23  ;;  %v5032_v55 = vadd.f32 %v14307_v19, %v4943_v57  ;;  %v14311_v5 = vld [vmem:[#allocation90_spill] sm:$0xff] }
 0x9da   :  { %v6196_v58 = vadd.f32 %v6195_v17, %v6106_v54  ;;  %v14309_v17 = vld [vmem:[#allocation227_spill] sm:$0xff]  ;;  %v14314_v19 = vld [vmem:[#allocation94_spill] sm:$0xff] }
 0x9db   :  { %v5225_v16 = vmax.f32 %v5119_v50, 0.0  ;;  %v4946_v21 = vadd.f32 %v14309_v17, %v4857_v4 }
 0x9e0   :  { %v6284_v60 = vpop.f32.mrf.mxu2  ;;  %v5120_v10 = vpop.f32.mrf.mxu3 }
 0x9e1   :  { %v12167_v51 = vadd.f32 %v6284_v60, %v6196_v58  ;;  %v6109_v56 = vpop.f32.mrf.mxu0  ;;  %v6198_v40 = vpop.f32.mrf.mxu1  ;;  %v5121_v22 = vadd.f32 %v5120_v10, %v5032_v55  ;;  %v14310_v58 = vld [vmem:[#allocation21_spill] sm:$0xff]  ;;  %v14315_v10 = vld [vmem:[#allocation276_spill] sm:$0xff] }
 0x9e2   :  { %v6199_v59 = vadd.f32 %v6198_v40, %v6109_v56  ;;  %v4859_v62 = vadd.f32 %v14311_v5, %v14310_v58  ;;  %v14318_v58 = vld [vmem:[#allocation216_spill] sm:$0xff] }
 0x9e3   :  { %14306 = vst [vmem:[#allocation74_spill] sm:$0xff] %v12167_v51  ;;  %v5229_v54 = vmax.f32 %v5121_v22, 0.0  ;;  %v14316_v22 = vld [vmem:[#allocation195_spill] sm:$0xff] }
 0x9e4   :  { %6148 = vmatmul.bf16.gmra.mxu0 %v14186_v52  ;;  %6237 = vmatmul.bf16.gmra.mxu1 %v14187_v18  ;;  %v5035_v18 = vadd.f32 %v14313_v32, %v4946_v21  ;;  %v4948_v55 = vadd.f32 %v14314_v19, %v4859_v62  ;;  %v14319_v51 = vld [vmem:[#allocation83_spill] sm:$0xff]  ;;  %v14320_v21 = vld [vmem:[#allocation229_spill] sm:$0xff]  ;;  %v8598_v32 = vld [vmem:[#allocation7 + $0x1e4] sm:$0xf] }
 0x9e5   :  { %6326 = vmatmul.bf16.gmra.mxu2 %v14308_v1  ;;  %6014 = vmatmul.bf16.gmra.mxu3 %v12044_v46  ;;  %v12175_v13 = vpack.c.bf16 %v5229_v54, %v5225_v16  ;;  %v4862_v1 = vadd.f32 %v14316_v22, %v14315_v10  ;;  %v14323_v10 = vld [vmem:[#allocation60_spill] sm:$0xff]  ;;  %v14324_v22 = vld [vmem:[#allocation65_spill] sm:$0xff] }
 0x9e8   :  { %v6287_v23 = vpop.f32.mrf.mxu2  ;;  %v5123_v40 = vpop.f32.mrf.mxu3 }
 0x9e9   :  { %v12179_v57 = vadd.f32 %v6287_v23, %v6199_v59  ;;  %v6111_v60 = vpop.f32.mrf.mxu0  ;;  %v6200_v52 = vpop.f32.mrf.mxu1  ;;  %v5124_v50 = vadd.f32 %v5123_v40, %v5035_v18  ;;  %v5037_v59 = vadd.f32 %v14318_v58, %v4948_v55  ;;  %v8234_v18 = vld [vmem:[#allocation7 + $0x1e8] sm:$0xf0]  ;;  %v14322_v40 = vld [vmem:[#allocation194_spill] sm:$0xff] }
 0x9ea   :  { %v6201_v56 = vadd.f32 %v6200_v52, %v6111_v60  ;;  %v14321_v60 = vld [vmem:[#allocation208_spill] sm:$0xff]  ;;  %v8237_v19 = vor.u32 %v8598_v32, %v8234_v18 }
 0x9eb   :  { %14312 = vst [vmem:[#allocation282_spill] sm:$0xff] %v12179_v57  ;;  %v5233_v62 = vmax.f32 %v5124_v50, 0.0  ;;  %v14326_v50 = vld [vmem:[#allocation198_spill] sm:$0xff]  ;;  %v14328_v32 = vld [vmem:[#allocation108_spill] sm:$0xff] }
 0x9ec   :  { %6358 = vmatpush.bf16.msrb.mxu3 %v8237_v19 }
 0x9f0   :  { %v6289_v4 = vpop.f32.mrf.mxu2  ;;  %v5125_v5 = vpop.f32.mrf.mxu3 }
 0x9f1   :  { %v12185_v16 = vadd.f32 %v6289_v4, %v6201_v56  ;;  %v6114_v54 = vpop.f32.mrf.mxu0  ;;  %v6203_v17 = vpop.f32.mrf.mxu1  ;;  %v5126_v57 = vadd.f32 %v5125_v5, %v5037_v59  ;;  %v4951_v56 = vadd.f32 %v14322_v40, %v4862_v1  ;;  %v14327_v1 = vld [vmem:[#allocation223_spill] sm:$0xff] }
 0x9f2   :  { %v6204_v23 = vadd.f32 %v6203_v17, %v6114_v54 }
 0x9f3   :  { %14317 = vst [vmem:[#allocation280_spill] sm:$0xff] %v12185_v16  ;;  %v5237_v52 = vmax.f32 %v5126_v57, 0.0  ;;  %v5040_v57 = vadd.f32 %v14326_v50, %v4951_v56  ;;  %v14331_v56 = vld [vmem:[#allocation196_spill] sm:$0xff] }
 0x9f4   :  { %6153 = vmatmul.bf16.gmra.mxu0 %v14319_v51  ;;  %6242 = vmatmul.bf16.gmra.mxu1 %v14320_v21  ;;  %v4864_v51 = vadd.f32 %v14324_v22, %v14323_v10  ;;  %v14330_v10 = vld [vmem:[#allocation137_spill] sm:$0xff] }
 0x9f5   :  { %6331 = vmatmul.bf16.gmra.mxu2 %v14321_v60  ;;  %6019 = vmatmul.bf16.gmra.mxu3 %v12063_v61  ;;  %v12193_v4 = vpack.c.bf16 %v5237_v52, %v5233_v62  ;;  %v14329_v62 = vld [vmem:[#allocation265_spill] sm:$0xff] }
 0x9f6   :  { %v4953_v60 = vadd.f32 %v14327_v1, %v4864_v51  ;;  %v4867_v52 = vadd.f32 %v14329_v62, %v14328_v32  ;;  %v14335_v1 = vld [vmem:[#allocation92_spill] sm:$0xff]  ;;  %v14336_v32 = vld [vmem:[#allocation19_spill] sm:$0xff] }
 0x9f8   :  { %v6292_v55 = vpop.f32.mrf.mxu2  ;;  %v5128_v5 = vpop.f32.mrf.mxu3 }
 0x9f9   :  { %v12197_v54 = vadd.f32 %v6292_v55, %v6204_v23  ;;  %v6116_v17 = vpop.f32.mrf.mxu0  ;;  %v6205_v58 = vpop.f32.mrf.mxu1  ;;  %v5129_v21 = vadd.f32 %v5128_v5, %v5040_v57  ;;  %v5042_v23 = vadd.f32 %v14330_v10, %v4953_v60  ;;  %v14334_v57 = vld [vmem:[#allocation266_spill] sm:$0xff] }
 0x9fa   :  { %v6206_v59 = vadd.f32 %v6205_v58, %v6116_v17  ;;  %v14332_v17 = vld [vmem:[#allocation199_spill] sm:$0xff]  ;;  %v14333_v58 = vld [vmem:[#allocation81_spill] sm:$0xff]  ;;  %v4956_v5 = vadd.f32 %v14334_v57, %v4867_v52 }
 0x9fb   :  { %14325 = vst [vmem:[#allocation118_spill] sm:$0xff] %v12197_v54  ;;  %v5241_v51 = vmax.f32 %v5129_v21, 0.0  ;;  %v14340_v57 = vld [vmem:[#allocation269_spill] sm:$0xff] }
 0x9fc   :  { %v5045_v62 = vadd.f32 %v14336_v32, %v4956_v5  ;;  %v14341_v5 = vld [vmem:[#allocation192_spill] sm:$0xff] }
 0xa00   :  { %v6294_v40 = vpop.f32.mrf.mxu2  ;;  %v5130_v22 = vpop.f32.mrf.mxu3 }
 0xa01   :  { %v12203_v18 = vadd.f32 %v6294_v40, %v6206_v59  ;;  %v6119_v19 = vpop.f32.mrf.mxu0  ;;  %v6208_v16 = vpop.f32.mrf.mxu1  ;;  %v5131_v54 = vadd.f32 %v5130_v22, %v5042_v23  ;;  %v14337_v23 = vld [vmem:[#allocation212_spill] sm:$0xff] }
 0xa02   :  { %v12206_v55 = vadd.f32 %v6208_v16, %v6119_v19  ;;  %v4869_v16 = vadd.f32 %v14335_v1, %v11938_v34 }
 0xa03   :  { %v5245_v50 = vmax.f32 %v5131_v54, 0.0  ;;  %v14338_v54 = vld [vmem:[#allocation231_spill] sm:$0xff] }
 0xa04   :  { %6158 = vmatmul.bf16.gmra.mxu0 %v14331_v56  ;;  %6247 = vmatmul.bf16.gmra.mxu1 %v14332_v17  ;;  %v4958_v21 = vadd.f32 %v14337_v23, %v4869_v16  ;;  %v4872_v52 = vadd.f32 %v14338_v54, %v11948_v20  ;;  %v14339_v17 = vld [vmem:[#allocation93_spill] sm:$0xff]  ;;  %v8596_v16 = vld [vmem:[#allocation7 + $0x1d4] sm:$0xf]  ;;  %v14343_v54 = vld [vmem:[#allocation91_spill] sm:$0xff] }
 0xa05   :  { %6336 = vmatmul.bf16.gmra.mxu2 %v14333_v58  ;;  %6024 = vmatmul.bf16.gmra.mxu3 %v12082_v11  ;;  %v12213_v59 = vpack.c.bf16 %v5245_v50, %v5241_v51 }
 0xa06   :  { %v5047_v58 = vadd.f32 %v14339_v17, %v4958_v21  ;;  %v14344_v17 = vld [vmem:[#allocation155_spill] sm:$0xff] }
 0xa08   :  { %v5133_v19 = vpop.f32.mrf.mxu3 }
 0xa09   :  { %v12217_v60 = vpop.f32.mrf.mxu0  ;;  %v12219_v40 = vpop.f32.mrf.mxu1  ;;  %v5134_v10 = vadd.f32 %v5133_v19, %v5045_v62  ;;  %v8226_v62 = vld [vmem:[#allocation7 + $0x1d8] sm:$0xf0] }
 0xa0a   :  { %v14342_v19 = vld [vmem:[#allocation267_spill] sm:$0xff]  ;;  %v8229_v23 = vor.u32 %v8596_v16, %v8226_v62 }
 0xa0b   :  { %v5249_v1 = vmax.f32 %v5134_v10, 0.0  ;;  %v4961_v20 = vadd.f32 %v14342_v19, %v4872_v52  ;;  %v14346_v52 = vld [vmem:[#allocation226_spill] sm:$0xff] }
 0xa0c   :  { %6359 = vmatpush.bf16.msrb.mxu3 %v8229_v23 }
 0xa0d   :  { %v5050_v10 = vadd.f32 %v14344_v17, %v4961_v20 }
 0xa10   :  { %v5135_v34 = vpop.f32.mrf.mxu3 }
 0xa11   :  { %v6124_v22 = vpop.f32.mrf.mxu0  ;;  %v6213_v56 = vpop.f32.mrf.mxu1  ;;  %v5136_v50 = vadd.f32 %v5135_v34, %v5047_v58 }
 0xa12   :  { %v12226_v51 = vadd.f32 %v6213_v56, %v6124_v22  ;;  %v4874_v22 = vadd.f32 %v14343_v54, %v11953_v14 }
 0xa13   :  { %v5253_v32 = vmax.f32 %v5136_v50, 0.0  ;;  %v14345_v50 = vld [vmem:[#allocation103_spill] sm:$0xff] }
 0xa14   :  { %6163 = vmatmul.bf16.gmra.mxu0 %v14205_v29  ;;  %6252 = vmatmul.bf16.gmra.mxu1 %v14340_v57  ;;  %v4963_v57 = vadd.f32 %v14345_v50, %v4874_v22  ;;  %v14348_v22 = vld [vmem:[#allocation145_spill] sm:$0xff] }
 0xa15   :  { %6341 = vmatmul.bf16.gmra.mxu2 %v14341_v5  ;;  %6029 = vmatmul.bf16.gmra.mxu3 %v12101_v3  ;;  %v12233_v21 = vpack.c.bf16 %v5253_v32, %v5249_v1  ;;  %v4877_v5 = vadd.f32 %v14346_v52, %v11963_v0  ;;  %v14347_v32 = vld [vmem:[#allocation233_spill] sm:$0xff] }
 0xa16   :  { %v5052_v62 = vadd.f32 %v14347_v32, %v4963_v57 }
 0xa17   :  { %v4966_v17 = vadd.f32 %v14348_v22, %v4877_v5  ;;  %v8218_v22 = vld [vmem:[#allocation7 + $0x1c8] sm:$0xf0] }
 0xa18   :  { %v5138_v58 = vpop.f32.mrf.mxu3 }
 0xa19   :  { %v12237_v29 = vpop.f32.mrf.mxu0  ;;  %v12239_v56 = vpop.f32.mrf.mxu1  ;;  %v5139_v34 = vadd.f32 %v5138_v58, %v5050_v10  ;;  %v14349_v10 = vld [vmem:[#allocation270_spill] sm:$0xff] }
 0xa1a   :  { %v4879_v58 = vadd.f32 %v14349_v10, %v11968_v44 }
 0xa1b   :  { %v5257_v20 = vmax.f32 %v5139_v34, 0.0 }
 0xa20   :  { %v5140_v14 = vpop.f32.mrf.mxu3 }
 0xa21   :  { %v6129_v16 = vpop.f32.mrf.mxu0  ;;  %v6218_v1 = vpop.f32.mrf.mxu1  ;;  %v5141_v23 = vadd.f32 %v5140_v14, %v5052_v62  ;;  %v14354_v14 = vld [vmem:[#allocation218_spill] sm:$0xff] }
 0xa22   :  { %v12246_v19 = vadd.f32 %v6218_v1, %v6129_v16  ;;  %v14353_v1 = vld [vmem:[#allocation268_spill] sm:$0xff] }
 0xa23   :  { %v5261_v54 = vmax.f32 %v5141_v23, 0.0  ;;  %v4882_v5 = vadd.f32 %v14353_v1, %v11978_v9  ;;  %v14357_v9 = vld [vmem:[#allocation205_spill] sm:$0xff] }
 0xa24   :  { %6168 = vmatmul.bf16.gmra.mxu0 %v14210_v42  ;;  %6257 = vmatmul.bf16.gmra.mxu1 %v14211_v30  ;;  %v14351_v42 = vld [vmem:[#allocation271_spill] sm:$0xff] }
 0xa25   :  { %6346 = vmatmul.bf16.gmra.mxu2 %v11702_v26  ;;  %6034 = vmatmul.bf16.gmra.mxu3 %v12120_v49  ;;  %v12253_v0 = vpack.c.bf16 %v5261_v54, %v5257_v20  ;;  %v5055_v52 = vadd.f32 %v14351_v42, %v4966_v17  ;;  %v14352_v26 = vld [vmem:[#allocation201_spill] sm:$0xff]  ;;  %v8594_v54 = vld [vmem:[#allocation7 + $0x1c4] sm:$0xf]  ;;  %v14356_v42 = vld [vmem:[#allocation263_spill] sm:$0xff] }
 0xa26   :  { %v4968_v34 = vadd.f32 %v14352_v26, %v4879_v58  ;;  %v14355_v17 = vld [vmem:[#allocation241_spill] sm:$0xff] }
 0xa28   :  { %v5143_v30 = vpop.f32.mrf.mxu3  ;;  %v5057_v23 = vadd.f32 %v14354_v14, %v4968_v34  ;;  %v14358_v34 = vld [vmem:[#allocation17_spill] sm:$0xff] }
 0xa29   :  { %v12257_v50 = vpop.f32.mrf.mxu0  ;;  %v12259_v57 = vpop.f32.mrf.mxu1  ;;  %v5144_v16 = vadd.f32 %v5143_v30, %v5055_v52  ;;  %v4971_v30 = vadd.f32 %v14357_v9, %v4882_v5  ;;  %v4884_v1 = vadd.f32 %v14358_v34, %v11983_v8 }
 0xa2a   :  { %14350 = vst [vmem:[#allocation117_spill] sm:$0xff] %v12259_v57  ;;  %v8221_v57 = vor.u32 %v8594_v54, %v8218_v22 }
 0xa2b   :  { %v5265_v58 = vmax.f32 %v5144_v16, 0.0  ;;  %v14362_v16 = vld [vmem:[#allocation100_spill] sm:$0xff] }
 0xa2c   :  { %6360 = vmatpush.bf16.msrb.mxu3 %v8221_v57  ;;  %v4973_v54 = vadd.f32 %v14362_v16, %v4884_v1  ;;  %v14363_v57 = vld [vmem:[#allocation153_spill] sm:$0xff]  ;;  %v14366_v1 = vld [vmem:[#allocation18_spill] sm:$0xff] }
 0xa2d   :  { %v4887_v5 = vadd.f32 %v14363_v57, %v11993_v35  ;;  %v4889_v35 = vadd.f32 %v14366_v1, %v12000_v7  ;;  %v14369_v16 = vld [vmem:[#allocation101_spill] sm:$0xff]  ;;  %v8592_v1 = vld [vmem:[#allocation7 + $0x1b4] sm:$0xf] }
 0xa30   :  { %v5145_v44 = vpop.f32.mrf.mxu3 }
 0xa31   :  { %v6134_v32 = vpop.f32.mrf.mxu0  ;;  %v6223_v62 = vpop.f32.mrf.mxu1  ;;  %v5146_v10 = vadd.f32 %v5145_v44, %v5057_v23 }
 0xa32   :  { %v12266_v20 = vadd.f32 %v6223_v62, %v6134_v32 }
 0xa33   :  { %v5269_v52 = vmax.f32 %v5146_v10, 0.0 }
 0xa34   :  { %6173 = vmatmul.bf16.gmra.mxu0 %v14216_v2  ;;  %6262 = vmatmul.bf16.gmra.mxu1 %v14355_v17  ;;  %v14361_v2 = vld [vmem:[#allocation152_spill] sm:$0xff]  ;;  %v14364_v17 = vld [vmem:[#allocation47_spill] sm:$0xff] }
 0xa35   :  { %6351 = vmatmul.bf16.gmra.mxu2 %v14356_v42  ;;  %6039 = vmatmul.bf16.gmra.mxu3 %v12139_v53  ;;  %v12273_v26 = vpack.c.bf16 %v5269_v52, %v5265_v58  ;;  %v5060_v14 = vadd.f32 %v14361_v2, %v4971_v30  ;;  %v5062_v42 = vadd.f32 %v14364_v17, %v4973_v54  ;;  %v8609_v30 = vld [vmem:[#allocation8 + $0x38] sm:$0xff] }
 0xa36   :  { %6674 = vmatpush.bf16.msrb.mxu0 %v8609_v30 }
 0xa38   :  { %v5148_v23 = vpop.f32.mrf.mxu3 }
 0xa39   :  { %v12277_v32 = vpop.f32.mrf.mxu0  ;;  %v12279_v62 = vpop.f32.mrf.mxu1  ;;  %v5149_v44 = vadd.f32 %v5148_v23, %v5060_v14 }
 0xa3a   :  { %14359 = vst [vmem:[#allocation49_spill] sm:$0xff] %v12277_v32 }
 0xa3b   :  { %14360 = vst [vmem:[#allocation191_spill] sm:$0xff] %v12279_v62  ;;  %v5273_v9 = vmax.f32 %v5149_v44, 0.0  ;;  %v14365_v62 = vld [vmem:[#allocation279_spill] sm:$0xff]  ;;  %v8608_v44 = vld [vmem:[#allocation8 + $0x30] sm:$0xff] }
 0xa3c   :  { %v4976_v32 = vadd.f32 %v14365_v62, %v4887_v5  ;;  %6675 = vmatpush.bf16.msrb.mxu0 %v8608_v44  ;;  %v14370_v62 = vld [vmem:[#allocation237_spill] sm:$0xff] }
 0xa3d   :  { %v4978_v5 = vadd.f32 %v14370_v62, %v4889_v35  ;;  %v8605_v35 = vld [vmem:[#allocation8 + $0x18] sm:$0xff] }
 0xa3e   :  { %v5065_v54 = vadd.f32 %v14369_v16, %v4976_v32 }
 0xa40   :  { %v5150_v8 = vpop.f32.mrf.mxu3 }
 0xa41   :  { %v6139_v22 = vpop.f32.mrf.mxu0  ;;  %v6228_v10 = vpop.f32.mrf.mxu1  ;;  %v5151_v52 = vadd.f32 %v5150_v8, %v5062_v42  ;;  %v14371_v8 = vld [vmem:[#allocation283_spill] sm:$0xff] }
 0xa42   :  { %v12286_v58 = vadd.f32 %v6228_v10, %v6139_v22  ;;  %v8607_v10 = vld [vmem:[#allocation8 + $0x28] sm:$0xff] }
 0xa43   :  { %v5277_v34 = vmax.f32 %v5151_v52, 0.0  ;;  %v5067_v52 = vadd.f32 %v14371_v8, %v4978_v5  ;;  %6676 = vmatpush.bf16.msrb.mxu0 %v8607_v10  ;;  %v8604_v5 = vld [vmem:[#allocation8 + $0x10] sm:$0xff]  ;;  %v8603_v10 = vld [vmem:[#allocation8 + $0x8] sm:$0xff] }
 0xa45   :  { %6044 = vmatmul.bf16.gmra.mxu3 %v12157_v45  ;;  %v12290_v2 = vpack.c.bf16 %v5277_v34, %v5273_v9  ;;  %v8606_v34 = vld [vmem:[#allocation8 + $0x20] sm:$0xff] }
 0xa47   :  { %6677 = vmatpush.bf16.msrb.mxu0 %v8606_v34 }
 0xa48   :  { %v5153_v57 = vpop.f32.mrf.mxu3 }
 0xa49   :  { %v12294_v14 = vpop.f32.mrf.mxu0  ;;  %v12296_v23 = vpop.f32.mrf.mxu1  ;;  %v5154_v22 = vadd.f32 %v5153_v57, %v5065_v54 }
 0xa4a   :  { %14367 = vst [vmem:[#allocation281_spill] sm:$0xff] %v12294_v14 }
 0xa4b   :  { %14368 = vst [vmem:[#allocation285_spill] sm:$0xff] %v12296_v23  ;;  %v8210_v23 = vld [vmem:[#allocation7 + $0x1b8] sm:$0xf0]  ;;  %v5281_v16 = vmax.f32 %v5154_v22, 0.0  ;;  %6678 = vmatpush.bf16.msrb.mxu0 %v8605_v35 }
 0xa4c   :  { %v8213_v30 = vor.u32 %v8592_v1, %v8210_v23  ;;  %v14375_v22 = vld [vmem:[#allocation207_spill] sm:$0xff] }
 0xa4e   :  { %6361 = vmatpush.bf16.msrb.mxu3 %v8213_v30 }
 0xa4f   :  { %6679 = vmatpush.bf16.msrb.mxu0 %v8604_v5  ;;  %v8617_v5 = vld [vmem:[#allocation8 + $0x78] sm:$0xff] }
 0xa50   :  { %v5155_v9 = vpop.f32.mrf.mxu3  ;;  %6763 = vmatpush.bf16.msrb.mxu1 %v8617_v5 }
 0xa51   :  { %v6144_v17 = vpop.f32.mrf.mxu0  ;;  %v6233_v42 = vpop.f32.mrf.mxu1  ;;  %v5156_v32 = vadd.f32 %v5155_v9, %v5067_v52  ;;  %v8602_v9 = vld [vmem:[#allocation8] sm:$0xff] }
 0xa52   :  { %v12301_v7 = vadd.f32 %v6233_v42, %v6144_v17 }
 0xa53   :  { %v5285_v14 = vmax.f32 %v5156_v32, 0.0  ;;  %6680 = vmatpush.bf16.msrb.mxu0 %v8603_v10 }
 0xa54   :  { %14372 = vst [vmem:[#allocation62_spill] sm:$0xff] %v12301_v7 }
 0xa55   :  { %6049 = vmatmul.bf16.gmra.mxu3 %v12175_v13  ;;  %v12304_v54 = vpack.c.bf16 %v5285_v14, %v5281_v16  ;;  %v14377_v14 = vld [vmem:[#allocation104_spill] sm:$0xff] }
 0xa57   :  { %6681 = vmatpush.bf16.msrb.mxu0 %v8602_v9  ;;  %v8202_v9 = vld [vmem:[#allocation7 + $0x1a8] sm:$0xf0] }
 0xa58   :  { %v6010_v62 = vpop.f32.mrf.mxu3 }
 0xa59   :  { %v12306_v57 = vpop.f32.mrf.mxu0  ;;  %v12308_v44 = vpop.f32.mrf.mxu1  ;;  %v6011_v42 = vadd.f32 %v6010_v62, %v14375_v22 }
 0xa5a   :  { %14373 = vst [vmem:[#allocation27_spill] sm:$0xff] %v12306_v57  ;;  %v8586_v57 = vld [vmem:[#allocation7 + $0x184] sm:$0xf] }
 0xa5b   :  { %14374 = vst [vmem:[#allocation173_spill] sm:$0xff] %v12308_v44  ;;  %v6446_v1 = vmax.f32 %v6011_v42, 0.0 }
 0xa60   :  { %v6012_v52 = vpop.f32.mrf.mxu3 }
 0xa61   :  { %v6149_v17 = vpop.f32.mrf.mxu0  ;;  %v6238_v23 = vpop.f32.mrf.mxu1  ;;  %v6013_v34 = vadd.f32 %v6012_v52, %v14377_v14  ;;  %v8590_v52 = vld [vmem:[#allocation7 + $0x1a4] sm:$0xf]  ;;  %v14382_v14 = vld [vmem:[#allocation170_spill] sm:$0xff] }
 0xa62   :  { %v12311_v8 = vadd.f32 %v6238_v23, %v6149_v17  ;;  %v14380_v23 = vld [vmem:[#allocation166_spill] sm:$0xff] }
 0xa63   :  { %v6448_v32 = vmax.f32 %v6013_v34, 0.0 }
 0xa64   :  { %14376 = vst [vmem:[#allocation23_spill] sm:$0xff] %v12311_v8 }
 0xa65   :  { %6054 = vmatmul.bf16.gmra.mxu3 %v12193_v4  ;;  %v6510_v30 = vpack.c.bf16 %v6448_v32, %v6446_v1  ;;  %v8205_v1 = vor.u32 %v8590_v52, %v8202_v9  ;;  %v14387_v52 = vld [vmem:[#allocation273_spill] sm:$0xff] }
 0xa67   :  { %6682 = vmatmul.bf16.vlgmr.msrb.gmra.mxu0 %v6510_v30  ;;  %6362 = vmatpush.bf16.msrb.mxu3 %v8205_v1 }
 0xa68   :  { %v6015_v62 = vpop.f32.mrf.mxu3 }
 0xa69   :  { %v12315_v16 = vpop.f32.mrf.mxu0  ;;  %v12317_v35 = vpop.f32.mrf.mxu1  ;;  %v6016_v22 = vadd.f32 %v6015_v62, %v14380_v23  ;;  %v14385_v23 = vld [vmem:[#allocation159_spill] sm:$0xff] }
 0xa6a   :  { %14378 = vst [vmem:[#allocation286_spill] sm:$0xff] %v12315_v16 }
 0xa6b   :  { %14379 = vst [vmem:[#allocation44_spill] sm:$0xff] %v12317_v35  ;;  %v6450_v32 = vmax.f32 %v6016_v22, 0.0 }
 0xa70   :  { %v6017_v42 = vpop.f32.mrf.mxu3 }
 0xa71   :  { %v6154_v10 = vpop.f32.mrf.mxu0  ;;  %v6243_v17 = vpop.f32.mrf.mxu1  ;;  %v6018_v34 = vadd.f32 %v6017_v42, %v14382_v14 }
 0xa72   :  { %v12320_v8 = vadd.f32 %v6243_v17, %v6154_v10 }
 0xa73   :  { %v6452_v16 = vmax.f32 %v6018_v34, 0.0 }
 0xa74   :  { %14381 = vst [vmem:[#allocation248_spill] sm:$0xff] %v12320_v8 }
 0xa75   :  { %6059 = vmatmul.bf16.gmra.mxu3 %v12213_v59  ;;  %v6512_v30 = vpack.c.bf16 %v6452_v16, %v6450_v32  ;;  %v8616_v32 = vld [vmem:[#allocation8 + $0x70] sm:$0xff] }
 0xa76   :  { %6764 = vmatpush.bf16.msrb.mxu1 %v8616_v32 }
 0xa77   :  { %6687 = vmatmul.bf16.gmra.mxu0 %v6512_v30 }
 0xa78   :  { %v6020_v62 = vpop.f32.mrf.mxu3 }
 0xa79   :  { %v12324_v35 = vpop.f32.mrf.mxu0  ;;  %v12326_v5 = vpop.f32.mrf.mxu1  ;;  %v6021_v8 = vadd.f32 %v6020_v62, %v14385_v23 }
 0xa7a   :  { %14383 = vst [vmem:[#allocation122_spill] sm:$0xff] %v12324_v35  ;;  %v8615_v35 = vld [vmem:[#allocation8 + $0x68] sm:$0xff] }
 0xa7b   :  { %14384 = vst [vmem:[#allocation124_spill] sm:$0xff] %v12326_v5  ;;  %v6454_v9 = vmax.f32 %v6021_v8, 0.0  ;;  %v8588_v8 = vld [vmem:[#allocation7 + $0x194] sm:$0xf]  ;;  %6765 = vmatpush.bf16.msrb.mxu1 %v8615_v35 }
 0xa80   :  { %v6022_v42 = vpop.f32.mrf.mxu3 }
 0xa81   :  { %v6159_v10 = vpop.f32.mrf.mxu0  ;;  %v6248_v17 = vpop.f32.mrf.mxu1  ;;  %v6023_v22 = vadd.f32 %v6022_v42, %v14387_v52  ;;  %v8194_v52 = vld [vmem:[#allocation7 + $0x198] sm:$0xf0] }
 0xa82   :  { %v12329_v44 = vadd.f32 %v6248_v17, %v6159_v10  ;;  %v14390_v10 = vld [vmem:[#allocation20_spill] sm:$0xff] }
 0xa83   :  { %v6456_v14 = vmax.f32 %v6023_v22, 0.0  ;;  %v14392_v22 = vld [vmem:[#allocation171_spill] sm:$0xff] }
 0xa84   :  { %14386 = vst [vmem:[#allocation160_spill] sm:$0xff] %v12329_v44 }
 0xa85   :  { %6064 = vmatmul.bf16.gmra.mxu3 %v12233_v21  ;;  %v6514_v16 = vpack.c.bf16 %v6456_v14, %v6454_v9  ;;  %v8197_v9 = vor.u32 %v8588_v8, %v8194_v52  ;;  %v14397_v52 = vld [vmem:[#allocation107_spill] sm:$0xff] }
 0xa87   :  { %6692 = vmatmul.bf16.gmra.mxu0 %v6514_v16  ;;  %6363 = vmatpush.bf16.msrb.mxu3 %v8197_v9 }
 0xa88   :  { %v6025_v30 = vpop.f32.mrf.mxu3 }
 0xa89   :  { %v12333_v34 = vpop.f32.mrf.mxu0  ;;  %v12335_v1 = vpop.f32.mrf.mxu1  ;;  %v6026_v17 = vadd.f32 %v6025_v30, %v14390_v10  ;;  %v14395_v10 = vld [vmem:[#allocation277_spill] sm:$0xff] }
 0xa8a   :  { %14388 = vst [vmem:[#allocation202_spill] sm:$0xff] %v12333_v34 }
 0xa8b   :  { %14389 = vst [vmem:[#allocation288_spill] sm:$0xff] %v12335_v1  ;;  %v6458_v14 = vmax.f32 %v6026_v17, 0.0 }
 0xa90   :  { %v6027_v42 = vpop.f32.mrf.mxu3 }
 0xa91   :  { %v6164_v5 = vpop.f32.mrf.mxu0  ;;  %v6253_v62 = vpop.f32.mrf.mxu1  ;;  %v6028_v44 = vadd.f32 %v6027_v42, %v14392_v22  ;;  %v8186_v42 = vld [vmem:[#allocation7 + $0x188] sm:$0xf0] }
 0xa92   :  { %v12338_v23 = vadd.f32 %v6253_v62, %v6164_v5  ;;  %v8189_v17 = vor.u32 %v8586_v57, %v8186_v42  ;;  %v14400_v57 = vld [vmem:[#allocation42_spill] sm:$0xff] }
 0xa93   :  { %v6460_v34 = vmax.f32 %v6028_v44, 0.0 }
 0xa94   :  { %14391 = vst [vmem:[#allocation53_spill] sm:$0xff] %v12338_v23  ;;  %6364 = vmatpush.bf16.msrb.mxu3 %v8189_v17 }
 0xa95   :  { %6069 = vmatmul.bf16.gmra.mxu3 %v12253_v0  ;;  %v6516_v16 = vpack.c.bf16 %v6460_v34, %v6458_v14 }
 0xa97   :  { %6697 = vmatmul.bf16.gmra.mxu0 %v6516_v16 }
 0xa98   :  { %v6030_v30 = vpop.f32.mrf.mxu3 }
 0xa99   :  { %v12342_v1 = vpop.f32.mrf.mxu0  ;;  %v12344_v32 = vpop.f32.mrf.mxu1  ;;  %v6031_v23 = vadd.f32 %v6030_v30, %v14395_v10  ;;  %v8614_v30 = vld [vmem:[#allocation8 + $0x60] sm:$0xff] }
 0xa9a   :  { %14393 = vst [vmem:[#allocation123_spill] sm:$0xff] %v12342_v1  ;;  %6766 = vmatpush.bf16.msrb.mxu1 %v8614_v30  ;;  %v14403_v30 = vld [vmem:[#allocation16_spill] sm:$0xff] }
 0xa9b   :  { %14394 = vst [vmem:[#allocation30_spill] sm:$0xff] %v12344_v32  ;;  %v6462_v34 = vmax.f32 %v6031_v23, 0.0  ;;  %v14401_v23 = vld [vmem:[#allocation177_spill] sm:$0xff] }
 0xaa0   :  { %v6032_v44 = vpop.f32.mrf.mxu3 }
 0xaa1   :  { %v6169_v5 = vpop.f32.mrf.mxu0  ;;  %v6258_v62 = vpop.f32.mrf.mxu1  ;;  %v6033_v22 = vadd.f32 %v6032_v44, %v14397_v52 }
 0xaa2   :  { %v12347_v8 = vadd.f32 %v6258_v62, %v6169_v5 }
 0xaa3   :  { %v6464_v9 = vmax.f32 %v6033_v22, 0.0 }
 0xaa4   :  { %14396 = vst [vmem:[#allocation130_spill] sm:$0xff] %v12347_v8 }
 0xaa5   :  { %6074 = vmatmul.bf16.gmra.mxu3 %v12273_v26  ;;  %v6518_v14 = vpack.c.bf16 %v6464_v9, %v6462_v34 }
 0xaa7   :  { %6702 = vmatmul.bf16.gmra.mxu0 %v6518_v14  ;;  %v14402_v14 = vld [vmem:[#allocation70_spill] sm:$0xff] }
 0xaa8   :  { %v6035_v10 = vpop.f32.mrf.mxu3 }
 0xaa9   :  { %v12351_v16 = vpop.f32.mrf.mxu0  ;;  %v12353_v32 = vpop.f32.mrf.mxu1  ;;  %v6036_v42 = vadd.f32 %v6035_v10, %v14400_v57 }
 0xaaa   :  { %14398 = vst [vmem:[#allocation252_spill] sm:$0xff] %v12351_v16 }
 0xaab   :  { %14399 = vst [vmem:[#allocation157_spill] sm:$0xff] %v12353_v32  ;;  %v6466_v52 = vmax.f32 %v6036_v42, 0.0 }
 0xab0   :  { %v6037_v35 = vpop.f32.mrf.mxu3 }
 0xab1   :  { %v6174_v5 = vpop.f32.mrf.mxu0  ;;  %v6263_v62 = vpop.f32.mrf.mxu1  ;;  %v6038_v17 = vadd.f32 %v6037_v35, %v14401_v23 }
 0xab2   :  { %v12356_v44 = vadd.f32 %v6263_v62, %v6174_v5  ;;  %v8613_v5 = vld [vmem:[#allocation8 + $0x58] sm:$0xff] }
 0xab3   :  { %v6468_v22 = vmax.f32 %v6038_v17, 0.0  ;;  %6767 = vmatpush.bf16.msrb.mxu1 %v8613_v5 }
 0xab5   :  { %6079 = vmatmul.bf16.gmra.mxu3 %v12290_v2  ;;  %v6520_v34 = vpack.c.bf16 %v6468_v22, %v6466_v52  ;;  %v8625_v52 = vld [vmem:[#allocation10 + $0x38] sm:$0xff] }
 0xab6   :  { %6968 = vmatpush.bf16.msrb.mxu2 %v8625_v52 }
 0xab7   :  { %6707 = vmatmul.bf16.gmra.mxu0 %v6520_v34 }
 0xab8   :  { %v6040_v9 = vpop.f32.mrf.mxu3 }
 0xab9   :  { %v6041_v32 = vadd.f32 %v6040_v9, %v14402_v14  ;;  %v12375_v52 = vpop.f32.mrf.mxu0 }
 0xabb   :  { %v6470_v1 = vmax.f32 %v6041_v32, 0.0 }
 0xac0   :  { %v6042_v16 = vpop.f32.mrf.mxu3 }
 0xac1   :  { %v6043_v8 = vadd.f32 %v6042_v16, %v14403_v30 }
 0xac3   :  { %v6472_v7 = vmax.f32 %v6043_v8, 0.0 }
 0xac5   :  { %6084 = vmatmul.bf16.gmra.mxu3 %v12304_v54  ;;  %v6522_v10 = vpack.c.bf16 %v6472_v7, %v6470_v1 }
 0xac7   :  { %6712 = vmatmul.bf16.gmra.mxu0 %v6522_v10 }
 0xac8   :  { %v6045_v62 = vpop.f32.mrf.mxu3 }
 0xac9   :  { %v6046_v57 = vadd.f32 %v6045_v62, %v11975_v38 }
 0xacb   :  { %v6474_v23 = vmax.f32 %v6046_v57, 0.0 }
 0xad0   :  { %v6047_v42 = vpop.f32.mrf.mxu3 }
 0xad1   :  { %v6048_v35 = vadd.f32 %v6047_v42, %v11980_v6  ;;  %v8612_v6 = vld [vmem:[#allocation8 + $0x50] sm:$0xff] }
 0xad2   :  { %6768 = vmatpush.bf16.msrb.mxu1 %v8612_v6 }
 0xad3   :  { %v6476_v17 = vmax.f32 %v6048_v35, 0.0 }
 0xad5   :  { %6365 = vmatmul.bf16.vlgmr.msrb.gmra.mxu3 %v12025_v63  ;;  %v6524_v16 = vpack.c.bf16 %v6476_v17, %v6474_v23 }
 0xad7   :  { %6717 = vmatmul.bf16.gmra.mxu0 %v6524_v16 }
 0xad8   :  { %v6050_v32 = vpop.f32.mrf.mxu3 }
 0xad9   :  { %v6051_v7 = vadd.f32 %v6050_v32, %v11990_v15  ;;  %v8624_v15 = vld [vmem:[#allocation10 + $0x30] sm:$0xff] }
 0xada   :  { %6969 = vmatpush.bf16.msrb.mxu2 %v8624_v15 }
 0xadb   :  { %v6478_v22 = vmax.f32 %v6051_v7, 0.0 }
 0xae0   :  { %v6052_v1 = vpop.f32.mrf.mxu3 }
 0xae1   :  { %v6053_v8 = vadd.f32 %v6052_v1, %v11997_v36  ;;  %v8623_v1 = vld [vmem:[#allocation10 + $0x28] sm:$0xff] }
 0xae2   :  { %6970 = vmatpush.bf16.msrb.mxu2 %v8623_v1 }
 0xae3   :  { %v6480_v34 = vmax.f32 %v6053_v8, 0.0 }
 0xae4   :  { %v12378_v32 = vpop.f32.mrf.mxu0 }
 0xae5   :  { %6370 = vmatmul.bf16.gmra.mxu3 %v12044_v46  ;;  %v6526_v38 = vpack.c.bf16 %v6480_v34, %v6478_v22 }
 0xae7   :  { %6722 = vmatmul.bf16.gmra.mxu0 %v6526_v38 }
 0xae8   :  { %v6055_v9 = vpop.f32.mrf.mxu3 }
 0xae9   :  { %v6056_v63 = vadd.f32 %v6055_v9, %v12010_v48 }
 0xaeb   :  { %v6482_v10 = vmax.f32 %v6056_v63, 0.0 }
 0xaec   :  { %v12382_v22 = vpop.f32.mrf.mxu0 }
 0xaf0   :  { %v6057_v14 = vpop.f32.mrf.mxu3 }
 0xaf1   :  { %v6058_v30 = vadd.f32 %v6057_v14, %v12016_v27  ;;  %v8611_v27 = vld [vmem:[#allocation8 + $0x48] sm:$0xff] }
 0xaf2   :  { %6769 = vmatpush.bf16.msrb.mxu1 %v8611_v27 }
 0xaf3   :  { %v6484_v5 = vmax.f32 %v6058_v30, 0.0 }
 0xaf5   :  { %6375 = vmatmul.bf16.gmra.mxu3 %v12063_v61  ;;  %v6528_v36 = vpack.c.bf16 %v6484_v5, %v6482_v10 }
 0xaf7   :  { %6727 = vmatmul.bf16.gmra.mxu0 %v6528_v36  ;;  %v8622_v36 = vld [vmem:[#allocation10 + $0x20] sm:$0xff] }
 0xaf8   :  { %v6060_v62 = vpop.f32.mrf.mxu3  ;;  %6971 = vmatpush.bf16.msrb.mxu2 %v8622_v36 }
 0xaf9   :  { %v6061_v46 = vadd.f32 %v6060_v62, %v12029_v33 }
 0xafb   :  { %v6486_v35 = vmax.f32 %v6061_v46, 0.0 }
 0xb00   :  { %v6062_v57 = vpop.f32.mrf.mxu3 }
 0xb01   :  { %v6063_v42 = vadd.f32 %v6062_v57, %v12035_v12 }
 0xb03   :  { %v6488_v23 = vmax.f32 %v6063_v42, 0.0 }
 0xb05   :  { %6380 = vmatmul.bf16.gmra.mxu3 %v12082_v11  ;;  %v6530_v48 = vpack.c.bf16 %v6488_v23, %v6486_v35  ;;  %v14404_v35 = vld [vmem:[#allocation109_spill] sm:$0xff] }
 0xb07   :  { %6732 = vmatmul.bf16.gmra.mxu0 %v6530_v48 }
 0xb08   :  { %v6065_v17 = vpop.f32.mrf.mxu3 }
 0xb09   :  { %v6066_v61 = vadd.f32 %v6065_v17, %v12048_v47 }
 0xb0b   :  { %v6490_v7 = vmax.f32 %v6066_v61, 0.0  ;;  %v14405_v61 = vld [vmem:[#allocation24_spill] sm:$0xff] }
 0xb10   :  { %v6067_v16 = vpop.f32.mrf.mxu3 }
 0xb11   :  { %v6068_v33 = vadd.f32 %v6067_v16, %v12054_v25  ;;  %v12387_v25 = vpop.f32.mrf.mxu0 }
 0xb13   :  { %v6492_v12 = vmax.f32 %v6068_v33, 0.0 }
 0xb15   :  { %6385 = vmatmul.bf16.gmra.mxu3 %v12101_v3  ;;  %v6532_v11 = vpack.c.bf16 %v6492_v12, %v6490_v7  ;;  %v8610_v3 = vld [vmem:[#allocation8 + $0x40] sm:$0xff] }
 0xb16   :  { %6770 = vmatpush.bf16.msrb.mxu1 %v8610_v3  ;;  %v14406_v7 = vld [vmem:[#allocation116_spill] sm:$0xff] }
 0xb17   :  { %6737 = vmatmul.bf16.gmra.mxu0 %v6532_v11  ;;  %v8621_v11 = vld [vmem:[#allocation10 + $0x18] sm:$0xff] }
 0xb18   :  { %v6070_v8 = vpop.f32.mrf.mxu3  ;;  %6972 = vmatpush.bf16.msrb.mxu2 %v8621_v11 }
 0xb19   :  { %v6071_v34 = vadd.f32 %v6070_v8, %v12067_v28  ;;  %v12389_v30 = vpop.f32.mrf.mxu0 }
 0xb1b   :  { %v6494_v6 = vmax.f32 %v6071_v34, 0.0 }
 0xb20   :  { %v6072_v38 = vpop.f32.mrf.mxu3 }
 0xb21   :  { %v6073_v47 = vadd.f32 %v6072_v38, %v12073_v37  ;;  %v12394_v46 = vpop.f32.mrf.mxu0  ;;  %v14407_v38 = vld [vmem:[#allocation244_spill] sm:$0xff] }
 0xb23   :  { %v6496_v9 = vmax.f32 %v6073_v47, 0.0 }
 0xb25   :  { %6390 = vmatmul.bf16.gmra.mxu3 %v12120_v49  ;;  %v6534_v63 = vpack.c.bf16 %v6496_v9, %v6494_v6 }
 0xb27   :  { %6742 = vmatmul.bf16.gmra.mxu0 %v6534_v63 }
 0xb28   :  { %v6075_v14 = vpop.f32.mrf.mxu3 }
 0xb29   :  { %v6076_v10 = vadd.f32 %v6075_v14, %v12086_v39  ;;  %v12398_v39 = vpop.f32.mrf.mxu0  ;;  %v6297_v14 = vpop.f32.mrf.mxu2 }
 0xb2b   :  { %v6498_v15 = vmax.f32 %v6076_v10, 0.0 }
 0xb30   :  { %v6077_v5 = vpop.f32.mrf.mxu3 }
 0xb31   :  { %v6078_v28 = vadd.f32 %v6077_v5, %v12092_v43  ;;  %v12401_v17 = vpop.f32.mrf.mxu0 }
 0xb33   :  { %v6500_v37 = vmax.f32 %v6078_v28, 0.0 }
 0xb35   :  { %6395 = vmatmul.bf16.gmra.mxu3 %v12139_v53  ;;  %v6536_v49 = vpack.c.bf16 %v6500_v37, %v6498_v15  ;;  %v14408_v37 = vld [vmem:[#allocation74_spill] sm:$0xff] }
 0xb37   :  { %6747 = vmatmul.bf16.gmra.mxu0 %v6536_v49 }
 0xb38   :  { %v6080_v62 = vpop.f32.mrf.mxu3 }
 0xb39   :  { %v6081_v57 = vadd.f32 %v6080_v62, %v12105_v24  ;;  %v12406_v34 = vpop.f32.mrf.mxu0 }
 0xb3b   :  { %v6502_v48 = vmax.f32 %v6081_v57, 0.0  ;;  %v8620_v57 = vld [vmem:[#allocation10 + $0x10] sm:$0xff] }
 0xb3c   :  { %6973 = vmatpush.bf16.msrb.mxu2 %v8620_v57 }
 0xb40   :  { %v6082_v42 = vpop.f32.mrf.mxu3 }
 0xb41   :  { %v6083_v23 = vadd.f32 %v6082_v42, %v14404_v35  ;;  %v14409_v35 = vld [vmem:[#allocation282_spill] sm:$0xff] }
 0xb43   :  { %v6504_v43 = vmax.f32 %v6083_v23, 0.0 }
 0xb45   :  { %6400 = vmatmul.bf16.gmra.mxu3 %v12157_v45  ;;  %v6538_v27 = vpack.c.bf16 %v6504_v43, %v6502_v48  ;;  %v14410_v43 = vld [vmem:[#allocation280_spill] sm:$0xff] }
 0xb47   :  { %6752 = vmatmul.bf16.gmra.mxu0 %v6538_v27 }
 0xb48   :  { %v6085_v53 = vpop.f32.mrf.mxu3 }
 0xb49   :  { %v6086_v16 = vadd.f32 %v6085_v53, %v14405_v61 }
 0xb4b   :  { %v6506_v24 = vmax.f32 %v6086_v16, 0.0 }
 0xb50   :  { %v6087_v33 = vpop.f32.mrf.mxu3 }
 0xb51   :  { %v6088_v12 = vadd.f32 %v6087_v33, %v14406_v7 }
 0xb53   :  { %v6508_v1 = vmax.f32 %v6088_v12, 0.0 }
 0xb55   :  { %6405 = vmatmul.bf16.gmra.mxu3 %v12175_v13  ;;  %v6540_v8 = vpack.c.bf16 %v6508_v1, %v6506_v24  ;;  %v6299_v13 = vpop.f32.mrf.mxu2 }
 0xb57   :  { %6757 = vmatmul.bf16.gmra.mxu0 %v6540_v8 }
 0xb58   :  { %v6366_v45 = vpop.f32.mrf.mxu3 }
 0xb59   :  { %v6367_v47 = vadd.f32 %v6366_v45, %v14407_v38  ;;  %v8619_v38 = vld [vmem:[#allocation10 + $0x8] sm:$0xff] }
 0xb5a   :  { %6974 = vmatpush.bf16.msrb.mxu2 %v8619_v38 }
 0xb5b   :  { %v6447_v63 = vmax.f32 %v6367_v47, 0.0 }
 0xb60   :  { %v6368_v6 = vpop.f32.mrf.mxu3 }
 0xb61   :  { %v6369_v9 = vadd.f32 %v6368_v6, %v12149_v41 }
 0xb63   :  { %v6449_v3 = vmax.f32 %v6369_v9, 0.0  ;;  %v6211_v9 = vadd.f32 %v12219_v40, %v12217_v60 }
 0xb65   :  { %6410 = vmatmul.bf16.gmra.mxu3 %v12193_v4  ;;  %v6511_v10 = vpack.c.bf16 %v6449_v3, %v6447_v63  ;;  %v6302_v4 = vpop.f32.mrf.mxu2  ;;  %v6300_v63 = vadd.f32 %v6299_v13, %v6211_v9  ;;  %v14416_v9 = vld [vmem:[#allocation285_spill] sm:$0xff] }
 0xb67   :  { %6771 = vmatmul.bf16.vlgmr.msrb.gmra.mxu1 %v6511_v10 }
 0xb68   :  { %v6371_v5 = vpop.f32.mrf.mxu3 }
 0xb69   :  { %v6372_v28 = vadd.f32 %v6371_v5, %v12161_v31 }
 0xb6b   :  { %v6451_v49 = vmax.f32 %v6372_v28, 0.0 }
 0xb6d   :  { %v6304_v53 = vpop.f32.mrf.mxu2 }
 0xb70   :  { %v6373_v15 = vpop.f32.mrf.mxu3 }
 0xb71   :  { %v6374_v36 = vadd.f32 %v6373_v15, %v14408_v37 }
 0xb73   :  { %v6453_v62 = vmax.f32 %v6374_v36, 0.0 }
 0xb75   :  { %6415 = vmatmul.bf16.gmra.mxu3 %v12213_v59  ;;  %v6513_v41 = vpack.c.bf16 %v6453_v62, %v6451_v49  ;;  %v6307_v7 = vpop.f32.mrf.mxu2  ;;  %v14411_v59 = vld [vmem:[#allocation118_spill] sm:$0xff]  ;;  %v6303_v49 = vadd.f32 %v6302_v4, %v12226_v51  ;;  %v14412_v51 = vld [vmem:[#allocation117_spill] sm:$0xff] }
 0xb76   :  { %v6221_v4 = vadd.f32 %v14412_v51, %v12257_v50 }
 0xb77   :  { %6776 = vmatmul.bf16.gmra.mxu1 %v6513_v41 }
 0xb78   :  { %v6376_v42 = vpop.f32.mrf.mxu3 }
 0xb79   :  { %v6377_v23 = vadd.f32 %v6376_v42, %v14409_v35 }
 0xb7b   :  { %v6455_v31 = vmax.f32 %v6377_v23, 0.0  ;;  %v6308_v23 = vadd.f32 %v6307_v7, %v12246_v19  ;;  %v14414_v19 = vld [vmem:[#allocation191_spill] sm:$0xff] }
 0xb7d   :  { %v6309_v47 = vpop.f32.mrf.mxu2 }
 0xb80   :  { %v6378_v48 = vpop.f32.mrf.mxu3 }
 0xb81   :  { %v6379_v27 = vadd.f32 %v6378_v48, %v14410_v43 }
 0xb83   :  { %v6457_v61 = vmax.f32 %v6379_v27, 0.0 }
 0xb85   :  { %6420 = vmatmul.bf16.gmra.mxu3 %v12233_v21  ;;  %v6515_v16 = vpack.c.bf16 %v6457_v61, %v6455_v31  ;;  %v6298_v21 = vadd.f32 %v6297_v14, %v12206_v55  ;;  %v6312_v5 = vpop.f32.mrf.mxu2  ;;  %v6216_v55 = vadd.f32 %v12239_v56, %v12237_v29  ;;  %v6310_v29 = vadd.f32 %v6309_v47, %v6221_v4 }
 0xb87   :  { %6781 = vmatmul.bf16.gmra.mxu1 %v6515_v16  ;;  %v6305_v14 = vadd.f32 %v6304_v53, %v6216_v55 }
 0xb88   :  { %v6381_v33 = vpop.f32.mrf.mxu3 }
 0xb89   :  { %v6382_v12 = vadd.f32 %v6381_v33, %v14411_v59  ;;  %v6313_v33 = vadd.f32 %v6312_v5, %v12266_v20  ;;  %v14413_v59 = vld [vmem:[#allocation49_spill] sm:$0xff] }
 0xb8a   :  { %v6226_v7 = vadd.f32 %v14414_v19, %v14413_v59 }
 0xb8b   :  { %v6459_v11 = vmax.f32 %v6382_v12, 0.0 }
 0xb8d   :  { %v6314_v36 = vpop.f32.mrf.mxu2 }
 0xb8e   :  { %v6315_v12 = vadd.f32 %v6314_v36, %v6226_v7 }
 0xb90   :  { %v6383_v24 = vpop.f32.mrf.mxu3 }
 0xb91   :  { %v6384_v1 = vadd.f32 %v6383_v24, %v12203_v18 }
 0xb93   :  { %v6461_v8 = vmax.f32 %v6384_v1, 0.0 }
 0xb95   :  { %6425 = vmatmul.bf16.gmra.mxu3 %v12253_v0  ;;  %v6517_v45 = vpack.c.bf16 %v6461_v8, %v6459_v11  ;;  %v6317_v41 = vpop.f32.mrf.mxu2 }
 0xb97   :  { %6786 = vmatmul.bf16.gmra.mxu1 %v6517_v45 }
 0xb98   :  { %v6386_v6 = vpop.f32.mrf.mxu3 }
 0xb99   :  { %v6387_v3 = vadd.f32 %v6386_v6, %v6298_v21  ;;  %v6318_v6 = vadd.f32 %v6317_v41, %v12286_v58  ;;  %v14415_v21 = vld [vmem:[#allocation281_spill] sm:$0xff] }
 0xb9a   :  { %v6231_v20 = vadd.f32 %v14416_v9, %v14415_v21  ;;  %v14419_v41 = vld [vmem:[#allocation173_spill] sm:$0xff] }
 0xb9b   :  { %v6463_v28 = vmax.f32 %v6387_v3, 0.0 }
 0xb9d   :  { %v6319_v56 = vpop.f32.mrf.mxu2 }
 0xb9e   :  { %v6320_v3 = vadd.f32 %v6319_v56, %v6231_v20 }
 0xba0   :  { %v6388_v10 = vpop.f32.mrf.mxu3 }
 0xba1   :  { %v6389_v18 = vadd.f32 %v6388_v10, %v6300_v63 }
 0xba3   :  { %v6465_v15 = vmax.f32 %v6389_v18, 0.0 }
 0xba5   :  { %6430 = vmatmul.bf16.gmra.mxu3 %v12273_v26  ;;  %v6519_v0 = vpack.c.bf16 %v6465_v15, %v6463_v28  ;;  %v8618_v26 = vld [vmem:[#allocation10] sm:$0xff]  ;;  %v6322_v16 = vpop.f32.mrf.mxu2 }
 0xba6   :  { %6975 = vmatpush.bf16.msrb.mxu2 %v8618_v26 }
 0xba7   :  { %6791 = vmatmul.bf16.gmra.mxu1 %v6519_v0 }
 0xba8   :  { %v6391_v37 = vpop.f32.mrf.mxu3 }
 0xba9   :  { %v6392_v60 = vadd.f32 %v6391_v37, %v6303_v49  ;;  %v12443_v37 = vld [vmem:[%s12565_s4] ss:$0 sm:$0xff] }
 0xbaa   :  { %v6684_v55 = vadd.f32 %v12443_v37, %v12378_v32  ;;  %v12452_v32 = vpop.f32.mrf.mxu0 }
 0xbab   :  { %v6467_v62 = vmax.f32 %v6392_v60, 0.0 }
 0xbad   :  { %v6324_v11 = vpop.f32.mrf.mxu2 }
 0xbb0   :  { %v6393_v40 = vpop.f32.mrf.mxu3 }
 0xbb1   :  { %v6394_v13 = vadd.f32 %v6393_v40, %v6305_v14  ;;  %v6686_v14 = vadd.f32 %v12443_v37, %v12382_v22 }
 0xbb2   :  { %v12458_v19 = vpop.f32.mrf.mxu0 }
 0xbb3   :  { %v6469_v57 = vmax.f32 %v6394_v13, 0.0  ;;  %v14417_v13 = vld [vmem:[#allocation62_spill] sm:$0xff] }
 0xbb5   :  { %6435 = vmatmul.bf16.gmra.mxu3 %v12290_v2  ;;  %v6521_v42 = vpack.c.bf16 %v6469_v57, %v6467_v62  ;;  %v6327_v63 = vpop.f32.mrf.mxu2  ;;  %v6323_v62 = vadd.f32 %v6322_v16, %v14417_v13  ;;  %v14418_v57 = vld [vmem:[#allocation27_spill] sm:$0xff] }
 0xbb7   :  { %6796 = vmatmul.bf16.gmra.mxu1 %v6521_v42  ;;  %v6236_v42 = vadd.f32 %v14419_v41, %v14418_v57 }
 0xbb8   :  { %v6396_v35 = vpop.f32.mrf.mxu3 }
 0xbb9   :  { %v6397_v48 = vadd.f32 %v6396_v35, %v6308_v23  ;;  %v6325_v35 = vadd.f32 %v6324_v11, %v6236_v42 }
 0xbbb   :  { %v6471_v53 = vmax.f32 %v6397_v48, 0.0 }
 0xbbd   :  { %v6329_v49 = vpop.f32.mrf.mxu2 }
 0xbc0   :  { %v6398_v43 = vpop.f32.mrf.mxu3 }
 0xbc1   :  { %v6399_v27 = vadd.f32 %v6398_v43, %v6310_v29 }
 0xbc3   :  { %v6473_v31 = vmax.f32 %v6399_v27, 0.0 }
 0xbc5   :  { %6440 = vmatmul.bf16.gmra.mxu3 %v12304_v54  ;;  %v6523_v2 = vpack.c.bf16 %v6473_v31, %v6471_v53  ;;  %v12435_v54 = vpop.f32.mrf.mxu1  ;;  %v6332_v56 = vpop.f32.mrf.mxu2 }
 0xbc7   :  { %6801 = vmatmul.bf16.gmra.mxu1 %v6523_v2 }
 0xbc8   :  { %v6401_v61 = vpop.f32.mrf.mxu3 }
 0xbc9   :  { %v6402_v50 = vadd.f32 %v6401_v61, %v6313_v33  ;;  %v6689_v61 = vadd.f32 %v12443_v37, %v12387_v25  ;;  %v6691_v33 = vadd.f32 %v12443_v37, %v12389_v30 }
 0xbcb   :  { %v6475_v8 = vmax.f32 %v6402_v50, 0.0 }
 0xbcd   :  { %v6334_v16 = vpop.f32.mrf.mxu2 }
 0xbd0   :  { %v6403_v24 = vpop.f32.mrf.mxu3 }
 0xbd1   :  { %v6404_v1 = vadd.f32 %v6403_v24, %v6315_v12  ;;  %v14420_v12 = vld [vmem:[#allocation23_spill] sm:$0xff]  ;;  %v14421_v24 = vld [vmem:[#allocation286_spill] sm:$0xff] }
 0xbd2   :  { %v6328_v50 = vadd.f32 %v6327_v63, %v14420_v12 }
 0xbd3   :  { %v6477_v45 = vmax.f32 %v6404_v1, 0.0  ;;  %v14422_v1 = vld [vmem:[#allocation44_spill] sm:$0xff] }
 0xbd4   :  { %v6241_v11 = vadd.f32 %v14422_v1, %v14421_v24 }
 0xbd5   :  { %v6525_v38 = vpack.c.bf16 %v6477_v45, %v6475_v8 }
 0xbd6   :  { %v6330_v45 = vadd.f32 %v6329_v49, %v6241_v11  ;;  %v14423_v49 = vld [vmem:[#allocation248_spill] sm:$0xff] }
 0xbd7   :  { %6806 = vmatmul.bf16.gmra.mxu1 %v6525_v38 }
 0xbd8   :  { %v6406_v47 = vpop.f32.mrf.mxu3 }
 0xbd9   :  { %v6407_v10 = vadd.f32 %v6406_v47, %v6318_v6 }
 0xbdb   :  { %v6479_v28 = vmax.f32 %v6407_v10, 0.0  ;;  %v6337_v10 = vpop.f32.mrf.mxu2 }
 0xbe0   :  { %v6408_v5 = vpop.f32.mrf.mxu3 }
 0xbe1   :  { %v6409_v18 = vadd.f32 %v6408_v5, %v6320_v3 }
 0xbe3   :  { %v6481_v15 = vmax.f32 %v6409_v18, 0.0  ;;  %v12463_v18 = vpop.f32.mrf.mxu0 }
 0xbe4   :  { %v6772_v0 = vpop.f32.mrf.mxu1 }
 0xbe5   :  { %v6527_v36 = vpack.c.bf16 %v6481_v15, %v6479_v28  ;;  %v6773_v60 = vadd.f32 %v6772_v0, %v6684_v55  ;;  %v6694_v28 = vadd.f32 %v12443_v37, %v12394_v46  ;;  %v6696_v15 = vadd.f32 %v12443_v37, %v12398_v39  ;;  %v14424_v55 = vld [vmem:[#allocation122_spill] sm:$0xff] }
 0xbe7   :  { %6811 = vmatmul.bf16.gmra.mxu1 %v6527_v36  ;;  %v6852_v23 = vmax.f32 %v6773_v60, 0.0 }
 0xbe8   :  { %v6411_v58 = vpop.f32.mrf.mxu3 }
 0xbe9   :  { %v6412_v51 = vadd.f32 %v6411_v58, %v6323_v62  ;;  %v6333_v58 = vadd.f32 %v6332_v56, %v14423_v49  ;;  %v6339_v62 = vpop.f32.mrf.mxu2 }
 0xbeb   :  { %v6483_v27 = vmax.f32 %v6412_v51, 0.0 }
 0xbec   :  { %v6774_v40 = vpop.f32.mrf.mxu1 }
 0xbed   :  { %v6775_v26 = vadd.f32 %v6774_v40, %v6686_v14  ;;  %v14425_v14 = vld [vmem:[#allocation124_spill] sm:$0xff] }
 0xbee   :  { %v6246_v60 = vadd.f32 %v14425_v14, %v14424_v55 }
 0xbef   :  { %v6853_v4 = vmax.f32 %v6775_v26, 0.0  ;;  %v6710_v26 = vpop.f32.mrf.mxu0 }
 0xbf0   :  { %v6413_v29 = vpop.f32.mrf.mxu3  ;;  %v6335_v13 = vadd.f32 %v6334_v16, %v6246_v60  ;;  %v14427_v16 = vld [vmem:[#allocation202_spill] sm:$0xff] }
 0xbf1   :  { %v6884_v48 = vpack.c.bf16 %v6853_v4, %v6852_v23  ;;  %v6414_v43 = vadd.f32 %v6413_v29, %v6325_v35 }
 0xbf3   :  { %v6485_v22 = vmax.f32 %v6414_v43, 0.0  ;;  %6976 = vmatmul.bf16.vlgmr.msrb.gmra.mxu2 %v6884_v48  ;;  %v6342_v48 = vpop.f32.mrf.mxu2  ;;  %v6699_v43 = vadd.f32 %v12443_v37, %v12401_v17 }
 0xbf4   :  { %v6777_v53 = vpop.f32.mrf.mxu1 }
 0xbf5   :  { %v6529_v31 = vpack.c.bf16 %v6485_v22, %v6483_v27  ;;  %v6778_v59 = vadd.f32 %v6777_v53, %v6689_v61  ;;  %v6701_v22 = vadd.f32 %v12443_v37, %v12406_v34 }
 0xbf7   :  { %6816 = vmatmul.bf16.gmra.mxu1 %v6529_v31  ;;  %v6854_v38 = vmax.f32 %v6778_v59, 0.0  ;;  %v12474_v27 = vpop.f32.mrf.mxu0 }
 0xbf8   :  { %v6416_v2 = vpop.f32.mrf.mxu3 }
 0xbf9   :  { %v6417_v47 = vadd.f32 %v6416_v2, %v6328_v50  ;;  %v14426_v2 = vld [vmem:[#allocation160_spill] sm:$0xff] }
 0xbfa   :  { %v6338_v61 = vadd.f32 %v6337_v10, %v14426_v2  ;;  %v14429_v10 = vld [vmem:[#allocation53_spill] sm:$0xff] }
 0xbfb   :  { %v6487_v20 = vmax.f32 %v6417_v47, 0.0 }
 0xbfc   :  { %v6779_v7 = vpop.f32.mrf.mxu1 }
 0xbfd   :  { %v6780_v8 = vadd.f32 %v6779_v7, %v6691_v33  ;;  %v14428_v33 = vld [vmem:[#allocation288_spill] sm:$0xff] }
 0xbfe   :  { %v6251_v59 = vadd.f32 %v14428_v33, %v14427_v16 }
 0xbff   :  { %v6855_v6 = vmax.f32 %v6780_v8, 0.0  ;;  %v6715_v34 = vpop.f32.mrf.mxu0 }
 0xc00   :  { %v6418_v21 = vpop.f32.mrf.mxu3  ;;  %v6340_v12 = vadd.f32 %v6339_v62, %v6251_v59 }
 0xc01   :  { %v6419_v25 = vadd.f32 %v6418_v21, %v6330_v45  ;;  %v6885_v9 = vpack.c.bf16 %v6855_v6, %v6854_v38  ;;  %v6344_v45 = vpop.f32.mrf.mxu2 }
 0xc03   :  { %v6489_v3 = vmax.f32 %v6419_v25, 0.0  ;;  %6981 = vmatmul.bf16.gmra.mxu2 %v6885_v9  ;;  %v6704_v9 = vadd.f32 %v12443_v37, %v12452_v32 }
 0xc04   :  { %v6782_v30 = vpop.f32.mrf.mxu1 }
 0xc05   :  { %v6531_v5 = vpack.c.bf16 %v6489_v3, %v6487_v20  ;;  %v6783_v0 = vadd.f32 %v6782_v30, %v6694_v28  ;;  %v6706_v20 = vadd.f32 %v12443_v37, %v12458_v19  ;;  %v14431_v28 = vld [vmem:[#allocation30_spill] sm:$0xff] }
 0xc07   :  { %6821 = vmatmul.bf16.gmra.mxu1 %v6531_v5  ;;  %v6856_v57 = vmax.f32 %v6783_v0, 0.0  ;;  %v6343_v5 = vadd.f32 %v6342_v48, %v14429_v10  ;;  %v12488_v49 = vpop.f32.mrf.mxu0  ;;  %v14433_v48 = vld [vmem:[#allocation252_spill] sm:$0xff] }
 0xc08   :  { %v6421_v63 = vpop.f32.mrf.mxu3 }
 0xc09   :  { %v6422_v41 = vadd.f32 %v6421_v63, %v6333_v58  ;;  %v14430_v63 = vld [vmem:[#allocation123_spill] sm:$0xff]  ;;  %v6347_v0 = vpop.f32.mrf.mxu2 }
 0xc0b   :  { %v6491_v51 = vmax.f32 %v6422_v41, 0.0 }
 0xc0c   :  { %v6784_v36 = vpop.f32.mrf.mxu1 }
 0xc0d   :  { %v6785_v40 = vadd.f32 %v6784_v36, %v6696_v15  ;;  %v6256_v15 = vadd.f32 %v14431_v28, %v14430_v63 }
 0xc0f   :  { %v6857_v42 = vmax.f32 %v6785_v40, 0.0  ;;  %v6345_v58 = vadd.f32 %v6344_v45, %v6256_v15  ;;  %v6716_v45 = vadd.f32 %v12443_v37, %v6715_v34 }
 0xc10   :  { %v6423_v35 = vpop.f32.mrf.mxu3 }
 0xc11   :  { %v6424_v23 = vadd.f32 %v6423_v35, %v6335_v13  ;;  %v6886_v46 = vpack.c.bf16 %v6857_v42, %v6856_v57  ;;  %v6349_v42 = vpop.f32.mrf.mxu2  ;;  %v6720_v35 = vpop.f32.mrf.mxu0 }
 0xc13   :  { %v6493_v4 = vmax.f32 %v6424_v23, 0.0  ;;  %6986 = vmatmul.bf16.gmra.mxu2 %v6886_v46  ;;  %v6709_v46 = vadd.f32 %v12443_v37, %v12463_v18 }
 0xc14   :  { %v6787_v39 = vpop.f32.mrf.mxu1 }
 0xc15   :  { %v6533_v29 = vpack.c.bf16 %v6493_v4, %v6491_v51  ;;  %v6788_v53 = vadd.f32 %v6787_v39, %v6699_v43  ;;  %v6711_v51 = vadd.f32 %v12443_v37, %v6710_v26  ;;  %v14434_v43 = vld [vmem:[#allocation157_spill] sm:$0xff] }
 0xc17   :  { %6826 = vmatmul.bf16.gmra.mxu1 %v6533_v29  ;;  %v6858_v50 = vmax.f32 %v6788_v53, 0.0  ;;  %v14432_v29 = vld [vmem:[#allocation130_spill] sm:$0xff] }
 0xc18   :  { %v6426_v56 = vpop.f32.mrf.mxu3 }
 0xc19   :  { %v6427_v24 = vadd.f32 %v6426_v56, %v6338_v61  ;;  %v6348_v56 = vadd.f32 %v6347_v0, %v14432_v29  ;;  %v6352_v59 = vpop.f32.mrf.mxu2 }
 0xc1b   :  { %v6495_v38 = vmax.f32 %v6427_v24, 0.0 }
 0xc1c   :  { %v6789_v31 = vpop.f32.mrf.mxu1 }
 0xc1d   :  { %v6790_v7 = vadd.f32 %v6789_v31, %v6701_v22  ;;  %v6261_v22 = vadd.f32 %v14434_v43, %v14433_v48 }
 0xc1f   :  { %v6859_v1 = vmax.f32 %v6790_v7, 0.0  ;;  %v6350_v31 = vadd.f32 %v6349_v42, %v6261_v22 }
 0xc20   :  { %v6428_v11 = vpop.f32.mrf.mxu3 }
 0xc21   :  { %v6429_v8 = vadd.f32 %v6428_v11, %v6340_v12  ;;  %v6887_v17 = vpack.c.bf16 %v6859_v1, %v6858_v50  ;;  %v6723_v50 = vpop.f32.mrf.mxu0 }
 0xc23   :  { %v6497_v47 = vmax.f32 %v6429_v8, 0.0  ;;  %6991 = vmatmul.bf16.gmra.mxu2 %v6887_v17  ;;  %v6714_v8 = vadd.f32 %v12443_v37, %v12474_v27  ;;  %v6354_v17 = vpop.f32.mrf.mxu2 }
 0xc24   :  { %v6792_v6 = vpop.f32.mrf.mxu1 }
 0xc25   :  { %v6535_v21 = vpack.c.bf16 %v6497_v47, %v6495_v38  ;;  %v6793_v3 = vadd.f32 %v6792_v6, %v6704_v9 }
 0xc27   :  { %6831 = vmatmul.bf16.gmra.mxu1 %v6535_v21  ;;  %v6860_v55 = vmax.f32 %v6793_v3, 0.0  ;;  %v6353_v21 = vadd.f32 %v6352_v59, %v12356_v44  ;;  %v6719_v44 = vadd.f32 %v12443_v37, %v12488_v49 }
 0xc28   :  { %v6431_v25 = vpop.f32.mrf.mxu3 }
 0xc29   :  { %v6432_v14 = vadd.f32 %v6431_v25, %v6343_v5  ;;  %v6725_v47 = vpop.f32.mrf.mxu0  ;;  %v6266_v25 = vadd.f32 %v12435_v54, %v12375_v52  ;;  %v6721_v52 = vadd.f32 %v12443_v37, %v6720_v35 }
 0xc2b   :  { %v6499_v62 = vmax.f32 %v6432_v14, 0.0 }
 0xc2c   :  { %v6794_v30 = vpop.f32.mrf.mxu1 }
 0xc2d   :  { %v6795_v36 = vadd.f32 %v6794_v30, %v6706_v20  ;;  %v6355_v20 = vadd.f32 %v6354_v17, %v6266_v25 }
 0xc2f   :  { %v6861_v60 = vmax.f32 %v6795_v36, 0.0 }
 0xc30   :  { %v6433_v40 = vpop.f32.mrf.mxu3 }
 0xc31   :  { %v6888_v32 = vpack.c.bf16 %v6861_v60, %v6860_v55  ;;  %v6434_v13 = vadd.f32 %v6433_v40, %v6345_v58  ;;  %v6728_v36 = vpop.f32.mrf.mxu0 }
 0xc32   :  { %v6729_v48 = vadd.f32 %v12443_v37, %v6728_v36 }
 0xc33   :  { %v6501_v19 = vmax.f32 %v6434_v13, 0.0  ;;  %6996 = vmatmul.bf16.gmra.mxu2 %v6888_v32 }
 0xc34   :  { %v6797_v57 = vpop.f32.mrf.mxu1 }
 0xc35   :  { %v6537_v41 = vpack.c.bf16 %v6501_v19, %v6499_v62  ;;  %v6798_v4 = vadd.f32 %v6797_v57, %v6709_v46  ;;  %v6724_v62 = vadd.f32 %v12443_v37, %v6723_v50  ;;  %v6726_v57 = vadd.f32 %v12443_v37, %v6725_v47 }
 0xc37   :  { %6836 = vmatmul.bf16.gmra.mxu1 %v6537_v41  ;;  %v6862_v2 = vmax.f32 %v6798_v4, 0.0 }
 0xc38   :  { %v6436_v23 = vpop.f32.mrf.mxu3 }
 0xc39   :  { %v6437_v61 = vadd.f32 %v6436_v23, %v6348_v56  ;;  %v6730_v40 = vpop.f32.mrf.mxu0 }
 0xc3a   :  { %v6731_v22 = vadd.f32 %v12443_v37, %v6730_v40 }
 0xc3b   :  { %v6503_v18 = vmax.f32 %v6437_v61, 0.0 }
 0xc3c   :  { %v6799_v39 = vpop.f32.mrf.mxu1 }
 0xc3d   :  { %v6800_v53 = vadd.f32 %v6799_v39, %v6711_v51  ;;  %v12510_v51 = vld [vmem:[%s12567_s6] ss:$0 sm:$0xff] }
 0xc3f   :  { %v6863_v16 = vmax.f32 %v6800_v53, 0.0 }
 0xc40   :  { %v6438_v33 = vpop.f32.mrf.mxu3 }
 0xc41   :  { %v6889_v7 = vpack.c.bf16 %v6863_v16, %v6862_v2  ;;  %v6439_v12 = vadd.f32 %v6438_v33, %v6350_v31  ;;  %v6733_v19 = vpop.f32.mrf.mxu0 }
 0xc43   :  { %v6505_v24 = vmax.f32 %v6439_v12, 0.0  ;;  %7001 = vmatmul.bf16.gmra.mxu2 %v6889_v7 }
 0xc44   :  { %v6802_v26 = vpop.f32.mrf.mxu1 }
 0xc45   :  { %v6539_v1 = vpack.c.bf16 %v6505_v24, %v6503_v18  ;;  %v6803_v38 = vadd.f32 %v6802_v26, %v6714_v8 }
 0xc47   :  { %6841 = vmatmul.bf16.gmra.mxu1 %v6539_v1  ;;  %v6864_v3 = vmax.f32 %v6803_v38, 0.0 }
 0xc48   :  { %v6441_v11 = vpop.f32.mrf.mxu3 }
 0xc49   :  { %v6442_v30 = vadd.f32 %v6441_v11, %v6353_v21  ;;  %v6735_v4 = vpop.f32.mrf.mxu0  ;;  %v6734_v11 = vadd.f32 %v12443_v37, %v6733_v19 }
 0xc4a   :  { %v6736_v17 = vadd.f32 %v12443_v37, %v6735_v4 }
 0xc4b   :  { %v6507_v27 = vmax.f32 %v6442_v30, 0.0 }
 0xc4c   :  { %v6804_v6 = vpop.f32.mrf.mxu1 }
 0xc4d   :  { %v6805_v9 = vadd.f32 %v6804_v6, %v6716_v45 }
 0xc4f   :  { %v6865_v10 = vmax.f32 %v6805_v9, 0.0 }
 0xc50   :  { %v6443_v5 = vpop.f32.mrf.mxu3 }
 0xc51   :  { %v6890_v63 = vpack.c.bf16 %v6865_v10, %v6864_v3  ;;  %v6444_v28 = vadd.f32 %v6443_v5, %v6355_v20  ;;  %v6738_v61 = vpop.f32.mrf.mxu0 }
 0xc53   :  { %v6509_v15 = vmax.f32 %v6444_v28, 0.0  ;;  %7006 = vmatmul.bf16.gmra.mxu2 %v6890_v63  ;;  %v6739_v28 = vadd.f32 %v12443_v37, %v6738_v61 }
 0xc54   :  { %v6807_v34 = vpop.f32.mrf.mxu1 }
 0xc55   :  { %v6541_v0 = vpack.c.bf16 %v6509_v15, %v6507_v27  ;;  %v6808_v54 = vadd.f32 %v6807_v34, %v6719_v44 }
 0xc57   :  { %6846 = vmatmul.bf16.gmra.mxu1 %v6541_v0  ;;  %v6866_v14 = vmax.f32 %v6808_v54, 0.0 }
 0xc59   :  { %v6740_v1 = vpop.f32.mrf.mxu0 }
 0xc5a   :  { %v6741_v15 = vadd.f32 %v12443_v37, %v6740_v1 }
 0xc5c   :  { %v6809_v58 = vpop.f32.mrf.mxu1 }
 0xc5d   :  { %v6810_v55 = vadd.f32 %v6809_v58, %v6721_v52 }
 0xc5f   :  { %v6867_v60 = vmax.f32 %v6810_v55, 0.0 }
 0xc61   :  { %v6891_v32 = vpack.c.bf16 %v6867_v60, %v6866_v14  ;;  %v6743_v30 = vpop.f32.mrf.mxu0 }
 0xc62   :  { %v6744_v19 = vadd.f32 %v12443_v37, %v6743_v30 }
 0xc63   :  { %7011 = vmatmul.bf16.gmra.mxu2 %v6891_v32 }
 0xc64   :  { %v6812_v13 = vpop.f32.mrf.mxu1 }
 0xc65   :  { %v6813_v41 = vadd.f32 %v6812_v13, %v6724_v62 }
 0xc67   :  { %v6868_v49 = vmax.f32 %v6813_v41, 0.0 }
 0xc69   :  { %v6745_v0 = vpop.f32.mrf.mxu0 }
 0xc6a   :  { %v6746_v41 = vadd.f32 %v12443_v37, %v6745_v0 }
 0xc6c   :  { %v6814_v42 = vpop.f32.mrf.mxu1 }
 0xc6d   :  { %v6815_v23 = vadd.f32 %v6814_v42, %v6726_v57 }
 0xc6f   :  { %v6869_v46 = vmax.f32 %v6815_v23, 0.0 }
 0xc71   :  { %v6892_v35 = vpack.c.bf16 %v6869_v46, %v6868_v49  ;;  %v6748_v32 = vpop.f32.mrf.mxu0 }
 0xc73   :  { %7016 = vmatmul.bf16.gmra.mxu2 %v6892_v35 }
 0xc74   :  { %v6817_v39 = vpop.f32.mrf.mxu1 }
 0xc75   :  { %v6818_v53 = vadd.f32 %v6817_v39, %v6729_v48 }
 0xc76   :  { %v6977_v29 = vpop.f32.mrf.mxu2 }
 0xc77   :  { %v6978_v56 = vadd.f32 %v12510_v51, %v6977_v29  ;;  %v6870_v33 = vmax.f32 %v6818_v53, 0.0 }
 0xc79   :  { %v7057_v43 = vmax.f32 %v6978_v56, 0.0  ;;  %v6750_v29 = vpop.f32.mrf.mxu0 }
 0xc7b   :  { %7089 = vst [vmem:[#allocation11] sm:$0xff] %v7057_v43 }
 0xc7c   :  { %v6819_v31 = vpop.f32.mrf.mxu1 }
 0xc7d   :  { %v6820_v2 = vadd.f32 %v6819_v31, %v6731_v22  ;;  %v6749_v31 = vadd.f32 %v12443_v37, %v6748_v32 }
 0xc7e   :  { %v6979_v16 = vpop.f32.mrf.mxu2 }
 0xc7f   :  { %v6871_v59 = vmax.f32 %v6820_v2, 0.0  ;;  %v6980_v7 = vadd.f32 %v12510_v51, %v6979_v16  ;;  %v6751_v16 = vadd.f32 %v12443_v37, %v6750_v29 }
 0xc81   :  { %v6893_v12 = vpack.c.bf16 %v6871_v59, %v6870_v33  ;;  %v7058_v50 = vmax.f32 %v6980_v7, 0.0  ;;  %v6753_v61 = vpop.f32.mrf.mxu0 }
 0xc83   :  { %7090 = vst [vmem:[#allocation11 + $0x8] sm:$0xff] %v7058_v50  ;;  %7021 = vmatmul.bf16.gmra.mxu2 %v6893_v12 }
 0xc84   :  { %v6822_v18 = vpop.f32.mrf.mxu1 }
 0xc85   :  { %v6823_v45 = vadd.f32 %v6822_v18, %v6734_v11 }
 0xc86   :  { %v6982_v24 = vpop.f32.mrf.mxu2 }
 0xc87   :  { %v6983_v26 = vadd.f32 %v12510_v51, %v6982_v24  ;;  %v6872_v21 = vmax.f32 %v6823_v45, 0.0 }
 0xc89   :  { %v7059_v8 = vmax.f32 %v6983_v26, 0.0  ;;  %v6755_v11 = vpop.f32.mrf.mxu0 }
 0xc8b   :  { %7091 = vst [vmem:[#allocation11 + $0x10] sm:$0xff] %v7059_v8 }
 0xc8c   :  { %v6824_v38 = vpop.f32.mrf.mxu1 }
 0xc8d   :  { %v6825_v47 = vadd.f32 %v6824_v38, %v6736_v17  ;;  %v6754_v38 = vadd.f32 %v12443_v37, %v6753_v61 }
 0xc8e   :  { %v6984_v6 = vpop.f32.mrf.mxu2 }
 0xc8f   :  { %v6873_v25 = vmax.f32 %v6825_v47, 0.0  ;;  %v6985_v9 = vadd.f32 %v12510_v51, %v6984_v6  ;;  %v6756_v6 = vadd.f32 %v12443_v37, %v6755_v11 }
 0xc91   :  { %v6894_v20 = vpack.c.bf16 %v6873_v25, %v6872_v21  ;;  %v7060_v3 = vmax.f32 %v6985_v9, 0.0 }
 0xc93   :  { %7092 = vst [vmem:[#allocation11 + $0x18] sm:$0xff] %v7060_v3  ;;  %7026 = vmatmul.bf16.gmra.mxu2 %v6894_v20  ;;  %v6758_v20 = vpop.f32.mrf.mxu0 }
 0xc94   :  { %v6827_v10 = vpop.f32.mrf.mxu1 }
 0xc95   :  { %v6828_v34 = vadd.f32 %v6827_v10, %v6739_v28 }
 0xc96   :  { %v6987_v5 = vpop.f32.mrf.mxu2 }
 0xc97   :  { %v6988_v63 = vadd.f32 %v12510_v51, %v6987_v5  ;;  %v6874_v54 = vmax.f32 %v6828_v34, 0.0 }
 0xc99   :  { %v7061_v27 = vmax.f32 %v6988_v63, 0.0 }
 0xc9b   :  { %7093 = vst [vmem:[#allocation11 + $0x20] sm:$0xff] %v7061_v27  ;;  %v6760_v0 = vpop.f32.mrf.mxu0 }
 0xc9c   :  { %v6829_v36 = vpop.f32.mrf.mxu1 }
 0xc9d   :  { %v6830_v44 = vadd.f32 %v6829_v36, %v6741_v15  ;;  %v6759_v36 = vadd.f32 %v12443_v37, %v6758_v20 }
 0xc9e   :  { %v6989_v52 = vpop.f32.mrf.mxu2 }
 0xc9f   :  { %v6875_v58 = vmax.f32 %v6830_v44, 0.0  ;;  %v6990_v55 = vadd.f32 %v12510_v51, %v6989_v52  ;;  %v6761_v52 = vadd.f32 %v12443_v37, %v6760_v0 }
 0xca1   :  { %v6895_v14 = vpack.c.bf16 %v6875_v58, %v6874_v54  ;;  %v7062_v60 = vmax.f32 %v6990_v55, 0.0 }
 0xca3   :  { %7094 = vst [vmem:[#allocation11 + $0x28] sm:$0xff] %v7062_v60  ;;  %7031 = vmatmul.bf16.gmra.mxu2 %v6895_v14 }
 0xca4   :  { %v6832_v40 = vpop.f32.mrf.mxu1 }
 0xca5   :  { %v6833_v42 = vadd.f32 %v6832_v40, %v6744_v19 }
 0xca6   :  { %v6992_v13 = vpop.f32.mrf.mxu2 }
 0xca7   :  { %v6993_v62 = vadd.f32 %v12510_v51, %v6992_v13  ;;  %v6876_v35 = vmax.f32 %v6833_v42, 0.0 }
 0xca9   :  { %v7063_v57 = vmax.f32 %v6993_v62, 0.0 }
 0xcab   :  { %7095 = vst [vmem:[#allocation11 + $0x30] sm:$0xff] %v7063_v57 }
 0xcac   :  { %v6834_v23 = vpop.f32.mrf.mxu1 }
 0xcad   :  { %v6835_v49 = vadd.f32 %v6834_v23, %v6746_v41 }
 0xcae   :  { %v6994_v46 = vpop.f32.mrf.mxu2 }
 0xcaf   :  { %v6877_v4 = vmax.f32 %v6835_v49, 0.0  ;;  %v6995_v39 = vadd.f32 %v12510_v51, %v6994_v46 }
 0xcb1   :  { %v6896_v56 = vpack.c.bf16 %v6877_v4, %v6876_v35  ;;  %v7064_v48 = vmax.f32 %v6995_v39, 0.0 }
 0xcb3   :  { %7096 = vst [vmem:[#allocation11 + $0x38] sm:$0xff] %v7064_v48  ;;  %7036 = vmatmul.bf16.gmra.mxu2 %v6896_v56 }
 0xcb4   :  { %v6837_v43 = vpop.f32.mrf.mxu1 }
 0xcb5   :  { %v6838_v33 = vadd.f32 %v6837_v43, %v6749_v31 }
 0xcb6   :  { %v6997_v22 = vpop.f32.mrf.mxu2 }
 0xcb7   :  { %v6998_v53 = vadd.f32 %v12510_v51, %v6997_v22  ;;  %v6878_v50 = vmax.f32 %v6838_v33, 0.0 }
 0xcb9   :  { %v7065_v2 = vmax.f32 %v6998_v53, 0.0 }
 0xcbb   :  { %7097 = vst [vmem:[#allocation11 + $0x40] sm:$0xff] %v7065_v2 }
 0xcbc   :  { %v6839_v59 = vpop.f32.mrf.mxu1 }
 0xcbd   :  { %v6840_v7 = vadd.f32 %v6839_v59, %v6751_v16 }
 0xcbe   :  { %v6999_v12 = vpop.f32.mrf.mxu2 }
 0xcbf   :  { %v6879_v18 = vmax.f32 %v6840_v7, 0.0  ;;  %v7000_v24 = vadd.f32 %v12510_v51, %v6999_v12 }
 0xcc1   :  { %v6897_v26 = vpack.c.bf16 %v6879_v18, %v6878_v50  ;;  %v7066_v1 = vmax.f32 %v7000_v24, 0.0 }
 0xcc3   :  { %7098 = vst [vmem:[#allocation11 + $0x48] sm:$0xff] %v7066_v1  ;;  %7041 = vmatmul.bf16.gmra.mxu2 %v6897_v26 }
 0xcc4   :  { %v6842_v8 = vpop.f32.mrf.mxu1 }
 0xcc5   :  { %v6843_v21 = vadd.f32 %v6842_v8, %v6754_v38 }
 0xcc6   :  { %v7002_v17 = vpop.f32.mrf.mxu2 }
 0xcc7   :  { %v7003_v45 = vadd.f32 %v12510_v51, %v7002_v17  ;;  %v6880_v30 = vmax.f32 %v6843_v21, 0.0 }
 0xcc9   :  { %v7067_v47 = vmax.f32 %v7003_v45, 0.0 }
 0xccb   :  { %7099 = vst [vmem:[#allocation11 + $0x50] sm:$0xff] %v7067_v47 }
 0xccc   :  { %v6844_v25 = vpop.f32.mrf.mxu1 }
 0xccd   :  { %v6845_v9 = vadd.f32 %v6844_v25, %v6756_v6 }
 0xcce   :  { %v7004_v3 = vpop.f32.mrf.mxu2 }
 0xccf   :  { %v6881_v10 = vmax.f32 %v6845_v9, 0.0  ;;  %v7005_v5 = vadd.f32 %v12510_v51, %v7004_v3 }
 0xcd1   :  { %v6898_v63 = vpack.c.bf16 %v6881_v10, %v6880_v30  ;;  %v7068_v28 = vmax.f32 %v7005_v5, 0.0 }
 0xcd3   :  { %7100 = vst [vmem:[#allocation11 + $0x58] sm:$0xff] %v7068_v28  ;;  %7046 = vmatmul.bf16.gmra.mxu2 %v6898_v63 }
 0xcd4   :  { %v6847_v27 = vpop.f32.mrf.mxu1 }
 0xcd5   :  { %v6848_v54 = vadd.f32 %v6847_v27, %v6759_v36 }
 0xcd6   :  { %v7007_v15 = vpop.f32.mrf.mxu2 }
 0xcd7   :  { %v7008_v34 = vadd.f32 %v12510_v51, %v7007_v15  ;;  %v6882_v60 = vmax.f32 %v6848_v54, 0.0 }
 0xcd9   :  { %v7069_v44 = vmax.f32 %v7008_v34, 0.0 }
 0xcdb   :  { %7101 = vst [vmem:[#allocation11 + $0x60] sm:$0xff] %v7069_v44 }
 0xcdc   :  { %v6849_v58 = vpop.f32.mrf.mxu1 }
 0xcdd   :  { %v6850_v55 = vadd.f32 %v6849_v58, %v6761_v52 }
 0xcde   :  { %v7009_v14 = vpop.f32.mrf.mxu2 }
 0xcdf   :  { %v6883_v40 = vmax.f32 %v6850_v55, 0.0  ;;  %v7010_v32 = vadd.f32 %v12510_v51, %v7009_v14 }
 0xce1   :  { %v6899_v13 = vpack.c.bf16 %v6883_v40, %v6882_v60  ;;  %v7070_v62 = vmax.f32 %v7010_v32, 0.0 }
 0xce3   :  { %7102 = vst [vmem:[#allocation11 + $0x68] sm:$0xff] %v7070_v62  ;;  %7051 = vmatmul.bf16.gmra.mxu2 %v6899_v13 }
 0xce6   :  { %v7012_v19 = vpop.f32.mrf.mxu2 }
 0xce7   :  { %v7013_v57 = vadd.f32 %v12510_v51, %v7012_v19 }
 0xce9   :  { %v7071_v41 = vmax.f32 %v7013_v57, 0.0 }
 0xceb   :  { %7103 = vst [vmem:[#allocation11 + $0x70] sm:$0xff] %v7071_v41 }
 0xcee   :  { %v7014_v42 = vpop.f32.mrf.mxu2 }
 0xcef   :  { %v7015_v37 = vadd.f32 %v12510_v51, %v7014_v42 }
 0xcf1   :  { %v7072_v23 = vmax.f32 %v7015_v37, 0.0 }
 0xcf3   :  { %7104 = vst [vmem:[#allocation11 + $0x78] sm:$0xff] %v7072_v23 }
 0xcf6   :  { %v7017_v49 = vpop.f32.mrf.mxu2 }
 0xcf7   :  { %v7018_v46 = vadd.f32 %v12510_v51, %v7017_v49 }
 0xcf9   :  { %v7073_v35 = vmax.f32 %v7018_v46, 0.0 }
 0xcfb   :  { %7105 = vst [vmem:[#allocation11 + $0x80] sm:$0xff] %v7073_v35 }
 0xcfe   :  { %v7019_v4 = vpop.f32.mrf.mxu2 }
 0xcff   :  { %v7020_v39 = vadd.f32 %v12510_v51, %v7019_v4 }
 0xd01   :  { %v7074_v29 = vmax.f32 %v7020_v39, 0.0 }
 0xd03   :  { %7106 = vst [vmem:[#allocation11 + $0x88] sm:$0xff] %v7074_v29 }
 0xd06   :  { %v7022_v56 = vpop.f32.mrf.mxu2 }
 0xd07   :  { %v7023_v48 = vadd.f32 %v12510_v51, %v7022_v56 }
 0xd09   :  { %v7075_v43 = vmax.f32 %v7023_v48, 0.0 }
 0xd0b   :  { %7107 = vst [vmem:[#allocation11 + $0x90] sm:$0xff] %v7075_v43 }
 0xd0e   :  { %v7024_v22 = vpop.f32.mrf.mxu2 }
 0xd0f   :  { %v7025_v53 = vadd.f32 %v12510_v51, %v7024_v22 }
 0xd11   :  { %v7076_v31 = vmax.f32 %v7025_v53, 0.0 }
 0xd13   :  { %7108 = vst [vmem:[#allocation11 + $0x98] sm:$0xff] %v7076_v31 }
 0xd16   :  { %v7027_v2 = vpop.f32.mrf.mxu2 }
 0xd17   :  { %v7028_v61 = vadd.f32 %v12510_v51, %v7027_v2 }
 0xd19   :  { %v7077_v16 = vmax.f32 %v7028_v61, 0.0 }
 0xd1b   :  { %7109 = vst [vmem:[#allocation11 + $0xa0] sm:$0xff] %v7077_v16 }
 0xd1e   :  { %v7029_v33 = vpop.f32.mrf.mxu2 }
 0xd1f   :  { %v7030_v59 = vadd.f32 %v12510_v51, %v7029_v33 }
 0xd21   :  { %v7078_v7 = vmax.f32 %v7030_v59, 0.0 }
 0xd23   :  { %7110 = vst [vmem:[#allocation11 + $0xa8] sm:$0xff] %v7078_v7 }
 0xd26   :  { %v7032_v12 = vpop.f32.mrf.mxu2 }
 0xd27   :  { %v7033_v50 = vadd.f32 %v12510_v51, %v7032_v12 }
 0xd29   :  { %v7079_v18 = vmax.f32 %v7033_v50, 0.0 }
 0xd2b   :  { %7111 = vst [vmem:[#allocation11 + $0xb0] sm:$0xff] %v7079_v18 }
 0xd2e   :  { %v7034_v24 = vpop.f32.mrf.mxu2 }
 0xd2f   :  { %v7035_v26 = vadd.f32 %v12510_v51, %v7034_v24 }
 0xd31   :  { %v7080_v1 = vmax.f32 %v7035_v26, 0.0 }
 0xd33   :  { %7112 = vst [vmem:[#allocation11 + $0xb8] sm:$0xff] %v7080_v1 }
 0xd36   :  { %v7037_v11 = vpop.f32.mrf.mxu2 }
 0xd37   :  { %v7038_v8 = vadd.f32 %v12510_v51, %v7037_v11 }
 0xd39   :  { %v7081_v17 = vmax.f32 %v7038_v8, 0.0 }
 0xd3b   :  { %7113 = vst [vmem:[#allocation11 + $0xc0] sm:$0xff] %v7081_v17 }
 0xd3e   :  { %v7039_v45 = vpop.f32.mrf.mxu2 }
 0xd3f   :  { %v7040_v38 = vadd.f32 %v12510_v51, %v7039_v45 }
 0xd41   :  { %v7082_v47 = vmax.f32 %v7040_v38, 0.0 }
 0xd43   :  { %7114 = vst [vmem:[#allocation11 + $0xc8] sm:$0xff] %v7082_v47 }
 0xd46   :  { %v7042_v6 = vpop.f32.mrf.mxu2 }
 0xd47   :  { %v7043_v21 = vadd.f32 %v12510_v51, %v7042_v6 }
 0xd49   :  { %v7083_v25 = vmax.f32 %v7043_v21, 0.0 }
 0xd4b   :  { %7115 = vst [vmem:[#allocation11 + $0xd0] sm:$0xff] %v7083_v25 }
 0xd4e   :  { %v7044_v9 = vpop.f32.mrf.mxu2 }
 0xd4f   :  { %v7045_v20 = vadd.f32 %v12510_v51, %v7044_v9 }
 0xd51   :  { %v7084_v3 = vmax.f32 %v7045_v20, 0.0 }
 0xd53   :  { %7116 = vst [vmem:[#allocation11 + $0xd8] sm:$0xff] %v7084_v3 }
 0xd56   :  { %v7047_v30 = vpop.f32.mrf.mxu2 }
 0xd57   :  { %v7048_v10 = vadd.f32 %v12510_v51, %v7047_v30 }
 0xd59   :  { %v7085_v5 = vmax.f32 %v7048_v10, 0.0 }
 0xd5b   :  { %7117 = vst [vmem:[#allocation11 + $0xe0] sm:$0xff] %v7085_v5 }
 0xd5e   :  { %v7049_v63 = vpop.f32.mrf.mxu2 }
 0xd5f   :  { %v7050_v28 = vadd.f32 %v12510_v51, %v7049_v63 }
 0xd61   :  { %v7086_v27 = vmax.f32 %v7050_v28, 0.0 }
 0xd63   :  { %7118 = vst [vmem:[#allocation11 + $0xe8] sm:$0xff] %v7086_v27 }
 0xd66   :  { %v7052_v15 = vpop.f32.mrf.mxu2 }
 0xd67   :  { %v7053_v34 = vadd.f32 %v12510_v51, %v7052_v15 }
 0xd69   :  { %v7087_v0 = vmax.f32 %v7053_v34, 0.0 }
 0xd6b   :  { %7119 = vst [vmem:[#allocation11 + $0xf0] sm:$0xff] %v7087_v0 }
 0xd6e   :  { %v7054_v36 = vpop.f32.mrf.mxu2 }
 0xd6f   :  { %v7055_v44 = vadd.f32 %v12510_v51, %v7054_v36 }
 0xd71   :  { %v7088_v52 = vmax.f32 %v7055_v44, 0.0 }
 0xd73   :  { %7120 = vst [vmem:[#allocation11 + $0xf8] sm:$0xff] %v7088_v52 }
 0xd74   :  { %7124 = vsyncadd [#allocation4], 4064  ;;  %s7127_s10 = sshll.u32 %s12568_s7, 4  ;;  %s8833_s11 = smov [#allocation11]   ;;  %s7128_s10 = int_to_ptr.hbm [resolvable:$true] %s7127_s10 }
 0xd75   :  { %s7125_s12 = sshll.u32 %s8833_s11, 4  ;;  %s8834_s13 = smov 32   ;;  %s7126_s12 = int_to_ptr.vmem [resolvable:$true] %s7125_s12 }
 0xd76   :  { %s8835_s14 = smov 2  }
 0xd77   :  { %7133 = dma.vmem_to_hbm [thread:$0]  %s7126_s12, 32, %s7128_s10, [#allocation4], %s8834_s13, %s8834_s13, %s8835_s14  }
 0xd78   :  { %8818 = dma.done.wait [#allocation4], 4096  }
 0xd79   :  { %8819 = vsyncadd [#allocation4], 4294963200 }
 0xd7a   :  { %7138 = vsyncpa [#allocation3], 1 }
 0xd7b   :  { %7139 = vsyncpa [#allocation6], 1 }
 0xd7c   :  { %7140 = vsyncpa [#allocation9], 1 }
 0xd7d   :  { %7141 = vsyncpa [#allocation4], 1 }

</bundles_post_ra>
